<compile_context>
chip_gen: v7x
topology: tpu7x:2x2x1
jax: 0.10.0
libtpu: 0.0.40
codegen_flags: <defaults>
</compile_context>

<pallas_src>
import functools

import numpy as np
import jax
import jax.numpy as jnp
from jax.experimental import pallas as pl
from jax.experimental.pallas import tpu as pltpu

LDA_WEIGHT = 0.1
CPAD = 128        # lane-dense padding for the class dim AND the (V*C) contraction dim
NEG_INF = -1e9    # finite "minus infinity" for padded logit lanes


def _sum11(x):
    """Full reduction of a 2-D value to a (1, 1) tile (explicit two-stage reduce)."""
    return jnp.sum(jnp.sum(x, axis=1, keepdims=True), axis=0, keepdims=True)


# ----------------------------------------------------------------------------------
# Pallas kernel: one grid point == one TASK.  All eval steps handled inside via a
# single wide matmul + an unrolled Python loop over the (static) step count.
# Output per task: (S, 128) f32 rows; lane 0 = loss, lane 1 = #correct for that step.
# ----------------------------------------------------------------------------------
def gcn_eval_kernel(yq_ref, ys_ref, x_ref, kcat_ref, b1_ref, wfc_ref, bfc_ref,
                    out_ref, z_ref, *, n_samples, feat_dim, n_steps):
    t = pl.program_id(0)

    # ---- ONE wide MXU matmul covering all eval steps: (R, 128) @ (128, S*F) ----
    x = x_ref[...]                                               # (R, 128) bf16
    z_ref[...] = jnp.dot(x, kcat_ref[...], preferred_element_type=jnp.float32)

    # ---- one-hots built in-kernel from SMEM scalar-prefetched labels ----
    lane = jax.lax.broadcasted_iota(jnp.int32, (n_samples, CPAD), 1)
    row = jax.lax.broadcasted_iota(jnp.int32, (n_samples, CPAD), 0)

    def onehot(y_ref):
        oh = jnp.zeros((n_samples, CPAD), jnp.float32)
        for i in range(n_samples):
            oh = jnp.where((row == i) & (lane == y_ref[t, i]), 1.0, oh)
        return oh

    oh_q = onehot(yq_ref)                                        # CE + LDA steps 0, 1
    # Quirk of the original: query LDA at eval steps >= 2 uses the SUPPORT labels.
    oh_lda_late = onehot(ys_ref) if n_steps > 2 else oh_q

    rows = x.shape[0]
    per_sample = rows // n_samples
    lane1 = jax.lax.broadcasted_iota(jnp.int32, (1, CPAD), 1)
    out_rows = []
    for s in range(n_steps):
        z = z_ref[:, pl.ds(s * feat_dim, feat_dim)] + b1_ref[pl.ds(s, 1), :]
        h = jnp.maximum(z, 0.0)                                  # (R, F) f32
        # NOTE: reshape-mean pooling stays layout-free because per_sample (M*T) is a
        # multiple of 8; swap to an averaging-matrix matmul for unaligned configs.
        feat = jnp.mean(h.reshape(n_samples, per_sample, feat_dim), axis=1)  # (N, F)

        # linear head; padded class lanes carry ~-1e9 through the padded bias
        logits = (jnp.dot(feat.astype(jnp.bfloat16), wfc_ref[s],
                          preferred_element_type=jnp.float32)
                  + bfc_ref[pl.ds(s, 1), :])                     # (N, CPAD)

        # ---- cross entropy (mean reduction) + correct count (picked hits row max) ----
        m = jnp.max(logits, axis=1, keepdims=True)               # (N, 1)
        lse = m + jnp.log(jnp.sum(jnp.exp(logits - m), axis=1, keepdims=True))
        picked = jnp.sum(oh_q * logits, axis=1, keepdims=True)   # (N, 1)
        ce = jnp.sum(lse - picked, axis=0, keepdims=True) / n_samples        # (1, 1)
        corr = jnp.sum((picked >= m).astype(jnp.float32), axis=0, keepdims=True)

        # ---- LDA loss, lane-dense class axis (no transposed one-hot input) ----
        oh_lda = oh_q if s < 2 else oh_lda_late                  # (N, CPAD)
        # csum[f, c] = sum_n feat[n, f] * onehot[n, c]
        csum = jax.lax.dot_general(feat, oh_lda, (((0,), (0,)), ((), ())),
                                   preferred_element_type=jnp.float32)       # (F, CPAD)
        cnt = jnp.sum(oh_lda, axis=0, keepdims=True)                          # (1, CPAD)
        cmean = csum / jnp.maximum(cnt, 1.0)                                  # (F, CPAD)
        has = (cnt > 0.5).astype(jnp.float32)                                 # (1, CPAD)
        # every sample contributes to exactly one class column => global mean from csum
        gmean = jnp.sum(csum, axis=1, keepdims=True) / n_samples              # (F, 1)
        # identity: sum_c cnt_c * ||cmean_c||^2  ==  sum(cmean * csum)
        sw = (_sum11(feat * feat) - _sum11(cmean * csum)) + 1e-4 * feat_dim   # (1, 1)
        diff = cmean - gmean
        sb = _sum11(has * diff * diff)                                        # (1, 1)
        lda = -sb / (sw + 1e-6)

        loss = ce + LDA_WEIGHT * lda                                          # (1, 1)
        out_rows.append(loss * (lane1 == 0).astype(jnp.float32)
                        + corr * (lane1 == 1).astype(jnp.float32))

    out_ref[...] = jnp.concatenate(out_rows, axis=0)             # (S, CPAD)


def pallas_batched_eval(yq, ys, xq, kcat, b1, wfc, bfc, *, n_samples, feat_dim, n_steps):
    """One gridded pallas_call over tasks; returns (T, S, CPAD) f32."""
    tn, r, kpad = xq.shape
    sf = kcat.shape[2]
    kernel = functools.partial(gcn_eval_kernel, n_samples=n_samples,
                               feat_dim=feat_dim, n_steps=n_steps)
    return pl.pallas_call(
        kernel,
        out_shape=jax.ShapeDtypeStruct((tn, n_steps, CPAD), jnp.float32),
        grid_spec=pltpu.PrefetchScalarGridSpec(
            num_scalar_prefetch=2,                     # y_qry, y_spt live in SMEM
            grid=(tn,),
            in_specs=[
                pl.BlockSpec((None, r, kpad),               lambda t, yq, ys: (t, 0, 0)),
                pl.BlockSpec((None, kpad, sf),              lambda t, yq, ys: (t, 0, 0)),
                pl.BlockSpec((None, n_steps, feat_dim),     lambda t, yq, ys: (t, 0, 0)),
                pl.BlockSpec((None, n_steps, feat_dim, CPAD),
                             lambda t, yq, ys: (t, 0, 0, 0)),
                pl.BlockSpec((None, n_steps, CPAD),         lambda t, yq, ys: (t, 0, 0)),
            ],
            out_specs=pl.BlockSpec((None, n_steps, CPAD),   lambda t, yq, ys: (t, 0, 0)),
            scratch_shapes=[pltpu.VMEM((r, n_steps * feat_dim), jnp.float32)],
        ),
        compiler_params=pltpu.CompilerParams(
            dimension_semantics=("parallel",)),        # tasks shard across TCs on v7x
    )(yq, ys, xq, kcat, b1, wfc, bfc)


# ----------------------------------------------------------------------------------
# MAML forward
# ----------------------------------------------------------------------------------
def prep_x(x_nctvm):
    """(N, C, T, V, M) -> (N*M*T, V*C); rows ordered (n, m, t), cols (v, c)."""
    n, c, t, v, m = x_nctvm.shape
    x = jnp.transpose(x_nctvm, (0, 4, 2, 3, 1))            # (N, M, T, V, C)
    return x.reshape(n * m * t, v * c)


def make_meta_forward(update_lr, update_step, n_way):
    s_steps = update_step + 1
    hp = jax.lax.Precision.HIGHEST

    # Pure-JAX mirror of the GCN forward + loss (support set; used only for grads).
    # TODO(synk): gradients cannot flow through the Pallas kernel without a custom_vjp,
    # so torch.autograd.grad is mirrored with jax.grad over this identical function.
    def support_loss(params, x2d, oh):
        A, W1, b1, Wfc, bfc = params
        v = A.shape[0]
        f = v * W1.shape[1]
        n = oh.shape[0]
        K = jnp.kron(A, W1)
        z = jnp.dot(x2d, K, precision=hp) + jnp.tile(b1, v)
        h = jax.nn.relu(z)
        feat = jnp.mean(h.reshape(n, -1, f), axis=1)
        logits = jnp.dot(feat, Wfc, precision=hp) + bfc
        lse = jax.scipy.special.logsumexp(logits, axis=1)
        ce = jnp.mean(lse - jnp.sum(oh * logits, axis=1))
        csum = jnp.dot(oh.T, feat, precision=hp)           # (n_way, F)
        cnt = jnp.sum(oh, axis=0)[:, None]
        cmean = csum / jnp.maximum(cnt, 1.0)
        has = (cnt > 0.5).astype(jnp.float32)
        gmean = jnp.mean(feat, axis=0, keepdims=True)
        sw = jnp.sum(feat * feat) - jnp.sum(cmean * csum) + 1e-4 * f
        sb = jnp.sum(has * (cmean - gmean) ** 2)
        return ce + LDA_WEIGHT * (-sb / (sw + 1e-6))

    grad_fn = jax.grad(support_loss)

    def fast_weight_stack(params, xs2d, oh_s):
        """Inner loop for one task -> params stacked over eval steps 0..update_step."""
        steps = [params]
        fast = params
        for _ in range(update_step):
            g = grad_fn(fast, xs2d, oh_s)
            fast = tuple(p - update_lr * gi for p, gi in zip(fast, g))
            steps.append(fast)
        return tuple(jnp.stack([st[j] for st in steps]) for j in range(len(params)))

    @jax.jit
    def run(params, x_spt, y_spt, x_qry, y_qry):
        A, W1, b1, Wfc, bfc = params
        v, hdim = A.shape[0], W1.shape[1]
        f, vc = v * hdim, v * W1.shape[0]
        tn = x_spt.shape[0]
        querysz = x_qry.shape[1]

        xs2d = jax.vmap(prep_x)(x_spt)                      # (T, Rs, VC)
        xq2d = jax.vmap(prep_x)(x_qry)                      # (T, Rq, VC)
        oh_s = jax.nn.one_hot(y_spt, n_way, dtype=jnp.float32)

        # ---- inner MAML loop: fast weights per task / step (pure JAX, under jit) ----
        A_st, W1_st, b1_st, Wfc_st, bfc_st = jax.vmap(
            lambda xs, oh: fast_weight_stack(params, xs, oh))(xs2d, oh_s)

        # ---- fused per-step conv weights, concatenated along the output dim ----
        k_st = jax.vmap(jax.vmap(jnp.kron))(A_st, W1_st)    # (T, S, VC, F)
        k_pad = jnp.pad(k_st, ((0, 0), (0, 0), (0, CPAD - vc), (0, 0))
                        ).astype(jnp.bfloat16)              # (T, S, 128, F)
        k_cat = jnp.transpose(k_pad, (0, 2, 1, 3)).reshape(tn, CPAD, s_steps * f)

        b1_full = jnp.tile(b1_st, (1, 1, v))                # (T, S, F) f32
        wfc_pad = jnp.pad(Wfc_st, ((0, 0), (0, 0), (0, 0), (0, CPAD - n_way))
                          ).astype(jnp.bfloat16)            # (T, S, F, 128)
        bfc_full = jnp.pad(bfc_st, ((0, 0), (0, 0), (0, CPAD - n_way)),
                           constant_values=NEG_INF)         # (T, S, 128) f32
        xq_pad = jnp.pad(xq2d, ((0, 0), (0, 0), (0, CPAD - vc))).astype(jnp.bfloat16)

        out = pallas_batched_eval(
            y_qry.astype(jnp.int32), y_spt.astype(jnp.int32),
            xq_pad, k_cat, b1_full, wfc_pad, bfc_full,
            n_samples=querysz, feat_dim=f, n_steps=s_steps)

        losses_q = jnp.sum(out[:, :, 0], axis=0)            # (S,)
        corrects = jnp.sum(out[:, :, 1], axis=0)            # (S,)
        loss_q = losses_q[-1] / tn
        return losses_q, corrects, loss_q, A

    def meta_forward(params, x_spt, y_spt, x_qry, y_qry):
        assert x_spt.shape[1] == x_qry.shape[1], (
            "reproducing the original's k>=1 query-LDA quirk requires setsz == querysz")
        _, corrects, loss_q, adj = run(params, x_spt, y_spt, x_qry, y_qry)
        task_num = x_spt.shape[0]
        querysz = x_qry.shape[1]
        accs = np.asarray(jax.device_get(corrects)) / (querysz * task_num)  # one sync
        # TODO(synk): outer-loop Adam step (self.meta_optim.step(), backprop through the
        # inner loop) and the dynamic import_class(graph) backbone have no Pallas
        # equivalent here and are not implemented.
        return accs, adj, loss_q

    return meta_forward


# ----------------------------------------------------------------------------------
if __name__ == "__main__":
    task_num, n_way = 2, 5
    setsz, querysz = 5, 5
    C, T, V, M = 3, 8, 16, 2
    H = 32
    update_lr = 0.01
    update_step = 2

    key = jax.random.PRNGKey(0)
    ks = jax.random.split(key, 8)

    A = jnp.eye(V, dtype=jnp.float32) * 0.5 + \
        0.05 * jax.random.normal(ks[0], (V, V), jnp.float32)
    W1 = 0.1 * jax.random.normal(ks[1], (C, H), jnp.float32)
    b1 = jnp.zeros((H,), jnp.float32)
    Wfc = 0.05 * jax.random.normal(ks[2], (V * H, n_way), jnp.float32)
    bfc = jnp.zeros((n_way,), jnp.float32)
    params = (A, W1, b1, Wfc, bfc)

    x_spt = jax.random.normal(ks[3], (task_num, setsz, C, T, V, M), jnp.float32)
    y_spt = jax.random.randint(ks[4], (task_num, setsz), 0, n_way)
    x_qry = jax.random.normal(ks[5], (task_num, querysz, C, T, V, M), jnp.float32)
    y_qry = jax.random.randint(ks[6], (task_num, querysz), 0, n_way)

    meta_forward = make_meta_forward(update_lr, update_step, n_way)
    accs, adj_matrix, loss_q = meta_forward(params, x_spt, y_spt, x_qry, y_qry)

    jax.block_until_ready(adj_matrix)
    jax.block_until_ready(loss_q)
    assert accs.shape == (update_step + 1,)
    assert adj_matrix.shape == (V, V)
    print("KERNEL_OK")
</pallas_src>

<mosaic_0001>
module attributes {stable_mosaic.version = 11 : i64} {
  func.func @gcn_eval_kernel(%arg0: i32, %arg1: memref<2x5xi32, #tpu.memory_space<smem>>, %arg2: memref<2x5xi32, #tpu.memory_space<smem>>, %arg3: memref<1x80x128xbf16, #tpu.memory_space<vmem>>, %arg4: memref<1x128x1536xbf16, #tpu.memory_space<vmem>>, %arg5: memref<1x3x512xf32, #tpu.memory_space<vmem>>, %arg6: memref<1x3x512x128xbf16, #tpu.memory_space<vmem>>, %arg7: memref<1x3x128xf32, #tpu.memory_space<vmem>>, %arg8: memref<1x3x128xf32, #tpu.memory_space<vmem>>, %arg9: memref<80x1536xf32, #tpu.memory_space<vmem>>) attributes {dimension_semantics = [#tpu.dimension_semantics<parallel>], iteration_bounds = array<i64: 2>, scalar_prefetch = 2 : i64, scratch_operands = 1 : i64, tpu.core_type = #tpu.core_type<tc>, window_params = [{transform_indices = @transform_0, window_bounds = array<i64: 1, 80, 128>}, {transform_indices = @transform_1, window_bounds = array<i64: 1, 128, 1536>}, {transform_indices = @transform_2, window_bounds = array<i64: 1, 3, 512>}, {transform_indices = @transform_3, window_bounds = array<i64: 1, 3, 512, 128>}, {transform_indices = @transform_4, window_bounds = array<i64: 1, 3, 128>}, {transform_indices = @transform_5, window_bounds = array<i64: 1, 3, 128>}]} {
    %c0 = arith.constant 0 : index
    %c0_0 = arith.constant 0 : index
    %c0_1 = arith.constant 0 : index
    %0 = vector.load %arg3[%c0, %c0_0, %c0_1] : memref<1x80x128xbf16, #tpu.memory_space<vmem>>, vector<1x80x128xbf16>
    %1 = vector.shape_cast %0 : vector<1x80x128xbf16> to vector<80x128xbf16>
    %c0_2 = arith.constant 0 : index
    %c0_3 = arith.constant 0 : index
    %c0_4 = arith.constant 0 : index
    %2 = vector.load %arg4[%c0_2, %c0_3, %c0_4] : memref<1x128x1536xbf16, #tpu.memory_space<vmem>>, vector<1x128x1536xbf16>
    %3 = vector.shape_cast %2 : vector<1x128x1536xbf16> to vector<128x1536xbf16>
    %cst = arith.constant dense<0.000000e+00> : vector<80x1536xf32>
    %4 = tpu.matmul %1, %3, %cst {dimension_numbers = #tpu.dot_dimension_numbers<[1], [0], [0], [1], [0, 0, 1, 1], [], []>} : vector<80x128xbf16>, vector<128x1536xbf16>, vector<80x1536xf32> -> vector<80x1536xf32>
    %c0_5 = arith.constant 0 : index
    %c0_6 = arith.constant 0 : index
    %5 = vector.load %arg9[%c0_5, %c0_6] : memref<80x1536xf32, #tpu.memory_space<vmem>>, vector<80x1536xf32>
    tpu.vector_store %arg9[%c0_5, %c0_6], %4 {strides = array<i32>} : memref<80x1536xf32, #tpu.memory_space<vmem>>, vector<80x1536xf32>,
    %6 = tpu.iota {dimensions = array<i32: 1>} : vector<5x128xi32>
    %7 = tpu.iota {dimensions = array<i32: 0>} : vector<5x128xi32>
    %cst_7 = arith.constant 0.000000e+00 : f32
    %8 = vector.broadcast %cst_7 : f32 to vector<5x128xf32>
    %c0_i32 = arith.constant 0 : i32
    %9 = vector.broadcast %c0_i32 : i32 to vector<5x128xi32>
    %10 = arith.cmpi eq, %7, %9 : vector<5x128xi32>
    %11 = arith.index_cast %arg0 : i32 to index
    %c0_8 = arith.constant 0 : index
    %12 = memref.load %arg1[%11, %c0_8] : memref<2x5xi32, #tpu.memory_space<smem>>
    %13 = vector.broadcast %12 : i32 to vector<5x128xi32>
    %14 = arith.cmpi eq, %6, %13 : vector<5x128xi32>
    %15 = arith.andi %10, %14 : vector<5x128xi1>
    %cst_9 = arith.constant 1.000000e+00 : f32
    %16 = vector.broadcast %cst_9 : f32 to vector<5x128xf32>
    %17 = arith.select %15, %16, %8 : vector<5x128xi1>, vector<5x128xf32>
    %c1_i32 = arith.constant 1 : i32
    %18 = vector.broadcast %c1_i32 : i32 to vector<5x128xi32>
    %19 = arith.cmpi eq, %7, %18 : vector<5x128xi32>
    %20 = arith.index_cast %arg0 : i32 to index
    %c1 = arith.constant 1 : index
    %21 = memref.load %arg1[%20, %c1] : memref<2x5xi32, #tpu.memory_space<smem>>
    %22 = vector.broadcast %21 : i32 to vector<5x128xi32>
    %23 = arith.cmpi eq, %6, %22 : vector<5x128xi32>
    %24 = arith.andi %19, %23 : vector<5x128xi1>
    %cst_10 = arith.constant 1.000000e+00 : f32
    %25 = vector.broadcast %cst_10 : f32 to vector<5x128xf32>
    %26 = arith.select %24, %25, %17 : vector<5x128xi1>, vector<5x128xf32>
    %c2_i32 = arith.constant 2 : i32
    %27 = vector.broadcast %c2_i32 : i32 to vector<5x128xi32>
    %28 = arith.cmpi eq, %7, %27 : vector<5x128xi32>
    %29 = arith.index_cast %arg0 : i32 to index
    %c2 = arith.constant 2 : index
    %30 = memref.load %arg1[%29, %c2] : memref<2x5xi32, #tpu.memory_space<smem>>
    %31 = vector.broadcast %30 : i32 to vector<5x128xi32>
    %32 = arith.cmpi eq, %6, %31 : vector<5x128xi32>
    %33 = arith.andi %28, %32 : vector<5x128xi1>
    %cst_11 = arith.constant 1.000000e+00 : f32
    %34 = vector.broadcast %cst_11 : f32 to vector<5x128xf32>
    %35 = arith.select %33, %34, %26 : vector<5x128xi1>, vector<5x128xf32>
    %c3_i32 = arith.constant 3 : i32
    %36 = vector.broadcast %c3_i32 : i32 to vector<5x128xi32>
    %37 = arith.cmpi eq, %7, %36 : vector<5x128xi32>
    %38 = arith.index_cast %arg0 : i32 to index
    %c3 = arith.constant 3 : index
    %39 = memref.load %arg1[%38, %c3] : memref<2x5xi32, #tpu.memory_space<smem>>
    %40 = vector.broadcast %39 : i32 to vector<5x128xi32>
    %41 = arith.cmpi eq, %6, %40 : vector<5x128xi32>
    %42 = arith.andi %37, %41 : vector<5x128xi1>
    %cst_12 = arith.constant 1.000000e+00 : f32
    %43 = vector.broadcast %cst_12 : f32 to vector<5x128xf32>
    %44 = arith.select %42, %43, %35 : vector<5x128xi1>, vector<5x128xf32>
    %c4_i32 = arith.constant 4 : i32
    %45 = vector.broadcast %c4_i32 : i32 to vector<5x128xi32>
    %46 = arith.cmpi eq, %7, %45 : vector<5x128xi32>
    %47 = arith.index_cast %arg0 : i32 to index
    %c4 = arith.constant 4 : index
    %48 = memref.load %arg1[%47, %c4] : memref<2x5xi32, #tpu.memory_space<smem>>
    %49 = vector.broadcast %48 : i32 to vector<5x128xi32>
    %50 = arith.cmpi eq, %6, %49 : vector<5x128xi32>
    %51 = arith.andi %46, %50 : vector<5x128xi1>
    %cst_13 = arith.constant 1.000000e+00 : f32
    %52 = vector.broadcast %cst_13 : f32 to vector<5x128xf32>
    %53 = arith.select %51, %52, %44 : vector<5x128xi1>, vector<5x128xf32>
    %cst_14 = arith.constant 0.000000e+00 : f32
    %54 = vector.broadcast %cst_14 : f32 to vector<5x128xf32>
    %c0_i32_15 = arith.constant 0 : i32
    %55 = vector.broadcast %c0_i32_15 : i32 to vector<5x128xi32>
    %56 = arith.cmpi eq, %7, %55 : vector<5x128xi32>
    %57 = arith.index_cast %arg0 : i32 to index
    %c0_16 = arith.constant 0 : index
    %58 = memref.load %arg2[%57, %c0_16] : memref<2x5xi32, #tpu.memory_space<smem>>
    %59 = vector.broadcast %58 : i32 to vector<5x128xi32>
    %60 = arith.cmpi eq, %6, %59 : vector<5x128xi32>
    %61 = arith.andi %56, %60 : vector<5x128xi1>
    %cst_17 = arith.constant 1.000000e+00 : f32
    %62 = vector.broadcast %cst_17 : f32 to vector<5x128xf32>
    %63 = arith.select %61, %62, %54 : vector<5x128xi1>, vector<5x128xf32>
    %c1_i32_18 = arith.constant 1 : i32
    %64 = vector.broadcast %c1_i32_18 : i32 to vector<5x128xi32>
    %65 = arith.cmpi eq, %7, %64 : vector<5x128xi32>
    %66 = arith.index_cast %arg0 : i32 to index
    %c1_19 = arith.constant 1 : index
    %67 = memref.load %arg2[%66, %c1_19] : memref<2x5xi32, #tpu.memory_space<smem>>
    %68 = vector.broadcast %67 : i32 to vector<5x128xi32>
    %69 = arith.cmpi eq, %6, %68 : vector<5x128xi32>
    %70 = arith.andi %65, %69 : vector<5x128xi1>
    %cst_20 = arith.constant 1.000000e+00 : f32
    %71 = vector.broadcast %cst_20 : f32 to vector<5x128xf32>
    %72 = arith.select %70, %71, %63 : vector<5x128xi1>, vector<5x128xf32>
    %c2_i32_21 = arith.constant 2 : i32
    %73 = vector.broadcast %c2_i32_21 : i32 to vector<5x128xi32>
    %74 = arith.cmpi eq, %7, %73 : vector<5x128xi32>
    %75 = arith.index_cast %arg0 : i32 to index
    %c2_22 = arith.constant 2 : index
    %76 = memref.load %arg2[%75, %c2_22] : memref<2x5xi32, #tpu.memory_space<smem>>
    %77 = vector.broadcast %76 : i32 to vector<5x128xi32>
    %78 = arith.cmpi eq, %6, %77 : vector<5x128xi32>
    %79 = arith.andi %74, %78 : vector<5x128xi1>
    %cst_23 = arith.constant 1.000000e+00 : f32
    %80 = vector.broadcast %cst_23 : f32 to vector<5x128xf32>
    %81 = arith.select %79, %80, %72 : vector<5x128xi1>, vector<5x128xf32>
    %c3_i32_24 = arith.constant 3 : i32
    %82 = vector.broadcast %c3_i32_24 : i32 to vector<5x128xi32>
    %83 = arith.cmpi eq, %7, %82 : vector<5x128xi32>
    %84 = arith.index_cast %arg0 : i32 to index
    %c3_25 = arith.constant 3 : index
    %85 = memref.load %arg2[%84, %c3_25] : memref<2x5xi32, #tpu.memory_space<smem>>
    %86 = vector.broadcast %85 : i32 to vector<5x128xi32>
    %87 = arith.cmpi eq, %6, %86 : vector<5x128xi32>
    %88 = arith.andi %83, %87 : vector<5x128xi1>
    %cst_26 = arith.constant 1.000000e+00 : f32
    %89 = vector.broadcast %cst_26 : f32 to vector<5x128xf32>
    %90 = arith.select %88, %89, %81 : vector<5x128xi1>, vector<5x128xf32>
    %c4_i32_27 = arith.constant 4 : i32
    %91 = vector.broadcast %c4_i32_27 : i32 to vector<5x128xi32>
    %92 = arith.cmpi eq, %7, %91 : vector<5x128xi32>
    %93 = arith.index_cast %arg0 : i32 to index
    %c4_28 = arith.constant 4 : index
    %94 = memref.load %arg2[%93, %c4_28] : memref<2x5xi32, #tpu.memory_space<smem>>
    %95 = vector.broadcast %94 : i32 to vector<5x128xi32>
    %96 = arith.cmpi eq, %6, %95 : vector<5x128xi32>
    %97 = arith.andi %92, %96 : vector<5x128xi1>
    %cst_29 = arith.constant 1.000000e+00 : f32
    %98 = vector.broadcast %cst_29 : f32 to vector<5x128xf32>
    %99 = arith.select %97, %98, %90 : vector<5x128xi1>, vector<5x128xf32>
    %100 = tpu.iota {dimensions = array<i32: 1>} : vector<1x128xi32>
    %c0_30 = arith.constant 0 : index
    %c0_31 = arith.constant 0 : index
    %101 = vector.load %arg9[%c0_30, %c0_31] : memref<80x1536xf32, #tpu.memory_space<vmem>>, vector<80x512xf32>
    %c0_32 = arith.constant 0 : index
    %c0_33 = arith.constant 0 : index
    %c0_34 = arith.constant 0 : index
    %102 = vector.load %arg5[%c0_32, %c0_33, %c0_34] : memref<1x3x512xf32, #tpu.memory_space<vmem>>, vector<1x1x512xf32>
    %103 = vector.shape_cast %102 : vector<1x1x512xf32> to vector<1x512xf32>
    %104 = vector.broadcast %103 : vector<1x512xf32> to vector<80x512xf32>
    %105 = arith.addf %101, %104 : vector<80x512xf32>
    %cst_35 = arith.constant 0.000000e+00 : f32
    %106 = vector.broadcast %cst_35 : f32 to vector<80x512xf32>
    %107 = arith.maximumf %105, %106 : vector<80x512xf32>
    %108 = vector.shape_cast %107 : vector<80x512xf32> to vector<5x16x512xf32>
    %cst_36 = arith.constant dense<0.000000e+00> : vector<5x512xf32>
    %109 = vector.multi_reduction <add>, %108, %cst_36 [1] : vector<5x16x512xf32> to vector<5x512xf32>
    %cst_37 = arith.constant 1.600000e+01 : f32
    %110 = vector.broadcast %cst_37 : f32 to vector<5x512xf32>
    %111 = arith.divf %109, %110 : vector<5x512xf32>
    %112 = arith.truncf %111 : vector<5x512xf32> to vector<5x512xbf16>
    %c0_38 = arith.constant 0 : index
    %c0_39 = arith.constant 0 : index
    %c0_40 = arith.constant 0 : index
    %c0_41 = arith.constant 0 : index
    %113 = vector.load %arg6[%c0_38, %c0_39, %c0_40, %c0_41] : memref<1x3x512x128xbf16, #tpu.memory_space<vmem>>, vector<1x1x512x128xbf16>
    %114 = vector.shape_cast %113 : vector<1x1x512x128xbf16> to vector<512x128xbf16>
    %cst_42 = arith.constant dense<0.000000e+00> : vector<5x128xf32>
    %115 = tpu.matmul %112, %114, %cst_42 {dimension_numbers = #tpu.dot_dimension_numbers<[1], [0], [0], [1], [0, 0, 1, 1], [], []>} : vector<5x512xbf16>, vector<512x128xbf16>, vector<5x128xf32> -> vector<5x128xf32>
    %c0_43 = arith.constant 0 : index
    %c0_44 = arith.constant 0 : index
    %c0_45 = arith.constant 0 : index
    %116 = vector.load %arg7[%c0_43, %c0_44, %c0_45] : memref<1x3x128xf32, #tpu.memory_space<vmem>>, vector<1x1x128xf32>
    %117 = vector.shape_cast %116 : vector<1x1x128xf32> to vector<1x128xf32>
    %118 = vector.broadcast %117 : vector<1x128xf32> to vector<5x128xf32>
    %119 = arith.addf %115, %118 : vector<5x128xf32>
    %cst_46 = arith.constant dense<0xFF800000> : vector<5xf32>
    %120 = vector.multi_reduction <maximumf>, %119, %cst_46 [1] : vector<5x128xf32> to vector<5xf32>
    %121 = vector.shape_cast %120 : vector<5xf32> to vector<5x1xf32>
    %122 = vector.broadcast %121 : vector<5x1xf32> to vector<5x128xf32>
    %123 = arith.subf %119, %122 : vector<5x128xf32>
    %124 = math.exp %123 : vector<5x128xf32>
    %cst_47 = arith.constant dense<0.000000e+00> : vector<5xf32>
    %125 = vector.multi_reduction <add>, %124, %cst_47 [1] : vector<5x128xf32> to vector<5xf32>
    %126 = vector.shape_cast %125 : vector<5xf32> to vector<5x1xf32>
    %127 = math.log %126 : vector<5x1xf32>
    %128 = arith.addf %121, %127 : vector<5x1xf32>
    %129 = arith.mulf %53, %119 : vector<5x128xf32>
    %cst_48 = arith.constant dense<0.000000e+00> : vector<5xf32>
    %130 = vector.multi_reduction <add>, %129, %cst_48 [1] : vector<5x128xf32> to vector<5xf32>
    %131 = vector.shape_cast %130 : vector<5xf32> to vector<5x1xf32>
    %132 = arith.subf %128, %131 : vector<5x1xf32>
    %cst_49 = arith.constant dense<0.000000e+00> : vector<1xf32>
    %133 = vector.multi_reduction <add>, %132, %cst_49 [0] : vector<5x1xf32> to vector<1xf32>
    %134 = vector.shape_cast %133 : vector<1xf32> to vector<1x1xf32>
    %cst_50 = arith.constant 5.000000e+00 : f32
    %135 = vector.broadcast %cst_50 : f32 to vector<1x1xf32>
    %136 = arith.divf %134, %135 : vector<1x1xf32>
    %137 = arith.cmpf oge, %131, %121 : vector<5x1xf32>
    %138 = arith.extui %137 : vector<5x1xi1> to vector<5x1xi32>
    %139 = arith.sitofp %138 : vector<5x1xi32> to vector<5x1xf32>
    %cst_51 = arith.constant dense<0.000000e+00> : vector<1xf32>
    %140 = vector.multi_reduction <add>, %139, %cst_51 [0] : vector<5x1xf32> to vector<1xf32>
    %141 = vector.shape_cast %140 : vector<1xf32> to vector<1x1xf32>
    %cst_52 = arith.constant dense<0.000000e+00> : vector<512x128xf32>
    %142 = tpu.matmul %111, %53, %cst_52 {dimension_numbers = #tpu.dot_dimension_numbers<[0], [0], [1], [1], [0, 1, 1, 1], [], []>} : vector<5x512xf32>, vector<5x128xf32>, vector<512x128xf32> -> vector<512x128xf32>
    %cst_53 = arith.constant dense<0.000000e+00> : vector<128xf32>
    %143 = vector.multi_reduction <add>, %53, %cst_53 [0] : vector<5x128xf32> to vector<128xf32>
    %144 = vector.shape_cast %143 : vector<128xf32> to vector<1x128xf32>
    %cst_54 = arith.constant 1.000000e+00 : f32
    %145 = vector.broadcast %cst_54 : f32 to vector<1x128xf32>
    %146 = arith.maximumf %144, %145 : vector<1x128xf32>
    %147 = vector.broadcast %146 : vector<1x128xf32> to vector<512x128xf32>
    %148 = arith.divf %142, %147 : vector<512x128xf32>
    %cst_55 = arith.constant 5.000000e-01 : f32
    %149 = vector.broadcast %cst_55 : f32 to vector<1x128xf32>
    %150 = arith.cmpf ogt, %144, %149 : vector<1x128xf32>
    %151 = arith.extui %150 : vector<1x128xi1> to vector<1x128xi32>
    %152 = arith.sitofp %151 : vector<1x128xi32> to vector<1x128xf32>
    %cst_56 = arith.constant dense<0.000000e+00> : vector<512xf32>
    %153 = vector.multi_reduction <add>, %142, %cst_56 [1] : vector<512x128xf32> to vector<512xf32>
    %154 = vector.shape_cast %153 : vector<512xf32> to vector<512x1xf32>
    %cst_57 = arith.constant 5.000000e+00 : f32
    %155 = vector.broadcast %cst_57 : f32 to vector<512x1xf32>
    %156 = arith.divf %154, %155 : vector<512x1xf32>
    %157 = arith.mulf %111, %111 : vector<5x512xf32>
    %cst_58 = arith.constant dense<0.000000e+00> : vector<5xf32>
    %158 = vector.multi_reduction <add>, %157, %cst_58 [1] : vector<5x512xf32> to vector<5xf32>
    %159 = vector.shape_cast %158 : vector<5xf32> to vector<5x1xf32>
    %cst_59 = arith.constant dense<0.000000e+00> : vector<1xf32>
    %160 = vector.multi_reduction <add>, %159, %cst_59 [0] : vector<5x1xf32> to vector<1xf32>
    %161 = vector.shape_cast %160 : vector<1xf32> to vector<1x1xf32>
    %162 = arith.mulf %148, %142 : vector<512x128xf32>
    %cst_60 = arith.constant dense<0.000000e+00> : vector<512xf32>
    %163 = vector.multi_reduction <add>, %162, %cst_60 [1] : vector<512x128xf32> to vector<512xf32>
    %164 = vector.shape_cast %163 : vector<512xf32> to vector<512x1xf32>
    %cst_61 = arith.constant dense<0.000000e+00> : vector<1xf32>
    %165 = vector.multi_reduction <add>, %164, %cst_61 [0] : vector<512x1xf32> to vector<1xf32>
    %166 = vector.shape_cast %165 : vector<1xf32> to vector<1x1xf32>
    %167 = arith.subf %161, %166 : vector<1x1xf32>
    %cst_62 = arith.constant 5.120000e-02 : f32
    %168 = vector.broadcast %cst_62 : f32 to vector<1x1xf32>
    %169 = arith.addf %167, %168 : vector<1x1xf32>
    %170 = vector.broadcast %156 : vector<512x1xf32> to vector<512x128xf32>
    %171 = arith.subf %148, %170 : vector<512x128xf32>
    %172 = vector.broadcast %152 : vector<1x128xf32> to vector<512x128xf32>
    %173 = arith.mulf %172, %171 : vector<512x128xf32>
    %174 = arith.mulf %173, %171 : vector<512x128xf32>
    %cst_63 = arith.constant dense<0.000000e+00> : vector<512xf32>
    %175 = vector.multi_reduction <add>, %174, %cst_63 [1] : vector<512x128xf32> to vector<512xf32>
    %176 = vector.shape_cast %175 : vector<512xf32> to vector<512x1xf32>
    %cst_64 = arith.constant dense<0.000000e+00> : vector<1xf32>
    %177 = vector.multi_reduction <add>, %176, %cst_64 [0] : vector<512x1xf32> to vector<1xf32>
    %178 = vector.shape_cast %177 : vector<1xf32> to vector<1x1xf32>
    %cst_65 = arith.constant 0.000000e+00 : f32
    %179 = vector.broadcast %cst_65 : f32 to vector<1x1xf32>
    %180 = arith.subf %179, %178 : vector<1x1xf32>
    %cst_66 = arith.constant 9.99999997E-7 : f32
    %181 = vector.broadcast %cst_66 : f32 to vector<1x1xf32>
    %182 = arith.addf %169, %181 : vector<1x1xf32>
    %183 = arith.divf %180, %182 : vector<1x1xf32>
    %cst_67 = arith.constant 1.000000e-01 : f32
    %184 = vector.broadcast %cst_67 : f32 to vector<1x1xf32>
    %185 = arith.mulf %184, %183 : vector<1x1xf32>
    %186 = arith.addf %136, %185 : vector<1x1xf32>
    %c0_i32_68 = arith.constant 0 : i32
    %187 = vector.broadcast %c0_i32_68 : i32 to vector<1x128xi32>
    %188 = arith.cmpi eq, %100, %187 : vector<1x128xi32>
    %189 = arith.extui %188 : vector<1x128xi1> to vector<1x128xi32>
    %190 = arith.sitofp %189 : vector<1x128xi32> to vector<1x128xf32>
    %191 = vector.broadcast %186 : vector<1x1xf32> to vector<1x128xf32>
    %192 = arith.mulf %191, %190 : vector<1x128xf32>
    %c1_i32_69 = arith.constant 1 : i32
    %193 = vector.broadcast %c1_i32_69 : i32 to vector<1x128xi32>
    %194 = arith.cmpi eq, %100, %193 : vector<1x128xi32>
    %195 = arith.extui %194 : vector<1x128xi1> to vector<1x128xi32>
    %196 = arith.sitofp %195 : vector<1x128xi32> to vector<1x128xf32>
    %197 = vector.broadcast %141 : vector<1x1xf32> to vector<1x128xf32>
    %198 = arith.mulf %197, %196 : vector<1x128xf32>
    %199 = arith.addf %192, %198 : vector<1x128xf32>
    %c0_70 = arith.constant 0 : index
    %c512 = arith.constant 512 : index
    %200 = vector.load %arg9[%c0_70, %c512] : memref<80x1536xf32, #tpu.memory_space<vmem>>, vector<80x512xf32>
    %c0_71 = arith.constant 0 : index
    %c1_72 = arith.constant 1 : index
    %c0_73 = arith.constant 0 : index
    %201 = vector.load %arg5[%c0_71, %c1_72, %c0_73] : memref<1x3x512xf32, #tpu.memory_space<vmem>>, vector<1x1x512xf32>
    %202 = vector.shape_cast %201 : vector<1x1x512xf32> to vector<1x512xf32>
    %203 = vector.broadcast %202 : vector<1x512xf32> to vector<80x512xf32>
    %204 = arith.addf %200, %203 : vector<80x512xf32>
    %cst_74 = arith.constant 0.000000e+00 : f32
    %205 = vector.broadcast %cst_74 : f32 to vector<80x512xf32>
    %206 = arith.maximumf %204, %205 : vector<80x512xf32>
    %207 = vector.shape_cast %206 : vector<80x512xf32> to vector<5x16x512xf32>
    %cst_75 = arith.constant dense<0.000000e+00> : vector<5x512xf32>
    %208 = vector.multi_reduction <add>, %207, %cst_75 [1] : vector<5x16x512xf32> to vector<5x512xf32>
    %cst_76 = arith.constant 1.600000e+01 : f32
    %209 = vector.broadcast %cst_76 : f32 to vector<5x512xf32>
    %210 = arith.divf %208, %209 : vector<5x512xf32>
    %211 = arith.truncf %210 : vector<5x512xf32> to vector<5x512xbf16>
    %c0_77 = arith.constant 0 : index
    %c1_78 = arith.constant 1 : index
    %c0_79 = arith.constant 0 : index
    %c0_80 = arith.constant 0 : index
    %212 = vector.load %arg6[%c0_77, %c1_78, %c0_79, %c0_80] : memref<1x3x512x128xbf16, #tpu.memory_space<vmem>>, vector<1x1x512x128xbf16>
    %213 = vector.shape_cast %212 : vector<1x1x512x128xbf16> to vector<512x128xbf16>
    %cst_81 = arith.constant dense<0.000000e+00> : vector<5x128xf32>
    %214 = tpu.matmul %211, %213, %cst_81 {dimension_numbers = #tpu.dot_dimension_numbers<[1], [0], [0], [1], [0, 0, 1, 1], [], []>} : vector<5x512xbf16>, vector<512x128xbf16>, vector<5x128xf32> -> vector<5x128xf32>
    %c0_82 = arith.constant 0 : index
    %c1_83 = arith.constant 1 : index
    %c0_84 = arith.constant 0 : index
    %215 = vector.load %arg7[%c0_82, %c1_83, %c0_84] : memref<1x3x128xf32, #tpu.memory_space<vmem>>, vector<1x1x128xf32>
    %216 = vector.shape_cast %215 : vector<1x1x128xf32> to vector<1x128xf32>
    %217 = vector.broadcast %216 : vector<1x128xf32> to vector<5x128xf32>
    %218 = arith.addf %214, %217 : vector<5x128xf32>
    %cst_85 = arith.constant dense<0xFF800000> : vector<5xf32>
    %219 = vector.multi_reduction <maximumf>, %218, %cst_85 [1] : vector<5x128xf32> to vector<5xf32>
    %220 = vector.shape_cast %219 : vector<5xf32> to vector<5x1xf32>
    %221 = vector.broadcast %220 : vector<5x1xf32> to vector<5x128xf32>
    %222 = arith.subf %218, %221 : vector<5x128xf32>
    %223 = math.exp %222 : vector<5x128xf32>
    %cst_86 = arith.constant dense<0.000000e+00> : vector<5xf32>
    %224 = vector.multi_reduction <add>, %223, %cst_86 [1] : vector<5x128xf32> to vector<5xf32>
    %225 = vector.shape_cast %224 : vector<5xf32> to vector<5x1xf32>
    %226 = math.log %225 : vector<5x1xf32>
    %227 = arith.addf %220, %226 : vector<5x1xf32>
    %228 = arith.mulf %53, %218 : vector<5x128xf32>
    %cst_87 = arith.constant dense<0.000000e+00> : vector<5xf32>
    %229 = vector.multi_reduction <add>, %228, %cst_87 [1] : vector<5x128xf32> to vector<5xf32>
    %230 = vector.shape_cast %229 : vector<5xf32> to vector<5x1xf32>
    %231 = arith.subf %227, %230 : vector<5x1xf32>
    %cst_88 = arith.constant dense<0.000000e+00> : vector<1xf32>
    %232 = vector.multi_reduction <add>, %231, %cst_88 [0] : vector<5x1xf32> to vector<1xf32>
    %233 = vector.shape_cast %232 : vector<1xf32> to vector<1x1xf32>
    %cst_89 = arith.constant 5.000000e+00 : f32
    %234 = vector.broadcast %cst_89 : f32 to vector<1x1xf32>
    %235 = arith.divf %233, %234 : vector<1x1xf32>
    %236 = arith.cmpf oge, %230, %220 : vector<5x1xf32>
    %237 = arith.extui %236 : vector<5x1xi1> to vector<5x1xi32>
    %238 = arith.sitofp %237 : vector<5x1xi32> to vector<5x1xf32>
    %cst_90 = arith.constant dense<0.000000e+00> : vector<1xf32>
    %239 = vector.multi_reduction <add>, %238, %cst_90 [0] : vector<5x1xf32> to vector<1xf32>
    %240 = vector.shape_cast %239 : vector<1xf32> to vector<1x1xf32>
    %cst_91 = arith.constant dense<0.000000e+00> : vector<512x128xf32>
    %241 = tpu.matmul %210, %53, %cst_91 {dimension_numbers = #tpu.dot_dimension_numbers<[0], [0], [1], [1], [0, 1, 1, 1], [], []>} : vector<5x512xf32>, vector<5x128xf32>, vector<512x128xf32> -> vector<512x128xf32>
    %cst_92 = arith.constant dense<0.000000e+00> : vector<128xf32>
    %242 = vector.multi_reduction <add>, %53, %cst_92 [0] : vector<5x128xf32> to vector<128xf32>
    %243 = vector.shape_cast %242 : vector<128xf32> to vector<1x128xf32>
    %cst_93 = arith.constant 1.000000e+00 : f32
    %244 = vector.broadcast %cst_93 : f32 to vector<1x128xf32>
    %245 = arith.maximumf %243, %244 : vector<1x128xf32>
    %246 = vector.broadcast %245 : vector<1x128xf32> to vector<512x128xf32>
    %247 = arith.divf %241, %246 : vector<512x128xf32>
    %cst_94 = arith.constant 5.000000e-01 : f32
    %248 = vector.broadcast %cst_94 : f32 to vector<1x128xf32>
    %249 = arith.cmpf ogt, %243, %248 : vector<1x128xf32>
    %250 = arith.extui %249 : vector<1x128xi1> to vector<1x128xi32>
    %251 = arith.sitofp %250 : vector<1x128xi32> to vector<1x128xf32>
    %cst_95 = arith.constant dense<0.000000e+00> : vector<512xf32>
    %252 = vector.multi_reduction <add>, %241, %cst_95 [1] : vector<512x128xf32> to vector<512xf32>
    %253 = vector.shape_cast %252 : vector<512xf32> to vector<512x1xf32>
    %cst_96 = arith.constant 5.000000e+00 : f32
    %254 = vector.broadcast %cst_96 : f32 to vector<512x1xf32>
    %255 = arith.divf %253, %254 : vector<512x1xf32>
    %256 = arith.mulf %210, %210 : vector<5x512xf32>
    %cst_97 = arith.constant dense<0.000000e+00> : vector<5xf32>
    %257 = vector.multi_reduction <add>, %256, %cst_97 [1] : vector<5x512xf32> to vector<5xf32>
    %258 = vector.shape_cast %257 : vector<5xf32> to vector<5x1xf32>
    %cst_98 = arith.constant dense<0.000000e+00> : vector<1xf32>
    %259 = vector.multi_reduction <add>, %258, %cst_98 [0] : vector<5x1xf32> to vector<1xf32>
    %260 = vector.shape_cast %259 : vector<1xf32> to vector<1x1xf32>
    %261 = arith.mulf %247, %241 : vector<512x128xf32>
    %cst_99 = arith.constant dense<0.000000e+00> : vector<512xf32>
    %262 = vector.multi_reduction <add>, %261, %cst_99 [1] : vector<512x128xf32> to vector<512xf32>
    %263 = vector.shape_cast %262 : vector<512xf32> to vector<512x1xf32>
    %cst_100 = arith.constant dense<0.000000e+00> : vector<1xf32>
    %264 = vector.multi_reduction <add>, %263, %cst_100 [0] : vector<512x1xf32> to vector<1xf32>
    %265 = vector.shape_cast %264 : vector<1xf32> to vector<1x1xf32>
    %266 = arith.subf %260, %265 : vector<1x1xf32>
    %cst_101 = arith.constant 5.120000e-02 : f32
    %267 = vector.broadcast %cst_101 : f32 to vector<1x1xf32>
    %268 = arith.addf %266, %267 : vector<1x1xf32>
    %269 = vector.broadcast %255 : vector<512x1xf32> to vector<512x128xf32>
    %270 = arith.subf %247, %269 : vector<512x128xf32>
    %271 = vector.broadcast %251 : vector<1x128xf32> to vector<512x128xf32>
    %272 = arith.mulf %271, %270 : vector<512x128xf32>
    %273 = arith.mulf %272, %270 : vector<512x128xf32>
    %cst_102 = arith.constant dense<0.000000e+00> : vector<512xf32>
    %274 = vector.multi_reduction <add>, %273, %cst_102 [1] : vector<512x128xf32> to vector<512xf32>
    %275 = vector.shape_cast %274 : vector<512xf32> to vector<512x1xf32>
    %cst_103 = arith.constant dense<0.000000e+00> : vector<1xf32>
    %276 = vector.multi_reduction <add>, %275, %cst_103 [0] : vector<512x1xf32> to vector<1xf32>
    %277 = vector.shape_cast %276 : vector<1xf32> to vector<1x1xf32>
    %cst_104 = arith.constant 0.000000e+00 : f32
    %278 = vector.broadcast %cst_104 : f32 to vector<1x1xf32>
    %279 = arith.subf %278, %277 : vector<1x1xf32>
    %cst_105 = arith.constant 9.99999997E-7 : f32
    %280 = vector.broadcast %cst_105 : f32 to vector<1x1xf32>
    %281 = arith.addf %268, %280 : vector<1x1xf32>
    %282 = arith.divf %279, %281 : vector<1x1xf32>
    %cst_106 = arith.constant 1.000000e-01 : f32
    %283 = vector.broadcast %cst_106 : f32 to vector<1x1xf32>
    %284 = arith.mulf %283, %282 : vector<1x1xf32>
    %285 = arith.addf %235, %284 : vector<1x1xf32>
    %c0_i32_107 = arith.constant 0 : i32
    %286 = vector.broadcast %c0_i32_107 : i32 to vector<1x128xi32>
    %287 = arith.cmpi eq, %100, %286 : vector<1x128xi32>
    %288 = arith.extui %287 : vector<1x128xi1> to vector<1x128xi32>
    %289 = arith.sitofp %288 : vector<1x128xi32> to vector<1x128xf32>
    %290 = vector.broadcast %285 : vector<1x1xf32> to vector<1x128xf32>
    %291 = arith.mulf %290, %289 : vector<1x128xf32>
    %c1_i32_108 = arith.constant 1 : i32
    %292 = vector.broadcast %c1_i32_108 : i32 to vector<1x128xi32>
    %293 = arith.cmpi eq, %100, %292 : vector<1x128xi32>
    %294 = arith.extui %293 : vector<1x128xi1> to vector<1x128xi32>
    %295 = arith.sitofp %294 : vector<1x128xi32> to vector<1x128xf32>
    %296 = vector.broadcast %240 : vector<1x1xf32> to vector<1x128xf32>
    %297 = arith.mulf %296, %295 : vector<1x128xf32>
    %298 = arith.addf %291, %297 : vector<1x128xf32>
    %c0_109 = arith.constant 0 : index
    %c1024 = arith.constant 1024 : index
    %299 = vector.load %arg9[%c0_109, %c1024] : memref<80x1536xf32, #tpu.memory_space<vmem>>, vector<80x512xf32>
    %c0_110 = arith.constant 0 : index
    %c2_111 = arith.constant 2 : index
    %c0_112 = arith.constant 0 : index
    %300 = vector.load %arg5[%c0_110, %c2_111, %c0_112] : memref<1x3x512xf32, #tpu.memory_space<vmem>>, vector<1x1x512xf32>
    %301 = vector.shape_cast %300 : vector<1x1x512xf32> to vector<1x512xf32>
    %302 = vector.broadcast %301 : vector<1x512xf32> to vector<80x512xf32>
    %303 = arith.addf %299, %302 : vector<80x512xf32>
    %cst_113 = arith.constant 0.000000e+00 : f32
    %304 = vector.broadcast %cst_113 : f32 to vector<80x512xf32>
    %305 = arith.maximumf %303, %304 : vector<80x512xf32>
    %306 = vector.shape_cast %305 : vector<80x512xf32> to vector<5x16x512xf32>
    %cst_114 = arith.constant dense<0.000000e+00> : vector<5x512xf32>
    %307 = vector.multi_reduction <add>, %306, %cst_114 [1] : vector<5x16x512xf32> to vector<5x512xf32>
    %cst_115 = arith.constant 1.600000e+01 : f32
    %308 = vector.broadcast %cst_115 : f32 to vector<5x512xf32>
    %309 = arith.divf %307, %308 : vector<5x512xf32>
    %310 = arith.truncf %309 : vector<5x512xf32> to vector<5x512xbf16>
    %c0_116 = arith.constant 0 : index
    %c2_117 = arith.constant 2 : index
    %c0_118 = arith.constant 0 : index
    %c0_119 = arith.constant 0 : index
    %311 = vector.load %arg6[%c0_116, %c2_117, %c0_118, %c0_119] : memref<1x3x512x128xbf16, #tpu.memory_space<vmem>>, vector<1x1x512x128xbf16>
    %312 = vector.shape_cast %311 : vector<1x1x512x128xbf16> to vector<512x128xbf16>
    %cst_120 = arith.constant dense<0.000000e+00> : vector<5x128xf32>
    %313 = tpu.matmul %310, %312, %cst_120 {dimension_numbers = #tpu.dot_dimension_numbers<[1], [0], [0], [1], [0, 0, 1, 1], [], []>} : vector<5x512xbf16>, vector<512x128xbf16>, vector<5x128xf32> -> vector<5x128xf32>
    %c0_121 = arith.constant 0 : index
    %c2_122 = arith.constant 2 : index
    %c0_123 = arith.constant 0 : index
    %314 = vector.load %arg7[%c0_121, %c2_122, %c0_123] : memref<1x3x128xf32, #tpu.memory_space<vmem>>, vector<1x1x128xf32>
    %315 = vector.shape_cast %314 : vector<1x1x128xf32> to vector<1x128xf32>
    %316 = vector.broadcast %315 : vector<1x128xf32> to vector<5x128xf32>
    %317 = arith.addf %313, %316 : vector<5x128xf32>
    %cst_124 = arith.constant dense<0xFF800000> : vector<5xf32>
    %318 = vector.multi_reduction <maximumf>, %317, %cst_124 [1] : vector<5x128xf32> to vector<5xf32>
    %319 = vector.shape_cast %318 : vector<5xf32> to vector<5x1xf32>
    %320 = vector.broadcast %319 : vector<5x1xf32> to vector<5x128xf32>
    %321 = arith.subf %317, %320 : vector<5x128xf32>
    %322 = math.exp %321 : vector<5x128xf32>
    %cst_125 = arith.constant dense<0.000000e+00> : vector<5xf32>
    %323 = vector.multi_reduction <add>, %322, %cst_125 [1] : vector<5x128xf32> to vector<5xf32>
    %324 = vector.shape_cast %323 : vector<5xf32> to vector<5x1xf32>
    %325 = math.log %324 : vector<5x1xf32>
    %326 = arith.addf %319, %325 : vector<5x1xf32>
    %327 = arith.mulf %53, %317 : vector<5x128xf32>
    %cst_126 = arith.constant dense<0.000000e+00> : vector<5xf32>
    %328 = vector.multi_reduction <add>, %327, %cst_126 [1] : vector<5x128xf32> to vector<5xf32>
    %329 = vector.shape_cast %328 : vector<5xf32> to vector<5x1xf32>
    %330 = arith.subf %326, %329 : vector<5x1xf32>
    %cst_127 = arith.constant dense<0.000000e+00> : vector<1xf32>
    %331 = vector.multi_reduction <add>, %330, %cst_127 [0] : vector<5x1xf32> to vector<1xf32>
    %332 = vector.shape_cast %331 : vector<1xf32> to vector<1x1xf32>
    %cst_128 = arith.constant 5.000000e+00 : f32
    %333 = vector.broadcast %cst_128 : f32 to vector<1x1xf32>
    %334 = arith.divf %332, %333 : vector<1x1xf32>
    %335 = arith.cmpf oge, %329, %319 : vector<5x1xf32>
    %336 = arith.extui %335 : vector<5x1xi1> to vector<5x1xi32>
    %337 = arith.sitofp %336 : vector<5x1xi32> to vector<5x1xf32>
    %cst_129 = arith.constant dense<0.000000e+00> : vector<1xf32>
    %338 = vector.multi_reduction <add>, %337, %cst_129 [0] : vector<5x1xf32> to vector<1xf32>
    %339 = vector.shape_cast %338 : vector<1xf32> to vector<1x1xf32>
    %cst_130 = arith.constant dense<0.000000e+00> : vector<512x128xf32>
    %340 = tpu.matmul %309, %99, %cst_130 {dimension_numbers = #tpu.dot_dimension_numbers<[0], [0], [1], [1], [0, 1, 1, 1], [], []>} : vector<5x512xf32>, vector<5x128xf32>, vector<512x128xf32> -> vector<512x128xf32>
    %cst_131 = arith.constant dense<0.000000e+00> : vector<128xf32>
    %341 = vector.multi_reduction <add>, %99, %cst_131 [0] : vector<5x128xf32> to vector<128xf32>
    %342 = vector.shape_cast %341 : vector<128xf32> to vector<1x128xf32>
    %cst_132 = arith.constant 1.000000e+00 : f32
    %343 = vector.broadcast %cst_132 : f32 to vector<1x128xf32>
    %344 = arith.maximumf %342, %343 : vector<1x128xf32>
    %345 = vector.broadcast %344 : vector<1x128xf32> to vector<512x128xf32>
    %346 = arith.divf %340, %345 : vector<512x128xf32>
    %cst_133 = arith.constant 5.000000e-01 : f32
    %347 = vector.broadcast %cst_133 : f32 to vector<1x128xf32>
    %348 = arith.cmpf ogt, %342, %347 : vector<1x128xf32>
    %349 = arith.extui %348 : vector<1x128xi1> to vector<1x128xi32>
    %350 = arith.sitofp %349 : vector<1x128xi32> to vector<1x128xf32>
    %cst_134 = arith.constant dense<0.000000e+00> : vector<512xf32>
    %351 = vector.multi_reduction <add>, %340, %cst_134 [1] : vector<512x128xf32> to vector<512xf32>
    %352 = vector.shape_cast %351 : vector<512xf32> to vector<512x1xf32>
    %cst_135 = arith.constant 5.000000e+00 : f32
    %353 = vector.broadcast %cst_135 : f32 to vector<512x1xf32>
    %354 = arith.divf %352, %353 : vector<512x1xf32>
    %355 = arith.mulf %309, %309 : vector<5x512xf32>
    %cst_136 = arith.constant dense<0.000000e+00> : vector<5xf32>
    %356 = vector.multi_reduction <add>, %355, %cst_136 [1] : vector<5x512xf32> to vector<5xf32>
    %357 = vector.shape_cast %356 : vector<5xf32> to vector<5x1xf32>
    %cst_137 = arith.constant dense<0.000000e+00> : vector<1xf32>
    %358 = vector.multi_reduction <add>, %357, %cst_137 [0] : vector<5x1xf32> to vector<1xf32>
    %359 = vector.shape_cast %358 : vector<1xf32> to vector<1x1xf32>
    %360 = arith.mulf %346, %340 : vector<512x128xf32>
    %cst_138 = arith.constant dense<0.000000e+00> : vector<512xf32>
    %361 = vector.multi_reduction <add>, %360, %cst_138 [1] : vector<512x128xf32> to vector<512xf32>
    %362 = vector.shape_cast %361 : vector<512xf32> to vector<512x1xf32>
    %cst_139 = arith.constant dense<0.000000e+00> : vector<1xf32>
    %363 = vector.multi_reduction <add>, %362, %cst_139 [0] : vector<512x1xf32> to vector<1xf32>
    %364 = vector.shape_cast %363 : vector<1xf32> to vector<1x1xf32>
    %365 = arith.subf %359, %364 : vector<1x1xf32>
    %cst_140 = arith.constant 5.120000e-02 : f32
    %366 = vector.broadcast %cst_140 : f32 to vector<1x1xf32>
    %367 = arith.addf %365, %366 : vector<1x1xf32>
    %368 = vector.broadcast %354 : vector<512x1xf32> to vector<512x128xf32>
    %369 = arith.subf %346, %368 : vector<512x128xf32>
    %370 = vector.broadcast %350 : vector<1x128xf32> to vector<512x128xf32>
    %371 = arith.mulf %370, %369 : vector<512x128xf32>
    %372 = arith.mulf %371, %369 : vector<512x128xf32>
    %cst_141 = arith.constant dense<0.000000e+00> : vector<512xf32>
    %373 = vector.multi_reduction <add>, %372, %cst_141 [1] : vector<512x128xf32> to vector<512xf32>
    %374 = vector.shape_cast %373 : vector<512xf32> to vector<512x1xf32>
    %cst_142 = arith.constant dense<0.000000e+00> : vector<1xf32>
    %375 = vector.multi_reduction <add>, %374, %cst_142 [0] : vector<512x1xf32> to vector<1xf32>
    %376 = vector.shape_cast %375 : vector<1xf32> to vector<1x1xf32>
    %cst_143 = arith.constant 0.000000e+00 : f32
    %377 = vector.broadcast %cst_143 : f32 to vector<1x1xf32>
    %378 = arith.subf %377, %376 : vector<1x1xf32>
    %cst_144 = arith.constant 9.99999997E-7 : f32
    %379 = vector.broadcast %cst_144 : f32 to vector<1x1xf32>
    %380 = arith.addf %367, %379 : vector<1x1xf32>
    %381 = arith.divf %378, %380 : vector<1x1xf32>
    %cst_145 = arith.constant 1.000000e-01 : f32
    %382 = vector.broadcast %cst_145 : f32 to vector<1x1xf32>
    %383 = arith.mulf %382, %381 : vector<1x1xf32>
    %384 = arith.addf %334, %383 : vector<1x1xf32>
    %c0_i32_146 = arith.constant 0 : i32
    %385 = vector.broadcast %c0_i32_146 : i32 to vector<1x128xi32>
    %386 = arith.cmpi eq, %100, %385 : vector<1x128xi32>
    %387 = arith.extui %386 : vector<1x128xi1> to vector<1x128xi32>
    %388 = arith.sitofp %387 : vector<1x128xi32> to vector<1x128xf32>
    %389 = vector.broadcast %384 : vector<1x1xf32> to vector<1x128xf32>
    %390 = arith.mulf %389, %388 : vector<1x128xf32>
    %c1_i32_147 = arith.constant 1 : i32
    %391 = vector.broadcast %c1_i32_147 : i32 to vector<1x128xi32>
    %392 = arith.cmpi eq, %100, %391 : vector<1x128xi32>
    %393 = arith.extui %392 : vector<1x128xi1> to vector<1x128xi32>
    %394 = arith.sitofp %393 : vector<1x128xi32> to vector<1x128xf32>
    %395 = vector.broadcast %339 : vector<1x1xf32> to vector<1x128xf32>
    %396 = arith.mulf %395, %394 : vector<1x128xf32>
    %397 = arith.addf %390, %396 : vector<1x128xf32>
    %398 = tpu.concatenate %199, %298, %397 in 0 : vector<1x128xf32>, vector<1x128xf32>, vector<1x128xf32> -> vector<3x128xf32>
    %c0_148 = arith.constant 0 : index
    %c0_149 = arith.constant 0 : index
    %c0_150 = arith.constant 0 : index
    %399 = vector.load %arg8[%c0_148, %c0_149, %c0_150] : memref<1x3x128xf32, #tpu.memory_space<vmem>>, vector<1x3x128xf32>
    %400 = vector.shape_cast %399 : vector<1x3x128xf32> to vector<3x128xf32>
    %401 = vector.shape_cast %398 : vector<3x128xf32> to vector<1x3x128xf32>
    tpu.vector_store %arg8[%c0_148, %c0_149, %c0_150], %401 {strides = array<i32>} : memref<1x3x128xf32, #tpu.memory_space<vmem>>, vector<1x3x128xf32>,
    return
  }
  func.func @transform_0(%arg0: i32, %arg1: memref<2x5xi32, #tpu.memory_space<smem>>, %arg2: memref<2x5xi32, #tpu.memory_space<smem>>) -> (i32, i32, i32) {
    %c0_i32 = arith.constant 0 : i32
    %c0_i32_0 = arith.constant 0 : i32
    %c0_i32_1 = arith.constant 0 : i32
    return %arg0, %c0_i32, %c0_i32_0 : i32, i32, i32
  }
  func.func @transform_1(%arg0: i32, %arg1: memref<2x5xi32, #tpu.memory_space<smem>>, %arg2: memref<2x5xi32, #tpu.memory_space<smem>>) -> (i32, i32, i32) {
    %c0_i32 = arith.constant 0 : i32
    %c0_i32_0 = arith.constant 0 : i32
    %c0_i32_1 = arith.constant 0 : i32
    return %arg0, %c0_i32, %c0_i32_0 : i32, i32, i32
  }
  func.func @transform_2(%arg0: i32, %arg1: memref<2x5xi32, #tpu.memory_space<smem>>, %arg2: memref<2x5xi32, #tpu.memory_space<smem>>) -> (i32, i32, i32) {
    %c0_i32 = arith.constant 0 : i32
    %c0_i32_0 = arith.constant 0 : i32
    %c0_i32_1 = arith.constant 0 : i32
    return %arg0, %c0_i32, %c0_i32_0 : i32, i32, i32
  }
  func.func @transform_3(%arg0: i32, %arg1: memref<2x5xi32, #tpu.memory_space<smem>>, %arg2: memref<2x5xi32, #tpu.memory_space<smem>>) -> (i32, i32, i32, i32) {
    %c0_i32 = arith.constant 0 : i32
    %c0_i32_0 = arith.constant 0 : i32
    %c0_i32_1 = arith.constant 0 : i32
    %c0_i32_2 = arith.constant 0 : i32
    return %arg0, %c0_i32, %c0_i32_0, %c0_i32_1 : i32, i32, i32, i32
  }
  func.func @transform_4(%arg0: i32, %arg1: memref<2x5xi32, #tpu.memory_space<smem>>, %arg2: memref<2x5xi32, #tpu.memory_space<smem>>) -> (i32, i32, i32) {
    %c0_i32 = arith.constant 0 : i32
    %c0_i32_0 = arith.constant 0 : i32
    %c0_i32_1 = arith.constant 0 : i32
    return %arg0, %c0_i32, %c0_i32_0 : i32, i32, i32
  }
  func.func @transform_5(%arg0: i32, %arg1: memref<2x5xi32, #tpu.memory_space<smem>>, %arg2: memref<2x5xi32, #tpu.memory_space<smem>>) -> (i32, i32, i32) {
    %c0_i32 = arith.constant 0 : i32
    %c0_i32_0 = arith.constant 0 : i32
    %c0_i32_1 = arith.constant 0 : i32
    return %arg0, %c0_i32, %c0_i32_0 : i32, i32, i32
  }
}

</mosaic_0001>

<bundles_post_ra>
// kernel: tile.18
= control target key start
LH: loop header
LB: loop body
LE: loop exit
PB: predicated region body
PF: predicated region fallthrough
CT: control target
= control target key end

     0   :  { %2 = vsyncpa [#allocation1], 0  ;;  %s47_s6 = smov [#allocation0]   ;;  %s76_s0 = inlined_call_operand.hbm [shape: f32[32], index: 0, kind: input, shape index: {}]   ;;  %s77_s1 = inlined_call_operand.vmem [shape: f32[16,32], index: 1, kind: output, shape index: {}]  }
   0x1   :  { %s9_s7 = sshll.u32 %s47_s6, 4  ;;  %s23_s10 = scalar_lea.hbm %s76_s0, 16  ;;  %s10_s7 = int_to_ptr.vmem [resolvable:$true] %s9_s7 }
   0x2   :  { %p24_p0 = scmp.ne.s32.totalorder %s76_s0, %s23_s10  ;;  %p27_p1 = scmp.lt.u32.totalorder %s23_s10, %s76_s0 }
   0x4   :  { %p29_p2 = pnand %p27_p1, %p24_p0 }
   0x6   :  { %32 = shalt.err (!%p29_p2)
}
   0x7   :  { %s33_s15 = scalar_lea.vmem %s10_s7, 16  ;;  %s37_s16 = scalar_lea.vmem %s10_s7, 32 }
   0x8   :  { %p34_p3 = scmp.ne.s32.totalorder %s10_s7, %s33_s15  ;;  %p38_p4 = scmp.lt.s32.totalorder %s10_s7, %s10_s7 }
   0x9   :  { %p39_p5 = scmp.lt.s32.totalorder %s37_s16, %s33_s15 }
   0xb   :  { %p40_p6 = por %p39_p5, %p38_p4 }
   0xd   :  { %p41_p7 = pnand %p40_p6, %p34_p3 }
   0xf   :  { %44 = shalt.err (!%p41_p7)
}
  0x10   :  { %12 = dma.hbm_to_vmem [thread:$0]  %s76_s0, 16, %s10_s7, [#allocation1]  }
  0x11   :  { %45 = dma.done.wait [#allocation1], 16  }
  0x12   :  { %46 = vsyncadd [#allocation1], 4294967280  ;;  %v16_v0 = vld [vmem:[#allocation0] ss:$0 sm:$0xff] }
  0x13   :  { %17 = vst [vmem:[%s77_s1] sm:$0xff] %v16_v0  ;;  %21 = vst [vmem:[%s77_s1 + $0x8] sm:$0xff] %v16_v0 }
  0x14   :  { %20 = vsyncpa [#allocation1], 1 }

// kernel: tile.29
= control target key start
LH: loop header
LB: loop body
LE: loop exit
PB: predicated region body
PF: predicated region fallthrough
CT: control target
= control target key end

     0   :  { %s22_s6 = smov 3  ;;  %s25_s7 = smov 12  ;;  %vm27_vm0 = vcmask 1043458   ;;  %vm32_vm1 = vcmask 1045508   ;;  %vm37_vm2 = vcmask 1047558   ;;  %vm3_vm3 = vcmask 261120   ;;  %s638_s0 = inlined_call_operand.vmem [shape: f32[2,3,16,32], index: 0, kind: input, shape index: {}]   ;;  %s639_s1 = inlined_call_operand.vmem [shape: f32[2,3,512], index: 1, kind: output, shape index: {}]  }
   0x1   :  { %v362_v0 = vld [vmem:[%s638_s0 + $0x3] ss:$16 sm:%s22_s6]   ;;  %v363_v1 = vld [vmem:[%s638_s0 - $0x19] ss:$16 sm:%s25_s7]   ;;  %s30_s12 = smov 48  ;;  %s35_s13 = smov 192 }
   0x2   :  { %v28_v2 = vsel %vm27_vm0, %v363_v1, %v362_v0  ;;  %v364_v3 = vld [vmem:[%s638_s0 - $0x35] ss:$16 sm:%s30_s12]   ;;  %v365_v4 = vld [vmem:[%s638_s0 - $0x51] ss:$16 sm:%s35_s13]   ;;  %s79_s18 = smov 3  ;;  %s82_s21 = smov 12 }
   0x3   :  { %v33_v5 = vsel %vm32_vm1, %v364_v3, %v28_v2  ;;  %v370_v6 = vld [vmem:[%s638_s0 + $0x43] ss:$16 sm:%s79_s18]   ;;  %s87_s22 = smov 48  ;;  %v2_v7 = vld [vmem:[%s638_s0] ss:$4 sm:$0xff]   ;;  %s92_s29 = smov 192 }
   0x4   :  { %v38_v8 = vsel %vm37_vm2, %v365_v4, %v33_v5  ;;  %v371_v9 = vld [vmem:[%s638_s0 + $0x27] ss:$16 sm:%s82_s21]   ;;  %v372_v10 = vld [vmem:[%s638_s0 + $0xb] ss:$16 sm:%s87_s22]   ;;  %s50_s30 = smov 3  ;;  %s412_s2 = smov 96  }
   0x5   :  { %39 = vrot.lane.b32.xlu0 %v38_v8, %s412_s2  ;;  %v85_v11 = vsel %vm27_vm0, %v371_v9, %v370_v6  ;;  %v373_v12 = vld [vmem:[%s638_s0 - $0x11] ss:$16 sm:%s92_s29]   ;;  %s53_s5 = smov 12  ;;  %s58_s6 = smov 48  ;;  %v361_v22 = vld [vmem:[%s638_s0 + $0x40] ss:$4 sm:$0xff]  }
   0x6   :  { %v90_v13 = vsel %vm32_vm1, %v372_v10, %v85_v11  ;;  %v366_v14 = vld [vmem:[%s638_s0 + $0x23] ss:$16 sm:%s50_s30]   ;;  %v367_v15 = vld [vmem:[%s638_s0 + $0x7] ss:$16 sm:%s53_s5]   ;;  %s63_s11 = smov 192  ;;  %s108_s12 = smov 3 }
   0x7   :  { %4 = vst.msk [vmem:[#allocation0] ss:$8 sm:$0xf] %vm3_vm3, %v2_v7   ;;  %6 = vst.msk [vmem:[#allocation0 - $0x1f] ss:$8 sm:$0xf0] %vm3_vm3, %v2_v7   ;;  %v95_v16 = vsel %vm37_vm2, %v373_v12, %v90_v13  ;;  %v56_v17 = vsel %vm27_vm0, %v367_v15, %v366_v14 }
   0x8   :  { %v368_v18 = vld [vmem:[%s638_s0 - $0x15] ss:$16 sm:%s58_s6]   ;;  %v369_v19 = vld [vmem:[%s638_s0 - $0x31] ss:$16 sm:%s63_s11]   ;;  %s111_s17 = smov 12  ;;  %s116_s18 = smov 48 }
   0x9   :  { %96 = vrot.lane.b32.xlu1 %v95_v16, %s412_s2  ;;  %v61_v20 = vsel %vm32_vm1, %v368_v18, %v56_v17  ;;  %v374_v21 = vld [vmem:[%s638_s0 + $0x2] ss:$16 sm:%s108_s12]   ;;  %s121_s21 = smov 192  ;;  %s136_s28 = smov 3  ;;  %v360_v28 = vld [vmem:[%s638_s0 + $0x20] ss:$4 sm:$0xff]  }
   0xa   :  { %v66_v23 = vsel %vm37_vm2, %v369_v19, %v61_v20  ;;  %v375_v24 = vld [vmem:[%s638_s0 - $0x1a] ss:$16 sm:%s111_s17]   ;;  %v376_v25 = vld [vmem:[%s638_s0 - $0x36] ss:$16 sm:%s116_s18]   ;;  %s139_s29 = smov 12  ;;  %s144_s3 = smov 48 }
   0xb   :  { %18 = vst.msk [vmem:[#allocation0 + $0x40] ss:$8 sm:$0xf] %vm3_vm3, %v361_v22   ;;  %20 = vst.msk [vmem:[#allocation0 + $0x21] ss:$8 sm:$0xf0] %vm3_vm3, %v361_v22   ;;  %67 = vrot.lane.b32.xlu0 %v66_v23, %s412_s2  ;;  %v114_v26 = vsel %vm27_vm0, %v375_v24, %v374_v21 }
   0xc   :  { %v377_v27 = vld [vmem:[%s638_s0 - $0x52] ss:$16 sm:%s121_s21]   ;;  %s149_s4 = smov 192  ;;  %v119_v29 = vsel %vm32_vm1, %v376_v25, %v114_v26  ;;  %v378_v30 = vld [vmem:[%s638_s0 + $0x22] ss:$16 sm:%s136_s28]   ;;  %s165_s11 = smov 3 }
   0xd   :  { %v379_v31 = vld [vmem:[%s638_s0 + $0x6] ss:$16 sm:%s139_s29]   ;;  %s168_s12 = smov 12  ;;  %11 = vst.msk [vmem:[#allocation0 + $0x20] ss:$8 sm:$0xf] %vm3_vm3, %v360_v28   ;;  %v124_v32 = vsel %vm37_vm2, %v377_v27, %v119_v29 }
   0xe   :  { %13 = vst.msk [vmem:[#allocation0 + $0x1] ss:$8 sm:$0xf0] %vm3_vm3, %v360_v28   ;;  %v142_v33 = vsel %vm27_vm0, %v379_v31, %v378_v30  ;;  %v380_v34 = vld [vmem:[%s638_s0 - $0x16] ss:$16 sm:%s144_s3]   ;;  %s173_s17 = smov 48 }
   0xf   :  { %v381_v35 = vld [vmem:[%s638_s0 - $0x32] ss:$16 sm:%s149_s4]   ;;  %s178_s18 = smov 192  ;;  %s413_s19 = smov 64   ;;  %v147_v36 = vsel %vm32_vm1, %v380_v34, %v142_v33  ;;  %v382_v37 = vld [vmem:[%s638_s0 + $0x42] ss:$16 sm:%s165_s11]  }
  0x10   :  { %125 = vrot.lane.b32.xlu1 %v124_v32, %s413_s19  ;;  %s194_s22 = smov 3  ;;  %s197_s23 = smov 12  ;;  %v152_v38 = vsel %vm37_vm2, %v381_v35, %v147_v36  ;;  %v383_v39 = vld [vmem:[%s638_s0 + $0x26] ss:$16 sm:%s168_s12]   ;;  %vm41_vm4 = vcmask 1048320   ;;  %vm127_vm5 = vcmask 785920  }
  0x11   :  { %v384_v40 = vld [vmem:[%s638_s0 + $0xa] ss:$16 sm:%s173_s17]   ;;  %s202_s28 = smov 48  ;;  %s207_s29 = smov 192  ;;  %153 = vrot.lane.b32.xlu0 %v152_v38, %s413_s19  ;;  %v171_v41 = vsel %vm27_vm0, %v383_v39, %v382_v37  ;;  %vm213_vm6 = vcmask 523520  }
  0x12   :  { %v385_v42 = vld [vmem:[%s638_s0 - $0x12] ss:$16 sm:%s178_s18]   ;;  %s222_s3 = smov 3  ;;  %v176_v43 = vsel %vm32_vm1, %v384_v40, %v171_v41  ;;  %v386_v44 = vld [vmem:[%s638_s0 + $0x1] ss:$16 sm:%s194_s22]   ;;  %s225_s8 = smov 12 }
  0x13   :  { %v387_v45 = vld [vmem:[%s638_s0 - $0x1b] ss:$16 sm:%s197_s23]   ;;  %s230_s9 = smov 48  ;;  %v181_v46 = vsel %vm37_vm2, %v385_v42, %v176_v43  ;;  %v388_v48 = vld [vmem:[%s638_s0 - $0x37] ss:$16 sm:%s202_s28]   ;;  %s235_s14 = smov 192 }
  0x14   :  { %v200_v47 = vsel %vm27_vm0, %v387_v45, %v386_v44  ;;  %v389_v49 = vld [vmem:[%s638_s0 - $0x53] ss:$16 sm:%s207_s29]   ;;  %182 = vrot.lane.b32.xlu1 %v181_v46, %s413_s19  ;;  %s251_s17 = smov 3  ;;  %s254_s18 = smov 12 }
  0x15   :  { %v205_v50 = vsel %vm32_vm1, %v388_v48, %v200_v47  ;;  %v390_v51 = vld [vmem:[%s638_s0 + $0x21] ss:$16 sm:%s222_s3]   ;;  %v391_v53 = vld [vmem:[%s638_s0 + $0x5] ss:$16 sm:%s225_s8]   ;;  %s259_s23 = smov 48  ;;  %s264_s24 = smov 192 }
  0x16   :  { %v210_v52 = vsel %vm37_vm2, %v389_v49, %v205_v50  ;;  %v392_v54 = vld [vmem:[%s638_s0 - $0x17] ss:$16 sm:%s230_s9]   ;;  %s414_s25 = smov 32   ;;  %v228_v55 = vsel %vm27_vm0, %v391_v53, %v390_v51  ;;  %v393_v56 = vld [vmem:[%s638_s0 - $0x33] ss:$16 sm:%s235_s14]  }
  0x17   :  { %211 = vrot.lane.b32.xlu0 %v210_v52, %s414_s25  ;;  %v233_v57 = vsel %vm32_vm1, %v392_v54, %v228_v55  ;;  %v394_v58 = vld [vmem:[%s638_s0 + $0x41] ss:$16 sm:%s251_s17]  }
  0x18   :  { %v395_v59 = vld [vmem:[%s638_s0 + $0x25] ss:$16 sm:%s254_s18]   ;;  %v238_v60 = vsel %vm37_vm2, %v393_v56, %v233_v57  ;;  %v396_v62 = vld [vmem:[%s638_s0 + $0x9] ss:$16 sm:%s259_s23]  }
  0x19   :  { %v257_v61 = vsel %vm27_vm0, %v395_v59, %v394_v58  ;;  %v397_v63 = vld [vmem:[%s638_s0 - $0x13] ss:$16 sm:%s264_s24]   ;;  %239 = vrot.lane.b32.xlu1 %v238_v60, %s414_s25 }
  0x1a   :  { %v262_v0 = vsel %vm32_vm1, %v396_v62, %v257_v61 }
  0x1b   :  { %v267_v1 = vsel %vm37_vm2, %v397_v63, %v262_v0 }
  0x1c   :  { %268 = vrot.lane.b32.xlu0 %v267_v1, %s414_s25 }
  0x77   :  { %v40_v2 = vpop.permute.xlu0 %39  }
  0x78   :  { %42 = vst.msk [vmem:[#allocation0] sm:$0x3] %vm41_vm4, %v40_v2   ;;  %44 = vst.msk [vmem:[#allocation0 + $0x6] sm:$0xc] %vm41_vm4, %v40_v2  }
  0x79   :  { %46 = vst.msk [vmem:[#allocation0 + $0xc] sm:$0x30] %vm41_vm4, %v40_v2   ;;  %48 = vst.msk [vmem:[#allocation0 + $0x12] sm:$0xc0] %vm41_vm4, %v40_v2  }
  0x7b   :  { %v97_v3 = vpop.permute.xlu1 %96  }
  0x7c   :  { %100 = vst.msk [vmem:[#allocation0 + $0x40] sm:$0x3] %vm41_vm4, %v97_v3   ;;  %102 = vst.msk [vmem:[#allocation0 + $0x46] sm:$0xc] %vm41_vm4, %v97_v3  }
  0x7d   :  { %104 = vst.msk [vmem:[#allocation0 + $0x4c] sm:$0x30] %vm41_vm4, %v97_v3   ;;  %106 = vst.msk [vmem:[#allocation0 + $0x52] sm:$0xc0] %vm41_vm4, %v97_v3   ;;  %v68_v4 = vpop.permute.xlu0 %67  }
  0x7e   :  { %71 = vst.msk [vmem:[#allocation0 + $0x20] sm:$0x3] %vm41_vm4, %v68_v4   ;;  %73 = vst.msk [vmem:[#allocation0 + $0x26] sm:$0xc] %vm41_vm4, %v68_v4  }
  0x7f   :  { %75 = vst.msk [vmem:[#allocation0 + $0x2c] sm:$0x30] %vm41_vm4, %v68_v4   ;;  %77 = vst.msk [vmem:[#allocation0 + $0x32] sm:$0xc0] %vm41_vm4, %v68_v4  }
  0x82   :  { %v126_v5 = vpop.permute.xlu1 %125  }
  0x83   :  { %128 = vst.msk [vmem:[#allocation0] sm:$0x3] %vm127_vm5, %v126_v5   ;;  %130 = vst.msk [vmem:[#allocation0 + $0x6] sm:$0xc] %vm127_vm5, %v126_v5   ;;  %v154_v6 = vpop.permute.xlu0 %153  }
  0x84   :  { %132 = vst.msk [vmem:[#allocation0 + $0xc] sm:$0x30] %vm127_vm5, %v126_v5   ;;  %134 = vst.msk [vmem:[#allocation0 + $0x12] sm:$0xc0] %vm127_vm5, %v126_v5  }
  0x85   :  { %157 = vst.msk [vmem:[#allocation0 + $0x20] sm:$0x3] %vm127_vm5, %v154_v6   ;;  %159 = vst.msk [vmem:[#allocation0 + $0x26] sm:$0xc] %vm127_vm5, %v154_v6  }
  0x86   :  { %161 = vst.msk [vmem:[#allocation0 + $0x2c] sm:$0x30] %vm127_vm5, %v154_v6   ;;  %163 = vst.msk [vmem:[#allocation0 + $0x32] sm:$0xc0] %vm127_vm5, %v154_v6   ;;  %v183_v7 = vpop.permute.xlu1 %182  }
  0x87   :  { %186 = vst.msk [vmem:[#allocation0 + $0x40] sm:$0x3] %vm127_vm5, %v183_v7   ;;  %188 = vst.msk [vmem:[#allocation0 + $0x46] sm:$0xc] %vm127_vm5, %v183_v7  }
  0x88   :  { %190 = vst.msk [vmem:[#allocation0 + $0x4c] sm:$0x30] %vm127_vm5, %v183_v7   ;;  %192 = vst.msk [vmem:[#allocation0 + $0x52] sm:$0xc0] %vm127_vm5, %v183_v7  }
  0x89   :  { %v212_v8 = vpop.permute.xlu0 %211  }
  0x8a   :  { %214 = vst.msk [vmem:[#allocation0] sm:$0x3] %vm213_vm6, %v212_v8   ;;  %216 = vst.msk [vmem:[#allocation0 + $0x6] sm:$0xc] %vm213_vm6, %v212_v8  }
  0x8b   :  { %218 = vst.msk [vmem:[#allocation0 + $0xc] sm:$0x30] %vm213_vm6, %v212_v8   ;;  %220 = vst.msk [vmem:[#allocation0 + $0x12] sm:$0xc0] %vm213_vm6, %v212_v8   ;;  %v240_v9 = vpop.permute.xlu1 %239  }
  0x8c   :  { %243 = vst.msk [vmem:[#allocation0 + $0x20] sm:$0x3] %vm213_vm6, %v240_v9   ;;  %245 = vst.msk [vmem:[#allocation0 + $0x26] sm:$0xc] %vm213_vm6, %v240_v9  }
  0x8d   :  { %247 = vst.msk [vmem:[#allocation0 + $0x2c] sm:$0x30] %vm213_vm6, %v240_v9   ;;  %249 = vst.msk [vmem:[#allocation0 + $0x32] sm:$0xc0] %vm213_vm6, %v240_v9  }
  0x8e   :  { %v269_v10 = vpop.permute.xlu0 %268  }
  0x8f   :  { %272 = vst.msk [vmem:[#allocation0 + $0x40] sm:$0x3] %vm213_vm6, %v269_v10   ;;  %274 = vst.msk [vmem:[#allocation0 + $0x46] sm:$0xc] %vm213_vm6, %v269_v10  }
  0x90   :  { %276 = vst.msk [vmem:[#allocation0 + $0x4c] sm:$0x30] %vm213_vm6, %v269_v10   ;;  %278 = vst.msk [vmem:[#allocation0 + $0x52] sm:$0xc0] %vm213_vm6, %v269_v10  }
  0x91   :  { %v282_v11 = vld [vmem:[#allocation0] sm:$0x3]  ;;  %v286_v12 = vld [vmem:[#allocation0 + $0x8] sm:$0x3] }
  0x92   :  { %v291_v13 = vld [vmem:[#allocation0 + $0x10] sm:$0x3]  ;;  %284 = vst [vmem:[%s639_s1] sm:$0x3] %v282_v11  ;;  %398 = vst [vmem:[%s639_s1 + $0x2] sm:$0x3] %v286_v12 }
  0x93   :  { %399 = vst [vmem:[%s639_s1 + $0x4] sm:$0x3] %v291_v13  ;;  %v297_v14 = vld [vmem:[#allocation0 + $0x18] sm:$0x3]  ;;  %v303_v15 = vld [vmem:[#allocation0 + $0x20] sm:$0x3] }
  0x94   :  { %400 = vst [vmem:[%s639_s1 + $0x6] sm:$0x3] %v297_v14  ;;  %v309_v16 = vld [vmem:[#allocation0 + $0x28] sm:$0x3]  ;;  %v315_v17 = vld [vmem:[#allocation0 + $0x30] sm:$0x3] }
  0x95   :  { %401 = vst [vmem:[%s639_s1 + $0x8] sm:$0x3] %v303_v15  ;;  %402 = vst [vmem:[%s639_s1 + $0xa] sm:$0x3] %v309_v16  ;;  %v321_v18 = vld [vmem:[#allocation0 + $0x38] sm:$0x3] }
  0x96   :  { %403 = vst [vmem:[%s639_s1 + $0xc] sm:$0x3] %v315_v17  ;;  %404 = vst [vmem:[%s639_s1 + $0xe] sm:$0x3] %v321_v18  ;;  %v327_v19 = vld [vmem:[#allocation0 + $0x40] sm:$0x3] }
  0x97   :  { %v333_v20 = vld [vmem:[#allocation0 + $0x48] sm:$0x3]  ;;  %v339_v21 = vld [vmem:[#allocation0 + $0x50] sm:$0x3]  ;;  %405 = vst [vmem:[%s639_s1 + $0x10] sm:$0x3] %v327_v19 }
  0x98   :  { %406 = vst [vmem:[%s639_s1 + $0x12] sm:$0x3] %v333_v20  ;;  %407 = vst [vmem:[%s639_s1 + $0x14] sm:$0x3] %v339_v21  ;;  %v345_v22 = vld [vmem:[#allocation0 + $0x58] sm:$0x3] }
  0x99   :  { %408 = vst [vmem:[%s639_s1 + $0x16] sm:$0x3] %v345_v22 }

// kernel: run.1
= control target key start
LH: loop header
LB: loop body
LE: loop exit
PB: predicated region body
PF: predicated region fallthrough
CT: control target
= control target key end

     0   :  { %s15718_s0 = inlined_call_operand.vmem [shape: s32[2,5], index: 0, kind: input, shape index: {}]   ;;  %s15719_s2 = inlined_call_operand.vmem [shape: bf16[2,80,128], index: 2, kind: input, shape index: {}]   ;;  %s15720_s3 = inlined_call_operand.vmem [shape: bf16[2,128,1536], index: 3, kind: input, shape index: {}]   ;;  %s15721_s4 = inlined_call_operand.vmem [shape: f32[2,3,512], index: 4, kind: input, shape index: {}]   ;;  %s15722_s5 = inlined_call_operand.vmem [shape: bf16[2,3,512,128], index: 5, kind: input, shape index: {}]   ;;  %s15723_s6 = inlined_call_operand.vmem [shape: f32[2,3,128], index: 6, kind: input, shape index: {}]   ;;  %s15724_s7 = inlined_call_operand.vmem [shape: f32[2,3,128], index: 7, kind: output, shape index: {}]   ;;  %s15725_s1 = inlined_call_operand.vmem [shape: s32[2,5], index: 1, kind: input, shape index: {}]  }
   0x1   :  { %s12_s26 = sshll.u32 %s15718_s0, 4  ;;  %s16_s29 = sshll.u32 %s15725_s1, 4  ;;  %s13_s26 = int_to_ptr.vmem [resolvable:$true] %s12_s26  ;;  %s17_s29 = int_to_ptr.vmem [resolvable:$true] %s16_s29 }
   0x2   :  { %s10717_s30 = scalar_lea.vmem %s13_s26, 32  ;;  %p10722_p1 = scmp.lt.s32.totalorder %s13_s26, %s13_s26 }
   0x3   :  { %p10718_p0 = scmp.ne.s32.totalorder %s13_s26, %s10717_s30  ;;  %p10723_p2 = scmp.lt.s32.totalorder %s10717_s30, %s10717_s30 }
   0x5   :  { %p10724_p3 = por %p10723_p2, %p10722_p1 }
   0x7   :  { %p10725_p4 = pnand %p10724_p3, %p10718_p0 }
   0x9   :  { %10728 = shalt.err (!%p10725_p4)  }
   0xa   :  { %s10751_s8 = smov [#allocation4]   ;;  %s10729_s9 = scalar_lea.vmem %s17_s29, 32 }
   0xb   :  { %15 = dma.vmem_to_smem %s13_s26, 32, %s10751_s8, [#allocation3] }
   0xc   :  { %p10730_p5 = scmp.ne.s32.totalorder %s17_s29, %s10729_s9  ;;  %p10734_p6 = scmp.lt.s32.totalorder %s17_s29, %s17_s29 }
   0xd   :  { %p10735_p7 = scmp.lt.s32.totalorder %s10729_s9, %s10729_s9 }
   0xf   :  { %p10736_p8 = por %p10735_p7, %p10734_p6 }
  0x11   :  { %p10737_p9 = pnand %p10736_p8, %p10730_p5 }
  0x13   :  { %10740 = shalt.err (!%p10737_p9)  }
  0x14   :  { %s10752_s0 = smov [#allocation5]  }
  0x15   :  { %19 = dma.vmem_to_smem %s17_s29, 32, %s10752_s0, [#allocation3] }
  0x16   :  { %10745 = dma.done.wait [#allocation3], 64 }
  0x17   :  { %10746 = vsyncadd [#allocation3], 4294967232 }
  0x18   :  { %21 = sfence }
  0x19   :  { %s10801_s1 = smov 0  }
  0x1a LB: > { %s10807_s10 = sadd.s32 4294967295, %s10749_s1   ;;  %p9269_p10 = scmp.ge.s32.totalorder %s10749_s1, 1  ;;  %s10749_s1 = sphi %s10801_s1, %s27_s1  }
  0x1b   : > { %p238_p11 = scmp.lt.s32.totalorder %s10749_s1, 3 }
  0x1d   : > { %p239_p12 = pnand %p9269_p10, %p238_p11 }
  0x1f   : > { %242 = sbr.rel (%p239_p12) target bundleno = 2474 (0x9aa), region = 40 }
  0x26   : > { %p284_p13 = scmp.lt.s32.totalorder %s10807_s10, 1  ;;  %v10753_v0 = vmov 0   ;;  %vm2043_vm0 = vcmask 1041409   ;;  %vm2045_vm1 = vcmask 1042434   ;;  %vm15941_vm2 = vcmask 1043459   ;;  %s11455_s27 = sshll.u32 %s10807_s10, 7 }
  0x27   : > { %961 = vmatprep.mubr.bf16.mxu0 %v10753_v0  ;;  %1044 = vmatprep.mubr.bf16.mxu1 %v10753_v0  ;;  %vm15940_vm3 = vcmask 1044484   ;;  %s11458_s28 = sld [smem:[#allocation4 + %s11455_s27]]  ;;  %s1559_s29 = sadd.s32 1, %s11455_s27 }
  0x28   : > { %s10815_s11 = scalar_select %p284_p13, %s10807_s10, 1 }
  0x29   : > { %s1566_s30 = sadd.s32 2, %s11455_s27  ;;  %s11481_s8 = sld [smem:[#allocation4 + %s1559_s29]] }
  0x2a   : > { %s10437_s12 = smul.u32 768, %s10815_s11  ;;  %s9812_s23 = sshll.u32 %s10815_s11, 4 }
  0x2b   : > { %s10436_s16 = smul.u32 40, %s10815_s11  ;;  %s11046_s26 = scalar_lea.vmem %s15721_s4, %s9812_s23 }
  0x2c   : > { %s10823_s15 = scalar_lea.vmem %s15720_s3, %s10437_s12  ;;  %s10924_s22 = scalar_lea.vmem %s15722_s5, %s10437_s12 }
  0x2d   : > { %v10450_v1 = vld [vmem:[%s10823_s15 + $0x4] ss:$48 sps:$4 sm:$0xff]   ;;  %v10452_v2 = vld [vmem:[%s10823_s15 + $0xc] ss:$48 sps:$4 sm:$0xff]   ;;  %v10454_v3 = vld [vmem:[%s10823_s15] ss:$48 sps:$4 sm:$0xff]   ;;  %s10854_s19 = scalar_lea.vmem %s15719_s2, %s10436_s16 }
  0x2e   : > { %929 = vmatprep.subr.bf16.mxu0 %v10450_v1  ;;  %v10455_v4 = vld [vmem:[%s10823_s15 + $0x8] ss:$48 sps:$4 sm:$0xff]   ;;  %1012 = vmatprep.subr.bf16.mxu1 %v10452_v2  ;;  %v10456_v5 = vld [vmem:[%s10823_s15 + $0x64] ss:$48 sps:$4 sm:$0xff]   ;;  %v10458_v6 = vld [vmem:[%s10823_s15 + $0x6c] ss:$48 sps:$4 sm:$0xff]  }
  0x2f   : > { %930 = vmatpush1.bf16.msra.mxu0 %v10454_v3  ;;  %1013 = vmatpush1.bf16.msra.mxu1 %v10455_v4  ;;  %v10460_v7 = vld [vmem:[%s10823_s15 + $0x60] ss:$48 sps:$4 sm:$0xff]   ;;  %v10461_v8 = vld [vmem:[%s10823_s15 + $0x68] ss:$48 sps:$4 sm:$0xff]   ;;  %v10462_v9 = vld [vmem:[%s10823_s15 + $0xc4] ss:$48 sps:$4 sm:$0xff]  }
  0x30   : > { %931 = vmatprep.subr.bf16.mxu0 %v10456_v5  ;;  %1014 = vmatprep.subr.bf16.mxu1 %v10458_v6  ;;  %v10464_v10 = vld [vmem:[%s10823_s15 + $0xcc] ss:$48 sps:$4 sm:$0xff]   ;;  %v10466_v11 = vld [vmem:[%s10823_s15 + $0xc0] ss:$48 sps:$4 sm:$0xff]   ;;  %v10467_v12 = vld [vmem:[%s10823_s15 + $0xc8] ss:$48 sps:$4 sm:$0xff]  }
  0x31   : > { %v10468_v13 = vld [vmem:[%s10823_s15 + $0x124] ss:$48 sps:$4 sm:$0xff]   ;;  %v10470_v14 = vld [vmem:[%s10823_s15 + $0x12c] ss:$48 sps:$4 sm:$0xff]   ;;  %v10472_v15 = vld [vmem:[%s10823_s15 + $0x120] ss:$48 sps:$4 sm:$0xff]  }
  0x32   : > { %v10473_v16 = vld [vmem:[%s10823_s15 + $0x128] ss:$48 sps:$4 sm:$0xff]   ;;  %v10474_v17 = vld [vmem:[%s10823_s15 + $0x184] ss:$48 sps:$4 sm:$0xff]   ;;  %v10476_v18 = vld [vmem:[%s10823_s15 + $0x18c] ss:$48 sps:$4 sm:$0xff]  }
  0x33   : > { %932 = vmatpush1.bf16.msra.mxu0 %v10460_v7  ;;  %1015 = vmatpush1.bf16.msra.mxu1 %v10461_v8  ;;  %v10478_v19 = vld [vmem:[%s10823_s15 + $0x180] ss:$48 sps:$4 sm:$0xff]   ;;  %v10479_v20 = vld [vmem:[%s10823_s15 + $0x188] ss:$48 sps:$4 sm:$0xff]   ;;  %v10480_v21 = vld [vmem:[%s10823_s15 + $0x1e4] ss:$48 sps:$4 sm:$0xff]  }
  0x34   : > { %933 = vmatprep.subr.bf16.mxu0 %v10462_v9  ;;  %1016 = vmatprep.subr.bf16.mxu1 %v10464_v10  ;;  %v10482_v22 = vld [vmem:[%s10823_s15 + $0x1ec] ss:$48 sps:$4 sm:$0xff]   ;;  %v10484_v23 = vld [vmem:[%s10823_s15 + $0x1e0] ss:$48 sps:$4 sm:$0xff]   ;;  %v10485_v24 = vld [vmem:[%s10823_s15 + $0x1e8] ss:$48 sps:$4 sm:$0xff]  }
  0x35   : > { %v10486_v25 = vld [vmem:[%s10823_s15 + $0x244] ss:$48 sps:$4 sm:$0xff]   ;;  %v10488_v26 = vld [vmem:[%s10823_s15 + $0x24c] ss:$48 sps:$4 sm:$0xff]   ;;  %v10490_v27 = vld [vmem:[%s10823_s15 + $0x240] ss:$48 sps:$4 sm:$0xff]  }
  0x36   : > { %v10491_v28 = vld [vmem:[%s10823_s15 + $0x248] ss:$48 sps:$4 sm:$0xff]   ;;  %v10492_v29 = vld [vmem:[%s10823_s15 + $0x2a4] ss:$48 sps:$4 sm:$0xff]   ;;  %v10494_v30 = vld [vmem:[%s10823_s15 + $0x2ac] ss:$48 sps:$4 sm:$0xff]  }
  0x37   : > { %934 = vmatpush1.bf16.msra.mxu0 %v10466_v11  ;;  %1017 = vmatpush1.bf16.msra.mxu1 %v10467_v12  ;;  %v10496_v31 = vld [vmem:[%s10823_s15 + $0x2a0] ss:$48 sps:$4 sm:$0xff]   ;;  %v10497_v32 = vld [vmem:[%s10823_s15 + $0x2a8] ss:$48 sps:$4 sm:$0xff]   ;;  %v10505_v33 = vld [vmem:[%s10823_s15 + $0x1c] ss:$48 sps:$4 sm:$0xff]  }
  0x38   : > { %935 = vmatprep.subr.bf16.mxu0 %v10468_v13  ;;  %1018 = vmatprep.subr.bf16.mxu1 %v10470_v14  ;;  %v10865_v34 = vld [vmem:[%s10854_s19] sm:$0xff]   ;;  %v10503_v35 = vld [vmem:[%s10823_s15 + $0x18] ss:$48 sps:$4 sm:$0xff]   ;;  %v10508_v36 = vld [vmem:[%s10823_s15 + $0x7c] ss:$48 sps:$4 sm:$0xff]   ;;  %s1573_s9 = sadd.s32 3, %s11455_s27 }
  0x39   : > { %v10506_v37 = vld [vmem:[%s10823_s15 + $0x78] ss:$48 sps:$4 sm:$0xff]   ;;  %v10511_v38 = vld [vmem:[%s10823_s15 + $0xdc] ss:$48 sps:$4 sm:$0xff]   ;;  %v10527_v39 = vld [vmem:[%s10823_s15 + $0x10] ss:$48 sps:$4 sm:$0xff]  }
  0x3a   : > { %v10529_v40 = vld [vmem:[%s10823_s15 + $0x14] ss:$48 sps:$4 sm:$0xff]   ;;  %v10878_v41 = vld [vmem:[%s10854_s19 + $0x8] sm:$0xff]   ;;  %v10530_v45 = vld [vmem:[%s10823_s15 + $0x70] ss:$48 sps:$4 sm:$0xff]   ;;  %s11491_s0 = sld [smem:[#allocation4 + %s1566_s30]] }
  0x3b   : > { %936 = vmatpush1.bf16.msra.mxu0 %v10472_v15  ;;  %1019 = vmatpush1.bf16.msra.mxu1 %v10473_v16  ;;  %v10532_v42 = vld [vmem:[%s10823_s15 + $0x74] ss:$48 sps:$4 sm:$0xff]   ;;  %v10509_v43 = vld [vmem:[%s10823_s15 + $0xd8] ss:$48 sps:$4 sm:$0xff]   ;;  %v10514_v44 = vld [vmem:[%s10823_s15 + $0x13c] ss:$48 sps:$4 sm:$0xff]  }
  0x3c   : > { %937 = vmatprep.subr.bf16.mxu0 %v10474_v17  ;;  %1020 = vmatprep.subr.bf16.mxu1 %v10476_v18  ;;  %v10535_v46 = vld [vmem:[%s10823_s15 + $0xd4] ss:$48 sps:$4 sm:$0xff]   ;;  %v10512_v47 = vld [vmem:[%s10823_s15 + $0x138] ss:$48 sps:$4 sm:$0xff]   ;;  %v10517_v48 = vld [vmem:[%s10823_s15 + $0x19c] ss:$48 sps:$4 sm:$0xff]  }
  0x3d   : > { %v10533_v49 = vld [vmem:[%s10823_s15 + $0xd0] ss:$48 sps:$4 sm:$0xff]   ;;  %v10538_v50 = vld [vmem:[%s10823_s15 + $0x134] ss:$48 sps:$4 sm:$0xff]   ;;  %v10515_v52 = vld [vmem:[%s10823_s15 + $0x198] ss:$48 sps:$4 sm:$0xff]  }
  0x3e   : > { %v10894_v51 = vld [vmem:[%s10854_s19 + $0x10] sm:$0xff]   ;;  %v10520_v53 = vld [vmem:[%s10823_s15 + $0x1fc] ss:$48 sps:$4 sm:$0xff]   ;;  %v10518_v56 = vld [vmem:[%s10823_s15 + $0x1f8] ss:$48 sps:$4 sm:$0xff]   ;;  %s1580_s10 = sadd.s32 4, %s11455_s27 }
  0x3f   : > { %938 = vmatpush1.bf16.msra.mxu0 %v10478_v19  ;;  %1021 = vmatpush1.bf16.msra.mxu1 %v10479_v20  ;;  %v10536_v54 = vld [vmem:[%s10823_s15 + $0x130] ss:$48 sps:$4 sm:$0xff]   ;;  %v10541_v55 = vld [vmem:[%s10823_s15 + $0x194] ss:$48 sps:$4 sm:$0xff]   ;;  %v10523_v57 = vld [vmem:[%s10823_s15 + $0x25c] ss:$48 sps:$4 sm:$0xff]  }
  0x40   : > { %939 = vmatprep.subr.bf16.mxu0 %v10480_v21  ;;  %1022 = vmatprep.subr.bf16.mxu1 %v10482_v22  ;;  %v10539_v58 = vld [vmem:[%s10823_s15 + $0x190] ss:$48 sps:$4 sm:$0xff]   ;;  %v10544_v59 = vld [vmem:[%s10823_s15 + $0x1f4] ss:$48 sps:$4 sm:$0xff]   ;;  %v10909_v60 = vld [vmem:[%s10854_s19 + $0x18] sm:$0xff]   ;;  %s11506_s12 = sld [smem:[#allocation4 + %s1573_s9]] }
  0x41   : > { %v10521_v61 = vld [vmem:[%s10823_s15 + $0x258] ss:$48 sps:$4 sm:$0xff]   ;;  %v10542_v62 = vld [vmem:[%s10823_s15 + $0x1f0] ss:$48 sps:$4 sm:$0xff]   ;;  %v10526_v63 = vld [vmem:[%s10823_s15 + $0x2bc] ss:$48 sps:$4 sm:$0xff]  }
  0x42   : > { %v10547_v1 = vld [vmem:[%s10823_s15 + $0x254] ss:$48 sps:$4 sm:$0xff]   ;;  %v10524_v2 = vld [vmem:[%s10823_s15 + $0x2b8] ss:$48 sps:$4 sm:$0xff]   ;;  %v10545_v3 = vld [vmem:[%s10823_s15 + $0x250] ss:$48 sps:$4 sm:$0xff]  }
  0x43   : > { %940 = vmatpush1.bf16.msra.mxu0 %v10484_v23  ;;  %1023 = vmatpush1.bf16.msra.mxu1 %v10485_v24  ;;  %v10550_v4 = vld [vmem:[%s10823_s15 + $0x2b4] ss:$48 sps:$4 sm:$0xff]   ;;  %v10556_v5 = vld [vmem:[%s10823_s15 + $0x2c] ss:$48 sps:$4 sm:$0xff]   ;;  %v10548_v7 = vld [vmem:[%s10823_s15 + $0x2b0] ss:$48 sps:$4 sm:$0xff]  }
  0x44   : > { %941 = vmatprep.subr.bf16.mxu0 %v10486_v25  ;;  %1024 = vmatprep.subr.bf16.mxu1 %v10488_v26  ;;  %v10931_v6 = vld [vmem:[%s10854_s19 + $0x20] sm:$0xff]   ;;  %v10554_v10 = vld [vmem:[%s10823_s15 + $0x28] ss:$48 sps:$4 sm:$0xff]   ;;  %v10562_v12 = vld [vmem:[%s10823_s15 + $0x8c] ss:$48 sps:$4 sm:$0xff]   ;;  %s11512_s13 = sld [smem:[#allocation4 + %s1580_s10]] }
  0x45   : > { %v10553_v8 = vld [vmem:[%s10823_s15 + $0x24] ss:$48 sps:$4 sm:$0xff]   ;;  %v10551_v9 = vld [vmem:[%s10823_s15 + $0x20] ss:$48 sps:$4 sm:$0xff]   ;;  %v10560_v14 = vld [vmem:[%s10823_s15 + $0x88] ss:$48 sps:$4 sm:$0xff]  }
  0x46   : > { %v10559_v11 = vld [vmem:[%s10823_s15 + $0x84] ss:$48 sps:$4 sm:$0xff]   ;;  %v10557_v13 = vld [vmem:[%s10823_s15 + $0x80] ss:$48 sps:$4 sm:$0xff]   ;;  %v10566_v17 = vld [vmem:[%s10823_s15 + $0xe8] ss:$48 sps:$4 sm:$0xff]  }
  0x47   : > { %942 = vmatpush1.bf16.msra.mxu0 %v10490_v27  ;;  %1025 = vmatpush1.bf16.msra.mxu1 %v10491_v28  ;;  %v10565_v15 = vld [vmem:[%s10823_s15 + $0xe4] ss:$48 sps:$4 sm:$0xff]   ;;  %v10563_v16 = vld [vmem:[%s10823_s15 + $0xe0] ss:$48 sps:$4 sm:$0xff]   ;;  %v10568_v18 = vld [vmem:[%s10823_s15 + $0xec] ss:$48 sps:$4 sm:$0xff]  }
  0x48   : > { %943 = vmatprep.subr.bf16.mxu0 %v10492_v29  ;;  %1026 = vmatprep.subr.bf16.mxu1 %v10494_v30  ;;  %v10571_v19 = vld [vmem:[%s10823_s15 + $0x144] ss:$48 sps:$4 sm:$0xff]   ;;  %v10574_v20 = vld [vmem:[%s10823_s15 + $0x14c] ss:$48 sps:$4 sm:$0xff]   ;;  %v10569_v21 = vld [vmem:[%s10823_s15 + $0x140] ss:$48 sps:$4 sm:$0xff]  }
  0x49   : > { %v10572_v22 = vld [vmem:[%s10823_s15 + $0x148] ss:$48 sps:$4 sm:$0xff]   ;;  %v10577_v23 = vld [vmem:[%s10823_s15 + $0x1a4] ss:$48 sps:$4 sm:$0xff]   ;;  %v10580_v24 = vld [vmem:[%s10823_s15 + $0x1ac] ss:$48 sps:$4 sm:$0xff]  }
  0x4a   : > { %v10575_v25 = vld [vmem:[%s10823_s15 + $0x1a0] ss:$48 sps:$4 sm:$0xff]   ;;  %v10578_v26 = vld [vmem:[%s10823_s15 + $0x1a8] ss:$48 sps:$4 sm:$0xff]   ;;  %v10583_v27 = vld [vmem:[%s10823_s15 + $0x204] ss:$48 sps:$4 sm:$0xff]  }
  0x4b   : > { %944 = vmatpush1.bf16.msra.mxu0 %v10496_v31  ;;  %1027 = vmatpush1.bf16.msra.mxu1 %v10497_v32  ;;  %v10586_v28 = vld [vmem:[%s10823_s15 + $0x20c] ss:$48 sps:$4 sm:$0xff]   ;;  %v10581_v29 = vld [vmem:[%s10823_s15 + $0x200] ss:$48 sps:$4 sm:$0xff]   ;;  %v10584_v30 = vld [vmem:[%s10823_s15 + $0x208] ss:$48 sps:$4 sm:$0xff]  }
  0x4c   : > { %1178 = vmatprep.subr.bf16.mxu1 %v10505_v33  ;;  %1095 = vmatprep.subr.bf16.mxu0 %v10529_v40  ;;  %v10589_v31 = vld [vmem:[%s10823_s15 + $0x264] ss:$48 sps:$4 sm:$0xff]   ;;  %v10592_v32 = vld [vmem:[%s10823_s15 + $0x26c] ss:$48 sps:$4 sm:$0xff]   ;;  %v10587_v33 = vld [vmem:[%s10823_s15 + $0x260] ss:$48 sps:$4 sm:$0xff]  }
  0x4d   : > { %v10600_v40 = vld [vmem:[%s10924_s22 + $0xc0] sm:$0xff]   ;;  %s9275_s14 = sshll.u32 %s10815_s11, 2  ;;  %s1586_s18 = sld [smem:[#allocation5 + %s11455_s27]] }
  0x4e   : > { %962 = vmatmul.mubr.bf16.vlgmr.msra.gmra.mrb[0].mxu0 %v10865_v34  ;;  %1045 = vmatmul.mubr.bf16.vlgmr.msra.gmra.mrb[0].mxu1 %v10865_v34  ;;  %s12274_s17 = scalar_lea.vmem %s15723_s6, %s9275_s14  ;;  %s1591_s19 = sld [smem:[#allocation5 + %s1559_s29]] }
  0x4f   : > { %971 = vmatprep.mubr.bf16.mxu0 %v10753_v0  ;;  %1054 = vmatprep.mubr.bf16.mxu1 %v10753_v0  ;;  %s1596_s20 = sld [smem:[#allocation5 + %s1566_s30]]  ;;  %s311_s25 = scalar_lea.vmem %s15724_s7, %s9275_s14 }
  0x50   : > { %1179 = vmatpush1.bf16.msra.mxu1 %v10503_v35  ;;  %1096 = vmatpush1.bf16.msra.mxu0 %v10527_v39  ;;  %v10590_v35 = vld [vmem:[%s10823_s15 + $0x268] ss:$48 sps:$4 sm:$0xff]   ;;  %s1601_s21 = sld [smem:[#allocation5 + %s1573_s9]] }
  0x51   : > { %1180 = vmatprep.subr.bf16.mxu1 %v10508_v36  ;;  %1097 = vmatprep.subr.bf16.mxu0 %v10532_v42  ;;  %v10595_v36 = vld [vmem:[%s10823_s15 + $0x2c4] ss:$48 sps:$4 sm:$0xff]   ;;  %v10596_v39 = vld [vmem:[%s10823_s15 + $0x2c8] ss:$48 sps:$4 sm:$0xff]  }
  0x52   : > { %v10601_v42 = vld [vmem:[%s10924_s22] sm:$0xff]  }
  0x54   : > { %1181 = vmatpush1.bf16.msra.mxu1 %v10506_v37  ;;  %1098 = vmatpush1.bf16.msra.mxu0 %v10530_v45  ;;  %v10598_v37 = vld [vmem:[%s10823_s15 + $0x2cc] ss:$48 sps:$4 sm:$0xff]  }
  0x55   : > { %1182 = vmatprep.subr.bf16.mxu1 %v10511_v38  ;;  %1099 = vmatprep.subr.bf16.mxu0 %v10535_v46  ;;  %v10593_v38 = vld [vmem:[%s10823_s15 + $0x2c0] ss:$48 sps:$4 sm:$0xff]   ;;  %v10605_v45 = vld [vmem:[%s10924_s22 + $0x8] sm:$0xff]  }
  0x56   : > { %972 = vmatmul.mubr.bf16.gmra.mrb[4].mxu0 %v10878_v41  ;;  %1055 = vmatmul.mubr.bf16.gmra.mrb[4].mxu1 %v10878_v41  ;;  %v10606_v46 = vld [vmem:[%s10924_s22 + $0x88] sm:$0xff]  }
  0x57   : > { %981 = vmatprep.mubr.bf16.mxu0 %v10753_v0  ;;  %1064 = vmatprep.mubr.bf16.mxu1 %v10753_v0 }
  0x58   : > { %1183 = vmatpush1.bf16.msra.mxu1 %v10509_v43  ;;  %1100 = vmatpush1.bf16.msra.mxu0 %v10533_v49  ;;  %v10603_v43 = vld [vmem:[%s10924_s22 + $0x48] sm:$0xff]   ;;  %v10609_v49 = vld [vmem:[%s10924_s22 + $0x10] sm:$0xff]  }
  0x59   : > { %1184 = vmatprep.subr.bf16.mxu1 %v10514_v44  ;;  %1101 = vmatprep.subr.bf16.mxu0 %v10538_v50  ;;  %v10604_v44 = vld [vmem:[%s10924_s22 + $0xc8] sm:$0xff]   ;;  %v10610_v50 = vld [vmem:[%s10924_s22 + $0x90] sm:$0xff]  }
  0x5c   : > { %1185 = vmatpush1.bf16.msra.mxu1 %v10512_v47  ;;  %1102 = vmatpush1.bf16.msra.mxu0 %v10536_v54  ;;  %v10607_v47 = vld [vmem:[%s10924_s22 + $0x50] sm:$0xff]   ;;  %v10615_v54 = vld [vmem:[%s10924_s22 + $0x60] sm:$0xff]  }
  0x5d   : > { %1186 = vmatprep.subr.bf16.mxu1 %v10517_v48  ;;  %1103 = vmatprep.subr.bf16.mxu0 %v10541_v55  ;;  %v10608_v48 = vld [vmem:[%s10924_s22 + $0xd0] sm:$0xff]   ;;  %v10616_v55 = vld [vmem:[%s10924_s22 + $0xe0] sm:$0xff]  }
  0x5e   : > { %982 = vmatmul.mubr.bf16.gmra.mrb[8].mxu0 %v10894_v51  ;;  %1065 = vmatmul.mubr.bf16.gmra.mrb[8].mxu1 %v10894_v51 }
  0x5f   : > { %991 = vmatprep.mubr.bf16.mxu0 %v10753_v0  ;;  %1074 = vmatprep.mubr.bf16.mxu1 %v10753_v0 }
  0x60   : > { %1187 = vmatpush1.bf16.msra.mxu1 %v10515_v52  ;;  %1104 = vmatpush1.bf16.msra.mxu0 %v10539_v58  ;;  %v10613_v52 = vld [vmem:[%s10924_s22 + $0x18] sm:$0xff]   ;;  %v10619_v58 = vld [vmem:[%s10924_s22 + $0x68] sm:$0xff]  }
  0x61   : > { %1188 = vmatprep.subr.bf16.mxu1 %v10520_v53  ;;  %1105 = vmatprep.subr.bf16.mxu0 %v10544_v59  ;;  %v10614_v53 = vld [vmem:[%s10924_s22 + $0x98] sm:$0xff]   ;;  %v10620_v59 = vld [vmem:[%s10924_s22 + $0xe8] sm:$0xff]  }
  0x64   : > { %1189 = vmatpush1.bf16.msra.mxu1 %v10518_v56  ;;  %1106 = vmatpush1.bf16.msra.mxu0 %v10542_v62  ;;  %v10617_v56 = vld [vmem:[%s10924_s22 + $0x20] sm:$0xff]   ;;  %v10623_v62 = vld [vmem:[%s10924_s22 + $0xf0] sm:$0xff]  }
  0x65   : > { %1190 = vmatprep.subr.bf16.mxu1 %v10523_v57  ;;  %1107 = vmatprep.subr.bf16.mxu0 %v10547_v1  ;;  %v10618_v57 = vld [vmem:[%s10924_s22 + $0xa0] sm:$0xff]   ;;  %v10625_v1 = vld [vmem:[%s10924_s22 + $0x30] sm:$0xff]  }
  0x66   : > { %992 = vmatmul.mubr.bf16.gmra.mrb[12].mxu0 %v10909_v60  ;;  %1075 = vmatmul.mubr.bf16.gmra.mrb[12].mxu1 %v10909_v60 }
  0x67   : > { %1001 = vmatprep.mubr.bf16.mxu0 %v10753_v0  ;;  %1084 = vmatprep.mubr.bf16.mxu1 %v10753_v0 }
  0x68   : > { %1191 = vmatpush1.bf16.msra.mxu1 %v10521_v61  ;;  %1108 = vmatpush1.bf16.msra.mxu0 %v10545_v3  ;;  %v10622_v61 = vld [vmem:[%s10924_s22 + $0xa8] sm:$0xff]   ;;  %v10627_v3 = vld [vmem:[%s10924_s22 + $0x78] sm:$0xff]  }
  0x69   : > { %1192 = vmatprep.subr.bf16.mxu1 %v10526_v63  ;;  %1109 = vmatprep.subr.bf16.mxu0 %v10550_v4  ;;  %v10624_v63 = vld [vmem:[%s10924_s22 + $0x70] sm:$0xff]   ;;  %v10628_v4 = vld [vmem:[%s10924_s22 + $0xf8] sm:$0xff]  }
  0x6c   : > { %1193 = vmatpush1.bf16.msra.mxu1 %v10524_v2  ;;  %1110 = vmatpush1.bf16.msra.mxu0 %v10548_v7  ;;  %v10626_v2 = vld [vmem:[%s10924_s22 + $0xb0] sm:$0xff]   ;;  %v15726_v7 = vlaneseq }
  0x6d   : > { %1344 = vmatprep.subr.bf16.mxu1 %v10556_v5  ;;  %1261 = vmatprep.subr.bf16.mxu0 %v10553_v8  ;;  %v10629_v5 = vld [vmem:[%s10924_s22 + $0x38] sm:$0xff]  }
  0x6e   : > { %1002 = vmatmul.mubr.bf16.gmra.mrb[16].mxu0 %v10931_v6  ;;  %1085 = vmatmul.mubr.bf16.gmra.mrb[16].mxu1 %v10931_v6  ;;  %v11041_v8 = vshrl.u32 %v15726_v7, 7 }
  0x6f   : > { %1210 = vmatprep.mubr.bf16.mxu1 %v10753_v0  ;;  %1127 = vmatprep.mubr.bf16.mxu0 %v10753_v0 }
  0x70   : > { %16065 = vst [vmem:[#allocation7_spill] sm:$0xff] %v11041_v8 }
  0x76   : > { %1211 = vmatmul.mubr.bf16.vlgmr.msra.gmra.mrb[20].mxu1 %v10865_v34  ;;  %1128 = vmatmul.mubr.bf16.vlgmr.msra.gmra.mrb[20].mxu0 %v10865_v34 }
  0x77   : > { %1220 = vmatprep.mubr.bf16.mxu1 %v10753_v0  ;;  %1137 = vmatprep.mubr.bf16.mxu0 %v10753_v0 }
  0x78   : > { %1262 = vmatpush1.bf16.msra.mxu0 %v10551_v9  ;;  %1345 = vmatpush1.bf16.msra.mxu1 %v10554_v10  ;;  %v11049_v9 = vsub.s32 0, %v11041_v8  ;;  %v11052_v10 = vsub.s32 2, %v11041_v8 }
  0x79   : > { %1263 = vmatprep.subr.bf16.mxu0 %v10559_v11  ;;  %1346 = vmatprep.subr.bf16.mxu1 %v10562_v12  ;;  %v1651_v11 = vld [vmem:[%s11046_s26] ss:$4 sm:$0xf]  ;;  %v11056_v12 = vsub.s32 1, %v11041_v8 }
  0x7a   : > { %16066 = vst [vmem:[#allocation8_spill] sm:$0xff] %v11049_v9  ;;  %16067 = vst [vmem:[#allocation9_spill] sm:$0xff] %v11052_v10 }
  0x7b   : > { %16068 = vst [vmem:[#allocation10_spill] sm:$0xff] %v11056_v12 }
  0x7c   : > { %1264 = vmatpush1.bf16.msra.mxu0 %v10557_v13  ;;  %1347 = vmatpush1.bf16.msra.mxu1 %v10560_v14  ;;  %v11059_v13 = vsub.s32 3, %v11041_v8  ;;  %v11062_v14 = vrot.slane %v1651_v11, %v11049_v9 }
  0x7d   : > { %1265 = vmatprep.subr.bf16.mxu0 %v10565_v15  ;;  %1348 = vmatprep.subr.bf16.mxu1 %v10568_v18  ;;  %v11065_v15 = vrot.slane %v1651_v11, %v11052_v10 }
  0x7e   : > { %1221 = vmatmul.mubr.bf16.gmra.mrb[24].mxu1 %v10878_v41  ;;  %1138 = vmatmul.mubr.bf16.gmra.mrb[24].mxu0 %v10878_v41  ;;  %16069 = vst [vmem:[#allocation11_spill] sm:$0xff] %v11059_v13 }
  0x7f   : > { %1230 = vmatprep.mubr.bf16.mxu1 %v10753_v0  ;;  %1147 = vmatprep.mubr.bf16.mxu0 %v10753_v0 }
  0x80   : > { %1266 = vmatpush1.bf16.msra.mxu0 %v10563_v16  ;;  %1349 = vmatpush1.bf16.msra.mxu1 %v10566_v17  ;;  %v11068_v16 = vrot.slane %v1651_v11, %v11056_v12  ;;  %v11071_v17 = vrot.slane %v1651_v11, %v11059_v13 }
  0x81   : > { %1267 = vmatprep.subr.bf16.mxu0 %v10571_v19  ;;  %1350 = vmatprep.subr.bf16.mxu1 %v10574_v20 }
  0x84   : > { %1268 = vmatpush1.bf16.msra.mxu0 %v10569_v21  ;;  %1351 = vmatpush1.bf16.msra.mxu1 %v10572_v22 }
  0x85   : > { %1269 = vmatprep.subr.bf16.mxu0 %v10577_v23  ;;  %1352 = vmatprep.subr.bf16.mxu1 %v10580_v24 }
  0x86   : > { %1231 = vmatmul.mubr.bf16.gmra.mrb[28].mxu1 %v10894_v51  ;;  %1148 = vmatmul.mubr.bf16.gmra.mrb[28].mxu0 %v10894_v51 }
  0x87   : > { %1240 = vmatprep.mubr.bf16.mxu1 %v10753_v0  ;;  %1157 = vmatprep.mubr.bf16.mxu0 %v10753_v0 }
  0x88   : > { %1270 = vmatpush1.bf16.msra.mxu0 %v10575_v25  ;;  %1353 = vmatpush1.bf16.msra.mxu1 %v10578_v26 }
  0x89   : > { %1271 = vmatprep.subr.bf16.mxu0 %v10583_v27  ;;  %1354 = vmatprep.subr.bf16.mxu1 %v10586_v28 }
  0x8c   : > { %1272 = vmatpush1.bf16.msra.mxu0 %v10581_v29  ;;  %1355 = vmatpush1.bf16.msra.mxu1 %v10584_v30 }
  0x8d   : > { %1273 = vmatprep.subr.bf16.mxu0 %v10589_v31  ;;  %1356 = vmatprep.subr.bf16.mxu1 %v10592_v32 }
  0x8e   : > { %1241 = vmatmul.mubr.bf16.gmra.mrb[32].mxu1 %v10909_v60  ;;  %1158 = vmatmul.mubr.bf16.gmra.mrb[32].mxu0 %v10909_v60 }
  0x8f   : > { %1250 = vmatprep.mubr.bf16.mxu1 %v10753_v0  ;;  %1167 = vmatprep.mubr.bf16.mxu0 %v10753_v0 }
  0x90   : > { %1274 = vmatpush1.bf16.msra.mxu0 %v10587_v33  ;;  %1357 = vmatpush1.bf16.msra.mxu1 %v10590_v35 }
  0x91   : > { %1275 = vmatprep.subr.bf16.mxu0 %v10595_v36  ;;  %1358 = vmatprep.subr.bf16.mxu1 %v10598_v37 }
  0x94   : > { %1276 = vmatpush1.bf16.msra.mxu0 %v10593_v38  ;;  %1359 = vmatpush1.bf16.msra.mxu1 %v10596_v39 }
  0x95   : > { %9835 = vmatprep.subr.bf16.mxu1 %v10600_v40 }
  0x96   : > { %1251 = vmatmul.mubr.bf16.gmra.mrb[36].mxu1 %v10931_v6  ;;  %1168 = vmatmul.mubr.bf16.gmra.mrb[36].mxu0 %v10931_v6 }
  0x97   : > { %1293 = vmatprep.mubr.bf16.mxu0 %v10753_v0  ;;  %1376 = vmatprep.mubr.bf16.mxu1 %v10753_v0 }
  0x9e   : > { %1294 = vmatmul.mubr.bf16.vlgmr.msra.gmra.mrb[40].mxu0 %v10865_v34  ;;  %1377 = vmatmul.mubr.bf16.vlgmr.msra.gmra.mrb[40].mxu1 %v10865_v34  ;;  %v10599_v34 = vld [vmem:[%s10924_s22 + $0x40] sm:$0xff]  }
  0x9f   : > { %1303 = vmatprep.mubr.bf16.mxu0 %v10753_v0  ;;  %1386 = vmatprep.mubr.bf16.mxu1 %v10753_v0 }
  0xa0   : > { %9813 = vmatprep.subr.bf16.mxu0 %v10599_v34 }
  0xa1   : > { %9814 = vmatpush3.bf16.msra.mxu0 %v10601_v42 }
  0xa2   : > { %9815 = vmatprep.subr.bf16.mxu0 %v10603_v43 }
  0xa5   : > { %9816 = vmatpush3.bf16.msra.mxu0 %v10605_v45 }
  0xa6   : > { %1304 = vmatmul.mubr.bf16.gmra.mrb[44].mxu0 %v10878_v41  ;;  %1387 = vmatmul.mubr.bf16.gmra.mrb[44].mxu1 %v10878_v41  ;;  %v10602_v41 = vld [vmem:[%s10924_s22 + $0x80] sm:$0xff]  }
  0xa7   : > { %1313 = vmatprep.mubr.bf16.mxu0 %v10753_v0  ;;  %1396 = vmatprep.mubr.bf16.mxu1 %v10753_v0 }
  0xa8   : > { %9836 = vmatpush3.bf16.msra.mxu1 %v10602_v41  ;;  %9817 = vmatprep.subr.bf16.mxu0 %v10607_v47 }
  0xa9   : > { %9837 = vmatprep.subr.bf16.mxu1 %v10604_v44  ;;  %9818 = vmatpush3.bf16.msra.mxu0 %v10609_v49 }
  0xac   : > { %9838 = vmatpush3.bf16.msra.mxu1 %v10606_v46 }
  0xad   : > { %9839 = vmatprep.subr.bf16.mxu1 %v10608_v48 }
  0xae   : > { %1314 = vmatmul.mubr.bf16.gmra.mrb[48].mxu0 %v10894_v51  ;;  %1397 = vmatmul.mubr.bf16.gmra.mrb[48].mxu1 %v10894_v51  ;;  %v10612_v51 = vld [vmem:[%s10924_s22 + $0xd8] sm:$0xff]  }
  0xaf   : > { %1323 = vmatprep.mubr.bf16.mxu0 %v10753_v0  ;;  %1406 = vmatprep.mubr.bf16.mxu1 %v10753_v0 }
  0xb0   : > { %9840 = vmatpush3.bf16.msra.mxu1 %v10610_v50 }
  0xb1   : > { %9841 = vmatprep.subr.bf16.mxu1 %v10612_v51 }
  0xb4   : > { %9842 = vmatpush3.bf16.msra.mxu1 %v10614_v53 }
  0xb5   : > { %9843 = vmatprep.subr.bf16.mxu1 %v10616_v55 }
  0xb6   : > { %1324 = vmatmul.mubr.bf16.gmra.mrb[52].mxu0 %v10909_v60  ;;  %1407 = vmatmul.mubr.bf16.gmra.mrb[52].mxu1 %v10909_v60  ;;  %v10621_v60 = vld [vmem:[%s10924_s22 + $0x28] sm:$0xff]  }
  0xb7   : > { %1333 = vmatprep.mubr.bf16.mxu0 %v10753_v0  ;;  %1416 = vmatprep.mubr.bf16.mxu1 %v10753_v0  ;;  %v10611_v0 = vld [vmem:[%s10924_s22 + $0x58] sm:$0xff]  }
  0xb8   : > { %9819 = vmatprep.subr.bf16.mxu0 %v10611_v0  ;;  %9844 = vmatpush3.bf16.msra.mxu1 %v10618_v57 }
  0xb9   : > { %9820 = vmatpush3.bf16.msra.mxu0 %v10613_v52  ;;  %9845 = vmatprep.subr.bf16.mxu1 %v10620_v59 }
  0xba   : > { %9821 = vmatprep.subr.bf16.mxu0 %v10615_v54 }
  0xbc   : > { %9846 = vmatpush3.bf16.msra.mxu1 %v10622_v61 }
  0xbd   : > { %9822 = vmatpush3.bf16.msra.mxu0 %v10617_v56  ;;  %9847 = vmatprep.subr.bf16.mxu1 %v10623_v62 }
  0xbe   : > { %1417 = vmatmul.mubr.bf16.gmra.mrb[56].mxu1 %v10931_v6  ;;  %1334 = vmatmul.mubr.bf16.gmra.mrb[56].mxu0 %v10931_v6  ;;  %v10630_v6 = vld [vmem:[%s10924_s22 + $0xb8] sm:$0xff]  }
  0xbf   : > { %9823 = vmatprep.subr.bf16.mxu0 %v10619_v58 }
  0xc0   : > { %9848 = vmatpush3.bf16.msra.mxu1 %v10626_v2 }
  0xc1   : > { %9824 = vmatpush3.bf16.msra.mxu0 %v10621_v60  ;;  %9849 = vmatprep.subr.bf16.mxu1 %v10628_v4 }
  0xc2   : > { %9825 = vmatprep.subr.bf16.mxu0 %v10624_v63 }
  0xc4   : > { %9850 = vmatpush3.bf16.msra.mxu1 %v10630_v6 }
  0xc5   : > { %9826 = vmatpush3.bf16.msra.mxu0 %v10625_v1 }
  0xc6   : > { %9827 = vmatprep.subr.bf16.mxu0 %v10627_v3 }
  0xc9   : > { %9828 = vmatpush3.bf16.msra.mxu0 %v10629_v5 }
 0x121   : > { %v963_v18 = vpop.f32.mrb[0].mxu0  ;;  %v1046_v19 = vpop.f32.mrb[0].mxu1 }
 0x122   : > { %v1673_v20 = vadd.f32 %v11062_v14, %v963_v18  ;;  %v965_v21 = vpop.f32.mrb[1].mxu0  ;;  %v1675_v22 = vadd.f32 %v11065_v15, %v1046_v19  ;;  %v1048_v23 = vpop.f32.mrb[1].mxu1 }
 0x123   : > { %v1674_v24 = vadd.f32 %v11068_v16, %v965_v21  ;;  %v967_v25 = vpop.f32.mrb[2].mxu0  ;;  %v1676_v26 = vadd.f32 %v11071_v17, %v1048_v23  ;;  %v1050_v27 = vpop.f32.mrb[2].mxu1 }
 0x124   : > { %v1677_v28 = vadd.f32 %v11062_v14, %v967_v25  ;;  %v969_v29 = vpop.f32.mrb[3].mxu0  ;;  %v1715_v30 = vmax.f32 %v1675_v22, 0.0  ;;  %v1679_v31 = vadd.f32 %v11065_v15, %v1050_v27  ;;  %v1052_v32 = vpop.f32.mrb[3].mxu1  ;;  %v1713_v37 = vmax.f32 %v1673_v20, 0.0 }
 0x125   : > { %v1678_v33 = vadd.f32 %v11068_v16, %v969_v29  ;;  %v1716_v35 = vmax.f32 %v1676_v26, 0.0  ;;  %v1680_v36 = vadd.f32 %v11071_v17, %v1052_v32  ;;  %v1714_v34 = vmax.f32 %v1674_v24, 0.0 }
 0x126   : > { %v1717_v38 = vmax.f32 %v1677_v28, 0.0  ;;  %v1719_v39 = vmax.f32 %v1679_v31, 0.0 }
 0x127   : > { %v1718_v40 = vmax.f32 %v1678_v33, 0.0  ;;  %v1720_v42 = vmax.f32 %v1680_v36, 0.0 }
 0x128   : > { %v1753_v41 = vadd.f32 %v1717_v38, %v1713_v37  ;;  %v1767_v43 = vadd.f32 %v1719_v39, %v1715_v30 }
 0x129   : > { %v1760_v44 = vadd.f32 %v1718_v40, %v1714_v34  ;;  %v973_v45 = vpop.f32.mrb[4].mxu0  ;;  %v1774_v46 = vadd.f32 %v1720_v42, %v1716_v35  ;;  %v1056_v47 = vpop.f32.mrb[4].mxu1 }
 0x12a   : > { %v1754_v48 = vrot.slane %v1753_v41, 4  ;;  %v1681_v49 = vadd.f32 %v11062_v14, %v973_v45  ;;  %v975_v50 = vpop.f32.mrb[5].mxu0  ;;  %v1768_v0 = vrot.slane %v1767_v43, 4  ;;  %v1058_v51 = vpop.f32.mrb[5].mxu1 }
 0x12b   : > { %v1761_v52 = vrot.slane %v1760_v44, 4  ;;  %v1682_v53 = vadd.f32 %v11068_v16, %v975_v50  ;;  %v977_v54 = vpop.f32.mrb[6].mxu0  ;;  %v1775_v55 = vrot.slane %v1774_v46, 4  ;;  %v1060_v56 = vpop.f32.mrb[6].mxu1  ;;  %v1684_v45 = vadd.f32 %v11071_v17, %v1058_v51 }
 0x12c   : > { %v1755_v57 = vadd.f32 %v1754_v48, %v1753_v41  ;;  %v1685_v58 = vadd.f32 %v11062_v14, %v977_v54  ;;  %v979_v59 = vpop.f32.mrb[7].mxu0  ;;  %v1769_v60 = vadd.f32 %v1768_v0, %v1767_v43  ;;  %v1062_v61 = vpop.f32.mrb[7].mxu1  ;;  %v1721_v3 = vmax.f32 %v1681_v49, 0.0 }
 0x12d   : > { %v1762_v62 = vadd.f32 %v1761_v52, %v1760_v44  ;;  %v1686_v63 = vadd.f32 %v11068_v16, %v979_v59  ;;  %v1776_v1 = vadd.f32 %v1775_v55, %v1774_v46  ;;  %v1722_v11 = vmax.f32 %v1682_v53, 0.0 }
 0x12e   : > { %v1756_v2 = vrot.slane %v1755_v57, 2  ;;  %v1725_v4 = vmax.f32 %v1685_v58, 0.0  ;;  %v1770_v5 = vrot.slane %v1769_v60, 2  ;;  %v1683_v44 = vadd.f32 %v11065_v15, %v1056_v47 }
 0x12f   : > { %v1763_v6 = vrot.slane %v1762_v62, 2  ;;  %v1726_v18 = vmax.f32 %v1686_v63, 0.0  ;;  %v1777_v22 = vrot.slane %v1776_v1, 2  ;;  %v1687_v50 = vadd.f32 %v11065_v15, %v1060_v56 }
 0x130   : > { %v1757_v19 = vadd.f32 %v1756_v2, %v1755_v57  ;;  %v1781_v20 = vadd.f32 %v1725_v4, %v1721_v3  ;;  %v1771_v21 = vadd.f32 %v1770_v5, %v1769_v60  ;;  %v1688_v47 = vadd.f32 %v11071_v17, %v1062_v61 }
 0x131   : > { %v1764_v23 = vadd.f32 %v1763_v6, %v1762_v62  ;;  %v1788_v24 = vadd.f32 %v1726_v18, %v1722_v11  ;;  %v983_v25 = vpop.f32.mrb[8].mxu0  ;;  %v1066_v26 = vpop.f32.mrb[8].mxu1  ;;  %v1778_v37 = vadd.f32 %v1777_v22, %v1776_v1  ;;  %v1723_v63 = vmax.f32 %v1683_v44, 0.0 }
 0x132   : > { %v1758_v27 = vrot.slane %v1757_v19, 1  ;;  %v1782_v28 = vrot.slane %v1781_v20, 4  ;;  %v1772_v29 = vrot.slane %v1771_v21, 1  ;;  %v985_v30 = vpop.f32.mrb[9].mxu0  ;;  %v11085_v31 = vpop.f32.mrb[9].mxu1  ;;  %v1689_v48 = vadd.f32 %v11062_v14, %v983_v25 }
 0x133   : > { %v1789_v32 = vrot.slane %v1788_v24, 4  ;;  %v987_v33 = vpop.f32.mrb[10].mxu0  ;;  %v11087_v35 = vpop.f32.mrb[10].mxu1  ;;  %v1765_v40 = vrot.slane %v1764_v23, 1  ;;  %v1690_v52 = vadd.f32 %v11068_v16, %v985_v30  ;;  %v1779_v53 = vrot.slane %v1778_v37, 1 }
 0x134   : > { %v1783_v36 = vadd.f32 %v1782_v28, %v1781_v20  ;;  %v989_v38 = vpop.f32.mrb[11].mxu0  ;;  %v11089_v39 = vpop.f32.mrb[11].mxu1  ;;  %v1759_v34 = vadd.f32 %v1758_v27, %v1757_v19  ;;  %v1773_v43 = vadd.f32 %v1772_v29, %v1771_v21  ;;  %v1693_v49 = vadd.f32 %v11062_v14, %v987_v33 }
 0x135   : > { %v1790_v42 = vadd.f32 %v1789_v32, %v1788_v24  ;;  %v1694_v54 = vadd.f32 %v11068_v16, %v989_v38  ;;  %v1766_v57 = vadd.f32 %v1765_v40, %v1764_v23  ;;  %v1729_v3 = vmax.f32 %v1689_v48, 0.0 }
 0x136   : > { %v1784_v41 = vrot.slane %v1783_v36, 2  ;;  %v11098_v55 = vmul.f32 0.0625, %v1759_v34  ;;  %v11103_v62 = vmul.f32 0.0625, %v1773_v43  ;;  %v1733_v4 = vmax.f32 %v1693_v49, 0.0 }
 0x137   : > { %v1791_v46 = vrot.slane %v1790_v42, 2  ;;  %v1724_v5 = vmax.f32 %v1684_v45, 0.0  ;;  %v1730_v18 = vmax.f32 %v1690_v52, 0.0  ;;  %v1780_v61 = vadd.f32 %v1779_v53, %v1778_v37 }
 0x138   : > { %v1785_v0 = vadd.f32 %v1784_v41, %v1783_v36  ;;  %v1734_v19 = vmax.f32 %v1694_v54, 0.0  ;;  %v1727_v20 = vmax.f32 %v1687_v50, 0.0  ;;  %v1914_v23 = vpack.c.bf16 %v11098_v55, %v11098_v55 }
 0x139   : > { %v1792_v58 = vadd.f32 %v1791_v46, %v1790_v42  ;;  %v993_v51 = vpop.f32.mrb[12].mxu0  ;;  %v11101_v59 = vpop.f32.mrb[12].mxu1  ;;  %v11117_v24 = vmul.f32 0.0625, %v1766_v57  ;;  %v1809_v25 = vadd.f32 %v1733_v4, %v1729_v3  ;;  %v1728_v27 = vmax.f32 %v1688_v47, 0.0 }
 0x13a   : > { %v1786_v60 = vrot.slane %v1785_v0, 1  ;;  %v11105_v56 = vpop.f32.mrb[13].mxu0  ;;  %v11107_v1 = vpop.f32.mrb[13].mxu1  ;;  %v1916_v29 = vpack.c.bf16 %v11103_v62, %v11103_v62  ;;  %v1816_v30 = vadd.f32 %v1734_v19, %v1730_v18  ;;  %v1795_v32 = vadd.f32 %v1727_v20, %v1723_v63 }
 0x13b   : > { %v1793_v2 = vrot.slane %v1792_v58, 1  ;;  %v997_v6 = vpop.f32.mrb[14].mxu0  ;;  %v11109_v11 = vpop.f32.mrb[14].mxu1  ;;  %v1810_v36 = vrot.slane %v1809_v25, 4  ;;  %v1802_v37 = vadd.f32 %v1728_v27, %v1724_v5  ;;  %v1691_v38 = vadd.f32 %v11065_v15, %v1066_v26 }
 0x13c   : > { %v11111_v21 = vpop.f32.mrb[15].mxu0  ;;  %v11113_v22 = vpop.f32.mrb[15].mxu1  ;;  %v1787_v28 = vadd.f32 %v1786_v60, %v1785_v0  ;;  %v11122_v34 = vmul.f32 0.0625, %v1780_v61  ;;  %v1817_v40 = vrot.slane %v1816_v30, 4  ;;  %v1796_v42 = vrot.slane %v1795_v32, 4 }
 0x13d   : > { %v1794_v33 = vadd.f32 %v1793_v2, %v1792_v58  ;;  %v1915_v41 = vpack.c.bf16 %v11117_v24, %v11117_v24  ;;  %v1811_v43 = vadd.f32 %v1810_v36, %v1809_v25  ;;  %v1803_v44 = vrot.slane %v1802_v37, 4 }
 0x13e   : > { %v1692_v45 = vadd.f32 %v11071_v17, %v11085_v31  ;;  %v11132_v49 = vunpack.c.l.b16 %v1914_v23  ;;  %v11134_v50 = vunpack.c.l.b16 %v1916_v29  ;;  %v1818_v26 = vadd.f32 %v1817_v40, %v1816_v30 }
 0x13f   : > { %v1797_v0 = vadd.f32 %v1796_v42, %v1795_v32  ;;  %v11140_v54 = vmul.f32 0.0625, %v1787_v28  ;;  %v11142_v57 = vmul.f32 0.0625, %v1794_v33  ;;  %v1804_v58 = vadd.f32 %v1803_v44, %v1802_v37 }
 0x140   : > { %v1731_v31 = vmax.f32 %v1691_v38, 0.0  ;;  %v1812_v63 = vrot.slane %v1811_v43, 2  ;;  %v1819_v2 = vrot.slane %v1818_v26, 2  ;;  %v1695_v4 = vadd.f32 %v11065_v15, %v11087_v35 }
 0x141   : > { %v11128_v46 = vpop.f32.mrb[16].mxu0  ;;  %v11130_v48 = vpop.f32.mrb[16].mxu1  ;;  %v1798_v3 = vrot.slane %v1797_v0, 2  ;;  %v1805_v61 = vrot.slane %v1804_v58, 2  ;;  %v1732_v19 = vmax.f32 %v1692_v45, 0.0  ;;  %v1697_v20 = vadd.f32 %v11062_v14, %v993_v51 }
 0x142   : > { %v11136_v52 = vpop.f32.mrb[17].mxu0  ;;  %v11138_v53 = vpop.f32.mrb[17].mxu1  ;;  %v1696_v23 = vadd.f32 %v11071_v17, %v11089_v39  ;;  %v1917_v25 = vpack.c.bf16 %v11122_v34, %v11122_v34  ;;  %v1820_v27 = vadd.f32 %v1819_v2, %v1818_v26  ;;  %v1735_v29 = vmax.f32 %v1695_v4, 0.0 }
 0x143   : > { %v11144_v47 = vpop.f32.mrb[18].mxu0  ;;  %v11146_v60 = vpop.f32.mrb[18].mxu1  ;;  %v1799_v28 = vadd.f32 %v1798_v3, %v1797_v0  ;;  %v1918_v35 = vpack.c.bf16 %v11140_v54, %v11140_v54  ;;  %v1806_v30 = vadd.f32 %v1805_v61, %v1804_v58  ;;  %v1701_v33 = vadd.f32 %v11062_v14, %v997_v6 }
 0x144   : > { %v11150_v5 = vpop.f32.mrb[19].mxu0  ;;  %v11152_v18 = vpop.f32.mrb[19].mxu1  ;;  %v1736_v32 = vmax.f32 %v1696_v23, 0.0  ;;  %v1919_v36 = vpack.c.bf16 %v11142_v57, %v11142_v57  ;;  %v1813_v51 = vadd.f32 %v1812_v63, %v1811_v43  ;;  %v1823_v38 = vadd.f32 %v1735_v29, %v1731_v31 }
 0x145   : > { %v1800_v37 = vrot.slane %v1799_v28, 1  ;;  %v1807_v39 = vrot.slane %v1806_v30, 1  ;;  %v1737_v40 = vmax.f32 %v1697_v20, 0.0  ;;  %v1741_v44 = vmax.f32 %v1701_v33, 0.0 }
 0x146   : > { %v1830_v42 = vadd.f32 %v1736_v32, %v1732_v19  ;;  %v1821_v26 = vrot.slane %v1820_v27, 1  ;;  %v1824_v2 = vrot.slane %v1823_v38, 4  ;;  %v1698_v58 = vadd.f32 %v11068_v16, %v11105_v56 }
 0x147   : > { %v1801_v0 = vadd.f32 %v1800_v37, %v1799_v28  ;;  %v1808_v6 = vadd.f32 %v1807_v39, %v1806_v30  ;;  %v1837_v61 = vadd.f32 %v1741_v44, %v1737_v40  ;;  %v1702_v43 = vadd.f32 %v11068_v16, %v11111_v21 }
 0x148   : > { %v1831_v4 = vrot.slane %v1830_v42, 4  ;;  %v11174_v63 = vunpack.c.l.b16 %v1915_v41  ;;  %v1814_v19 = vrot.slane %v1813_v51, 1  ;;  %v1825_v23 = vadd.f32 %v1824_v2, %v1823_v38 }
 0x149   : > { %v11164_v45 = vpop.f32.mrb[20].mxu1  ;;  %v11176_v20 = vmul.f32 0.0625, %v1801_v0  ;;  %v1838_v56 = vrot.slane %v1837_v61, 4  ;;  %v1699_v30 = vadd.f32 %v11065_v15, %v11101_v59  ;;  %v1742_v32 = vmax.f32 %v1702_v43, 0.0 }
 0x14a   : > { %v11168_v3 = vpop.f32.mrb[21].mxu1  ;;  %v1832_v29 = vadd.f32 %v1831_v4, %v1830_v42  ;;  %v1822_v33 = vadd.f32 %v1821_v26, %v1820_v27  ;;  %v1826_v37 = vrot.slane %v1825_v23, 2  ;;  %v1738_v39 = vmax.f32 %v1698_v58, 0.0 }
 0x14b   : > { %v11172_v31 = vpop.f32.mrb[22].mxu1  ;;  %16070 = vst [vmem:[#allocation12_spill] sm:$0xff] %v11176_v20  ;;  %v1700_v21 = vadd.f32 %v11071_v17, %v11107_v1  ;;  %v11184_v41 = vunpack.c.l.b16 %v1918_v35  ;;  %v11186_v40 = vunpack.c.l.b16 %v1919_v36  ;;  %v11188_v44 = vunpack.c.l.b16 %v1917_v25 }
 0x14c   : > { %v11178_v28 = vpop.f32.mrb[23].mxu1  ;;  %v11190_v38 = vmul.f32 0.0625, %v1808_v6  ;;  %v11192_v42 = vadd.f32 %v1814_v19, %v1813_v51  ;;  %v1920_v59 = vpack.c.bf16 %v11176_v20, %v11176_v20  ;;  %v1833_v0 = vrot.slane %v1832_v29, 2 }
 0x14d   : > { %v1844_v27 = vadd.f32 %v1742_v32, %v1738_v39  ;;  %v1827_v26 = vadd.f32 %v1826_v37, %v1825_v23  ;;  %v1839_v2 = vadd.f32 %v1838_v56, %v1837_v61  ;;  %v1739_v58 = vmax.f32 %v1699_v30, 0.0 }
 0x14e   : > { %16071 = vst [vmem:[#allocation13_spill] sm:$0xff] %v11190_v38  ;;  %v1703_v1 = vadd.f32 %v11065_v15, %v11109_v11  ;;  %v11200_v36 = vmul.f32 0.0625, %v1822_v33  ;;  %v1740_v6 = vmax.f32 %v1700_v21, 0.0  ;;  %v1704_v51 = vadd.f32 %v11071_v17, %v11113_v22 }
 0x14f   : > { %v1845_v25 = vrot.slane %v1844_v27, 4  ;;  %v1921_v43 = vpack.c.bf16 %v11190_v38, %v11190_v38  ;;  %v1705_v61 = vadd.f32 %v11062_v14, %v11128_v46  ;;  %v1707_v11 = vadd.f32 %v11065_v15, %v11130_v48 }
 0x150   : > { %v1743_v19 = vmax.f32 %v1703_v1, 0.0  ;;  %v11214_v56 = vunpack.c.l.b16 %v1920_v59  ;;  %v11216_v30 = vadd.f32 %v1833_v0, %v1832_v29  ;;  %v1744_v22 = vmax.f32 %v1704_v51, 0.0 }
 0x151   : > { %v11198_v35 = vpop.f32.mrb[24].mxu1  ;;  %v1846_v32 = vadd.f32 %v1845_v25, %v1844_v27  ;;  %v1828_v37 = vrot.slane %v1827_v26, 1  ;;  %v1840_v39 = vrot.slane %v1839_v2, 2  ;;  %v1706_v1 = vadd.f32 %v11068_v16, %v11136_v52 }
 0x152   : > { %v11204_v4 = vpop.f32.mrb[25].mxu1  ;;  %v1851_v21 = vadd.f32 %v1743_v19, %v1739_v58  ;;  %v1858_v7 = vadd.f32 %v1744_v22, %v1740_v6  ;;  %v1708_v48 = vadd.f32 %v11071_v17, %v11138_v53  ;;  %v1709_v59 = vadd.f32 %v11062_v14, %v11144_v47 }
 0x153   : > { %v11212_v23 = vpop.f32.mrb[26].mxu1  ;;  %v1847_v46 = vrot.slane %v1846_v32, 2  ;;  %v1745_v0 = vmax.f32 %v1705_v61, 0.0  ;;  %v1747_v27 = vmax.f32 %v1707_v11, 0.0  ;;  %v1711_v25 = vadd.f32 %v11065_v15, %v11146_v60 }
 0x154   : > { %v11218_v33 = vpop.f32.mrb[27].mxu1  ;;  %v1852_v29 = vrot.slane %v1851_v21, 4  ;;  %v1859_v58 = vrot.slane %v1858_v7, 4  ;;  %v1748_v19 = vmax.f32 %v1708_v48, 0.0  ;;  %v1749_v8 = vmax.f32 %v1709_v59, 0.0 }
 0x155   : > { %v1848_v51 = vadd.f32 %v1847_v46, %v1846_v32  ;;  %v1751_v12 = vmax.f32 %v1711_v25, 0.0  ;;  %v1710_v6 = vadd.f32 %v11068_v16, %v11150_v5  ;;  %v1712_v53 = vadd.f32 %v11071_v17, %v11152_v18 }
 0x156   : > { %v1853_v52 = vadd.f32 %v1852_v29, %v1851_v21  ;;  %v1829_v47 = vadd.f32 %v1828_v37, %v1827_v26  ;;  %v1860_v61 = vadd.f32 %v1859_v58, %v1858_v7  ;;  %v1746_v11 = vmax.f32 %v1706_v1, 0.0 }
 0x157   : > { %v1865_v15 = vadd.f32 %v1749_v8, %v1745_v0  ;;  %v1879_v22 = vadd.f32 %v1751_v12, %v1747_v27  ;;  %v1750_v46 = vmax.f32 %v1710_v6, 0.0  ;;  %v1752_v21 = vmax.f32 %v1712_v53, 0.0 }
 0x158   : > { %v1854_v32 = vrot.slane %v1853_v52, 2  ;;  %v1835_v16 = vrot.slane %v11216_v30, 1  ;;  %v1849_v5 = vrot.slane %v1848_v51, 1  ;;  %v1861_v59 = vrot.slane %v1860_v61, 2 }
 0x159   : > { %v11232_v14 = vpop.f32.mrb[28].mxu1  ;;  %v1866_v17 = vrot.slane %v1865_v15, 4  ;;  %v1880_v26 = vrot.slane %v1879_v22, 4  ;;  %v1872_v7 = vadd.f32 %v1750_v46, %v1746_v11  ;;  %v1886_v37 = vadd.f32 %v1752_v21, %v1748_v19 }
 0x15a   : > { %v11234_v60 = vpop.f32.mrb[29].mxu1  ;;  %v1855_v29 = vadd.f32 %v1854_v32, %v1853_v52  ;;  %v1841_v8 = vadd.f32 %v1840_v39, %v1839_v2  ;;  %v1862_v1 = vadd.f32 %v1861_v59, %v1860_v61  ;;  %v11241_v12 = vmul.f32 0.0625, %v1829_v47 }
 0x15b   : > { %v11236_v48 = vpop.f32.mrb[30].mxu1  ;;  %v1867_v0 = vadd.f32 %v1866_v17, %v1865_v15  ;;  %v1881_v27 = vadd.f32 %v1880_v26, %v1879_v22  ;;  %v1873_v25 = vrot.slane %v1872_v7, 4  ;;  %v1887_v58 = vrot.slane %v1886_v37, 4 }
 0x15c   : > { %16072 = vst [vmem:[#allocation14_spill] sm:$0xff] %v11236_v48  ;;  %v11239_v18 = vpop.f32.mrb[31].mxu1  ;;  %16073 = vst [vmem:[#allocation15_spill] sm:$0xff] %v11241_v12  ;;  %v1856_v6 = vrot.slane %v1855_v29, 1  ;;  %v11243_v53 = vunpack.c.l.b16 %v1921_v43  ;;  %v1850_v9 = vadd.f32 %v1849_v5, %v1848_v51  ;;  %v2408_v52 = vsel %vm2043_vm0, %v11176_v20, %v11103_v62 }
 0x15d   : > { %v1868_v48 = vrot.slane %v1867_v0, 2  ;;  %v1882_v19 = vrot.slane %v1881_v27, 2  ;;  %v1874_v11 = vadd.f32 %v1873_v25, %v1872_v7  ;;  %v1888_v2 = vadd.f32 %v1887_v58, %v1886_v37 }
 0x15e   : > { %v1857_v39 = vadd.f32 %v1856_v6, %v1855_v29  ;;  %v1836_v47 = vadd.f32 %v1835_v16, %v11216_v30  ;;  %v1863_v15 = vrot.slane %v1862_v1, 1  ;;  %v2409_v43 = vsel %vm2045_vm1, %v11241_v12, %v2408_v52 }
 0x15f   : > { %v1842_v32 = vrot.slane %v1841_v8, 1  ;;  %v1875_v22 = vrot.slane %v1874_v11, 2  ;;  %v1889_v46 = vrot.slane %v1888_v2, 2  ;;  %v1883_v21 = vadd.f32 %v1882_v19, %v1881_v27 }
 0x160   : > { %v11255_v5 = vmul.f32 0.0625, %v1857_v39  ;;  %v1924_v17 = vpack.c.bf16 %v11241_v12, %v11241_v12  ;;  %v1869_v26 = vadd.f32 %v1868_v48, %v1867_v0  ;;  %v11262_v30 = vmul.f32 0.0625, %v11192_v42 }
 0x161   : > { %v11248_v61 = vpop.f32.mrb[32].mxu1  ;;  %v1843_v29 = vadd.f32 %v1842_v32, %v1841_v8  ;;  %v11266_v7 = vmul.f32 0.0625, %v1850_v9  ;;  %v1876_v37 = vadd.f32 %v1875_v22, %v1874_v11  ;;  %v1890_v25 = vadd.f32 %v1889_v46, %v1888_v2 }
 0x162   : > { %v11253_v51 = vpop.f32.mrb[33].mxu1  ;;  %16074 = vst [vmem:[#allocation16_spill] sm:$0xff] %v11255_v5  ;;  %16075 = vst [vmem:[#allocation17_spill] sm:$0xff] %v11262_v30  ;;  %v1884_v58 = vrot.slane %v1883_v21, 1  ;;  %v1864_v27 = vadd.f32 %v1863_v15, %v1862_v1  ;;  %v2410_v6 = vsel %vm15941_vm2, %v11255_v5, %v2409_v43  ;;  %v1870_v52 = vrot.slane %v1869_v26, 1 }
 0x163   : > { %v11257_v59 = vpop.f32.mrb[34].mxu1  ;;  %16076 = vst [vmem:[#allocation18_spill] sm:$0xff] %v11266_v7  ;;  %v11270_v19 = vmul.f32 0.0625, %v1843_v29  ;;  %v1877_v39 = vrot.slane %v1876_v37, 1  ;;  %v1891_v8 = vrot.slane %v1890_v25, 1  ;;  %v1928_v42 = vpack.c.bf16 %v11255_v5, %v11255_v5 }
 0x164   : > { %v11264_v16 = vpop.f32.mrb[35].mxu1  ;;  %v1885_v48 = vadd.f32 %v1884_v58, %v1883_v21  ;;  %v1871_v0 = vadd.f32 %v1870_v52, %v1869_v26  ;;  %v1922_v9 = vpack.c.bf16 %v11262_v30, %v11262_v30  ;;  %v2400_v1 = vsel %vm2043_vm0, %v11140_v54, %v11098_v55 }
 0x165   : > { %16077 = vst [vmem:[#allocation19_spill] sm:$0xff] %v11270_v19  ;;  %v1926_v11 = vpack.c.bf16 %v11270_v19, %v11270_v19  ;;  %v1878_v2 = vadd.f32 %v1877_v39, %v1876_v37  ;;  %v1892_v15 = vadd.f32 %v1891_v8, %v1890_v25  ;;  %v2401_v32 = vsel %vm2045_vm1, %v11262_v30, %v2400_v1 }
 0x166   : > { %v11281_v43 = vmul.f32 0.0625, %v1885_v48  ;;  %v11287_v46 = vmul.f32 0.0625, %v1836_v47  ;;  %v2033_v21 = vunpack.c.l.b16 %v1924_v17  ;;  %v11289_v29 = vmul.f32 0.0625, %v1871_v0 }
 0x167   : > { %v2402_v26 = vsel %vm15941_vm2, %v11270_v19, %v2401_v32  ;;  %v11295_v52 = vmul.f32 0.0625, %v1864_v27  ;;  %v11297_v37 = vmul.f32 0.0625, %v1878_v2  ;;  %v2037_v25 = vunpack.c.l.b16 %v1928_v42  ;;  %v11315_v2 = vpop.f32.mrb[20].mxu0 }
 0x168   : > { %16078 = vst [vmem:[#allocation20_spill] sm:$0xff] %v11281_v43  ;;  %16079 = vst [vmem:[#allocation21_spill] sm:$0xff] %v11289_v29  ;;  %v2411_v39 = vsel %vm15940_vm3, %v11281_v43, %v2410_v6  ;;  %v11303_v47 = vmul.f32 0.0625, %v1892_v15  ;;  %v1932_v17 = vpack.c.bf16 %v11281_v43, %v11281_v43  ;;  %v2031_v48 = vunpack.c.l.b16 %v1922_v9 }
 0x169   : > { %v11285_v22 = vpop.f32.mrb[36].mxu1  ;;  %2484 = vxpose.xlu0.b32.start.end [1/1] (short) %v2411_v39, 128  ;;  %v2403_v0 = vsel %vm15940_vm3, %v11289_v29, %v2402_v26  ;;  %v2035_v27 = vunpack.c.l.b16 %v1926_v11  ;;  %v1930_v42 = vpack.c.bf16 %v11289_v29, %v11289_v29  ;;  %v1923_v6 = vpack.c.bf16 %v11200_v36, %v11200_v36  ;;  %v11324_v26 = vpop.f32.mrb[21].mxu0 }
 0x16a   : > { %v11293_v58 = vpop.f32.mrb[37].mxu1  ;;  %2420 = vxpose.xlu1.b32.start.end [1/1] (short) %v2403_v0, 128  ;;  %v1927_v1 = vpack.c.bf16 %v11266_v7, %v11266_v7  ;;  %v2041_v15 = vunpack.c.l.b16 %v1932_v17  ;;  %v1931_v9 = vpack.c.bf16 %v11297_v37, %v11297_v37  ;;  %v2051_v11 = vsel %vm2043_vm0, %v11186_v40, %v11174_v63  ;;  %v11328_v5 = vpop.f32.mrb[22].mxu0 }
 0x16b   : > { %v11301_v8 = vpop.f32.mrb[38].mxu1  ;;  %v1925_v32 = vpack.c.bf16 %v11287_v46, %v11287_v46  ;;  %v2039_v39 = vunpack.c.l.b16 %v1930_v42  ;;  %v2032_v0 = vunpack.c.l.b16 %v1923_v6  ;;  %v1929_v43 = vpack.c.bf16 %v11295_v52, %v11295_v52 }
 0x16c   : > { %v2036_v29 = vunpack.c.l.b16 %v1927_v1  ;;  %v2040_v17 = vunpack.c.l.b16 %v1931_v9  ;;  %v1933_v19 = vpack.c.bf16 %v11303_v47, %v11303_v47  ;;  %v2059_v63 = vsel %vm2043_vm0, %v11243_v53, %v11188_v44  ;;  %v11342_v9 = vpop.f32.mrb[23].mxu0 }
 0x16d   : > { %v2034_v12 = vunpack.c.l.b16 %v1925_v32  ;;  %v2052_v40 = vsel %vm2045_vm1, %v2032_v0, %v2051_v11  ;;  %v2038_v42 = vunpack.c.l.b16 %v1929_v43  ;;  %v2044_v6 = vsel %vm2043_vm0, %v11184_v41, %v11132_v49  ;;  %v11347_v53 = vpop.f32.mrb[24].mxu0 }
 0x16e   : > { %v2055_v1 = vsel %vm2043_vm0, %v11214_v56, %v11134_v50  ;;  %v2053_v32 = vsel %vm15941_vm2, %v2036_v29, %v2052_v40  ;;  %v2042_v30 = vunpack.c.l.b16 %v1933_v19  ;;  %v2046_v44 = vsel %vm2045_vm1, %v2031_v48, %v2044_v6  ;;  %v11354_v50 = vld [vmem:[%s11046_s26 + $0x1] ss:$4 sm:$0xf]  ;;  %v11356_v56 = vpop.f32.mrb[25].mxu0 }
 0x16f   : > { %v2060_v20 = vsel %vm2045_vm1, %v2034_v12, %v2059_v63  ;;  %v2054_v43 = vsel %vm15940_vm3, %v2040_v17, %v2053_v32  ;;  %v2048_v49 = vsel %vm15941_vm2, %v2035_v27, %v2046_v44  ;;  %v2056_v41 = vsel %vm2045_vm1, %v2033_v21, %v2055_v1  ;;  %v11361_v0 = vpop.f32.mrb[26].mxu0 }
 0x170   : > { %v2061_v11 = vsel %vm15941_vm2, %v2038_v42, %v2060_v20  ;;  %v2064_v29 = vpack.c.b16 %v2054_v43, %v2054_v43  ;;  %v2050_v12 = vsel %vm15940_vm3, %v2039_v39, %v2048_v49  ;;  %v2057_v48 = vsel %vm15941_vm2, %v2037_v25, %v2056_v41  ;;  %v11369_v27 = vpop.f32.mrb[27].mxu0 }
 0x171   : > { %v2062_v19 = vsel %vm15940_vm3, %v2042_v30, %v2061_v11  ;;  %v2063_v63 = vpack.c.b16 %v2050_v12, %v2050_v12  ;;  %v2058_v20 = vsel %vm15940_vm3, %v2041_v15, %v2057_v48  ;;  %v11367_v21 = vsel %vm2043_vm0, %v11190_v38, %v11122_v34  ;;  %v11378_v39 = vpop.f32.mrb[28].mxu0 }
 0x172   : > { %v2066_v17 = vpack.c.b16 %v2062_v19, %v2062_v19  ;;  %2295 = vmatprep.mubr.bf16.mxu0 %v2064_v29  ;;  %v2065_v40 = vpack.c.b16 %v2058_v20, %v2058_v20  ;;  %v2404_v30 = vsel %vm2043_vm0, %v11142_v57, %v11117_v24  ;;  %v11376_v25 = vrot.slane %v11354_v50, %v11052_v10  ;;  %v11386_v6 = vpop.f32.mrb[29].mxu0 }
 0x173   : > { %2296 = vmatmul.mubr.bf16.vlgmr.msra.gmra.mrb[60].mxu0 %v2063_v63  ;;  %v2405_v15 = vsel %vm2045_vm1, %v11200_v36, %v2404_v30  ;;  %v11384_v42 = vrot.slane %v11354_v50, %v11059_v13  ;;  %v11396_v43 = vpop.f32.mrb[30].mxu0 }
 0x174   : > { %2335 = vmatprep.mubr.bf16.mxu1 %v2066_v17  ;;  %v11390_v1 = vsel %vm15941_vm2, %v11266_v7, %v2405_v15  ;;  %v4205_v32 = vadd.f32 %v11376_v25, %v11164_v45  ;;  %v4209_v44 = vadd.f32 %v11376_v25, %v11172_v31  ;;  %v4213_v41 = vadd.f32 %v11376_v25, %v11198_v35  ;;  %v11404_v29 = vpop.f32.mrb[31].mxu0 }
 0x175   : > { %2336 = vmatmul.mubr.bf16.vlgmr.msra.gmra.mrb[60].mxu1 %v2065_v40  ;;  %v4206_v11 = vadd.f32 %v11384_v42, %v11168_v3  ;;  %v4210_v49 = vadd.f32 %v11384_v42, %v11178_v28  ;;  %v4214_v45 = vadd.f32 %v11384_v42, %v11204_v4  ;;  %v4217_v31 = vadd.f32 %v11376_v25, %v11212_v23  ;;  %v11410_v48 = vpop.f32.mrb[32].mxu0 }
 0x176   : > { %v4245_v19 = vmax.f32 %v4205_v32, 0.0  ;;  %v4249_v12 = vmax.f32 %v4209_v44, 0.0  ;;  %v4253_v63 = vmax.f32 %v4213_v41, 0.0  ;;  %v4218_v28 = vadd.f32 %v11384_v42, %v11218_v33  ;;  %v11414_v20 = vpop.f32.mrb[33].mxu0 }
 0x177   : > { %v4246_v17 = vmax.f32 %v4206_v11, 0.0  ;;  %v4250_v3 = vmax.f32 %v4210_v49, 0.0  ;;  %v4254_v40 = vmax.f32 %v4214_v45, 0.0  ;;  %v4257_v30 = vmax.f32 %v4217_v31, 0.0  ;;  %v11418_v4 = vpop.f32.mrb[34].mxu0  ;;  %v16081_v11 = vld [vmem:[#allocation14_spill] sm:$0xff] }
 0x178   : > { %v4297_v35 = vadd.f32 %v4249_v12, %v4245_v19  ;;  %v4221_v15 = vadd.f32 %v11376_v25, %v11232_v14  ;;  %v4258_v23 = vmax.f32 %v4218_v28, 0.0  ;;  %v4222_v44 = vadd.f32 %v11384_v42, %v11234_v60  ;;  %v11426_v33 = vpop.f32.mrb[35].mxu0 }
 0x179   : > { %v11420_v32 = vadd.f32 %v4250_v3, %v4246_v17  ;;  %v4225_v49 = vadd.f32 %v11376_v25, %v16081_v11  ;;  %v4325_v19 = vadd.f32 %v4257_v30, %v4253_v63  ;;  %v4226_v45 = vadd.f32 %v11384_v42, %v11239_v18  ;;  %v11430_v14 = vpop.f32.mrb[36].mxu0 }
 0x17a   : > { %v4298_v41 = vrot.slane %v4297_v35, 4  ;;  %v4261_v12 = vmax.f32 %v4221_v15, 0.0  ;;  %v11432_v31 = vadd.f32 %v4258_v23, %v4254_v40  ;;  %v4262_v17 = vmax.f32 %v4222_v44, 0.0  ;;  %v11434_v28 = vpop.f32.mrb[37].mxu0 }
 0x17b   : > { %16080 = vst [vmem:[#allocation22_spill] sm:$0xff] %v11420_v32  ;;  %v4265_v3 = vmax.f32 %v4225_v49, 0.0  ;;  %v4326_v32 = vrot.slane %v4325_v19, 4  ;;  %v4266_v13 = vmax.f32 %v4226_v45, 0.0  ;;  %v4229_v11 = vadd.f32 %v11376_v25, %v11248_v61  ;;  %v11438_v10 = vpop.f32.mrb[38].mxu0  ;;  %v11448_v61 = vpop.f32.mrb[39].mxu1 }
 0x17c   : > { %16082 = vst [vmem:[#allocation14_spill] sm:$0xff] %v11432_v31  ;;  %v4299_v60 = vadd.f32 %v4298_v41, %v4297_v35  ;;  %v4230_v18 = vadd.f32 %v11384_v42, %v11253_v51  ;;  %v11442_v30 = vpop.f32.mrb[39].mxu0  ;;  %v4233_v45 = vadd.f32 %v11376_v25, %v11257_v59  ;;  %16084 = vst [vmem:[#allocation24_spill] sm:$0xff] %v11448_v61 }
 0x17d   : > { %v4353_v63 = vadd.f32 %v4265_v3, %v4261_v12  ;;  %v4327_v15 = vadd.f32 %v4326_v32, %v4325_v19  ;;  %v11444_v23 = vadd.f32 %v4266_v13, %v4262_v17  ;;  %v4269_v41 = vmax.f32 %v4229_v11, 0.0 }
 0x17e   : > { %v4300_v40 = vrot.slane %v4299_v60, 2  ;;  %v4270_v12 = vmax.f32 %v4230_v18, 0.0  ;;  %v4234_v51 = vadd.f32 %v11384_v42, %v11264_v16  ;;  %v4273_v7 = vmax.f32 %v4233_v45, 0.0 }
 0x17f   : > { %16083 = vst [vmem:[#allocation23_spill] sm:$0xff] %v11444_v23  ;;  %v4354_v44 = vrot.slane %v4353_v63, 4  ;;  %v4328_v35 = vrot.slane %v4327_v15, 2  ;;  %v4237_v18 = vadd.f32 %v11376_v25, %v11285_v22 }
 0x180   : > { %v4301_v49 = vadd.f32 %v4300_v40, %v4299_v60  ;;  %v4274_v19 = vmax.f32 %v4234_v51, 0.0  ;;  %v4381_v60 = vadd.f32 %v4273_v7, %v4269_v41 }
 0x181   : > { %v4355_v31 = vadd.f32 %v4354_v44, %v4353_v63  ;;  %v4329_v3 = vadd.f32 %v4328_v35, %v4327_v15  ;;  %v11469_v44 = vadd.f32 %v11384_v42, %v11293_v58 }
 0x182   : > { %v4302_v32 = vrot.slane %v4301_v49, 1  ;;  %v11452_v11 = vadd.f32 %v4274_v19, %v4270_v12  ;;  %v4382_v61 = vrot.slane %v4381_v60, 4  ;;  %v16091_v12 = vld [vmem:[#allocation8_spill] sm:$0xff]  ;;  %v1554_v19 = vstv %s11458_s28 }
 0x183   : > { %v4356_v13 = vrot.slane %v4355_v31, 2  ;;  %v4330_v17 = vrot.slane %v4329_v3, 1  ;;  %v11496_v51 = vrot.slane %v11354_v50, %v16091_v12 }
 0x184   : > { %16085 = vst [vmem:[#allocation25_spill] sm:$0xff] %v11452_v11  ;;  %v4303_v23 = vadd.f32 %v4302_v32, %v4301_v49 }
 0x185   : > { %v4357_v40 = vadd.f32 %v4356_v13, %v4355_v31  ;;  %v4331_v59 = vadd.f32 %v4330_v17, %v4329_v3  ;;  %v4383_v31 = vadd.f32 %v4382_v61, %v4381_v60  ;;  %v16092_v3 = vld [vmem:[#allocation10_spill] sm:$0xff]  ;;  %v16093_v13 = vld [vmem:[#allocation7_spill] sm:$0xff] }
 0x186   : > { %v11460_v63 = vmul.f32 0.0625, %v4303_v23  ;;  %v4277_v23 = vmax.f32 %v4237_v18, 0.0  ;;  %v11500_v32 = vrot.slane %v11354_v50, %v16092_v3  ;;  %vm1551_vm4 = vcmp.eq.s32.totalorder %v16093_v13, 0 }
 0x187   : > { %v4358_v38 = vrot.slane %v4357_v40, 1  ;;  %v11462_v7 = vmul.f32 0.0625, %v4331_v59  ;;  %v4384_v15 = vrot.slane %v4383_v31, 2  ;;  %v4207_v59 = vadd.f32 %v11496_v51, %v11328_v5 }
 0x188   : > { %16086 = vst [vmem:[#allocation26_spill] sm:$0xff] %v11460_v63  ;;  %v15747_v5 = vmov 0.0   ;;  %vm1558_vm7 = vcmp.eq.s32.totalorder %v16093_v13, 1  ;;  %vm1565_vm8 = vcmp.eq.s32.totalorder %v16093_v13, 2  ;;  %vm1572_vm12 = vcmp.eq.s32.totalorder %v16093_v13, 3 }
 0x189   : > { %v4359_v16 = vadd.f32 %v4358_v38, %v4357_v40  ;;  %16087 = vst [vmem:[#allocation27_spill] sm:$0xff] %v11462_v7  ;;  %v4241_v38 = vadd.f32 %v11376_v25, %v11301_v8  ;;  %v4385_v35 = vadd.f32 %v4384_v15, %v4383_v31  ;;  %v4932_v22 = vsel %vm2043_vm0, %v11462_v7, %v11460_v63 }
 0x18a   : > { %v16089_v8 = vlaneseq  ;;  %v4203_v40 = vadd.f32 %v11496_v51, %v11315_v2  ;;  %v4204_v2 = vadd.f32 %v11500_v32, %v11324_v26  ;;  %v4247_v18 = vmax.f32 %v4207_v59, 0.0 }
 0x18b   : > { %v11474_v49 = vmul.f32 0.0625, %v4359_v16  ;;  %v4281_v41 = vmax.f32 %v4241_v38, 0.0  ;;  %v4386_v45 = vrot.slane %v4385_v35, 1  ;;  %v1575_v26 = vstv %s11506_s12 }
 0x18c   : > { %v11487_v25 = vand.u32 127, %v16089_v8  ;;  %v4243_v31 = vmax.f32 %v4203_v40, 0.0  ;;  %vm1579_vm13 = vcmp.eq.s32.totalorder %v16093_v13, 4  ;;  %v4208_v59 = vadd.f32 %v11500_v32, %v11342_v9 }
 0x18d   : > { %16088 = vst [vmem:[#allocation28_spill] sm:$0xff] %v11474_v49  ;;  %v4933_v58 = vsel %vm2045_vm1, %v11474_v49, %v4932_v22  ;;  %v4409_v61 = vadd.f32 %v4281_v41, %v4277_v23  ;;  %v4387_v60 = vadd.f32 %v4386_v45, %v4385_v35  ;;  %v1561_v41 = vstv %s11481_s8 }
 0x18e   : > { %16090 = vst [vmem:[#allocation29_spill] sm:$0xff] %v11487_v25  ;;  %vm1555_vm5 = vcmp.eq.s32.totalorder %v11487_v25, %v1554_v19  ;;  %v11527_v35 = vadd.f32 %v4247_v18, %v4243_v31  ;;  %v1568_v22 = vstv %s11491_s0  ;;  %vm1562_vm9 = vcmp.eq.s32.totalorder %v11487_v25, %v1561_v41 }
 0x18f   : > { %v4410_v17 = vrot.slane %v4409_v61, 4  ;;  %v11517_v16 = vmul.f32 0.0625, %v4387_v60  ;;  %vm1556_vm6 = vmand %vm1551_vm4, %vm1555_vm5  ;;  %vm1569_vm10 = vcmp.eq.s32.totalorder %v11487_v25, %v1568_v22  ;;  %vm1576_vm15 = vcmp.eq.s32.totalorder %v11487_v25, %v1575_v26 }
 0x190   : > { %v1557_v23 = vsel %vm1556_vm6, 1.0, %v15747_v5  ;;  %vm1563_vm11 = vmand %vm1558_vm7, %vm1562_vm9  ;;  %v4244_v19 = vmax.f32 %v4204_v2, 0.0  ;;  %v4212_v2 = vadd.f32 %v11500_v32, %v11356_v56  ;;  %v4215_v18 = vadd.f32 %v11496_v51, %v11361_v0 }
 0x191   : > { %v4411_v50 = vadd.f32 %v4410_v17, %v4409_v61  ;;  %16094 = vst [vmem:[#allocation8_spill] sm:$0xff] %v11517_v16  ;;  %v4934_v38 = vsel %vm15941_vm2, %v11517_v16, %v4933_v58  ;;  %v1564_v45 = vsel %vm1563_vm11, 1.0, %v1557_v23  ;;  %vm1570_vm14 = vmand %vm1565_vm8, %vm1569_vm10  ;;  %v1582_v61 = vstv %s11512_s13  ;;  %v16104_v16 = vld [vmem:[#allocation24_spill] sm:$0xff] }
 0x192   : > { %v1571_v17 = vsel %vm1570_vm14, 1.0, %v1564_v45  ;;  %vm1577_vm5 = vmand %vm1572_vm12, %vm1576_vm15  ;;  %vm1583_vm6 = vcmp.eq.s32.totalorder %v11487_v25, %v1582_v61  ;;  %vm2343_vm10 = vcmask 1044480   ;;  %v4248_v23 = vmax.f32 %v4208_v59, 0.0 }
 0x193   : > { %v4412_v15 = vrot.slane %v4411_v50, 2  ;;  %v1578_v40 = vsel %vm1577_vm5, 1.0, %v1571_v17  ;;  %vm1584_vm9 = vmand %vm1579_vm13, %vm1583_vm6  ;;  %v4255_v9 = vmax.f32 %v4215_v18, 0.0  ;;  %v4252_v22 = vmax.f32 %v4212_v2, 0.0 }
 0x194   : > { %v11552_v31 = vsel %vm1584_vm9, 1.0, %v1578_v40  ;;  %v4290_v0 = vadd.f32 %v4248_v23, %v4244_v19  ;;  %v4216_v26 = vadd.f32 %v11500_v32, %v11369_v27  ;;  %v4220_v45 = vadd.f32 %v11500_v32, %v11386_v6 }
 0x195   : > { %v4413_v8 = vadd.f32 %v4412_v15, %v4411_v50  ;;  %v4211_v50 = vadd.f32 %v11496_v51, %v11347_v53  ;;  %16095 = vst [vmem:[#allocation10_spill] sm:$0xff] %v11552_v31  ;;  %10434 = vmatprep.subr.msk.mxu1 %vm2343_vm10, %v11552_v31  ;;  %10140 = vmatprep.subr.msk.mxu0 %vm2343_vm10, %v11552_v31  ;;  %vm15939_vm11 = vcmask 39936  }
 0x196   : > { %10435 = vmatpush3.msk.msra.mxu1 %vm2343_vm10, %v11552_v31  ;;  %10141 = vmatpush3.msk.msra.mxu0 %vm2343_vm10, %v11552_v31  ;;  %v2413_v53 = vsel %vm2045_vm1, %v11287_v46, %v11367_v21  ;;  %v4256_v61 = vmax.f32 %v4216_v26, 0.0  ;;  %v4223_v27 = vadd.f32 %v11496_v51, %v11396_v43  ;;  %v4224_v40 = vadd.f32 %v11500_v32, %v11404_v29 }
 0x197   : > { %v4414_v58 = vrot.slane %v4413_v8, 1  ;;  %v4251_v41 = vmax.f32 %v4211_v50, 0.0  ;;  %v2414_v21 = vsel %vm15941_vm2, %v11295_v52, %v2413_v53  ;;  %v4227_v59 = vadd.f32 %v11496_v51, %v11410_v48 }
 0x198   : > { %v2415_v19 = vsel %vm15940_vm3, %v11303_v47, %v2414_v21  ;;  %v4263_v6 = vmax.f32 %v4223_v27, 0.0  ;;  %v4264_v50 = vmax.f32 %v4224_v40, 0.0  ;;  %v4291_v2 = vrot.slane %v4290_v0, 4 }
 0x199   : > { %v4415_v60 = vadd.f32 %v4414_v58, %v4413_v8  ;;  %v11575_v8 = vadd.f32 %v4255_v9, %v4251_v41  ;;  %v4219_v58 = vadd.f32 %v11496_v51, %v11378_v39  ;;  %v4318_v39 = vadd.f32 %v4256_v61, %v4252_v22  ;;  %v11602_v41 = vpop.f32.mrb[40].mxu0  ;;  %v11604_v9 = vpop.f32.mrb[40].mxu1 }
 0x19a   : > { %v4228_v43 = vadd.f32 %v11500_v32, %v11414_v20  ;;  %v4292_v53 = vadd.f32 %v4291_v2, %v4290_v0  ;;  %v4231_v29 = vadd.f32 %v11496_v51, %v11418_v4  ;;  %v11608_v22 = vpop.f32.mrb[41].mxu1  ;;  %v4267_v26 = vmax.f32 %v4227_v59, 0.0  ;;  %v11614_v20 = vpop.f32.mrb[41].mxu0 }
 0x19b   : > { %v11558_v15 = vmul.f32 0.0625, %v4415_v60  ;;  %v4259_v17 = vmax.f32 %v4219_v58, 0.0  ;;  %v4260_v60 = vmax.f32 %v4220_v45, 0.0  ;;  %v4319_v23 = vrot.slane %v4318_v39, 4  ;;  %v11618_v0 = vpop.f32.mrb[42].mxu0 }
 0x19c   : > { %v4232_v58 = vadd.f32 %v11500_v32, %v11426_v33  ;;  %v4235_v45 = vadd.f32 %v11496_v51, %v11430_v14  ;;  %v4268_v21 = vmax.f32 %v4228_v43, 0.0  ;;  %v4271_v61 = vmax.f32 %v4231_v29, 0.0  ;;  %v11622_v27 = vpop.f32.mrb[43].mxu0 }
 0x19d   : > { %16096 = vst [vmem:[#allocation30_spill] sm:$0xff] %v11558_v15  ;;  %v11573_v56 = vsel %vm15940_vm3, %v11558_v15, %v4934_v38  ;;  %v2407_v38 = vsel %vm15940_vm3, %v11297_v37, %v11390_v1  ;;  %v11596_v1 = vadd.f32 %v4263_v6, %v4259_v17  ;;  %v11598_v18 = vadd.f32 %v4264_v50, %v4260_v60  ;;  %v11628_v14 = vpop.f32.mrb[44].mxu0 }
 0x19e   : > { %v4320_v48 = vadd.f32 %v4319_v23, %v4318_v39  ;;  %v4293_v4 = vrot.slane %v4292_v53, 2  ;;  %v4272_v17 = vmax.f32 %v4232_v58, 0.0  ;;  %v11626_v60 = vadd.f32 %v4271_v61, %v4267_v26  ;;  %v11636_v50 = vpop.f32.mrb[45].mxu0 }
 0x19f   : > { %16097 = vst [vmem:[#allocation31_spill] sm:$0xff] %v11598_v18  ;;  %v4236_v59 = vadd.f32 %v11500_v32, %v11434_v28  ;;  %v4275_v23 = vmax.f32 %v4235_v45, 0.0  ;;  %v4239_v43 = vadd.f32 %v11496_v51, %v11438_v10  ;;  %v4240_v29 = vadd.f32 %v11500_v32, %v11442_v30  ;;  %v11644_v26 = vpop.f32.mrb[46].mxu0  ;;  %v16112_v18 = vld [vmem:[#allocation18_spill] sm:$0xff] }
 0x1a0   : > { %v4321_v33 = vrot.slane %v4320_v48, 2  ;;  %v11632_v40 = vadd.f32 %v4272_v17, %v4268_v21  ;;  %v4294_v21 = vadd.f32 %v4293_v4, %v4292_v53  ;;  %v11648_v61 = vpop.f32.mrb[47].mxu0  ;;  %v3397_v28 = vmul.f32 %v11098_v55, %v11098_v55 }
 0x1a1   : > { %v4276_v45 = vmax.f32 %v4236_v59, 0.0  ;;  %v4279_v13 = vmax.f32 %v4239_v43, 0.0  ;;  %v11654_v25 = vpop.f32.mrb[48].mxu0  ;;  %v3398_v30 = vmul.f32 %v11117_v24, %v11117_v24  ;;  %v3401_v51 = vmul.f32 %v11140_v54, %v11140_v54 }
 0x1a2   : > { %16098 = vst [vmem:[#allocation32_spill] sm:$0xff] %v11632_v40  ;;  %v4322_v5 = vadd.f32 %v4321_v33, %v4320_v48  ;;  %v3399_v32 = vmul.f32 %v11103_v62, %v11103_v62  ;;  %v3400_v53 = vmul.f32 %v11122_v34, %v11122_v34  ;;  %v11666_v55 = vpop.f32.mrb[49].mxu0  ;;  %v3402_v4 = vmul.f32 %v11142_v57, %v11142_v57  ;;  %v16103_v62 = vld [vmem:[#allocation12_spill] sm:$0xff] }
 0x1a3   : > { %16099 = vst [vmem:[#allocation33_spill] sm:$0xff] %v11666_v55  ;;  %v3406_v33 = vmul.f32 %v11200_v36, %v11200_v36  ;;  %v11674_v24 = vadd.f32 %v4279_v13, %v4275_v23  ;;  %v4280_v59 = vmax.f32 %v4240_v29, 0.0  ;;  %v11676_v54 = vpop.f32.mrb[50].mxu0  ;;  %v3403_v34 = vmul.f32 %v16103_v62, %v16103_v62  ;;  %v16107_v36 = vld [vmem:[#allocation13_spill] sm:$0xff] }
 0x1a4   : > { %16101 = vst [vmem:[#allocation35_spill] sm:$0xff] %v11676_v54  ;;  %v4278_v31 = vmax.f32 %v11469_v44, 0.0  ;;  %v4295_v15 = vrot.slane %v4294_v21, 1  ;;  %v4242_v49 = vadd.f32 %v11384_v42, %v16104_v16  ;;  %v11685_v57 = vpop.f32.mrb[51].mxu0  ;;  %v3404_v13 = vmul.f32 %v16107_v36, %v16107_v36  ;;  %v16108_v23 = vld [vmem:[#allocation17_spill] sm:$0xff]  ;;  %v16113_v16 = vld [vmem:[#allocation15_spill] sm:$0xff] }
 0x1a5   : > { %16105 = vst [vmem:[#allocation12_spill] sm:$0xff] %v11685_v57  ;;  %v3405_v29 = vmul.f32 %v16108_v23, %v16108_v23  ;;  %v4323_v63 = vrot.slane %v4322_v5, 1  ;;  %v11693_v40 = vadd.f32 %v4280_v59, %v4276_v45  ;;  %v11695_v62 = vpop.f32.mrb[52].mxu0  ;;  %v3410_v42 = vmul.f32 %v16112_v18, %v16112_v18  ;;  %v16117_v45 = vld [vmem:[#allocation16_spill] sm:$0xff] }
 0x1a6   : > { %2452 = vxpose.xlu0.b32.start.end [1/1] (short) %v2407_v38, 128  ;;  %v11616_v38 = vpop.f32.mrb[42].mxu1  ;;  %16110 = vst [vmem:[#allocation17_spill] sm:$0xff] %v11695_v62  ;;  %v3407_v11 = vmul.f32 %v16113_v16, %v16113_v16  ;;  %v4282_v36 = vmax.f32 %v4242_v49, 0.0  ;;  %v11705_v57 = vpop.f32.mrb[53].mxu0  ;;  %v3411_v59 = vmul.f32 %v16117_v45, %v16117_v45  ;;  %v16119_v62 = vld [vmem:[#allocation21_spill] sm:$0xff]  ;;  %v3414_v16 = vmul.f32 %v11297_v37, %v11297_v37 }
 0x1a7   : > { %2516 = vxpose.xlu1.b32.start.end [1/1] (short) %v2415_v19, 128  ;;  %v11620_v19 = vpop.f32.mrb[43].mxu1  ;;  %16109 = vst [vmem:[#allocation13_spill] sm:$0xff] %v11693_v40  ;;  %16115 = vst [vmem:[#allocation18_spill] sm:$0xff] %v11705_v57  ;;  %v16118_v40 = vld [vmem:[#allocation20_spill] sm:$0xff]  ;;  %v3413_v18 = vmul.f32 %v16119_v62, %v16119_v62  ;;  %v4296_v49 = vadd.f32 %v4295_v15, %v4294_v21  ;;  %v3441_v45 = vsel %vm2043_vm0, %v3402_v4, %v3398_v30 }
 0x1a8   : > { %v11624_v39 = vpop.f32.mrb[44].mxu1  ;;  %v11721_v57 = vadd.f32 %v4282_v36, %v4278_v31  ;;  %v4324_v55 = vadd.f32 %v4323_v63, %v4322_v5  ;;  %v3408_v62 = vmul.f32 %v11287_v46, %v11287_v46  ;;  %v3412_v15 = vmul.f32 %v11295_v52, %v11295_v52 }
 0x1a9   : > { %v11630_v6 = vpop.f32.mrb[45].mxu1  ;;  %v3445_v63 = vsel %vm2043_vm0, %v3403_v34, %v3399_v32  ;;  %v3416_v30 = vmul.f32 %v11303_v47, %v11303_v47  ;;  %v3449_v32 = vsel %vm2043_vm0, %v3404_v13, %v3400_v53  ;;  %v9645_v53 = vld [vmem:[%s11046_s26 + $0x2] ss:$4 sm:$0xf] }
 0x1aa   : > { %v11638_v2 = vpop.f32.mrb[46].mxu1 }
 0x1ab   : > { %v11646_v58 = vpop.f32.mrb[47].mxu1 }
 0x1ac   : > { %v11650_v17 = vpop.f32.mrb[48].mxu1 }
 0x1ad   : > { %v11656_v10 = vpop.f32.mrb[49].mxu1 }
 0x1ae   : > { %v11668_v48 = vpop.f32.mrb[50].mxu1 }
 0x1af   : > { %16100 = vst [vmem:[#allocation34_spill] sm:$0xff] %v11668_v48  ;;  %v11678_v43 = vpop.f32.mrb[51].mxu1  ;;  %v11717_v48 = vpop.f32.mrb[54].mxu0 }
 0x1b0   : > { %16102 = vst [vmem:[#allocation36_spill] sm:$0xff] %v11678_v43  ;;  %v11687_v7 = vpop.f32.mrb[52].mxu1  ;;  %v11725_v54 = vpop.f32.mrb[55].mxu0 }
 0x1b1   : > { %16106 = vst [vmem:[#allocation24_spill] sm:$0xff] %v11687_v7  ;;  %v11697_v44 = vpop.f32.mrb[53].mxu1  ;;  %v16114_v7 = vld [vmem:[#allocation19_spill] sm:$0xff] }
 0x1b2   : > { %16111 = vst [vmem:[#allocation37_spill] sm:$0xff] %v11697_v44  ;;  %v3409_v43 = vmul.f32 %v16114_v7, %v16114_v7  ;;  %v11707_v23 = vpop.f32.mrb[54].mxu1  ;;  %v3415_v44 = vmul.f32 %v16118_v40, %v16118_v40  ;;  %16120 = vst [vmem:[#allocation19_spill] sm:$0xff] %v11717_v48  ;;  %v3442_v48 = vsel %vm2045_vm1, %v3406_v33, %v3441_v45 }
 0x1b3   : > { %16116 = vst [vmem:[#allocation15_spill] sm:$0xff] %v11707_v23  ;;  %v11719_v7 = vpop.f32.mrb[55].mxu1  ;;  %v3437_v23 = vsel %vm2043_vm0, %v3401_v51, %v3397_v28  ;;  %v3443_v28 = vsel %vm15941_vm2, %v3410_v42, %v3442_v48  ;;  %v3446_v48 = vsel %vm2045_vm1, %v3407_v11, %v3445_v63  ;;  %v3450_v42 = vsel %vm2045_vm1, %v3408_v62, %v3449_v32  ;;  %v10631_v32 = vld [vmem:[%s10924_s22 + $0x140] sm:$0xff]  }
 0x1b4   : > { %16121 = vst [vmem:[#allocation16_spill] sm:$0xff] %v11719_v7  ;;  %v11727_v40 = vpop.f32.mrb[56].mxu1  ;;  %v3438_v37 = vsel %vm2045_vm1, %v3405_v29, %v3437_v23  ;;  %v11733_v7 = vpop.f32.mrb[56].mxu0  ;;  %v3444_v4 = vsel %vm15940_vm3, %v3414_v16, %v3443_v28  ;;  %v11759_v29 = vmul.f32 0.0625, %v4296_v49  ;;  %v3447_v47 = vsel %vm15941_vm2, %v3411_v59, %v3446_v48  ;;  %9922 = vmatprep.subr.bf16.mxu1 %v10631_v32 }
 0x1b5   : > { %v11735_v31 = vpop.f32.mrb[57].mxu1  ;;  %v3439_v21 = vsel %vm15941_vm2, %v3409_v43, %v3438_v37  ;;  %v11742_v5 = vpop.f32.mrb[57].mxu0  ;;  %v3458_v36 = vsel %vm2343_vm10, %v3444_v4, 0.0  ;;  %v11764_v23 = vmul.f32 0.0625, %v4324_v55  ;;  %v3451_v11 = vsel %vm15941_vm2, %v3412_v15, %v3450_v42  ;;  %v16122_v37 = vld [vmem:[#allocation9_spill] sm:$0xff] }
 0x1b6   : > { %v11744_v46 = vpop.f32.mrb[58].mxu1  ;;  %v3440_v51 = vsel %vm15940_vm3, %v3413_v18, %v3439_v21  ;;  %v11750_v33 = vpop.f32.mrb[58].mxu0  ;;  %v3448_v18 = vsel %vm15940_vm3, %v3415_v44, %v3447_v47  ;;  %v3452_v13 = vsel %vm15940_vm3, %v3416_v30, %v3451_v11  ;;  %v11778_v62 = vrot.slane %v9645_v53, %v16091_v12  ;;  %v16123_v21 = vld [vmem:[#allocation11_spill] sm:$0xff] }
 0x1b7   : > { %v11752_v52 = vpop.f32.mrb[59].mxu1  ;;  %v3457_v43 = vsel %vm2343_vm10, %v3440_v51, 0.0  ;;  %v11757_v34 = vpop.f32.mrb[59].mxu0  ;;  %v3460_v49 = vsel %vm2343_vm10, %v3448_v18, 0.0  ;;  %v11774_v59 = vsel %vm2043_vm0, %v11764_v23, %v11759_v29  ;;  %v3462_v55 = vsel %vm2343_vm10, %v3452_v13, 0.0 }
 0x1b8   : > { %v3459_v16 = vadd.f32 %v3458_v36, %v3457_v43  ;;  %v11783_v15 = vrot.slane %v9645_v53, %v16122_v37  ;;  %v11786_v28 = vrot.slane %v9645_v53, %v16123_v21  ;;  %v6705_v63 = vadd.f32 %v11778_v62, %v11602_v41 }
 0x1b9   : > { %v11795_v12 = vrot.slane %v9645_v53, %v16092_v3  ;;  %v6709_v48 = vadd.f32 %v11778_v62, %v11618_v0  ;;  %v6713_v0 = vadd.f32 %v11778_v62, %v11628_v14  ;;  %v4284_v21 = vrot.slane %v11527_v35, 4 }
 0x1ba   : > { %v3461_v45 = vadd.f32 %v3460_v49, %v3459_v16  ;;  %v6707_v30 = vadd.f32 %v11783_v15, %v11604_v9  ;;  %v6708_v51 = vadd.f32 %v11786_v28, %v11608_v22  ;;  %v6745_v4 = vmax.f32 %v6705_v63, 0.0 }
 0x1bb   : > { %v6706_v42 = vadd.f32 %v11795_v12, %v11614_v20  ;;  %v6749_v41 = vmax.f32 %v6709_v48, 0.0  ;;  %v6711_v9 = vadd.f32 %v11783_v15, %v11616_v38  ;;  %v6710_v22 = vadd.f32 %v11795_v12, %v11622_v27 }
 0x1bc   : > { %v11780_v44 = vadd.f32 %v3462_v55, %v3461_v45  ;;  %v6747_v43 = vmax.f32 %v6707_v30, 0.0  ;;  %v6748_v47 = vmax.f32 %v6708_v51, 0.0  ;;  %v6712_v3 = vadd.f32 %v11786_v28, %v11620_v19 }
 0x1bd   : > { %v6746_v36 = vmax.f32 %v6706_v42, 0.0  ;;  %v6715_v18 = vadd.f32 %v11783_v15, %v11624_v39  ;;  %v6716_v20 = vadd.f32 %v11786_v28, %v11630_v6  ;;  %v11814_v11 = vadd.f32 %v6749_v41, %v6745_v4 }
 0x1be   : > { %v6751_v38 = vmax.f32 %v6711_v9, 0.0  ;;  %v6750_v16 = vmax.f32 %v6710_v22, 0.0  ;;  %v6752_v53 = vmax.f32 %v6712_v3, 0.0  ;;  %v6753_v27 = vmax.f32 %v6713_v0, 0.0 }
 0x1bf   : > { %v6714_v19 = vadd.f32 %v11795_v12, %v11636_v50  ;;  %v6755_v45 = vmax.f32 %v6715_v18, 0.0  ;;  %v6717_v6 = vadd.f32 %v11778_v62, %v11644_v26  ;;  %v6719_v55 = vadd.f32 %v11783_v15, %v11638_v2 }
 0x1c0   : > { %v11818_v13 = vadd.f32 %v6751_v38, %v6747_v43  ;;  %v11820_v49 = vadd.f32 %v6750_v16, %v6746_v36  ;;  %v11822_v14 = vadd.f32 %v6752_v53, %v6748_v47  ;;  %v6718_v37 = vadd.f32 %v11795_v12, %v11648_v61 }
 0x1c1   : > { %v6754_v39 = vmax.f32 %v6714_v19, 0.0  ;;  %v4312_v50 = vrot.slane %v11575_v8, 4  ;;  %v4340_v63 = vrot.slane %v11596_v1, 4  ;;  %v6756_v30 = vmax.f32 %v6716_v20, 0.0 }
 0x1c2   : > { %16124 = vst [vmem:[#allocation20_spill] sm:$0xff] %v11818_v13  ;;  %v6757_v51 = vmax.f32 %v6717_v6, 0.0  ;;  %v6759_v4 = vmax.f32 %v6719_v55, 0.0  ;;  %v6758_v48 = vmax.f32 %v6718_v37, 0.0  ;;  %v6720_v32 = vadd.f32 %v11786_v28, %v11646_v58 }
 0x1c3   : > { %v4368_v47 = vrot.slane %v11626_v60, 4  ;;  %v4285_v42 = vadd.f32 %v4284_v21, %v11527_v35  ;;  %v4313_v41 = vadd.f32 %v4312_v50, %v11575_v8  ;;  %v4341_v9 = vadd.f32 %v4340_v63, %v11596_v1  ;;  %v16126_v8 = vld [vmem:[#allocation22_spill] sm:$0xff] }
 0x1c4   : > { %v11835_v26 = vadd.f32 %v6757_v51, %v6753_v27  ;;  %v11837_v43 = vadd.f32 %v6759_v4, %v6755_v45  ;;  %v11839_v2 = vadd.f32 %v6758_v48, %v6754_v39  ;;  %v6760_v61 = vmax.f32 %v6720_v32, 0.0  ;;  %v16127_v50 = vld [vmem:[#allocation14_spill] sm:$0xff]  ;;  %v16128_v32 = vld [vmem:[#allocation33_spill] sm:$0xff] }
 0x1c5   : > { %v4369_v3 = vadd.f32 %v4368_v47, %v11626_v60  ;;  %v4286_v58 = vrot.slane %v4285_v42, 2  ;;  %v4314_v36 = vrot.slane %v4313_v41, 2  ;;  %v4342_v0 = vrot.slane %v4341_v9, 2  ;;  %v16129_v47 = vld [vmem:[#allocation35_spill] sm:$0xff] }
 0x1c6   : > { %16125 = vst [vmem:[#allocation21_spill] sm:$0xff] %v11837_v43  ;;  %v11845_v22 = vadd.f32 %v6760_v61, %v6756_v30  ;;  %v4396_v18 = vrot.slane %v11674_v24, 4  ;;  %v4305_v27 = vrot.slane %v16126_v8, 4  ;;  %v6721_v6 = vadd.f32 %v11778_v62, %v11654_v25 }
 0x1c7   : > { %v4370_v20 = vrot.slane %v4369_v3, 2  ;;  %v4287_v38 = vadd.f32 %v4286_v58, %v4285_v42  ;;  %v4315_v16 = vadd.f32 %v4314_v36, %v4313_v41  ;;  %v4343_v53 = vadd.f32 %v4342_v0, %v4341_v9  ;;  %v16130_v9 = vld [vmem:[#allocation34_spill] sm:$0xff]  ;;  %v16131_v58 = vld [vmem:[#allocation12_spill] sm:$0xff] }
 0x1c8   : > { %v4397_v35 = vadd.f32 %v4396_v18, %v11674_v24  ;;  %v6723_v55 = vadd.f32 %v11783_v15, %v11650_v17  ;;  %v4306_v37 = vadd.f32 %v4305_v27, %v16126_v8  ;;  %v6724_v24 = vadd.f32 %v11786_v28, %v11656_v10  ;;  %v10632_v10 = vld [vmem:[%s10924_s22 + $0x100] sm:$0xff]   ;;  %v16132_v0 = vld [vmem:[#allocation36_spill] sm:$0xff] }
 0x1c9   : > { %v4371_v1 = vadd.f32 %v4370_v20, %v4369_v3  ;;  %v4288_v19 = vrot.slane %v4287_v38, 1  ;;  %v4316_v45 = vrot.slane %v4315_v16, 1  ;;  %v4344_v39 = vrot.slane %v4343_v53, 1  ;;  %v10633_v20 = vld [vmem:[%s10924_s22 + $0x148] sm:$0xff]  }
 0x1ca   : > { %v4398_v60 = vrot.slane %v4397_v35, 2  ;;  %v4333_v63 = vrot.slane %v16127_v50, 4  ;;  %v6761_v48 = vmax.f32 %v6721_v6, 0.0  ;;  %v6722_v61 = vadd.f32 %v11795_v12, %v16128_v32 }
 0x1cb   : > { %v4372_v21 = vrot.slane %v4371_v1, 1  ;;  %v4289_v51 = vadd.f32 %v4288_v19, %v4287_v38  ;;  %v4317_v4 = vadd.f32 %v4316_v45, %v4315_v16  ;;  %v4345_v25 = vadd.f32 %v4344_v39, %v4343_v53 }
 0x1cc   : > { %v4399_v17 = vadd.f32 %v4398_v60, %v4397_v35  ;;  %v6725_v42 = vadd.f32 %v11778_v62, %v16129_v47  ;;  %v6763_v41 = vmax.f32 %v6723_v55, 0.0  ;;  %v6727_v3 = vadd.f32 %v11783_v15, %v16130_v9  ;;  %v10636_v9 = vld [vmem:[%s10924_s22 + $0x110] sm:$0xff]  }
 0x1cd   : > { %v6726_v36 = vadd.f32 %v11795_v12, %v16131_v58  ;;  %v6728_v18 = vadd.f32 %v11786_v28, %v16132_v0  ;;  %v6764_v16 = vmax.f32 %v6724_v24, 0.0  ;;  %v6762_v53 = vmax.f32 %v6722_v61, 0.0  ;;  %v16134_v58 = vld [vmem:[#allocation23_spill] sm:$0xff]  ;;  %v10637_v0 = vld [vmem:[%s10924_s22 + $0x158] sm:$0xff]  }
 0x1ce   : > { %v6765_v35 = vmax.f32 %v6725_v42, 0.0  ;;  %v4373_v8 = vadd.f32 %v4372_v21, %v4371_v1  ;;  %v4307_v27 = vrot.slane %v4306_v37, 2  ;;  %v11874_v19 = vmul.f32 0.0625, %v4289_v51 }
 0x1cf   : > { %v6767_v39 = vmax.f32 %v6727_v3, 0.0  ;;  %v6766_v60 = vmax.f32 %v6726_v36, 0.0  ;;  %v11877_v6 = vmul.f32 0.0625, %v4317_v4  ;;  %v4400_v24 = vrot.slane %v4399_v17, 1  ;;  %v10635_v4 = vld [vmem:[%s10924_s22 + $0x150] sm:$0xff]  }
 0x1d0   : > { %v11880_v55 = vadd.f32 %v6765_v35, %v6761_v48  ;;  %v4334_v1 = vadd.f32 %v4333_v63, %v16127_v50  ;;  %v11884_v21 = vmul.f32 0.0625, %v4345_v25  ;;  %v11893_v42 = vmul.f32 0.0625, %v4373_v8 }
 0x1d1   : > { %v11886_v51 = vadd.f32 %v6767_v39, %v6763_v41  ;;  %v11888_v32 = vadd.f32 %v6766_v60, %v6762_v53  ;;  %v4401_v48 = vadd.f32 %v4400_v24, %v4399_v17  ;;  %v4924_v50 = vsel %vm2043_vm0, %v11877_v6, %v11874_v19  ;;  %v16136_v53 = vld [vmem:[#allocation17_spill] sm:$0xff]  ;;  %v10638_v39 = vld [vmem:[%s10924_s22 + $0x118] sm:$0xff]   ;;  %v10639_v24 = vld [vmem:[%s10924_s22 + $0x160] sm:$0xff]  }
 0x1d2   : > { %v4925_v25 = vsel %vm2045_vm1, %v11884_v21, %v4924_v50  ;;  %v4335_v3 = vrot.slane %v4334_v1, 2  ;;  %v4361_v36 = vrot.slane %v16134_v58, 4  ;;  %v6729_v35 = vadd.f32 %v11778_v62, %v16136_v53 }
 0x1d3   : > { %16133 = vst [vmem:[#allocation9_spill] sm:$0xff] %v11886_v51  ;;  %v11902_v41 = vmul.f32 0.0625, %v4401_v48  ;;  %v4926_v17 = vsel %vm15941_vm2, %v11893_v42, %v4925_v25  ;;  %v16139_v25 = vld [vmem:[#allocation37_spill] sm:$0xff] }
 0x1d4   : > { %v4336_v60 = vadd.f32 %v4335_v3, %v4334_v1  ;;  %v16141_v3 = vld [vmem:[#allocation15_spill] sm:$0xff] }
 0x1d6   : > { %v4337_v53 = vrot.slane %v4336_v60, 1 }
 0x1e3   : > { %5008 = vxpose.xlu0.b32.start.end [1/1] (short) %v11573_v56, 128 }
 0x1e9   : > { %v2500_v56 = vpop.trf.xlu0 }
 0x1ea   : > { %v2436_v30 = vpop.trf.xlu1  ;;  %10190 = vmatprep.mubr.msk.f32.mxu1 %vm15939_vm11, %v2500_v56  ;;  %v6768_v56 = vmax.f32 %v6728_v18, 0.0 }
 0x1eb   : > { %10142 = vmatprep.mubr.msk.f32.mxu0 %vm15939_vm11, %v2436_v30  ;;  %v10634_v30 = vld [vmem:[%s10924_s22 + $0x108] sm:$0xff]  }
 0x1ec   : > { %v11891_v47 = vadd.f32 %v6768_v56, %v6764_v16  ;;  %v4362_v56 = vadd.f32 %v4361_v36, %v16134_v58  ;;  %v6735_v58 = vadd.f32 %v11783_v15, %v16141_v3 }
 0x1ed   : > { %v2501_v38 = vpop.trf.xlu0 }
 0x1ee   : > { %v2437_v45 = vpop.trf.xlu1  ;;  %10191 = vmatmul.mubr.msk.f32.vlgmr.msra.gmra.mrb[64].mxu1 %vm15939_vm11, %v2501_v38  ;;  %v11913_v38 = vsel %vm15940_vm3, %v11902_v41, %v4926_v17  ;;  %v6732_v17 = vadd.f32 %v11786_v28, %v16139_v25  ;;  %v10641_v25 = vld [vmem:[%s10924_s22 + $0x168] sm:$0xff]  }
 0x1ef   : > { %10143 = vmatmul.mubr.msk.f32.vlgmr.msra.gmra.mrb[64].mxu0 %vm15939_vm11, %v2437_v45  ;;  %9923 = vmatpush3.bf16.msra.mxu1 %v10632_v10  ;;  %v4308_v10 = vadd.f32 %v4307_v27, %v4306_v37  ;;  %v16137_v27 = vld [vmem:[#allocation18_spill] sm:$0xff] }
 0x1f0   : > { %9924 = vmatprep.subr.bf16.mxu1 %v10633_v20  ;;  %v16135_v20 = vld [vmem:[#allocation24_spill] sm:$0xff]  ;;  %v6730_v45 = vadd.f32 %v11795_v12, %v16137_v27 }
 0x1f1   : > { %v2502_v61 = vpop.trf.xlu0  ;;  %v6731_v37 = vadd.f32 %v11783_v15, %v16135_v20  ;;  %v4309_v8 = vrot.slane %v4308_v10, 1  ;;  %v16142_v20 = vld [vmem:[#allocation16_spill] sm:$0xff] }
 0x1f2   : > { %v2438_v63 = vpop.trf.xlu1  ;;  %10193 = vmatprep.mubr.msk.f32.mxu1 %vm15939_vm11, %v2502_v61 }
 0x1f3   : > { %10145 = vmatprep.mubr.msk.f32.mxu0 %vm15939_vm11, %v2438_v63  ;;  %9925 = vmatpush3.bf16.msra.mxu1 %v10634_v30  ;;  %v16138_v30 = vld [vmem:[#allocation25_spill] sm:$0xff]  ;;  %v6771_v48 = vmax.f32 %v6731_v37, 0.0  ;;  %v6769_v63 = vmax.f32 %v6729_v35, 0.0  ;;  %v4310_v36 = vadd.f32 %v4309_v8, %v4308_v10  ;;  %v6736_v37 = vadd.f32 %v11786_v28, %v16142_v20  ;;  %v16143_v10 = vld [vmem:[#allocation31_spill] sm:$0xff] }
 0x1f4   : > { %9926 = vmatprep.subr.bf16.mxu1 %v10635_v4  ;;  %v4389_v4 = vrot.slane %v16138_v30, 4  ;;  %v4363_v35 = vrot.slane %v4362_v56, 2  ;;  %v4347_v8 = vrot.slane %v16143_v10, 4 }
 0x1f5   : > { %v2503_v18 = vpop.trf.xlu0 }
 0x1f6   : > { %v2439_v16 = vpop.trf.xlu1  ;;  %10194 = vmatmul.mubr.msk.f32.gmra.mrb[66].mxu1 %vm15939_vm11, %v2503_v18  ;;  %v6734_v18 = vadd.f32 %v11795_v12, %v11725_v54 }
 0x1f7   : > { %10146 = vmatmul.mubr.msk.f32.gmra.mrb[66].mxu0 %vm15939_vm11, %v2439_v16  ;;  %9927 = vmatpush3.bf16.msra.mxu1 %v10636_v9  ;;  %v16140_v9 = vld [vmem:[#allocation19_spill] sm:$0xff] }
 0x1f8   : > { %9928 = vmatprep.subr.bf16.mxu1 %v10637_v0  ;;  %v6733_v1 = vadd.f32 %v11778_v62, %v16140_v9  ;;  %v6770_v0 = vmax.f32 %v6730_v45, 0.0  ;;  %v10640_v16 = vld [vmem:[%s10924_s22 + $0x120] sm:$0xff]   ;;  %v4390_v9 = vadd.f32 %v4389_v4, %v16138_v30  ;;  %v4417_v45 = vrot.slane %v11721_v57, 4 }
 0x1f9   : > { %v2504_v61 = vpop.trf.xlu0  ;;  %v6774_v54 = vmax.f32 %v6734_v18, 0.0  ;;  %v11952_v4 = vadd.f32 %v4363_v35, %v4362_v56  ;;  %v16145_v18 = vld [vmem:[#allocation32_spill] sm:$0xff] }
 0x1fa   : > { %v2440_v50 = vpop.trf.xlu1  ;;  %10196 = vmatprep.mubr.msk.f32.mxu1 %vm15939_vm11, %v2504_v61  ;;  %v6773_v27 = vmax.f32 %v6733_v1, 0.0  ;;  %v6775_v61 = vmax.f32 %v6735_v58, 0.0  ;;  %v11947_v58 = vmul.f32 0.0625, %v4310_v36  ;;  %v4375_v51 = vrot.slane %v16145_v18, 4 }
 0x1fb   : > { %10148 = vmatprep.mubr.msk.f32.mxu0 %vm15939_vm11, %v2440_v50  ;;  %9929 = vmatpush3.bf16.msra.mxu1 %v10638_v39  ;;  %v6772_v39 = vmax.f32 %v6732_v17, 0.0  ;;  %v11950_v30 = vadd.f32 %v6774_v54, %v6770_v0  ;;  %v10642_v17 = vld [vmem:[%s10924_s22 + $0x128] sm:$0xff]   ;;  %v4348_v36 = vadd.f32 %v4347_v8, %v16143_v10  ;;  %v10660_v54 = vld [vmem:[%s10924_s22 + $0x240] sm:$0xff]   ;;  %v6739_v10 = vadd.f32 %v11783_v15, %v11727_v40 }
 0x1fc   : > { %9930 = vmatprep.subr.bf16.mxu1 %v10639_v24  ;;  %v11943_v20 = vadd.f32 %v6773_v27, %v6769_v63  ;;  %v11945_v1 = vadd.f32 %v6775_v61, %v6771_v48  ;;  %v6776_v24 = vmax.f32 %v6736_v37, 0.0  ;;  %v16146_v63 = vld [vmem:[#allocation26_spill] sm:$0xff]  ;;  %v4338_v48 = vadd.f32 %v4337_v53, %v4336_v60  ;;  %10031 = vmatprep.subr.bf16.mxu0 %v10660_v54 }
 0x1fd   : > { %v2505_v50 = vpop.trf.xlu0  ;;  %v4391_v61 = vrot.slane %v4390_v9, 2  ;;  %v11970_v60 = vmul.f32 %v16146_v63, %v16146_v63  ;;  %v4376_v8 = vadd.f32 %v4375_v51, %v16145_v18  ;;  %v10645_v51 = vld [vmem:[%s10924_s22 + $0x178] sm:$0xff]   ;;  %v10662_v18 = vld [vmem:[%s10924_s22 + $0x200] sm:$0xff]  }
 0x1fe   : > { %v2441_v3 = vpop.trf.xlu1  ;;  %10197 = vmatmul.mubr.msk.f32.gmra.mrb[68].mxu1 %vm15939_vm11, %v2505_v50  ;;  %16144 = vst [vmem:[#allocation11_spill] sm:$0xff] %v11945_v1  ;;  %v10643_v50 = vld [vmem:[%s10924_s22 + $0x170] sm:$0xff]   ;;  %v11963_v35 = vadd.f32 %v6776_v24, %v6772_v39  ;;  %v6738_v39 = vadd.f32 %v11795_v12, %v11742_v5  ;;  %v11990_v53 = vmul.f32 0.0625, %v4338_v48  ;;  %v6741_v48 = vadd.f32 %v11778_v62, %v11750_v33  ;;  %v10646_v33 = vld [vmem:[%s10924_s22 + $0x138] sm:$0xff]  }
 0x1ff   : > { %10149 = vmatmul.mubr.msk.f32.gmra.mrb[68].mxu0 %vm15939_vm11, %v2441_v3  ;;  %9931 = vmatpush3.bf16.msra.mxu1 %v10640_v16  ;;  %v16147_v3 = vld [vmem:[#allocation13_spill] sm:$0xff]  ;;  %v4418_v16 = vadd.f32 %v4417_v45, %v11721_v57  ;;  %v11976_v57 = vmul.f32 %v11947_v58, %v11947_v58  ;;  %v6740_v45 = vadd.f32 %v11786_v28, %v11735_v31 }
 0x200   : > { %9932 = vmatprep.subr.bf16.mxu1 %v10641_v25  ;;  %v4403_v0 = vrot.slane %v16147_v3, 4  ;;  %v6737_v25 = vadd.f32 %v11778_v62, %v11733_v7  ;;  %v10644_v24 = vld [vmem:[%s10924_s22 + $0x130] sm:$0xff]   ;;  %v11992_v40 = vadd.f32 %v4391_v61, %v4390_v9  ;;  %v4349_v7 = vrot.slane %v4348_v36, 2  ;;  %10032 = vmatpush3.bf16.msra.mxu0 %v10662_v18 }
 0x201   : > { %v2506_v37 = vpop.trf.xlu0  ;;  %v4419_v5 = vrot.slane %v4418_v16, 2  ;;  %v6779_v9 = vmax.f32 %v6739_v10, 0.0  ;;  %v6778_v61 = vmax.f32 %v6738_v39, 0.0  ;;  %v6780_v1 = vmax.f32 %v6740_v45, 0.0 }
 0x202   : > { %v2442_v56 = vpop.trf.xlu1  ;;  %10199 = vmatprep.mubr.msk.f32.mxu1 %vm15939_vm11, %v2506_v37  ;;  %v16148_v37 = vld [vmem:[#allocation27_spill] sm:$0xff]  ;;  %v11997_v31 = vadd.f32 %v4403_v0, %v16147_v3  ;;  %v6777_v54 = vmax.f32 %v6737_v25, 0.0  ;;  %v6742_v3 = vadd.f32 %v11795_v12, %v11757_v34  ;;  %v4377_v0 = vrot.slane %v4376_v8, 2  ;;  %v10666_v34 = vld [vmem:[%s10924_s22 + $0x208] sm:$0xff]  }
 0x203   : > { %10151 = vmatprep.mubr.msk.f32.mxu0 %vm15939_vm11, %v2442_v56  ;;  %9933 = vmatpush3.bf16.msra.mxu1 %v10642_v17  ;;  %v10664_v56 = vld [vmem:[%s10924_s22 + $0x248] sm:$0xff]   ;;  %v6744_v25 = vadd.f32 %v11786_v28, %v11752_v52  ;;  %v4444_v62 = vpack.c.bf16 %v11759_v29, %v11759_v29  ;;  %v4350_v10 = vadd.f32 %v4349_v7, %v4348_v36 }
 0x204   : > { %9934 = vmatprep.subr.bf16.mxu1 %v10643_v50  ;;  %v6743_v50 = vadd.f32 %v11783_v15, %v11744_v46  ;;  %v6782_v46 = vmax.f32 %v6742_v3, 0.0  ;;  %v10647_v15 = vld [vmem:[%s10924_s22 + $0x1c0] sm:$0xff]   ;;  %10033 = vmatprep.subr.bf16.mxu0 %v10664_v56  ;;  %v4448_v12 = vpack.c.bf16 %v11764_v23, %v11764_v23  ;;  %v4420_v45 = vadd.f32 %v4419_v5, %v4418_v16 }
 0x205   : > { %v2507_v27 = vpop.trf.xlu0  ;;  %v6784_v28 = vmax.f32 %v6744_v25, 0.0  ;;  %v4443_v36 = vpack.c.bf16 %v11874_v19, %v11874_v19  ;;  %v4405_v7 = vrot.slane %v11997_v31, 2  ;;  %v4378_v18 = vadd.f32 %v4377_v0, %v4376_v8  ;;  %10034 = vmatpush3.bf16.msra.mxu0 %v10666_v34 }
 0x206   : > { %v2443_v17 = vpop.trf.xlu1  ;;  %10200 = vmatmul.mubr.msk.f32.gmra.mrb[70].mxu1 %vm15939_vm11, %v2507_v27  ;;  %v6781_v27 = vmax.f32 %v6741_v48, 0.0  ;;  %v12027_v16 = vadd.f32 %v6782_v46, %v6778_v61  ;;  %v4393_v61 = vrot.slane %v11992_v40, 1  ;;  %v4554_v8 = vunpack.c.l.b16 %v4444_v62 }
 0x207   : > { %10152 = vmatmul.mubr.msk.f32.gmra.mrb[70].mxu0 %vm15939_vm11, %v2443_v17  ;;  %9935 = vmatpush3.bf16.msra.mxu1 %v10644_v24  ;;  %v6783_v17 = vmax.f32 %v6743_v50, 0.0  ;;  %v12036_v5 = vadd.f32 %v6784_v28, %v6780_v1  ;;  %v4351_v50 = vrot.slane %v4350_v10, 1  ;;  %v4558_v1 = vunpack.c.l.b16 %v4448_v12 }
 0x208   : > { %9936 = vmatprep.subr.bf16.mxu1 %v10645_v51  ;;  %v12019_v52 = vadd.f32 %v6781_v27, %v6777_v54  ;;  %v4447_v51 = vpack.c.bf16 %v11877_v6, %v11877_v6  ;;  %v10667_v54 = vld [vmem:[%s10924_s22 + $0x250] sm:$0xff]   ;;  %v4421_v0 = vrot.slane %v4420_v45, 1  ;;  %v16153_v34 = vrot.slane %v11952_v4, 1 }
 0x209   : > { %v2508_v39 = vpop.trf.xlu0  ;;  %v12025_v24 = vadd.f32 %v6783_v17, %v6779_v9  ;;  %16151 = vst [vmem:[#allocation14_spill] sm:$0xff] %v12036_v5  ;;  %v12041_v9 = vmul.f32 %v16148_v37, %v16148_v37  ;;  %v10668_v27 = vld [vmem:[%s10924_s22 + $0x210] sm:$0xff]   ;;  %v16152_v17 = vpack.c.bf16 %v11947_v58, %v11947_v58  ;;  %v4406_v62 = vadd.f32 %v4405_v7, %v11997_v31  ;;  %v10671_v5 = vld [vmem:[%s10924_s22 + $0x260] sm:$0xff]  }
 0x20a   : > { %v2444_v48 = vpop.trf.xlu1  ;;  %3464 = vadd.xlane.f32.xlu1 %v11780_v44  ;;  %10202 = vmatprep.mubr.msk.f32.mxu1 %vm15939_vm11, %v2508_v39  ;;  %v16150_v44 = vpack.c.bf16 %v16146_v63, %v16146_v63  ;;  %v4451_v63 = vpack.c.bf16 %v11884_v21, %v11884_v21  ;;  %v10669_v39 = vld [vmem:[%s10924_s22 + $0x258] sm:$0xff]   ;;  %v4459_v12 = vpack.c.bf16 %v11902_v41, %v11902_v41  ;;  %v4553_v28 = vunpack.c.l.b16 %v4443_v36 }
 0x20b   : > { %10154 = vmatprep.mubr.msk.f32.mxu0 %vm15939_vm11, %v2444_v48  ;;  %16149 = vst [vmem:[#allocation22_spill] sm:$0xff] %v12025_v24  ;;  %9937 = vmatpush3.bf16.msra.mxu1 %v10646_v33  ;;  %v4455_v33 = vpack.c.bf16 %v11893_v42, %v11893_v42  ;;  %v12054_v46 = vunpack.c.l.b16 %v16152_v17  ;;  %v4450_v48 = vpack.c.bf16 %v11990_v53, %v11990_v53  ;;  %v16154_v24 = vld [vmem:[#allocation28_spill] sm:$0xff] }
 0x20c   : > { %v12032_v56 = vunpack.c.l.b16 %v16150_v44  ;;  %9944 = vmatprep.subr.bf16.mxu1 %v10647_v15  ;;  %v4366_v15 = vadd.f32 %v16153_v34, %v11952_v4  ;;  %v4557_v44 = vunpack.c.l.b16 %v4447_v51  ;;  %10035 = vmatprep.subr.bf16.mxu0 %v10667_v54  ;;  %v12067_v17 = vmul.f32 %v11990_v53, %v11990_v53  ;;  %v10670_v34 = vld [vmem:[%s10924_s22 + $0x218] sm:$0xff]  }
 0x20d   : > { %v2509_v3 = vpop.trf.xlu0  ;;  %v4394_v4 = vadd.f32 %v4393_v61, %v11992_v40  ;;  %v4561_v31 = vunpack.c.l.b16 %v4451_v63  ;;  %v4352_v7 = vadd.f32 %v4351_v50, %v4350_v10  ;;  %10036 = vmatpush3.bf16.msra.mxu0 %v10668_v27  ;;  %v4453_v43 = vpack.c.bf16 %v16154_v24, %v16154_v24  ;;  %v16156_v27 = vld [vmem:[#allocation8_spill] sm:$0xff] }
 0x20e   : > { %v2445_v25 = vpop.trf.xlu1  ;;  %10203 = vmatmul.mubr.msk.f32.gmra.mrb[72].mxu1 %vm15939_vm11, %v2509_v3  ;;  %v4379_v3 = vrot.slane %v4378_v18, 1  ;;  %v4422_v13 = vadd.f32 %v4421_v0, %v4420_v45  ;;  %v4565_v51 = vunpack.c.l.b16 %v4455_v33  ;;  %v12075_v54 = vsel %vm2043_vm0, %v4558_v1, %v4554_v8  ;;  %10037 = vmatprep.subr.bf16.mxu0 %v10669_v39 }
 0x20f   : > { %10155 = vmatmul.mubr.msk.f32.gmra.mrb[72].mxu0 %vm15939_vm11, %v2445_v25  ;;  %v16155_v40 = vpack.c.bf16 %v16148_v37, %v16148_v37  ;;  %v12081_v61 = vmul.f32 0.0625, %v4366_v15  ;;  %v4407_v63 = vrot.slane %v4406_v62, 1  ;;  %v4569_v50 = vunpack.c.l.b16 %v4459_v12 }
 0x210   : > { %v4560_v45 = vunpack.c.l.b16 %v4450_v48  ;;  %v4457_v0 = vpack.c.bf16 %v16156_v27, %v16156_v27  ;;  %v4380_v33 = vadd.f32 %v4379_v3, %v4378_v18  ;;  %v4573_v8 = vsel %vm2043_vm0, %v4557_v44, %v4553_v28  ;;  %v10672_v48 = vld [vmem:[%s10924_s22 + $0x220] sm:$0xff]  }
 0x211   : > { %v2510_v25 = vpop.trf.xlu0  ;;  %v4559_v10 = vunpack.c.l.b16 %v16155_v40  ;;  %v12087_v1 = vmul.f32 0.0625, %v4394_v4  ;;  %v12091_v37 = vmul.f32 %v16154_v24, %v16154_v24  ;;  %v12093_v39 = vmul.f32 0.0625, %v4352_v7  ;;  %10038 = vmatpush3.bf16.msra.mxu0 %v10670_v34  ;;  %v10673_v24 = vld [vmem:[%s10924_s22 + $0x268] sm:$0xff]  }
 0x212   : > { %v2446_v36 = vpop.trf.xlu1  ;;  %10205 = vmatprep.mubr.msk.f32.mxu1 %vm15939_vm11, %v2510_v25  ;;  %v4574_v12 = vsel %vm2045_vm1, %v4561_v31, %v4573_v8  ;;  %v16157_v25 = vld [vmem:[#allocation30_spill] sm:$0xff]  ;;  %v4563_v18 = vunpack.c.l.b16 %v4453_v43  ;;  %v12099_v3 = vmul.f32 0.0625, %v4422_v13  ;;  %10039 = vmatprep.subr.bf16.mxu0 %v10671_v5  ;;  %v12106_v4 = vmul.f32 %v16156_v27, %v16156_v27 }
 0x213   : > { %10157 = vmatprep.mubr.msk.f32.mxu0 %vm15939_vm11, %v2446_v36  ;;  %v4461_v36 = vpack.c.bf16 %v16157_v25, %v16157_v25  ;;  %v4575_v44 = vsel %vm15941_vm2, %v4565_v51, %v4574_v12  ;;  %v4408_v31 = vadd.f32 %v4407_v63, %v4406_v62  ;;  %v4929_v7 = vsel %vm2045_vm1, %v12093_v39, %v11774_v59 }
 0x214   : > { %v12113_v13 = vsel %vm15940_vm3, %v4569_v50, %v4575_v44  ;;  %v4567_v43 = vunpack.c.l.b16 %v4457_v0  ;;  %v5905_v34 = vmul.f32 %v11874_v19, %v11874_v19  ;;  %v5906_v5 = vmul.f32 %v11759_v29, %v11759_v29 }
 0x215   : > { %v2511_v15 = vpop.trf.xlu0  ;;  %v12119_v51 = vmul.f32 0.0625, %v4380_v33  ;;  %v5909_v62 = vmul.f32 %v11877_v6, %v11877_v6  ;;  %v5910_v59 = vmul.f32 %v11764_v23, %v11764_v23  ;;  %v4454_v63 = vpack.c.bf16 %v12081_v61, %v12081_v61  ;;  %10040 = vmatpush3.bf16.msra.mxu0 %v10672_v48 }
 0x216   : > { %v2447_v28 = vpop.trf.xlu1  ;;  %10206 = vmatmul.mubr.msk.f32.gmra.mrb[74].mxu1 %vm15939_vm11, %v2511_v15  ;;  %v4458_v50 = vpack.c.bf16 %v12087_v1, %v12087_v1  ;;  %v4571_v19 = vunpack.c.l.b16 %v4461_v36  ;;  %v5913_v29 = vmul.f32 %v11884_v21, %v11884_v21  ;;  %v4462_v23 = vpack.c.bf16 %v12099_v3, %v12099_v3  ;;  %10041 = vmatprep.subr.bf16.mxu0 %v10673_v24 }
 0x217   : > { %10158 = vmatmul.mubr.msk.f32.gmra.mrb[74].mxu0 %vm15939_vm11, %v2447_v28  ;;  %v4930_v0 = vsel %vm15941_vm2, %v12119_v51, %v4929_v7  ;;  %v12136_v6 = vmul.f32 0.0625, %v4408_v31  ;;  %v4564_v33 = vunpack.c.l.b16 %v4454_v63  ;;  %v4585_v15 = vsel %vm2043_vm0, %v4560_v45, %v12054_v46 }
 0x218   : > { %v4568_v8 = vunpack.c.l.b16 %v4458_v50  ;;  %v5914_v21 = vmul.f32 %v12093_v39, %v12093_v39  ;;  %v5918_v12 = vmul.f32 %v12119_v51, %v12119_v51  ;;  %v4572_v48 = vunpack.c.l.b16 %v4462_v23 }
 0x219   : > { %v2512_v40 = vpop.trf.xlu0  ;;  %v4936_v36 = vsel %vm2043_vm0, %v11990_v53, %v11947_v58  ;;  %v4931_v44 = vsel %vm15940_vm3, %v12136_v6, %v4930_v0  ;;  %v4586_v24 = vsel %vm2045_vm1, %v4564_v33, %v4585_v15  ;;  %v4581_v45 = vsel %vm2043_vm0, %v4559_v10, %v12032_v56 }
 0x21a   : > { %v2448_v27 = vpop.trf.xlu1  ;;  %10208 = vmatprep.mubr.msk.f32.mxu1 %vm15939_vm11, %v2512_v40  ;;  %v4937_v46 = vsel %vm2045_vm1, %v12081_v61, %v4936_v36  ;;  %v5917_v7 = vmul.f32 %v11893_v42, %v11893_v42  ;;  %v4587_v58 = vsel %vm15941_vm2, %v4568_v8, %v4586_v24  ;;  %v4582_v40 = vsel %vm2045_vm1, %v4563_v18, %v4581_v45  ;;  %v10678_v45 = vld [vmem:[%s10924_s22 + $0x238] sm:$0xff]  }
 0x21b   : > { %10160 = vmatprep.mubr.msk.f32.mxu0 %vm15939_vm11, %v2448_v27  ;;  %v4938_v53 = vsel %vm15941_vm2, %v12087_v1, %v4937_v46  ;;  %v5922_v63 = vmul.f32 %v12136_v6, %v12136_v6  ;;  %v12166_v56 = vsel %vm15940_vm3, %v4572_v48, %v4587_v58  ;;  %v4583_v10 = vsel %vm15941_vm2, %v4567_v43, %v4582_v40  ;;  %v10676_v48 = vld [vmem:[%s10924_s22 + $0x230] sm:$0xff]  }
 0x21c   : > { %v12170_v42 = vsel %vm15940_vm3, %v12099_v3, %v4938_v53  ;;  %v5921_v50 = vmul.f32 %v11902_v41, %v11902_v41  ;;  %v12176_v27 = vsel %vm15940_vm3, %v4571_v19, %v4583_v10  ;;  %v5945_v18 = vsel %vm2043_vm0, %v5909_v62, %v5905_v34  ;;  %v10679_v53 = vld [vmem:[%s10924_s22 + $0x2c0] sm:$0xff]  }
 0x21d   : > { %v2513_v28 = vpop.trf.xlu0  ;;  %v5949_v0 = vsel %vm2043_vm0, %v5910_v59, %v5906_v5  ;;  %v5916_v23 = vmul.f32 %v12081_v61, %v12081_v61  ;;  %v5946_v8 = vsel %vm2045_vm1, %v5913_v29, %v5945_v18  ;;  %v5953_v41 = vsel %vm2043_vm0, %v12041_v9, %v11970_v60  ;;  %v10674_v59 = vld [vmem:[%s10924_s22 + $0x228] sm:$0xff]   ;;  %v10675_v29 = vld [vmem:[%s10924_s22 + $0x270] sm:$0xff]  }
 0x21e   : > { %v2449_v31 = vpop.trf.xlu1  ;;  %10209 = vmatmul.mubr.msk.f32.gmra.mrb[76].mxu1 %vm15939_vm11, %v2513_v28  ;;  %v5950_v43 = vsel %vm2045_vm1, %v5914_v21, %v5949_v0  ;;  %v5923_v19 = vmul.f32 %v16157_v25, %v16157_v25  ;;  %v5947_v5 = vsel %vm15941_vm2, %v5917_v7, %v5946_v8  ;;  %v5954_v62 = vsel %vm2045_vm1, %v12091_v37, %v5953_v41 }
 0x21f   : > { %10161 = vmatmul.mubr.msk.f32.gmra.mrb[76].mxu0 %vm15939_vm11, %v2449_v31  ;;  %v5951_v61 = vsel %vm15941_vm2, %v5918_v12, %v5950_v43  ;;  %v5920_v60 = vmul.f32 %v12087_v1, %v12087_v1  ;;  %v5957_v9 = vsel %vm2043_vm0, %v12067_v17, %v11976_v57  ;;  %v5924_v25 = vmul.f32 %v12099_v3, %v12099_v3  ;;  %v10677_v1 = vld [vmem:[%s10924_s22 + $0x278] sm:$0xff]  }
 0x220   : > { %v5948_v15 = vsel %vm15940_vm3, %v5921_v50, %v5947_v5  ;;  %v5952_v21 = vsel %vm15940_vm3, %v5922_v63, %v5951_v61  ;;  %v5955_v37 = vsel %vm15941_vm2, %v12106_v4, %v5954_v62  ;;  %10042 = vmatpush3.bf16.msra.mxu0 %v10674_v59  ;;  %v5958_v17 = vsel %vm2045_vm1, %v5916_v23, %v5957_v9 }
 0x221   : > { %v2514_v33 = vpop.trf.xlu0  ;;  %4976 = vxpose.xlu0.b32.start.end [1/1] (short) %v4931_v44, 128  ;;  %10043 = vmatprep.subr.bf16.mxu0 %v10675_v29  ;;  %v5956_v57 = vsel %vm15940_vm3, %v5923_v19, %v5955_v37  ;;  %v5965_v3 = vsel %vm2343_vm10, %v5948_v15, 0.0  ;;  %v5959_v4 = vsel %vm15941_vm2, %v5920_v60, %v5958_v17  ;;  %v5966_v28 = vsel %vm2343_vm10, %v5952_v21, 0.0 }
 0x222   : > { %v2450_v34 = vpop.trf.xlu1  ;;  %10211 = vmatprep.mubr.msk.f32.mxu1 %vm15939_vm11, %v2514_v33  ;;  %v5960_v44 = vsel %vm15940_vm3, %v5924_v25, %v5959_v4  ;;  %v5967_v24 = vadd.f32 %v5966_v28, %v5965_v3  ;;  %v5968_v31 = vsel %vm2343_vm10, %v5956_v57, 0.0  ;;  %v6786_v23 = vrot.slane %v11814_v11, 4 }
 0x223   : > { %10163 = vmatprep.mubr.msk.f32.mxu0 %vm15939_vm11, %v2450_v34  ;;  %v5970_v7 = vsel %vm2343_vm10, %v5960_v44, 0.0  ;;  %v6793_v33 = vrot.slane %v11820_v49, 4  ;;  %v6807_v8 = vrot.slane %v11822_v14, 4  ;;  %v6821_v34 = vrot.slane %v11839_v2, 4 }
 0x224   : > { %10044 = vmatpush3.bf16.msra.mxu0 %v10676_v48  ;;  %v5969_v40 = vadd.f32 %v5968_v31, %v5967_v24  ;;  %v6787_v41 = vadd.f32 %v6786_v23, %v11814_v11  ;;  %v6849_v62 = vrot.slane %v11888_v32, 4  ;;  %v6814_v60 = vrot.slane %v11835_v26, 4 }
 0x225   : > { %v2515_v12 = vpop.trf.xlu0  ;;  %10045 = vmatprep.subr.bf16.mxu0 %v10677_v1  ;;  %v6794_v5 = vadd.f32 %v6793_v33, %v11820_v49  ;;  %v6808_v61 = vadd.f32 %v6807_v8, %v11822_v14  ;;  %v6822_v9 = vadd.f32 %v6821_v34, %v11839_v2  ;;  %v6835_v15 = vrot.slane %v11845_v22, 4 }
 0x226   : > { %v2451_v36 = vpop.trf.xlu1  ;;  %10212 = vmatmul.mubr.msk.f32.gmra.mrb[78].mxu1 %vm15939_vm11, %v2515_v12  ;;  %v12224_v63 = vadd.f32 %v5970_v7, %v5969_v40  ;;  %v6788_v29 = vrot.slane %v6787_v41, 2  ;;  %v6877_v21 = vrot.slane %v11950_v30, 4  ;;  %v6842_v14 = vrot.slane %v11880_v55, 4 }
 0x227   : > { %10164 = vmatmul.mubr.msk.f32.gmra.mrb[78].mxu0 %vm15939_vm11, %v2451_v36  ;;  %v6795_v25 = vrot.slane %v6794_v5, 2  ;;  %v6809_v49 = vrot.slane %v6808_v61, 2  ;;  %v6850_v37 = vadd.f32 %v6849_v62, %v11888_v32  ;;  %v6815_v2 = vadd.f32 %v6814_v60, %v11835_v26 }
 0x228   : > { %16158 = vst [vmem:[#allocation33_spill] sm:$0xff] %v12224_v63  ;;  %10046 = vmatpush3.bf16.msra.mxu0 %v10678_v45  ;;  %v6789_v48 = vadd.f32 %v6788_v29, %v6787_v41  ;;  %v6823_v36 = vrot.slane %v6822_v9, 2  ;;  %v6863_v1 = vrot.slane %v11891_v47, 4  ;;  %v6836_v3 = vadd.f32 %v6835_v15, %v11845_v22 }
 0x229   : > { %v2468_v46 = vpop.trf.xlu0  ;;  %10053 = vmatprep.subr.bf16.mxu0 %v10679_v53  ;;  %v6796_v17 = vadd.f32 %v6795_v25, %v6794_v5  ;;  %v6905_v4 = vrot.slane %v12027_v16, 4  ;;  %v6810_v32 = vadd.f32 %v6809_v49, %v6808_v61  ;;  %v6878_v28 = vadd.f32 %v6877_v21, %v11950_v30  ;;  %v9379_v21 = vld [vmem:[%s12274_s17] ss:$0 sm:$0xff] }
 0x22a   : > { %v2532_v58 = vpop.trf.xlu1  ;;  %10166 = vmatprep.mubr.msk.f32.mxu0 %vm15939_vm11, %v2468_v46  ;;  %v6843_v26 = vadd.f32 %v6842_v14, %v11880_v55  ;;  %v6851_v44 = vrot.slane %v6850_v37, 2  ;;  %v6891_v24 = vrot.slane %v11963_v35, 4  ;;  %v6790_v45 = vrot.slane %v6789_v48, 1 }
 0x22b   : > { %10214 = vmatprep.mubr.msk.f32.mxu1 %vm15939_vm11, %v2532_v58  ;;  %v6816_v31 = vrot.slane %v6815_v2, 2  ;;  %v6824_v7 = vadd.f32 %v6823_v36, %v6822_v9  ;;  %v6864_v22 = vadd.f32 %v6863_v1, %v11891_v47  ;;  %v6797_v53 = vrot.slane %v6796_v17, 1  ;;  %v16160_v47 = vld [vmem:[#allocation20_spill] sm:$0xff] }
 0x22c   : > { %v6837_v40 = vrot.slane %v6836_v3, 2  ;;  %v6898_v30 = vrot.slane %v12019_v52, 4  ;;  %v6906_v55 = vadd.f32 %v6905_v4, %v12027_v16  ;;  %v6800_v33 = vrot.slane %v16160_v47, 4 }
 0x22d   : > { %v2469_v10 = vpop.trf.xlu0  ;;  %v6844_v8 = vrot.slane %v6843_v26, 2  ;;  %v6892_v41 = vadd.f32 %v6891_v24, %v11963_v35  ;;  %v6817_v34 = vadd.f32 %v6816_v31, %v6815_v2  ;;  %v6865_v5 = vrot.slane %v6864_v22, 2 }
 0x22e   : > { %v2533_v50 = vpop.trf.xlu1  ;;  %10167 = vmatmul.mubr.msk.f32.gmra.mrb[80].mxu0 %vm15939_vm11, %v2469_v10  ;;  %v6811_v10 = vrot.slane %v6810_v32, 1  ;;  %v6798_v62 = vadd.f32 %v6797_v53, %v6796_v17  ;;  %v6899_v29 = vadd.f32 %v6898_v30, %v12019_v52  ;;  %v6907_v35 = vrot.slane %v6906_v55, 2 }
 0x22f   : > { %10215 = vmatmul.mubr.msk.f32.gmra.mrb[80].mxu1 %vm15939_vm11, %v2533_v50  ;;  %v6866_v17 = vadd.f32 %v6865_v5, %v6864_v22 }
 0x230   : > { %v6812_v9 = vadd.f32 %v6811_v10, %v6810_v32  ;;  %v12281_v31 = vmul.f32 0.0625, %v6798_v62 }
 0x231   : > { %v2470_v18 = vpop.trf.xlu0 }
 0x232   : > { %v2534_v0 = vpop.trf.xlu1  ;;  %10169 = vmatprep.mubr.msk.f32.mxu0 %vm15939_vm11, %v2470_v18  ;;  %v6879_v18 = vrot.slane %v6878_v28, 2  ;;  %16161 = vst [vmem:[#allocation35_spill] sm:$0xff] %v12281_v31 }
 0x233   : > { %10217 = vmatprep.mubr.msk.f32.mxu1 %vm15939_vm11, %v2534_v0  ;;  %v16159_v0 = vld [vmem:[#allocation14_spill] sm:$0xff] }
 0x234   : > { %v6919_v23 = vrot.slane %v16159_v0, 4  ;;  %v6880_v25 = vadd.f32 %v6879_v18, %v6878_v28  ;;  %v6908_v28 = vadd.f32 %v6907_v35, %v6906_v55  ;;  %v12288_v55 = vadd.f32 %v6800_v33, %v16160_v47 }
 0x235   : > { %v2471_v43 = vpop.trf.xlu0  ;;  %v6946_v47 = vpack.c.bf16 %v12281_v31, %v12281_v31 }
 0x236   : > { %v2535_v19 = vpop.trf.xlu1  ;;  %10170 = vmatmul.mubr.msk.f32.gmra.mrb[82].mxu0 %vm15939_vm11, %v2471_v43  ;;  %v6852_v43 = vadd.f32 %v6851_v44, %v6850_v37  ;;  %v6920_v15 = vadd.f32 %v6919_v23, %v16159_v0  ;;  %v6845_v37 = vadd.f32 %v6844_v8, %v6843_v26  ;;  %v6900_v44 = vrot.slane %v6899_v29, 2 }
 0x237   : > { %10218 = vmatmul.mubr.msk.f32.gmra.mrb[82].mxu1 %vm15939_vm11, %v2535_v19  ;;  %v6791_v19 = vadd.f32 %v6790_v45, %v6789_v48  ;;  %v6893_v48 = vrot.slane %v6892_v41, 2  ;;  %v6867_v23 = vrot.slane %v6866_v17, 1 }
 0x238   : > { %v6921_v53 = vrot.slane %v6920_v15, 2  ;;  %v6846_v30 = vrot.slane %v6845_v37, 1 }
 0x239   : > { %v2472_v59 = vpop.trf.xlu0  ;;  %v6894_v22 = vadd.f32 %v6893_v48, %v6892_v41 }
 0x23a   : > { %v2536_v11 = vpop.trf.xlu1  ;;  %10172 = vmatprep.mubr.msk.f32.mxu0 %vm15939_vm11, %v2472_v59  ;;  %v6838_v59 = vadd.f32 %v6837_v40, %v6836_v3  ;;  %v6922_v62 = vadd.f32 %v6921_v53, %v6920_v15  ;;  %v6847_v33 = vadd.f32 %v6846_v30, %v6845_v37 }
 0x23b   : > { %10220 = vmatprep.mubr.msk.f32.mxu1 %vm15939_vm11, %v2536_v11 }
 0x23c   : > { %v6839_v32 = vrot.slane %v6838_v59, 1 }
 0x23d   : > { %4944 = vxpose.xlu1.b32.start.end [1/1] (short) %v11913_v38, 128  ;;  %v2473_v12 = vpop.trf.xlu0  ;;  %v6870_v38 = vrot.slane %v11943_v20, 4 }
 0x23e   : > { %v2537_v57 = vpop.trf.xlu1  ;;  %10173 = vmatmul.mubr.msk.f32.gmra.mrb[84].mxu0 %vm15939_vm11, %v2473_v12  ;;  %v6853_v12 = vrot.slane %v6852_v43, 1  ;;  %v6840_v8 = vadd.f32 %v6839_v32, %v6838_v59  ;;  %v4452_v32 = vpack.c.bf16 %v12093_v39, %v12093_v39 }
 0x23f   : > { %10221 = vmatmul.mubr.msk.f32.gmra.mrb[84].mxu1 %vm15939_vm11, %v2537_v57  ;;  %v6871_v50 = vadd.f32 %v6870_v38, %v11943_v20  ;;  %v6825_v20 = vrot.slane %v6824_v7, 1  ;;  %v6818_v57 = vrot.slane %v6817_v34, 1 }
 0x240   : > { %v12309_v15 = vmul.f32 0.0625, %v6840_v8  ;;  %v4562_v8 = vunpack.c.l.b16 %v4452_v32 }
 0x241   : > { %v2474_v46 = vpop.trf.xlu0  ;;  %v6872_v11 = vrot.slane %v6871_v50, 2  ;;  %v6826_v52 = vadd.f32 %v6825_v20, %v6824_v7  ;;  %v6854_v7 = vadd.f32 %v6853_v12, %v6852_v43  ;;  %v6819_v18 = vadd.f32 %v6818_v57, %v6817_v34 }
 0x242   : > { %v2538_v58 = vpop.trf.xlu1  ;;  %10175 = vmatprep.mubr.msk.f32.mxu0 %vm15939_vm11, %v2474_v46  ;;  %v6909_v20 = vrot.slane %v6908_v28, 1  ;;  %16168 = vst [vmem:[#allocation17_spill] sm:$0xff] %v12309_v15  ;;  %v12316_v57 = vmul.f32 0.0625, %v6847_v33 }
 0x243   : > { %10223 = vmatprep.mubr.msk.f32.mxu1 %vm15939_vm11, %v2538_v58  ;;  %v6873_v26 = vadd.f32 %v6872_v11, %v6871_v50  ;;  %v6881_v58 = vrot.slane %v6880_v25, 1  ;;  %v12290_v0 = vmul.f32 0.0625, %v6826_v52  ;;  %v12292_v50 = vmul.f32 0.0625, %v6791_v19 }
 0x244   : > { %v12299_v34 = vmul.f32 0.0625, %v6854_v7  ;;  %v6895_v19 = vrot.slane %v6894_v22, 1  ;;  %v12302_v59 = vmul.f32 0.0625, %v6819_v18  ;;  %v6868_v11 = vadd.f32 %v6867_v23, %v6866_v17  ;;  %16170 = vst [vmem:[#allocation25_spill] sm:$0xff] %v12316_v57 }
 0x245   : > { %v2475_v16 = vpop.trf.xlu0  ;;  %16162 = vst [vmem:[#allocation34_spill] sm:$0xff] %v12290_v0  ;;  %16163 = vst [vmem:[#allocation12_spill] sm:$0xff] %v12292_v50  ;;  %v6874_v43 = vrot.slane %v6873_v26, 1  ;;  %v6882_v41 = vadd.f32 %v6881_v58, %v6880_v25  ;;  %v6945_v25 = vpack.c.bf16 %v12292_v50, %v12292_v50  ;;  %v6953_v39 = vpack.c.bf16 %v12316_v57, %v12316_v57 }
 0x246   : > { %v2539_v61 = vpop.trf.xlu1  ;;  %10176 = vmatmul.mubr.msk.f32.gmra.mrb[86].mxu0 %vm15939_vm11, %v2475_v16  ;;  %v9829_v60 = vpop.f32.mrb[60].mxu0  ;;  %v6901_v16 = vadd.f32 %v6900_v44, %v6899_v29  ;;  %16165 = vst [vmem:[#allocation23_spill] sm:$0xff] %v12299_v34  ;;  %16166 = vst [vmem:[#allocation24_spill] sm:$0xff] %v12302_v59  ;;  %v16167_v29 = vld [vmem:[#allocation21_spill] sm:$0xff]  ;;  %v6896_v52 = vadd.f32 %v6895_v19, %v6894_v22  ;;  %v6954_v17 = vpack.c.bf16 %v12299_v34, %v12299_v34 }
 0x247   : > { %10224 = vmatmul.mubr.msk.f32.gmra.mrb[86].mxu1 %vm15939_vm11, %v2539_v61  ;;  %v9830_v14 = vpop.f32.mrb[61].mxu0  ;;  %v12294_v61 = vmul.f32 0.0625, %v6812_v9  ;;  %v6950_v9 = vpack.c.bf16 %v12290_v0, %v12290_v0  ;;  %v6875_v12 = vadd.f32 %v6874_v43, %v6873_v26  ;;  %v12313_v48 = vmul.f32 0.0625, %v6882_v41  ;;  %v16175_v43 = vld [vmem:[#allocation9_spill] sm:$0xff] }
 0x248   : > { %v9851_v49 = vpop.f32.mrb[60].mxu1  ;;  %v9831_v36 = vadd.f32 %v9830_v14, %v9829_v60  ;;  %v9832_v1 = vpop.f32.mrb[62].mxu0  ;;  %v6828_v60 = vrot.slane %v16167_v29, 4  ;;  %v7055_v44 = vunpack.c.l.b16 %v6945_v25  ;;  %v12338_v7 = vmul.f32 0.0625, %v6896_v52 }
 0x249   : > { %v9852_v2 = vpop.f32.mrb[61].mxu1  ;;  %v9833_v38 = vpop.f32.mrb[63].mxu0  ;;  %16164 = vst [vmem:[#allocation36_spill] sm:$0xff] %v12294_v61  ;;  %v6948_v37 = vpack.c.bf16 %v12294_v61, %v12294_v61  ;;  %16169 = vst [vmem:[#allocation18_spill] sm:$0xff] %v12313_v48  ;;  %v7056_v1 = vunpack.c.l.b16 %v6946_v47  ;;  %v12331_v58 = vmul.f32 0.0625, %v6875_v12  ;;  %v6958_v30 = vpack.c.bf16 %v12313_v48, %v12313_v48 }
 0x24a   : > { %v9853_v3 = vadd.f32 %v9852_v2, %v9851_v49  ;;  %v9854_v4 = vpop.f32.mrb[62].mxu1  ;;  %v2298_v24 = vadd.f32 %v9831_v36, %v9379_v21  ;;  %v2540_v45 = vpop.trf.xlu1  ;;  %v6902_v49 = vrot.slane %v6901_v16, 1  ;;  %v6910_v21 = vadd.f32 %v6909_v20, %v6908_v28  ;;  %16174 = vst [vmem:[#allocation16_spill] sm:$0xff] %v12338_v7 }
 0x24b   : > { %v9855_v46 = vpop.f32.mrb[63].mxu1  ;;  %10226 = vmatprep.mubr.msk.f32.mxu1 %vm15939_vm11, %v2540_v45  ;;  %v2476_v40 = vpop.trf.xlu0  ;;  %v6923_v2 = vrot.slane %v6922_v62, 1  ;;  %v7060_v4 = vunpack.c.l.b16 %v6950_v9  ;;  %v12323_v38 = vmul.f32 0.0625, %v6868_v11  ;;  %v6952_v28 = vpack.c.bf16 %v12309_v15, %v12309_v15  ;;  %16173 = vst [vmem:[#allocation15_spill] sm:$0xff] %v12331_v58 }
 0x24c   : > { %v12284_v10 = vadd.f32 %v9853_v3, %v2298_v24  ;;  %10178 = vmatprep.mubr.msk.f32.mxu0 %vm15939_vm11, %v2476_v40  ;;  %v6949_v3 = vpack.c.bf16 %v12302_v59, %v12302_v59  ;;  %v6903_v24 = vadd.f32 %v6902_v49, %v6901_v16  ;;  %v12329_v46 = vmul.f32 0.0625, %v6910_v21 }
 0x24d   : > { %16171 = vst [vmem:[#allocation37_spill] sm:$0xff] %v12323_v38  ;;  %v7058_v26 = vunpack.c.l.b16 %v6948_v37  ;;  %v6924_v53 = vadd.f32 %v6923_v2, %v6922_v62  ;;  %v4456_v22 = vpack.c.bf16 %v12119_v51, %v12119_v51  ;;  %v7064_v18 = vunpack.c.l.b16 %v6954_v17 }
 0x24e   : > { %v2541_v5 = vpop.trf.xlu1  ;;  %16172 = vst [vmem:[#allocation19_spill] sm:$0xff] %v12329_v46  ;;  %v7059_v23 = vunpack.c.l.b16 %v6949_v3  ;;  %v7079_v16 = vsel %vm2043_vm0, %v7060_v4, %v7056_v1  ;;  %v6956_v20 = vpack.c.bf16 %v12323_v38, %v12323_v38  ;;  %v6856_v41 = vrot.slane %v16175_v43, 4 }
 0x24f   : > { %10227 = vmatmul.mubr.msk.f32.gmra.mrb[88].mxu1 %vm15939_vm11, %v2541_v5  ;;  %v2477_v35 = vpop.trf.xlu0  ;;  %v7062_v5 = vunpack.c.l.b16 %v6952_v28  ;;  %v12347_v62 = vmul.f32 0.0625, %v6903_v24  ;;  %v6962_v47 = vpack.c.bf16 %v12329_v46, %v12329_v46  ;;  %v6957_v51 = vpack.c.bf16 %v12331_v58, %v12331_v58 }
 0x250   : > { %10179 = vmatmul.mubr.msk.f32.gmra.mrb[88].mxu0 %vm15939_vm11, %v2477_v35  ;;  %v12353_v33 = vmul.f32 0.0625, %v6924_v53  ;;  %v4460_v19 = vpack.c.bf16 %v12136_v6, %v12136_v6  ;;  %v7068_v11 = vunpack.c.l.b16 %v6958_v30  ;;  %v7063_v25 = vunpack.c.l.b16 %v6953_v39  ;;  %v16178_v6 = vld [vmem:[#allocation11_spill] sm:$0xff] }
 0x251   : > { %16176 = vst [vmem:[#allocation31_spill] sm:$0xff] %v12347_v62  ;;  %v4566_v49 = vunpack.c.l.b16 %v4456_v22  ;;  %v7080_v21 = vsel %vm2045_vm1, %v7064_v18, %v7079_v16  ;;  %v6829_v37 = vadd.f32 %v6828_v60, %v16167_v29  ;;  %v4578_v12 = vsel %vm2045_vm1, %v4562_v8, %v12075_v54  ;;  %v16179_v22 = vld [vmem:[#allocation22_spill] sm:$0xff] }
 0x252   : > { %v2542_v14 = vpop.trf.xlu1  ;;  %16177 = vst [vmem:[#allocation32_spill] sm:$0xff] %v12353_v33  ;;  %v7075_v2 = vsel %vm2043_vm0, %v7059_v23, %v7055_v44  ;;  %v6884_v1 = vrot.slane %v16178_v6, 4  ;;  %v6961_v52 = vpack.c.bf16 %v12347_v62, %v12347_v62  ;;  %v7072_v3 = vunpack.c.l.b16 %v6962_v47 }
 0x253   : > { %10229 = vmatprep.mubr.msk.f32.mxu1 %vm15939_vm11, %v2542_v14  ;;  %v2478_v36 = vpop.trf.xlu0  ;;  %v6960_v14 = vpack.c.bf16 %v12338_v7, %v12338_v7  ;;  %v7087_v4 = vsel %vm2043_vm0, %v7062_v5, %v7058_v26  ;;  %v7067_v32 = vunpack.c.l.b16 %v6957_v51  ;;  %v4570_v28 = vunpack.c.l.b16 %v4460_v19 }
 0x254   : > { %10181 = vmatprep.mubr.msk.f32.mxu0 %vm15939_vm11, %v2478_v36  ;;  %v7066_v36 = vunpack.c.l.b16 %v6956_v20  ;;  %v7081_v60 = vsel %vm15941_vm2, %v7068_v11, %v7080_v21  ;;  %v6964_v54 = vpack.c.bf16 %v12353_v33, %v12353_v33  ;;  %v6857_v44 = vadd.f32 %v6856_v41, %v16175_v43 }
 0x255   : > { %v4579_v24 = vsel %vm15941_vm2, %v4566_v49, %v4578_v12  ;;  %v7070_v53 = vunpack.c.l.b16 %v6960_v14  ;;  %v6802_v26 = vrot.slane %v12288_v55, 2  ;;  %v7071_v39 = vunpack.c.l.b16 %v6961_v52  ;;  %v10649_v52 = vld [vmem:[%s10924_s22 + $0x1c8] sm:$0xff]  }
 0x256   : > { %v2543_v45 = vpop.trf.xlu1  ;;  %v7088_v30 = vsel %vm2045_vm1, %v7066_v36, %v7087_v4  ;;  %v6912_v18 = vrot.slane %v16179_v22, 4  ;;  %v7082_v8 = vsel %vm15940_vm3, %v7072_v3, %v7081_v60  ;;  %v6885_v16 = vadd.f32 %v6884_v1, %v16178_v6 }
 0x257   : > { %10230 = vmatmul.mubr.msk.f32.gmra.mrb[90].mxu1 %vm15939_vm11, %v2543_v45  ;;  %v2479_v40 = vpop.trf.xlu0  ;;  %v7076_v45 = vsel %vm2045_vm1, %v7063_v25, %v7075_v2  ;;  %v4580_v20 = vsel %vm15940_vm3, %v4570_v28, %v4579_v24  ;;  %v7074_v41 = vunpack.c.l.b16 %v6964_v54  ;;  %v7089_v47 = vsel %vm15941_vm2, %v7070_v53, %v7088_v30  ;;  %v10681_v54 = vld [vmem:[%s10924_s22 + $0x2c8] sm:$0xff]   ;;  %v10651_v53 = vld [vmem:[%s10924_s22 + $0x1d0] sm:$0xff]  }
 0x258   : > { %10182 = vmatmul.mubr.msk.f32.gmra.mrb[90].mxu0 %vm15939_vm11, %v2479_v40  ;;  %v6830_v40 = vrot.slane %v6829_v37, 2  ;;  %v7077_v43 = vsel %vm15941_vm2, %v7067_v32, %v7076_v45  ;;  %v6803_v51 = vadd.f32 %v6802_v26, %v12288_v55  ;;  %v6913_v11 = vadd.f32 %v6912_v18, %v16179_v22  ;;  %v10648_v55 = vld [vmem:[%s10924_s22 + $0x180] sm:$0xff]   ;;  %v10682_v26 = vld [vmem:[%s10924_s22 + $0x288] sm:$0xff]   ;;  %v10652_v18 = vld [vmem:[%s10924_s22 + $0x190] sm:$0xff]  }
 0x259   : > { %v4590_v49 = vpack.c.b16 %v4580_v20, %v4580_v20  ;;  %v7078_v21 = vsel %vm15940_vm3, %v7071_v39, %v7077_v43  ;;  %v6886_v14 = vrot.slane %v6885_v16, 2  ;;  %v7090_v2 = vsel %vm15940_vm3, %v7074_v41, %v7089_v47  ;;  %v10680_v32 = vld [vmem:[%s10924_s22 + $0x280] sm:$0xff]   ;;  %v10683_v39 = vld [vmem:[%s10924_s22 + $0x2d0] sm:$0xff]  }
 0x25a   : > { %v2544_v35 = vpop.trf.xlu1  ;;  %v6831_v19 = vadd.f32 %v6830_v40, %v6829_v37  ;;  %v6804_v37 = vrot.slane %v6803_v51, 1  ;;  %v4589_v1 = vpack.c.b16 %v12113_v13, %v12113_v13  ;;  %v6914_v3 = vrot.slane %v6913_v11, 2  ;;  %v10650_v13 = vld [vmem:[%s10924_s22 + $0x188] sm:$0xff]  }
 0x25b   : > { %10232 = vmatprep.mubr.msk.f32.mxu1 %vm15939_vm11, %v2544_v35  ;;  %v2480_v9 = vpop.trf.xlu0  ;;  %v6858_v35 = vrot.slane %v6857_v44, 2  ;;  %v4592_v4 = vpack.c.b16 %v12166_v56, %v12166_v56  ;;  %v7094_v28 = vpack.c.b16 %v7090_v2, %v7090_v2 }
 0x25c   : > { %10184 = vmatprep.mubr.msk.f32.mxu0 %vm15939_vm11, %v2480_v9  ;;  %v7092_v9 = vpack.c.b16 %v7082_v8, %v7082_v8  ;;  %v6832_v6 = vrot.slane %v6831_v19, 1  ;;  %v6805_v24 = vadd.f32 %v6804_v37, %v6803_v51  ;;  %v6915_v56 = vadd.f32 %v6914_v3, %v6913_v11  ;;  %v10654_v51 = vld [vmem:[%s10924_s22 + $0x198] sm:$0xff]   ;;  %v10655_v11 = vld [vmem:[%s10924_s22 + $0x1e0] sm:$0xff]  }
 0x25d   : > { %v6859_v36 = vadd.f32 %v6858_v35, %v6857_v44  ;;  %v10685_v35 = vld [vmem:[%s10924_s22 + $0x2d8] sm:$0xff]  }
 0x25e   : > { %v2545_v17 = vpop.trf.xlu1  ;;  %v6833_v45 = vadd.f32 %v6832_v6, %v6831_v19  ;;  %v6916_v20 = vrot.slane %v6915_v56, 1  ;;  %v10657_v6 = vld [vmem:[%s10924_s22 + $0x1e8] sm:$0xff]  }
 0x25f   : > { %10233 = vmatmul.mubr.msk.f32.gmra.mrb[92].mxu1 %vm15939_vm11, %v2545_v17  ;;  %v2481_v29 = vpop.trf.xlu0  ;;  %v7091_v17 = vpack.c.b16 %v7078_v21, %v7078_v21  ;;  %v6860_v44 = vrot.slane %v6859_v36, 1 }
 0x260   : > { %10185 = vmatmul.mubr.msk.f32.gmra.mrb[92].mxu0 %vm15939_vm11, %v2481_v29  ;;  %v6887_v29 = vadd.f32 %v6886_v14, %v6885_v16  ;;  %v12413_v8 = vmul.f32 0.0625, %v6833_v45  ;;  %v10653_v16 = vld [vmem:[%s10924_s22 + $0x1d8] sm:$0xff]  }
 0x261   : > { %v6861_v22 = vadd.f32 %v6860_v44, %v6859_v36  ;;  %v10656_v36 = vld [vmem:[%s10924_s22 + $0x1a0] sm:$0xff]  }
 0x262   : > { %v2546_v23 = vpop.trf.xlu1  ;;  %v6888_v40 = vrot.slane %v6887_v29, 1  ;;  %16181 = vst [vmem:[#allocation13_spill] sm:$0xff] %v12413_v8 }
 0x263   : > { %10235 = vmatprep.mubr.msk.f32.mxu1 %vm15939_vm11, %v2546_v23  ;;  %v2482_v5 = vpop.trf.xlu0  ;;  %v12411_v23 = vmul.f32 0.0625, %v6805_v24  ;;  %v12420_v47 = vmul.f32 0.0625, %v6861_v22  ;;  %v10691_v24 = vld [vmem:[%s10924_s22 + $0x2f0] sm:$0xff]  }
 0x264   : > { %10187 = vmatprep.mubr.msk.f32.mxu0 %vm15939_vm11, %v2482_v5  ;;  %v10684_v5 = vld [vmem:[%s10924_s22 + $0x290] sm:$0xff]   ;;  %v6889_v43 = vadd.f32 %v6888_v40, %v6887_v29 }
 0x265   : > { %16180 = vst [vmem:[#allocation26_spill] sm:$0xff] %v12411_v23  ;;  %16182 = vst [vmem:[#allocation27_spill] sm:$0xff] %v12420_v47  ;;  %v6947_v19 = vpack.c.bf16 %v12411_v23, %v12411_v23  ;;  %v6955_v2 = vpack.c.bf16 %v12420_v47, %v12420_v47  ;;  %v10692_v40 = vld [vmem:[%s10924_s22 + $0x2b0] sm:$0xff]  }
 0x266   : > { %v2547_v25 = vpop.trf.xlu1  ;;  %v12429_v21 = vmul.f32 0.0625, %v6889_v43 }
 0x267   : > { %10236 = vmatmul.mubr.msk.f32.gmra.mrb[94].mxu1 %vm15939_vm11, %v2547_v25  ;;  %v2483_v12 = vpop.trf.xlu0  ;;  %v6917_v25 = vadd.f32 %v6916_v20, %v6915_v56  ;;  %v10665_v20 = vld [vmem:[%s10924_s22 + $0x1b8] sm:$0xff]  }
 0x268   : > { %4821 = vmatprep.mubr.bf16.mxu1 %v4590_v49  ;;  %10188 = vmatmul.mubr.msk.f32.gmra.mrb[94].mxu0 %vm15939_vm11, %v2483_v12  ;;  %v10686_v49 = vld [vmem:[%s10924_s22 + $0x298] sm:$0xff]   ;;  %16183 = vst [vmem:[#allocation28_spill] sm:$0xff] %v12429_v21  ;;  %v10687_v12 = vld [vmem:[%s10924_s22 + $0x2e0] sm:$0xff]  }
 0x269   : > { %7323 = vmatprep.mubr.bf16.mxu0 %v7092_v9  ;;  %v6951_v9 = vpack.c.bf16 %v12413_v8, %v12413_v8 }
 0x26b   : > { %4822 = vmatmul.mubr.bf16.vlgmr.msra.gmra.mrb[96].mxu1 %v4589_v1  ;;  %v12401_v60 = vpop.trf.xlu0  ;;  %v7061_v37 = vunpack.c.l.b16 %v6951_v9  ;;  %v12439_v1 = vmul.f32 0.0625, %v6917_v25 }
 0x26c   : > { %9945 = vmatpush3.bf16.msra.mxu1 %v10648_v55  ;;  %4861 = vmatprep.mubr.bf16.mxu1 %v4592_v4  ;;  %v7057_v55 = vunpack.c.l.b16 %v6947_v19  ;;  %v10689_v4 = vld [vmem:[%s10924_s22 + $0x2e8] sm:$0xff]   ;;  %v4591_v19 = vpack.c.b16 %v12176_v27, %v12176_v27 }
 0x26d   : > { %9946 = vmatprep.subr.bf16.mxu1 %v10649_v52  ;;  %7324 = vmatmul.mubr.bf16.vlgmr.msra.gmra.mrb[96].mxu0 %v7091_v17  ;;  %16184 = vst [vmem:[#allocation8_spill] sm:$0xff] %v12439_v1  ;;  %v10688_v52 = vld [vmem:[%s10924_s22 + $0x2a0] sm:$0xff]   ;;  %v6959_v17 = vpack.c.bf16 %v12429_v21, %v12429_v21  ;;  %v6963_v44 = vpack.c.bf16 %v12439_v1, %v12439_v1 }
 0x26e   : > { %10054 = vmatpush3.bf16.msra.mxu0 %v10680_v32  ;;  %7363 = vmatprep.mubr.bf16.mxu0 %v7094_v28  ;;  %v7065_v32 = vunpack.c.l.b16 %v6955_v2  ;;  %v10659_v28 = vld [vmem:[%s10924_s22 + $0x1f0] sm:$0xff]   ;;  %v7083_v29 = vsel %vm2043_vm0, %v7061_v37, %v7057_v55 }
 0x26f   : > { %v12407_v30 = vpop.trf.xlu0  ;;  %10055 = vmatprep.subr.bf16.mxu0 %v10681_v54  ;;  %v10690_v54 = vld [vmem:[%s10924_s22 + $0x2a8] sm:$0xff]   ;;  %v7069_v45 = vunpack.c.l.b16 %v6959_v17 }
 0x270   : > { %9947 = vmatpush3.bf16.msra.mxu1 %v10650_v13  ;;  %v7084_v56 = vsel %vm2045_vm1, %v7065_v32, %v7083_v29 }
 0x271   : > { %9948 = vmatprep.subr.bf16.mxu1 %v10651_v53  ;;  %v10661_v53 = vld [vmem:[%s10924_s22 + $0x1b0] sm:$0xff]  }
 0x272   : > { %10056 = vmatpush3.bf16.msra.mxu0 %v10682_v26  ;;  %v10663_v26 = vld [vmem:[%s10924_s22 + $0x1f8] sm:$0xff]  }
 0x273   : > { %v12417_v41 = vpop.trf.xlu0  ;;  %10057 = vmatprep.subr.bf16.mxu0 %v10683_v39  ;;  %v7073_v39 = vunpack.c.l.b16 %v6963_v44 }
 0x274   : > { %9949 = vmatpush3.bf16.msra.mxu1 %v10652_v18  ;;  %v10693_v18 = vld [vmem:[%s10924_s22 + $0x2f8] sm:$0xff]  }
 0x275   : > { %9950 = vmatprep.subr.bf16.mxu1 %v10653_v16  ;;  %v7085_v16 = vsel %vm15941_vm2, %v7069_v45, %v7084_v56 }
 0x276   : > { %10058 = vmatpush3.bf16.msra.mxu0 %v10684_v5  ;;  %v10694_v5 = vld [vmem:[%s10924_s22 + $0x2b8] sm:$0xff]   ;;  %v7086_v43 = vsel %vm15940_vm3, %v7073_v39, %v7085_v16 }
 0x277   : > { %v12431_v14 = vpop.trf.xlu0  ;;  %10059 = vmatprep.subr.bf16.mxu0 %v10685_v35  ;;  %v7093_v9 = vpack.c.b16 %v7086_v43, %v7086_v43 }
 0x278   : > { %9951 = vmatpush3.bf16.msra.mxu1 %v10654_v51  ;;  %v2344_v51 = vsel %vm2343_vm10, %v12284_v10, -inf }
 0x279   : > { %9952 = vmatprep.subr.bf16.mxu1 %v10655_v11  ;;  %v16185_v11 = vld [vmem:[#allocation10_spill] sm:$0xff] }
 0x27a   : > { %5040 = vxpose.xlu1.b32.start.end [1/1] (short) %v12170_v42, 128  ;;  %10060 = vmatpush3.bf16.msra.mxu0 %v10686_v49  ;;  %v10658_v42 = vld [vmem:[%s10924_s22 + $0x1a8] sm:$0xff]   ;;  %v3129_v27 = vsel %vm2343_vm10, %v16185_v11, 0.0  ;;  %v2356_v33 = vmul.f32 %v12284_v10, %v16185_v11  ;;  %s1606_s22 = sld [smem:[#allocation5 + %s1580_s10]] }
 0x27b   : > { %v12444_v3 = vpop.trf.xlu0  ;;  %10061 = vmatprep.subr.bf16.mxu0 %v10687_v12 }
 0x27c   : > { %9953 = vmatpush3.bf16.msra.mxu1 %v10656_v36  ;;  %v3130_v36 = vrot.slane %v3129_v27, 4 }
 0x27d   : > { %9954 = vmatprep.subr.bf16.mxu1 %v10657_v6 }
 0x27e   : > { %10062 = vmatpush3.bf16.msra.mxu0 %v10688_v52  ;;  %v3131_v37 = vadd.f32 %v3130_v36, %v3129_v27 }
 0x27f   : > { %v12453_v13 = vpop.trf.xlu0  ;;  %10063 = vmatprep.subr.bf16.mxu0 %v10689_v4 }
 0x280   : > { %9955 = vmatpush3.bf16.msra.mxu1 %v10658_v42  ;;  %v3132_v52 = vrot.slane %v3131_v37, 2 }
 0x281   : > { %9956 = vmatprep.subr.bf16.mxu1 %v10659_v28 }
 0x282   : > { %10064 = vmatpush3.bf16.msra.mxu0 %v10690_v54  ;;  %v3133_v17 = vadd.f32 %v3132_v52, %v3131_v37 }
 0x283   : > { %v12460_v22 = vpop.trf.xlu0  ;;  %10065 = vmatprep.subr.bf16.mxu0 %v10691_v24 }
 0x284   : > { %9957 = vmatpush3.bf16.msra.mxu1 %v10661_v53  ;;  %v3134_v32 = vrot.slane %v3133_v17, 1 }
 0x285   : > { %9958 = vmatprep.subr.bf16.mxu1 %v10663_v26 }
 0x286   : > { %10066 = vmatpush3.bf16.msra.mxu0 %v10692_v40  ;;  %v12495_v28 = vadd.f32 %v3134_v32, %v3133_v17 }
 0x287   : > { %v12467_v35 = vpop.trf.xlu0  ;;  %10067 = vmatprep.subr.bf16.mxu0 %v10693_v18 }
 0x288   : > { %9959 = vmatpush3.bf16.msra.mxu1 %v10665_v20  ;;  %16186 = vst [vmem:[#allocation30_spill] sm:$0xff] %v12495_v28  ;;  %v3136_v29 = vmax.f32 %v12495_v28, 1.0 }
 0x289   : > { %10238 = vmatprep.subr.msk.mxu1 %vm2343_vm10, %v16185_v11 }
 0x28a   : > { %2345 = vmax.xlane.f32.xlu0 %v2344_v51  ;;  %10068 = vmatpush3.bf16.msra.mxu0 %v10694_v5  ;;  %10695 = vrcp.f32 %v3136_v29 }
 0x28b   : > { %4862 = vmatmul.mubr.bf16.vlgmr.msra.gmra.mrb[100].mxu1 %v4591_v19  ;;  %v12475_v25 = vpop.trf.xlu0 }
 0x28c   : > { %10239 = vmatpush3.msk.msra.mxu1 %vm2343_vm10, %v16185_v11 }
 0x28d   : > { %7364 = vmatmul.mubr.bf16.vlgmr.msra.gmra.mrb[100].mxu0 %v7093_v9 }
 0x28f   : > { %v12479_v49 = vpop.trf.xlu0 }
 0x293   : > { %v12481_v12 = vpop.trf.xlu0 }
 0x294   : > { %v12507_v56 = vpop.eup %10695 }
 0x295   : > { %16188 = vst [vmem:[#allocation20_spill] sm:$0xff] %v12507_v56 }
 0x297   : > { %v12485_v2 = vpop.trf.xlu0  ;;  %v12500_v44 = vpop.xlane.xlu1 %3464 }
 0x298   : > { %16187 = vst [vmem:[#allocation14_spill] sm:$0xff] %v12500_v44 }
 0x29b   : > { %v12487_v55 = vpop.trf.xlu0 }
 0x29f   : > { %v12489_v6 = vpop.trf.xlu0 }
 0x2a3   : > { %v12491_v4 = vpop.trf.xlu0 }
 0x2a7   : > { %v12493_v42 = vpop.trf.xlu0 }
 0x2ab   : > { %v12498_v54 = vpop.trf.xlu0 }
 0x2af   : > { %v12502_v24 = vpop.trf.xlu0 }
 0x2b3   : > { %v12505_v53 = vpop.trf.xlu0 }
 0x2b7   : > { %v12523_v19 = vpop.trf.xlu0 }
 0x2bb   : > { %v12536_v29 = vpop.trf.xlu0 }
 0x2bd   : > { %v4960_v45 = vpop.trf.xlu1 }
 0x2be   : > { %10240 = vmatprep.mubr.msk.f32.mxu1 %vm15939_vm11, %v4960_v45 }
 0x2c1   : > { %v4961_v26 = vpop.trf.xlu1  ;;  %v12509_v40 = vpop.f32.mrb[64].mxu1 }
 0x2c2   : > { %3271 = vadd.xlane.f32.xlu0 %v12509_v40  ;;  %v12512_v39 = vpop.f32.mrb[64].mxu0  ;;  %v2970_v18 = vpop.f32.mrb[65].mxu1  ;;  %10241 = vmatmul.mubr.msk.f32.vlgmr.msra.gmra.mrb[104].mxu1 %vm15939_vm11, %v4961_v26  ;;  %v12608_v1 = vmul.f32 %v12507_v56, %v12509_v40 }
 0x2c3   : > { %v2810_v16 = vpop.f32.mrb[65].mxu0  ;;  %v12520_v51 = vmul.f32 %v12507_v56, %v2970_v18 }
 0x2c4   : > { %v12516_v20 = vmul.f32 %v12507_v56, %v2810_v16  ;;  %16196 = vst [vmem:[#allocation41_spill] sm:$0xff] %v12608_v1  ;;  %v3506_v58 = vmul.f32 %v12509_v40, %v12608_v1 }
 0x2c5   : > { %v4962_v5 = vpop.trf.xlu1  ;;  %16190 = vst [vmem:[#allocation9_spill] sm:$0xff] %v12520_v51  ;;  %v3505_v36 = vmul.f32 %v12520_v51, %v2970_v18 }
 0x2c6   : > { %16189 = vst [vmem:[#allocation21_spill] sm:$0xff] %v12516_v20  ;;  %v3473_v43 = vmul.f32 %v12516_v20, %v2810_v16  ;;  %3205 = vadd.xlane.f32.xlu0 %v2810_v16  ;;  %10243 = vmatprep.mubr.msk.f32.mxu1 %vm15939_vm11, %v4962_v5 }
 0x2c9   : > { %v4963_v9 = vpop.trf.xlu1  ;;  %v12525_v27 = vpop.f32.mrb[66].mxu1 }
 0x2ca   : > { %3537 = vadd.xlane.f32.xlu0 %v3473_v43  ;;  %v12528_v37 = vpop.f32.mrb[66].mxu0  ;;  %v12530_v52 = vpop.f32.mrb[67].mxu1  ;;  %10244 = vmatmul.mubr.msk.f32.gmra.mrb[106].mxu1 %vm15939_vm11, %v4963_v9 }
 0x2cb   : > { %v12533_v17 = vpop.f32.mrb[67].mxu0  ;;  %v12557_v63 = vmul.f32 %v12507_v56, %v12530_v52 }
 0x2cc   : > { %v12543_v16 = vmul.f32 %v12507_v56, %v12533_v17 }
 0x2cd   : > { %v4964_v32 = vpop.trf.xlu1  ;;  %16192 = vst [vmem:[#allocation22_spill] sm:$0xff] %v12557_v63  ;;  %v3507_v15 = vmul.f32 %v12557_v63, %v12530_v52 }
 0x2ce   : > { %3601 = vadd.xlane.f32.xlu0 %v3505_v36  ;;  %10246 = vmatprep.mubr.msk.f32.mxu1 %vm15939_vm11, %v4964_v32  ;;  %16191 = vst [vmem:[#allocation11_spill] sm:$0xff] %v12543_v16  ;;  %v3475_v32 = vmul.f32 %v12543_v16, %v12533_v17 }
 0x2d1   : > { %v4965_v45 = vpop.trf.xlu1  ;;  %v12538_v26 = vpop.f32.mrb[68].mxu1 }
 0x2d2   : > { %3211 = vadd.xlane.f32.xlu0 %v12528_v37  ;;  %v12545_v5 = vpop.f32.mrb[68].mxu0  ;;  %10247 = vmatmul.mubr.msk.f32.gmra.mrb[108].mxu1 %vm15939_vm11, %v4965_v45  ;;  %v12548_v43 = vpop.f32.mrb[69].mxu1 }
 0x2d3   : > { %v12550_v9 = vpop.f32.mrb[69].mxu0  ;;  %v12562_v45 = vpop.trf.xlu0 }
 0x2d5   : > { %v4966_v36 = vpop.trf.xlu1 }
 0x2d6   : > { %3275 = vadd.xlane.f32.xlu0 %v12525_v27  ;;  %10249 = vmatprep.mubr.msk.f32.mxu1 %vm15939_vm11, %v4966_v36  ;;  %v2357_v36 = vsel %vm2343_vm10, %v2356_v33, 0.0 }
 0x2d7   : > { %v12577_v48 = vpop.trf.xlu0 }
 0x2d9   : > { %v4967_v7 = vpop.trf.xlu1  ;;  %v12564_v38 = vpop.f32.mrb[70].mxu1 }
 0x2da   : > { %3541 = vadd.xlane.f32.xlu0 %v3475_v32  ;;  %10250 = vmatmul.mubr.msk.f32.gmra.mrb[110].mxu1 %vm15939_vm11, %v4967_v7  ;;  %v12569_v61 = vpop.f32.mrb[70].mxu0  ;;  %v12571_v44 = vpop.f32.mrb[71].mxu1  ;;  %v12585_v7 = vmul.f32 %v12507_v56, %v12550_v9 }
 0x2db   : > { %v12573_v46 = vpop.f32.mrb[71].mxu0  ;;  %v12612_v47 = vpop.trf.xlu0 }
 0x2dc   : > { %16193 = vst [vmem:[#allocation38_spill] sm:$0xff] %v12585_v7  ;;  %v3477_v31 = vmul.f32 %v12585_v7, %v12550_v9 }
 0x2dd   : > { %v4968_v11 = vpop.trf.xlu1  ;;  %2358 = vadd.xlane.f32.xlu1 %v2357_v36 }
 0x2de   : > { %3605 = vadd.xlane.f32.xlu0 %v3507_v15  ;;  %10252 = vmatprep.mubr.msk.f32.mxu1 %vm15939_vm11, %v4968_v11  ;;  %v12594_v11 = vmul.f32 %v12507_v56, %v12512_v39 }
 0x2e0   : > { %16194 = vst [vmem:[#allocation39_spill] sm:$0xff] %v12594_v11  ;;  %v3474_v21 = vmul.f32 %v12512_v39, %v12594_v11 }
 0x2e1   : > { %v4969_v34 = vpop.trf.xlu1  ;;  %3207 = vadd.xlane.f32.xlu1 %v12512_v39  ;;  %v12580_v32 = vpop.f32.mrb[72].mxu1 }
 0x2e2   : > { %3215 = vadd.xlane.f32.xlu0 %v12545_v5  ;;  %10253 = vmatmul.mubr.msk.f32.gmra.mrb[112].mxu1 %vm15939_vm11, %v4969_v34  ;;  %v12588_v33 = vpop.f32.mrb[72].mxu0  ;;  %v12590_v15 = vpop.f32.mrb[73].mxu1  ;;  %v12603_v34 = vmul.f32 %v12507_v56, %v12548_v43 }
 0x2e3   : > { %v12596_v36 = vpop.f32.mrb[73].mxu0 }
 0x2e4   : > { %16195 = vst [vmem:[#allocation40_spill] sm:$0xff] %v12603_v34  ;;  %v3509_v23 = vmul.f32 %v12603_v34, %v12548_v43  ;;  %v12662_v34 = vmul.f32 %v12507_v56, %v12525_v27 }
 0x2e5   : > { %v4970_v0 = vpop.trf.xlu1  ;;  %3269 = vadd.xlane.f32.xlu1 %v2970_v18 }
 0x2e6   : > { %3279 = vadd.xlane.f32.xlu0 %v12538_v26  ;;  %10255 = vmatprep.mubr.msk.f32.mxu1 %vm15939_vm11, %v4970_v0  ;;  %16200 = vst [vmem:[#allocation45_spill] sm:$0xff] %v12662_v34 }
 0x2e9   : > { %v4971_v18 = vpop.trf.xlu1  ;;  %3539 = vadd.xlane.f32.xlu1 %v3474_v21  ;;  %v12614_v8 = vpop.f32.mrb[74].mxu1 }
 0x2ea   : > { %3545 = vadd.xlane.f32.xlu0 %v3477_v31  ;;  %10256 = vmatmul.mubr.msk.f32.gmra.mrb[114].mxu1 %vm15939_vm11, %v4971_v18  ;;  %v12619_v0 = vpop.f32.mrb[74].mxu0  ;;  %v12621_v62 = vpop.f32.mrb[75].mxu1  ;;  %v12636_v18 = vmul.f32 %v12507_v56, %v12573_v46 }
 0x2eb   : > { %v12625_v39 = vpop.f32.mrb[75].mxu0  ;;  %v12628_v21 = vpop.trf.xlu0 }
 0x2ec   : > { %16197 = vst [vmem:[#allocation42_spill] sm:$0xff] %v12636_v18  ;;  %v3479_v1 = vmul.f32 %v12636_v18, %v12573_v46 }
 0x2ed   : > { %v4972_v57 = vpop.trf.xlu1  ;;  %3603 = vadd.xlane.f32.xlu1 %v3506_v58 }
 0x2ee   : > { %3609 = vadd.xlane.f32.xlu0 %v3509_v23  ;;  %10258 = vmatprep.mubr.msk.f32.mxu1 %vm15939_vm11, %v4972_v57  ;;  %v12645_v57 = vmul.f32 %v12507_v56, %v12528_v37 }
 0x2ef   : > { %v5001_v50 = vpop.trf.xlu0 }
 0x2f0   : > { %16198 = vst [vmem:[#allocation43_spill] sm:$0xff] %v12645_v57  ;;  %v3476_v11 = vmul.f32 %v12528_v37, %v12645_v57  ;;  %v3508_v37 = vmul.f32 %v12525_v27, %v12662_v34  ;;  %v12723_v34 = vmul.f32 %v12507_v56, %v12538_v26 }
 0x2f1   : > { %v4973_v59 = vpop.trf.xlu1  ;;  %3209 = vadd.xlane.f32.xlu1 %v12533_v17  ;;  %v12631_v31 = vpop.f32.mrb[76].mxu1 }
 0x2f2   : > { %3219 = vadd.xlane.f32.xlu0 %v12569_v61  ;;  %10259 = vmatmul.mubr.msk.f32.gmra.mrb[116].mxu1 %vm15939_vm11, %v4973_v59  ;;  %v12639_v40 = vpop.f32.mrb[76].mxu0  ;;  %v12641_v58 = vpop.f32.mrb[77].mxu1  ;;  %v12656_v59 = vmul.f32 %v12507_v56, %v12571_v44  ;;  %16204 = vst [vmem:[#allocation49_spill] sm:$0xff] %v12723_v34  ;;  %v3510_v51 = vmul.f32 %v12538_v26, %v12723_v34 }
 0x2f3   : > { %v12647_v23 = vpop.f32.mrb[77].mxu0  ;;  %v5002_v57 = vpop.trf.xlu0  ;;  %v12756_v26 = vmul.f32 %v12507_v56, %v12625_v39  ;;  %v12778_v34 = vmul.f32 %v12507_v56, %v12621_v62 }
 0x2f4   : > { %16199 = vst [vmem:[#allocation44_spill] sm:$0xff] %v12656_v59  ;;  %v3511_v18 = vmul.f32 %v12656_v59, %v12571_v44 }
 0x2f5   : > { %v4974_v17 = vpop.trf.xlu1  ;;  %3273 = vadd.xlane.f32.xlu1 %v12530_v52  ;;  %16205 = vst [vmem:[#allocation50_spill] sm:$0xff] %v12756_v26 }
 0x2f6   : > { %3283 = vadd.xlane.f32.xlu0 %v12564_v38  ;;  %10261 = vmatprep.mubr.msk.f32.mxu1 %vm15939_vm11, %v4974_v17 }
 0x2f9   : > { %v4975_v52 = vpop.trf.xlu1  ;;  %3543 = vadd.xlane.f32.xlu1 %v3476_v11  ;;  %v12664_v7 = vpop.f32.mrb[78].mxu1 }
 0x2fa   : > { %10262 = vmatmul.mubr.msk.f32.gmra.mrb[118].mxu1 %vm15939_vm11, %v4975_v52  ;;  %3549 = vadd.xlane.f32.xlu0 %v3479_v1  ;;  %v12669_v17 = vpop.f32.mrb[79].mxu1  ;;  %v12671_v63 = vpop.f32.mrb[78].mxu0 }
 0x2fb   : > { %10264 = vmatprep.mubr.msk.f32.mxu1 %vm15939_vm11, %v12498_v54  ;;  %v12677_v11 = vpop.f32.mrb[79].mxu0  ;;  %v5003_v1 = vpop.trf.xlu0  ;;  %v12693_v54 = vmul.f32 %v12507_v56, %v12596_v36 }
 0x2fd   : > { %3607 = vadd.xlane.f32.xlu1 %v3508_v37  ;;  %v12679_v16 = vpop.trf.xlu1  ;;  %16201 = vst [vmem:[#allocation46_spill] sm:$0xff] %v12693_v54  ;;  %v12717_v37 = vmul.f32 %v12507_v56, %v12590_v15 }
 0x2fe   : > { %10265 = vmatmul.mubr.msk.f32.gmra.mrb[120].mxu1 %vm15939_vm11, %v12502_v24  ;;  %3613 = vadd.xlane.f32.xlu0 %v3511_v18  ;;  %v3481_v18 = vmul.f32 %v12693_v54, %v12596_v36 }
 0x2ff   : > { %10267 = vmatprep.mubr.msk.f32.mxu1 %vm15939_vm11, %v12505_v53  ;;  %v12701_v53 = vmul.f32 %v12507_v56, %v12545_v5  ;;  %16203 = vst [vmem:[#allocation48_spill] sm:$0xff] %v12717_v37  ;;  %v3513_v59 = vmul.f32 %v12717_v37, %v12590_v15  ;;  %v12784_v37 = vmul.f32 %v12507_v56, %v12564_v38 }
 0x301   : > { %3213 = vadd.xlane.f32.xlu1 %v12550_v9  ;;  %v12686_v27 = vpop.f32.mrb[80].mxu0  ;;  %16202 = vst [vmem:[#allocation47_spill] sm:$0xff] %v12701_v53  ;;  %v12705_v9 = vpop.trf.xlu1  ;;  %16207 = vst [vmem:[#allocation52_spill] sm:$0xff] %v12784_v37 }
 0x302   : > { %10268 = vmatmul.mubr.msk.f32.gmra.mrb[122].mxu1 %vm15939_vm11, %v12523_v19  ;;  %3223 = vadd.xlane.f32.xlu0 %v12588_v33  ;;  %v12695_v52 = vpop.f32.mrb[80].mxu1  ;;  %v12697_v24 = vpop.f32.mrb[81].mxu0 }
 0x303   : > { %10270 = vmatprep.mubr.msk.f32.mxu1 %vm15939_vm11, %v12536_v29  ;;  %v12707_v19 = vpop.f32.mrb[81].mxu1  ;;  %v3478_v29 = vmul.f32 %v12545_v5, %v12701_v53 }
 0x305   : > { %3277 = vadd.xlane.f32.xlu1 %v12548_v43  ;;  %v5004_v43 = vpop.trf.xlu0  ;;  %v12727_v54 = vpop.trf.xlu1 }
 0x306   : > { %10271 = vmatmul.mubr.msk.f32.gmra.mrb[124].mxu1 %vm15939_vm11, %v12562_v45  ;;  %3287 = vadd.xlane.f32.xlu0 %v12580_v32 }
 0x307   : > { %10273 = vmatprep.mubr.msk.f32.mxu1 %vm15939_vm11, %v12577_v48 }
 0x309   : > { %3547 = vadd.xlane.f32.xlu1 %v3478_v29  ;;  %v12729_v45 = vpop.f32.mrb[82].mxu0  ;;  %v5005_v29 = vpop.trf.xlu0 }
 0x30a   : > { %10274 = vmatmul.mubr.msk.f32.gmra.mrb[126].mxu1 %vm15939_vm11, %v12612_v47  ;;  %3553 = vadd.xlane.f32.xlu0 %v3481_v18  ;;  %v12735_v5 = vpop.f32.mrb[82].mxu1  ;;  %v12737_v53 = vpop.f32.mrb[83].mxu0 }
 0x30b   : > { %10276 = vmatprep.mubr.msk.f32.mxu1 %vm15939_vm11, %v12628_v21  ;;  %v12743_v48 = vpop.f32.mrb[83].mxu1  ;;  %v12747_v47 = vpop.trf.xlu1  ;;  %v12764_v21 = vmul.f32 %v12507_v56, %v12569_v61 }
 0x30d   : > { %3611 = vadd.xlane.f32.xlu1 %v3510_v51  ;;  %16206 = vst [vmem:[#allocation51_spill] sm:$0xff] %v12764_v21 }
 0x30e   : > { %10277 = vmatmul.mubr.msk.f32.gmra.mrb[128].mxu1 %vm15939_vm11, %v5001_v50  ;;  %3617 = vadd.xlane.f32.xlu0 %v3513_v59 }
 0x30f   : > { %10279 = vmatprep.mubr.msk.f32.mxu1 %vm15939_vm11, %v5002_v57  ;;  %v5006_v57 = vpop.trf.xlu0  ;;  %v12770_v59 = vpop.trf.xlu1 }
 0x311   : > { %3217 = vadd.xlane.f32.xlu1 %v12573_v46  ;;  %v12750_v18 = vpop.f32.mrb[84].mxu0 }
 0x312   : > { %10280 = vmatmul.mubr.msk.f32.gmra.mrb[130].mxu1 %vm15939_vm11, %v5003_v1  ;;  %3227 = vadd.xlane.f32.xlu0 %v12619_v0  ;;  %v12758_v51 = vpop.f32.mrb[84].mxu1  ;;  %v12760_v50 = vpop.f32.mrb[85].mxu0  ;;  %v3483_v1 = vmul.f32 %v12756_v26, %v12625_v39 }
 0x313   : > { %10282 = vmatprep.mubr.msk.f32.mxu1 %vm15939_vm11, %v5004_v43  ;;  %v12767_v46 = vpop.f32.mrb[85].mxu1  ;;  %v3480_v43 = vmul.f32 %v12569_v61, %v12764_v21  ;;  %v3512_v61 = vmul.f32 %v12564_v38, %v12784_v37  ;;  %v12816_v38 = vmul.f32 %v12507_v56, %v12647_v23 }
 0x315   : > { %3281 = vadd.xlane.f32.xlu1 %v12571_v44  ;;  %v5007_v44 = vpop.trf.xlu0 }
 0x316   : > { %10283 = vmatmul.mubr.msk.f32.gmra.mrb[132].mxu1 %vm15939_vm11, %v5005_v29  ;;  %3291 = vadd.xlane.f32.xlu0 %v12614_v8  ;;  %v3515_v29 = vmul.f32 %v12778_v34, %v12621_v62 }
 0x317   : > { %10285 = vmatprep.mubr.msk.f32.mxu1 %vm15939_vm11, %v5006_v57 }
 0x319   : > { %3551 = vadd.xlane.f32.xlu1 %v3480_v43  ;;  %v12787_v26 = vpop.f32.mrb[86].mxu0  ;;  %v12802_v43 = vpop.trf.xlu1 }
 0x31a   : > { %10286 = vmatmul.mubr.msk.f32.gmra.mrb[134].mxu1 %vm15939_vm11, %v5007_v44  ;;  %3557 = vadd.xlane.f32.xlu0 %v3483_v1  ;;  %v12792_v20 = vpop.f32.mrb[86].mxu1  ;;  %v12794_v28 = vpop.f32.mrb[87].mxu0  ;;  %v3485_v44 = vmul.f32 %v12816_v38, %v12647_v23 }
 0x31b   : > { %10288 = vmatprep.mubr.msk.f32.mxu1 %vm15939_vm11, %v12401_v60  ;;  %v12800_v57 = vpop.f32.mrb[87].mxu1  ;;  %v12820_v60 = vmul.f32 %v12507_v56, %v12588_v33 }
 0x31d   : > { %3615 = vadd.xlane.f32.xlu1 %v3512_v61  ;;  %v12809_v1 = vpop.trf.xlu1  ;;  %16208 = vst [vmem:[#allocation53_spill] sm:$0xff] %v12820_v60 }
 0x31e   : > { %10289 = vmatmul.mubr.msk.f32.gmra.mrb[136].mxu1 %vm15939_vm11, %v12407_v30  ;;  %3621 = vadd.xlane.f32.xlu0 %v3515_v29  ;;  %v3482_v29 = vmul.f32 %v12588_v33, %v12820_v60 }
 0x31f   : > { %10291 = vmatprep.mubr.msk.f32.mxu1 %vm15939_vm11, %v12417_v41 }
 0x321   : > { %3221 = vadd.xlane.f32.xlu1 %v12596_v36  ;;  %v12850_v61 = vpop.trf.xlu1 }
 0x322   : > { %10292 = vmatmul.mubr.msk.f32.gmra.mrb[138].mxu1 %vm15939_vm11, %v12431_v14  ;;  %3231 = vadd.xlane.f32.xlu0 %v12639_v40  ;;  %v12824_v30 = vpop.f32.mrb[88].mxu1 }
 0x323   : > { %10294 = vmatprep.mubr.msk.f32.mxu1 %vm15939_vm11, %v12444_v3  ;;  %v12826_v41 = vpop.f32.mrb[89].mxu1  ;;  %v12828_v36 = vpop.f32.mrb[88].mxu0  ;;  %v12840_v3 = vmul.f32 %v12507_v56, %v12641_v58 }
 0x324   : > { %v12831_v14 = vpop.f32.mrb[89].mxu0 }
 0x325   : > { %3285 = vadd.xlane.f32.xlu1 %v12590_v15  ;;  %16209 = vst [vmem:[#allocation54_spill] sm:$0xff] %v12840_v3  ;;  %v12846_v15 = vmul.f32 %v12507_v56, %v12580_v32 }
 0x326   : > { %10295 = vmatmul.mubr.msk.f32.gmra.mrb[140].mxu1 %vm15939_vm11, %v12453_v13  ;;  %3295 = vadd.xlane.f32.xlu0 %v12631_v31  ;;  %v3517_v13 = vmul.f32 %v12840_v3, %v12641_v58 }
 0x327   : > { %16210 = vst [vmem:[#allocation55_spill] sm:$0xff] %v12846_v15  ;;  %10297 = vmatprep.mubr.msk.f32.mxu1 %vm15939_vm11, %v12460_v22  ;;  %v3514_v33 = vmul.f32 %v12580_v32, %v12846_v15 }
 0x329   : > { %3555 = vadd.xlane.f32.xlu1 %v3482_v29  ;;  %v12866_v29 = vpop.trf.xlu1 }
 0x32a   : > { %10298 = vmatmul.mubr.msk.f32.gmra.mrb[142].mxu1 %vm15939_vm11, %v12467_v35  ;;  %3561 = vadd.xlane.f32.xlu0 %v3485_v44  ;;  %v12860_v60 = vpop.f32.mrb[90].mxu1  ;;  %v12880_v35 = vmul.f32 %v12507_v56, %v12619_v0 }
 0x32b   : > { %10300 = vmatprep.mubr.msk.f32.mxu1 %vm15939_vm11, %v12475_v25  ;;  %v12862_v37 = vpop.f32.mrb[91].mxu1  ;;  %v12864_v22 = vpop.f32.mrb[90].mxu0 }
 0x32c   : > { %v12868_v21 = vpop.f32.mrb[91].mxu0  ;;  %16211 = vst [vmem:[#allocation56_spill] sm:$0xff] %v12880_v35 }
 0x32d   : > { %3619 = vadd.xlane.f32.xlu1 %v3514_v33 }
 0x32e   : > { %10301 = vmatmul.mubr.msk.f32.gmra.mrb[144].mxu1 %vm15939_vm11, %v12479_v49  ;;  %3625 = vadd.xlane.f32.xlu0 %v3517_v13  ;;  %v5065_v49 = vpop.trf.xlu1 }
 0x32f   : > { %10303 = vmatprep.mubr.msk.f32.mxu1 %vm15939_vm11, %v12481_v12 }
 0x331   : > { %3225 = vadd.xlane.f32.xlu1 %v12625_v39 }
 0x332   : > { %10304 = vmatmul.mubr.msk.f32.gmra.mrb[146].mxu1 %vm15939_vm11, %v12485_v2  ;;  %3235 = vadd.xlane.f32.xlu0 %v12671_v63  ;;  %v12884_v25 = vpop.f32.mrb[92].mxu1  ;;  %v3484_v2 = vmul.f32 %v12619_v0, %v12880_v35  ;;  %v5066_v44 = vpop.trf.xlu1 }
 0x333   : > { %10306 = vmatprep.mubr.msk.f32.mxu1 %vm15939_vm11, %v12487_v55  ;;  %v12886_v32 = vpop.f32.mrb[93].mxu1  ;;  %v12888_v12 = vpop.f32.mrb[92].mxu0  ;;  %v12900_v55 = vmul.f32 %v12507_v56, %v12614_v8 }
 0x334   : > { %v12891_v39 = vpop.f32.mrb[93].mxu0 }
 0x335   : > { %3289 = vadd.xlane.f32.xlu1 %v12621_v62  ;;  %16212 = vst [vmem:[#allocation57_spill] sm:$0xff] %v12900_v55  ;;  %v12906_v62 = vmul.f32 %v12507_v56, %v12677_v11 }
 0x336   : > { %10307 = vmatmul.mubr.msk.f32.gmra.mrb[148].mxu1 %vm15939_vm11, %v12489_v6  ;;  %3299 = vadd.xlane.f32.xlu0 %v12664_v7  ;;  %v3516_v6 = vmul.f32 %v12614_v8, %v12900_v55 }
 0x337   : > { %10309 = vmatprep.mubr.msk.f32.mxu1 %vm15939_vm11, %v12491_v4  ;;  %16213 = vst [vmem:[#allocation58_spill] sm:$0xff] %v12906_v62 }
 0x339   : > { %3559 = vadd.xlane.f32.xlu1 %v3484_v2  ;;  %v3487_v2 = vmul.f32 %v12906_v62, %v12677_v11 }
 0x33a   : > { %10310 = vmatmul.mubr.msk.f32.gmra.mrb[150].mxu1 %vm15939_vm11, %v12493_v42  ;;  %3239 = vadd.xlane.f32.xlu0 %v12686_v27  ;;  %v12915_v0 = vpop.f32.mrb[94].mxu1  ;;  %v12925_v42 = vmul.f32 %v12507_v56, %v12669_v17 }
 0x33b   : > { %10312 = vmatprep.mubr.msk.f32.mxu1 %vm15939_vm11, %v12679_v16  ;;  %v12917_v4 = vpop.f32.mrb[95].mxu1  ;;  %v12919_v13 = vpop.f32.mrb[94].mxu0 }
 0x33c   : > { %v12921_v33 = vpop.f32.mrb[95].mxu0  ;;  %v5067_v16 = vpop.trf.xlu1  ;;  %v3519_v62 = vmul.f32 %v12925_v42, %v12669_v17 }
 0x33d   : > { %3623 = vadd.xlane.f32.xlu1 %v3516_v6 }
 0x33e   : > { %10313 = vmatmul.mubr.msk.f32.gmra.mrb[152].mxu1 %vm15939_vm11, %v12705_v9  ;;  %3303 = vadd.xlane.f32.xlu0 %v12695_v52  ;;  %v9938_v8 = vpop.f32.mrb[96].mxu1 }
 0x33f   : > { %10315 = vmatprep.mubr.msk.f32.mxu1 %vm15939_vm11, %v12727_v54  ;;  %v9939_v6 = vpop.f32.mrb[97].mxu1  ;;  %v12943_v54 = vmul.f32 %v12507_v56, %v12639_v40 }
 0x340   : > { %v12934_v55 = vadd.f32 %v9939_v6, %v9938_v8  ;;  %v9941_v35 = vpop.f32.mrb[98].mxu1  ;;  %v10047_v15 = vpop.f32.mrb[96].mxu0 }
 0x341   : > { %3229 = vadd.xlane.f32.xlu1 %v12647_v23  ;;  %v9942_v3 = vpop.f32.mrb[99].mxu1  ;;  %v10048_v9 = vpop.f32.mrb[97].mxu0  ;;  %16214 = vst [vmem:[#allocation59_spill] sm:$0xff] %v12943_v54 }
 0x342   : > { %10316 = vmatmul.mubr.msk.f32.gmra.mrb[154].mxu1 %vm15939_vm11, %v12747_v47  ;;  %3565 = vadd.xlane.f32.xlu0 %v3487_v2  ;;  %v10049_v35 = vadd.f32 %v10048_v9, %v10047_v15  ;;  %v10050_v8 = vpop.f32.mrb[98].mxu0  ;;  %v5068_v6 = vpop.trf.xlu1  ;;  %v3486_v47 = vmul.f32 %v12639_v40, %v12943_v54  ;;  %v12954_v3 = vmul.f32 %v12507_v56, %v12631_v31 }
 0x343   : > { %10318 = vmatprep.mubr.msk.f32.mxu1 %vm15939_vm11, %v12770_v59  ;;  %v10051_v23 = vpop.f32.mrb[99].mxu0  ;;  %v12960_v59 = vmul.f32 %v12507_v56, %v12697_v24 }
 0x344   : > { %16215 = vst [vmem:[#allocation60_spill] sm:$0xff] %v12954_v3  ;;  %v3518_v40 = vmul.f32 %v12631_v31, %v12954_v3  ;;  %v9546_v23 = vld [vmem:[%s12274_s17 + $0x1] ss:$0 sm:$0xff] }
 0x345   : > { %3293 = vadd.xlane.f32.xlu1 %v12641_v58  ;;  %v12965_v58 = vpop.xlane.xlu0 %2345  ;;  %v3489_v15 = vmul.f32 %v12960_v59, %v12697_v24 }
 0x346   : > { %10319 = vmatmul.mubr.msk.f32.gmra.mrb[156].mxu1 %vm15939_vm11, %v12802_v43  ;;  %3629 = vadd.xlane.f32.xlu0 %v3519_v62  ;;  %16216 = vst [vmem:[#allocation61_spill] sm:$0xff] %v12965_v58  ;;  %v5069_v43 = vpop.trf.xlu1  ;;  %v12988_v62 = vmul.f32 %v12507_v56, %v12671_v63 }
 0x347   : > { %10321 = vmatprep.mubr.msk.f32.mxu1 %vm15939_vm11, %v12809_v1  ;;  %v12973_v1 = vmul.f32 %v12507_v56, %v12707_v19 }
 0x348   : > { %16217 = vst [vmem:[#allocation62_spill] sm:$0xff] %v12988_v62 }
 0x349   : > { %3563 = vadd.xlane.f32.xlu1 %v3486_v47  ;;  %v9710_v47 = vld [vmem:[%s12274_s17 + $0x2] ss:$0 sm:$0xff] }
 0x34a   : > { %10322 = vmatmul.mubr.msk.f32.gmra.mrb[158].mxu1 %vm15939_vm11, %v12850_v61  ;;  %3243 = vadd.xlane.f32.xlu0 %v12729_v45  ;;  %v5070_v31 = vpop.trf.xlu1 }
 0x34b   : > { %10324 = vmatprep.mubr.msk.f32.mxu1 %vm15939_vm11, %v12866_v29  ;;  %v3521_v29 = vmul.f32 %v12973_v1, %v12707_v19 }
 0x34d   : > { %3627 = vadd.xlane.f32.xlu1 %v3518_v40 }
 0x34e   : > { %10325 = vmatmul.mubr.msk.f32.gmra.mrb[160].mxu1 %vm15939_vm11, %v5065_v49  ;;  %3307 = vadd.xlane.f32.xlu0 %v12735_v5 }
 0x34f   : > { %v12979_v61 = vpop.xlane.xlu0 %3271  ;;  %10327 = vmatprep.mubr.msk.f32.mxu1 %vm15939_vm11, %v5066_v44  ;;  %v3488_v44 = vmul.f32 %v12671_v63, %v12988_v62  ;;  %v13016_v63 = vmul.f32 %v12507_v56, %v12743_v48  ;;  %v13031_v62 = vmul.f32 %v12507_v56, %v12686_v27 }
 0x351   : > { %3233 = vadd.xlane.f32.xlu1 %v12677_v11  ;;  %v12997_v11 = vmul.f32 %v12507_v56, %v12664_v7  ;;  %16220 = vst [vmem:[#allocation65_spill] sm:$0xff] %v13031_v62 }
 0x352   : > { %3569 = vadd.xlane.f32.xlu0 %v3489_v15  ;;  %10328 = vmatmul.mubr.msk.f32.gmra.mrb[162].mxu1 %vm15939_vm11, %v5067_v16  ;;  %v5071_v16 = vpop.trf.xlu1 }
 0x353   : > { %v12990_v49 = vpop.xlane.xlu0 %3205  ;;  %10330 = vmatprep.mubr.msk.f32.mxu1 %vm15939_vm11, %v5068_v6  ;;  %16218 = vst [vmem:[#allocation63_spill] sm:$0xff] %v12997_v11  ;;  %v3520_v9 = vmul.f32 %v12664_v7, %v12997_v11  ;;  %v4824_v7 = vadd.f32 %v12934_v55, %v9546_v23 }
 0x355   : > { %3297 = vadd.xlane.f32.xlu1 %v12669_v17  ;;  %v13006_v17 = vmul.f32 %v12507_v56, %v12737_v53 }
 0x356   : > { %3633 = vadd.xlane.f32.xlu0 %v3521_v29  ;;  %10331 = vmatmul.mubr.msk.f32.gmra.mrb[164].mxu1 %vm15939_vm11, %v5069_v43 }
 0x357   : > { %v13001_v2 = vpop.xlane.xlu0 %3537  ;;  %10333 = vmatprep.mubr.msk.f32.mxu1 %vm15939_vm11, %v5070_v31  ;;  %v3491_v6 = vmul.f32 %v13006_v17, %v12737_v53 }
 0x359   : > { %3567 = vadd.xlane.f32.xlu1 %v3488_v44  ;;  %v7326_v44 = vadd.f32 %v10049_v35, %v9710_v47  ;;  %v13042_v35 = vmul.f32 %v12507_v56, %v12695_v52  ;;  %v13048_v47 = vmul.f32 %v12507_v56, %v12760_v50 }
 0x35a   : > { %3247 = vadd.xlane.f32.xlu0 %v12750_v18  ;;  %10334 = vmatmul.mubr.msk.f32.gmra.mrb[166].mxu1 %vm15939_vm11, %v5071_v16 }
 0x35b   : > { %v13012_v8 = vpop.xlane.xlu0 %3601  ;;  %16223 = vst [vmem:[#allocation68_spill] sm:$0xff] %v13042_v35 }
 0x35c   : > { %16219 = vst [vmem:[#allocation64_spill] sm:$0xff] %v13012_v8 }
 0x35d   : > { %3631 = vadd.xlane.f32.xlu1 %v3520_v9  ;;  %v3523_v9 = vmul.f32 %v13016_v63, %v12743_v48 }
 0x35e   : > { %3311 = vadd.xlane.f32.xlu0 %v12758_v51  ;;  %v9960_v40 = vpop.f32.mrb[100].mxu1 }
 0x35f   : > { %v13023_v43 = vpop.xlane.xlu0 %3211  ;;  %v9961_v15 = vpop.f32.mrb[101].mxu1 }
 0x360   : > { %v9962_v31 = vadd.f32 %v9961_v15, %v9960_v40  ;;  %v9963_v29 = vpop.f32.mrb[102].mxu1  ;;  %v10069_v16 = vpop.f32.mrb[100].mxu0 }
 0x361   : > { %3237 = vadd.xlane.f32.xlu1 %v12697_v24  ;;  %v9964_v8 = vpop.f32.mrb[103].mxu1  ;;  %v10070_v11 = vpop.f32.mrb[101].mxu0 }
 0x362   : > { %3573 = vadd.xlane.f32.xlu0 %v3491_v6  ;;  %v13033_v3 = vadd.f32 %v9962_v31, %v4824_v7  ;;  %v10071_v55 = vadd.f32 %v10070_v11, %v10069_v16  ;;  %v10072_v23 = vpop.f32.mrb[102].mxu0  ;;  %v3490_v8 = vmul.f32 %v12686_v27, %v13031_v62  ;;  %v13059_v7 = vmul.f32 %v12507_v56, %v12767_v46 }
 0x363   : > { %v13035_v54 = vpop.xlane.xlu0 %3275  ;;  %v10073_v40 = vpop.f32.mrb[103].mxu0  ;;  %v3493_v27 = vmul.f32 %v13048_v47, %v12760_v50  ;;  %v13075_v16 = vmul.f32 %v12507_v56, %v12729_v45  ;;  %v13082_v23 = vmul.f32 %v12507_v56, %v12735_v5 }
 0x364   : > { %16221 = vst [vmem:[#allocation66_spill] sm:$0xff] %v13033_v3  ;;  %v13038_v24 = vadd.f32 %v10071_v55, %v7326_v44 }
 0x365   : > { %3301 = vadd.xlane.f32.xlu1 %v12707_v19  ;;  %v3522_v19 = vmul.f32 %v12695_v52, %v13042_v35  ;;  %v3525_v52 = vmul.f32 %v13059_v7, %v12767_v46  ;;  %16226 = vst [vmem:[#allocation71_spill] sm:$0xff] %v13075_v16  ;;  %16227 = vst [vmem:[#allocation72_spill] sm:$0xff] %v13082_v23 }
 0x366   : > { %16222 = vst [vmem:[#allocation67_spill] sm:$0xff] %v13038_v24  ;;  %3637 = vadd.xlane.f32.xlu0 %v3523_v9 }
 0x367   : > { %v3542_v6 = vpop.xlane.xlu0 %3541 }
 0x369   : > { %3571 = vadd.xlane.f32.xlu1 %v3490_v8 }
 0x36a   : > { %v13050_v11 = vpop.xlane.xlu1 %2358  ;;  %3251 = vadd.xlane.f32.xlu0 %v12787_v26 }
 0x36b   : > { %16224 = vst [vmem:[#allocation69_spill] sm:$0xff] %v13050_v11  ;;  %v13055_v15 = vpop.xlane.xlu0 %3605 }
 0x36c   : > { %16225 = vst [vmem:[#allocation70_spill] sm:$0xff] %v13055_v15 }
 0x36d   : > { %3635 = vadd.xlane.f32.xlu1 %v3522_v19 }
 0x36e   : > { %v13063_v31 = vpop.xlane.xlu1 %3207  ;;  %3315 = vadd.xlane.f32.xlu0 %v12792_v20 }
 0x36f   : > { %v13066_v29 = vpop.xlane.xlu0 %3215 }
 0x371   : > { %3241 = vadd.xlane.f32.xlu1 %v12737_v53  ;;  %v3492_v53 = vmul.f32 %v12729_v45, %v13075_v16  ;;  %v13100_v45 = vmul.f32 %v12507_v56, %v12800_v57 }
 0x372   : > { %v13071_v44 = vpop.xlane.xlu1 %3269  ;;  %3577 = vadd.xlane.f32.xlu0 %v3493_v27  ;;  %v13089_v27 = vmul.f32 %v12507_v56, %v12794_v28 }
 0x373   : > { %v13077_v9 = vpop.xlane.xlu0 %3279  ;;  %16231 = vst [vmem:[#allocation76_spill] sm:$0xff] %v13100_v45 }
 0x374   : > { %16228 = vst [vmem:[#allocation73_spill] sm:$0xff] %v13089_v27 }
 0x375   : > { %3305 = vadd.xlane.f32.xlu1 %v12743_v48  ;;  %v3524_v48 = vmul.f32 %v12735_v5, %v13082_v23  ;;  %v3527_v5 = vmul.f32 %v13100_v45, %v12800_v57  ;;  %v13129_v23 = vmul.f32 %v12507_v56, %v12831_v14 }
 0x376   : > { %v3540_v55 = vpop.xlane.xlu1 %3539  ;;  %3641 = vadd.xlane.f32.xlu0 %v3525_v52 }
 0x377   : > { %v3665_v40 = vadd.f32 %v3540_v55, %v13001_v2  ;;  %v3546_v8 = vpop.xlane.xlu0 %3545  ;;  %v3495_v2 = vmul.f32 %v13089_v27, %v12794_v28  ;;  %16234 = vst [vmem:[#allocation79_spill] sm:$0xff] %v13129_v23 }
 0x379   : > { %3575 = vadd.xlane.f32.xlu1 %v3492_v53  ;;  %v3666_v19 = vadd.f32 %v3665_v40, %v3542_v6  ;;  %v13116_v40 = vmul.f32 %v12507_v56, %v12750_v18 }
 0x37a   : > { %v13091_v11 = vpop.xlane.xlu1 %3603  ;;  %3255 = vadd.xlane.f32.xlu0 %v12828_v36 }
 0x37b   : > { %16229 = vst [vmem:[#allocation74_spill] sm:$0xff] %v13091_v11  ;;  %v13096_v52 = vpop.xlane.xlu0 %3609  ;;  %16232 = vst [vmem:[#allocation77_spill] sm:$0xff] %v13116_v40 }
 0x37c   : > { %16230 = vst [vmem:[#allocation75_spill] sm:$0xff] %v13096_v52  ;;  %v13123_v52 = vmul.f32 %v12507_v56, %v12758_v51 }
 0x37d   : > { %3639 = vadd.xlane.f32.xlu1 %v3524_v48 }
 0x37e   : > { %v13104_v6 = vpop.xlane.xlu1 %3209  ;;  %3319 = vadd.xlane.f32.xlu0 %v12824_v30  ;;  %16233 = vst [vmem:[#allocation78_spill] sm:$0xff] %v13123_v52 }
 0x37f   : > { %v13107_v55 = vpop.xlane.xlu0 %3219 }
 0x381   : > { %3245 = vadd.xlane.f32.xlu1 %v12760_v50  ;;  %v3494_v50 = vmul.f32 %v12750_v18, %v13116_v40  ;;  %v13140_v18 = vmul.f32 %v12507_v56, %v12826_v41 }
 0x382   : > { %v13112_v53 = vpop.xlane.xlu1 %3273  ;;  %3581 = vadd.xlane.f32.xlu0 %v3495_v2 }
 0x383   : > { %v13118_v48 = vpop.xlane.xlu0 %3283  ;;  %16237 = vst [vmem:[#allocation82_spill] sm:$0xff] %v13140_v18 }
 0x385   : > { %3309 = vadd.xlane.f32.xlu1 %v12767_v46  ;;  %v3526_v46 = vmul.f32 %v12758_v51, %v13123_v52  ;;  %v3529_v51 = vmul.f32 %v13140_v18, %v12826_v41 }
 0x386   : > { %v3544_v24 = vpop.xlane.xlu1 %3543  ;;  %3645 = vadd.xlane.f32.xlu0 %v3527_v5 }
 0x387   : > { %v3667_v15 = vadd.f32 %v3666_v19, %v3544_v24  ;;  %v3550_v11 = vpop.xlane.xlu0 %3549  ;;  %v3497_v24 = vmul.f32 %v13129_v23, %v12831_v14 }
 0x389   : > { %3579 = vadd.xlane.f32.xlu1 %v3494_v50  ;;  %v3668_v2 = vadd.f32 %v3667_v15, %v3546_v8  ;;  %v13156_v50 = vmul.f32 %v12507_v56, %v12787_v26 }
 0x38a   : > { %v13131_v16 = vpop.xlane.xlu1 %3607  ;;  %3259 = vadd.xlane.f32.xlu0 %v12864_v22 }
 0x38b   : > { %16235 = vst [vmem:[#allocation80_spill] sm:$0xff] %v13131_v16  ;;  %v13136_v5 = vpop.xlane.xlu0 %3613  ;;  %16238 = vst [vmem:[#allocation83_spill] sm:$0xff] %v13156_v50 }
 0x38c   : > { %16236 = vst [vmem:[#allocation81_spill] sm:$0xff] %v13136_v5 }
 0x38d   : > { %3643 = vadd.xlane.f32.xlu1 %v3526_v46 }
 0x38e   : > { %v13144_v15 = vpop.xlane.xlu1 %3213  ;;  %3323 = vadd.xlane.f32.xlu0 %v12860_v60 }
 0x38f   : > { %v13147_v8 = vpop.xlane.xlu0 %3223 }
 0x391   : > { %3249 = vadd.xlane.f32.xlu1 %v12794_v28  ;;  %v13167_v28 = vmul.f32 %v12507_v56, %v12792_v20 }
 0x392   : > { %v13152_v19 = vpop.xlane.xlu1 %3277  ;;  %3585 = vadd.xlane.f32.xlu0 %v3497_v24  ;;  %v3496_v24 = vmul.f32 %v12787_v26, %v13156_v50  ;;  %v13186_v26 = vmul.f32 %v12507_v56, %v12862_v37 }
 0x393   : > { %v13158_v46 = vpop.xlane.xlu0 %3287  ;;  %16241 = vst [vmem:[#allocation86_spill] sm:$0xff] %v13167_v28 }
 0x394   : > { %16246 = vst [vmem:[#allocation91_spill] sm:$0xff] %v13186_v26 }
 0x395   : > { %3313 = vadd.xlane.f32.xlu1 %v12800_v57  ;;  %v13161_v5 = vpop.f32.mrb[104].mxu1  ;;  %v13173_v57 = vmul.f32 %v12507_v56, %v12868_v21 }
 0x396   : > { %16239 = vst [vmem:[#allocation84_spill] sm:$0xff] %v13161_v5  ;;  %v3548_v16 = vpop.xlane.xlu1 %3547  ;;  %3649 = vadd.xlane.f32.xlu0 %v3529_v51  ;;  %v13163_v52 = vpop.f32.mrb[105].mxu1  ;;  %v3528_v51 = vmul.f32 %v12792_v20, %v13167_v28  ;;  %v3531_v20 = vmul.f32 %v13186_v26, %v12862_v37 }
 0x397   : > { %16240 = vst [vmem:[#allocation85_spill] sm:$0xff] %v13163_v52  ;;  %v3669_v40 = vadd.f32 %v3668_v2, %v3548_v16  ;;  %v3554_v35 = vpop.xlane.xlu0 %3553  ;;  %16242 = vst [vmem:[#allocation87_spill] sm:$0xff] %v13173_v57 }
 0x399   : > { %3583 = vadd.xlane.f32.xlu1 %v3496_v24  ;;  %v3670_v18 = vadd.f32 %v3669_v40, %v3550_v11  ;;  %v3499_v11 = vmul.f32 %v13173_v57, %v12868_v21 }
 0x39a   : > { %v13175_v62 = vpop.xlane.xlu1 %3611  ;;  %3263 = vadd.xlane.f32.xlu0 %v12888_v12 }
 0x39b   : > { %16243 = vst [vmem:[#allocation88_spill] sm:$0xff] %v13175_v62  ;;  %v13180_v52 = vpop.xlane.xlu0 %3617 }
 0x39c   : > { %16244 = vst [vmem:[#allocation89_spill] sm:$0xff] %v13180_v52 }
 0x39d   : > { %3647 = vadd.xlane.f32.xlu1 %v3528_v51  ;;  %v13182_v23 = vpop.f32.mrb[106].mxu1  ;;  %v13204_v51 = vmul.f32 %v12507_v56, %v12828_v36 }
 0x39e   : > { %16245 = vst [vmem:[#allocation90_spill] sm:$0xff] %v13182_v23  ;;  %v13190_v16 = vpop.xlane.xlu1 %3217  ;;  %3327 = vadd.xlane.f32.xlu0 %v12884_v25  ;;  %v13193_v40 = vpop.f32.mrb[107].mxu1 }
 0x39f   : > { %16247 = vst [vmem:[#allocation92_spill] sm:$0xff] %v13193_v40  ;;  %v13195_v2 = vpop.xlane.xlu0 %3227  ;;  %16249 = vst [vmem:[#allocation94_spill] sm:$0xff] %v13204_v51 }
 0x3a0   : > { %16248 = vst [vmem:[#allocation93_spill] sm:$0xff] %v13195_v2 }
 0x3a1   : > { %3253 = vadd.xlane.f32.xlu1 %v12831_v14  ;;  %v13215_v14 = vmul.f32 %v12507_v56, %v12824_v30 }
 0x3a2   : > { %v13200_v24 = vpop.xlane.xlu1 %3281  ;;  %3589 = vadd.xlane.f32.xlu0 %v3499_v11  ;;  %v3498_v11 = vmul.f32 %v12828_v36, %v13204_v51  ;;  %v2347_v36 = vsub.f32 %v12284_v10, %v12965_v58  ;;  %v13250_v10 = vmul.f32 %v12507_v56, %v12921_v33  ;;  %v13256_v58 = vmul.f32 %v12507_v56, %v12864_v22 }
 0x3a3   : > { %v13206_v23 = vpop.xlane.xlu0 %3291  ;;  %16253 = vst [vmem:[#allocation98_spill] sm:$0xff] %v13215_v14  ;;  %v13271_v51 = vmul.f32 %v12507_v56, %v12860_v60 }
 0x3a4   : > { %16250 = vst [vmem:[#allocation95_spill] sm:$0xff] %v13206_v23  ;;  %16261 = vst [vmem:[#allocation106_spill] sm:$0xff] %v13250_v10 }
 0x3a5   : > { %3317 = vadd.xlane.f32.xlu1 %v12826_v41  ;;  %v13209_v52 = vpop.f32.mrb[108].mxu1  ;;  %v13221_v41 = vmul.f32 %v12507_v56, %v12891_v39  ;;  %16262 = vst [vmem:[#allocation107_spill] sm:$0xff] %v13256_v58  ;;  %16266 = vst [vmem:[#allocation111_spill] sm:$0xff] %v13271_v51 }
 0x3a6   : > { %16251 = vst [vmem:[#allocation96_spill] sm:$0xff] %v13209_v52  ;;  %v3552_v62 = vpop.xlane.xlu1 %3551  ;;  %3653 = vadd.xlane.f32.xlu0 %v3531_v20  ;;  %v13211_v28 = vpop.f32.mrb[109].mxu1  ;;  %v3530_v20 = vmul.f32 %v12824_v30, %v13215_v14  ;;  %v2348_v30 = vmul.f32 1.442695, %v2347_v36 }
 0x3a7   : > { %16252 = vst [vmem:[#allocation97_spill] sm:$0xff] %v13211_v28  ;;  %v3671_v50 = vadd.f32 %v3670_v18, %v3552_v62  ;;  %v3558_v26 = vpop.xlane.xlu0 %3557  ;;  %16254 = vst [vmem:[#allocation99_spill] sm:$0xff] %v13221_v41 }
 0x3a8   : > { %10697 = vpow2.f32 %v2348_v30  ;;  %v3500_v30 = vmul.f32 %v12864_v22, %v13256_v58  ;;  %v3333_v22 = vmul.f32 0.2, %v12990_v49 }
 0x3a9   : > { %3587 = vadd.xlane.f32.xlu1 %v3498_v11  ;;  %v3672_v57 = vadd.f32 %v3671_v50, %v3554_v35  ;;  %v3501_v35 = vmul.f32 %v13221_v41, %v12891_v39 }
 0x3aa   : > { %v13223_v52 = vpop.xlane.xlu1 %3615  ;;  %3267 = vadd.xlane.f32.xlu0 %v12919_v13 }
 0x3ab   : > { %16255 = vst [vmem:[#allocation100_spill] sm:$0xff] %v13223_v52  ;;  %v13228_v45 = vpop.xlane.xlu0 %3621  ;;  %v3503_v52 = vmul.f32 %v13250_v10, %v12921_v33 }
 0x3ac   : > { %16256 = vst [vmem:[#allocation101_spill] sm:$0xff] %v13228_v45  ;;  %v13245_v45 = vmul.f32 %v12507_v56, %v12886_v32 }
 0x3ad   : > { %3651 = vadd.xlane.f32.xlu1 %v3530_v20  ;;  %v13232_v62 = vpop.f32.mrb[110].mxu1 }
 0x3ae   : > { %16257 = vst [vmem:[#allocation102_spill] sm:$0xff] %v13232_v62  ;;  %v13236_v18 = vpop.xlane.xlu1 %3221  ;;  %3331 = vadd.xlane.f32.xlu0 %v12915_v0  ;;  %v13239_v50 = vpop.f32.mrb[111].mxu1  ;;  %16260 = vst [vmem:[#allocation105_spill] sm:$0xff] %v13245_v45  ;;  %v3533_v36 = vmul.f32 %v13245_v45, %v12886_v32 }
 0x3af   : > { %16258 = vst [vmem:[#allocation103_spill] sm:$0xff] %v13239_v50  ;;  %v13241_v11 = vpop.xlane.xlu0 %3231 }
 0x3b0   : > { %16259 = vst [vmem:[#allocation104_spill] sm:$0xff] %v13241_v11 }
 0x3b1   : > { %3257 = vadd.xlane.f32.xlu1 %v12868_v21 }
 0x3b2   : > { %v13252_v20 = vpop.xlane.xlu1 %3285  ;;  %3593 = vadd.xlane.f32.xlu0 %v3501_v35 }
 0x3b3   : > { %v13258_v62 = vpop.xlane.xlu0 %3295 }
 0x3b4   : > { %16263 = vst [vmem:[#allocation108_spill] sm:$0xff] %v13258_v62 }
 0x3b5   : > { %3321 = vadd.xlane.f32.xlu1 %v12862_v37  ;;  %v13263_v21 = vpop.f32.mrb[112].mxu1  ;;  %v13277_v37 = vmul.f32 %v12507_v56, %v12917_v4 }
 0x3b6   : > { %16264 = vst [vmem:[#allocation109_spill] sm:$0xff] %v13263_v21  ;;  %v3556_v14 = vpop.xlane.xlu1 %3555  ;;  %3657 = vadd.xlane.f32.xlu0 %v3533_v36  ;;  %v13267_v35 = vpop.f32.mrb[113].mxu1  ;;  %v3532_v36 = vmul.f32 %v12860_v60, %v13271_v51  ;;  %v16274_v60 = vld [vmem:[#allocation21_spill] sm:$0xff]  ;;  %v13324_v51 = vmul.f32 %v12507_v56, %v12884_v25 }
 0x3b7   : > { %16265 = vst [vmem:[#allocation110_spill] sm:$0xff] %v13267_v35  ;;  %v3673_v41 = vadd.f32 %v3672_v57, %v3556_v14  ;;  %v3562_v45 = vpop.xlane.xlu0 %3561  ;;  %16267 = vst [vmem:[#allocation112_spill] sm:$0xff] %v13277_v37  ;;  %v3535_v27 = vmul.f32 %v13277_v37, %v12917_v4  ;;  %v10698_v14 = vpop.eup %10697 }
 0x3b8   : > { %v2350_v49 = vsel %vm2343_vm10, %v10698_v14, 0.0  ;;  %v4869_v14 = vsel %vm2343_vm10, %v13033_v3, -inf  ;;  %v3534_v23 = vmul.f32 %v12884_v25, %v13324_v51 }
 0x3b9   : > { %3591 = vadd.xlane.f32.xlu1 %v3500_v30  ;;  %v3674_v21 = vadd.f32 %v3673_v41, %v3558_v26  ;;  %v16273_v41 = vld [vmem:[#allocation30_spill] sm:$0xff]  ;;  %v3736_v30 = vsub.f32 %v16274_v60, %v3333_v22 }
 0x3ba   : > { %v13279_v10 = vpop.xlane.xlu1 %3619  ;;  %3597 = vadd.xlane.f32.xlu0 %v3503_v52  ;;  %vm3202_vm14 = vcmp.gt.f32.partialorder %v16273_v41, 0.5  ;;  %v16279_v41 = vld [vmem:[#allocation9_spill] sm:$0xff] }
 0x3bb   : > { %16268 = vst [vmem:[#allocation113_spill] sm:$0xff] %v13279_v10  ;;  %v13283_v62 = vpop.xlane.xlu0 %3625 }
 0x3bc   : > { %16269 = vst [vmem:[#allocation114_spill] sm:$0xff] %v13283_v62  ;;  %v3365_v62 = vmul.f32 0.2, %v13071_v44 }
 0x3bd   : > { %3655 = vadd.xlane.f32.xlu1 %v3532_v36  ;;  %v13288_v57 = vpop.f32.mrb[114].mxu1 }
 0x3be   : > { %16270 = vst [vmem:[#allocation115_spill] sm:$0xff] %v13288_v57  ;;  %v13290_v58 = vpop.xlane.xlu1 %3225  ;;  %3661 = vadd.xlane.f32.xlu0 %v3535_v27  ;;  %v13292_v26 = vpop.f32.mrb[115].mxu1  ;;  %v16275_v57 = vmov 0.0   ;;  %v13308_v27 = vmul.f32 %v12507_v56, %v12888_v12  ;;  %v3768_v44 = vsub.f32 %v16279_v41, %v3365_v62 }
 0x3bf   : > { %16271 = vst [vmem:[#allocation116_spill] sm:$0xff] %v13292_v26  ;;  %v13294_v52 = vpop.xlane.xlu0 %3235  ;;  %v13304_v10 = vsel %vm3202_vm14, 1.0, %v16275_v57 }
 0x3c0   : > { %16272 = vst [vmem:[#allocation117_spill] sm:$0xff] %v13294_v52  ;;  %16276 = vst [vmem:[#allocation30_spill] sm:$0xff] %v13304_v10  ;;  %v3800_v22 = vmul.f32 %v13304_v10, %v3736_v30  ;;  %v3502_v62 = vmul.f32 %v12888_v12, %v13308_v27 }
 0x3c1   : > { %3261 = vadd.xlane.f32.xlu1 %v12891_v39  ;;  %16277 = vst [vmem:[#allocation21_spill] sm:$0xff] %v13308_v27  ;;  %v3335_v39 = vmul.f32 0.2, %v13104_v6  ;;  %v3337_v27 = vmul.f32 0.2, %v13144_v15 }
 0x3c2   : > { %v13301_v36 = vpop.xlane.xlu1 %3289  ;;  %2351 = vadd.xlane.f32.xlu0 %v2350_v49  ;;  %v3864_v52 = vmul.f32 %v3800_v22, %v3736_v30  ;;  %v16285_v22 = vld [vmem:[#allocation38_spill] sm:$0xff] }
 0x3c3   : > { %v13310_v37 = vpop.xlane.xlu0 %3299 }
 0x3c4   : > { %16278 = vst [vmem:[#allocation118_spill] sm:$0xff] %v13310_v37  ;;  %v16282_v37 = vld [vmem:[#allocation11_spill] sm:$0xff] }
 0x3c5   : > { %3325 = vadd.xlane.f32.xlu1 %v12886_v32  ;;  %v13318_v60 = vpop.f32.mrb[116].mxu1  ;;  %v3832_v32 = vmul.f32 %v13304_v10, %v3768_v44  ;;  %v3738_v3 = vsub.f32 %v16282_v37, %v3335_v39  ;;  %v3740_v39 = vsub.f32 %v16285_v22, %v3337_v27 }
 0x3c6   : > { %16280 = vst [vmem:[#allocation9_spill] sm:$0xff] %v13318_v60  ;;  %v3560_v49 = vpop.xlane.xlu1 %3559  ;;  %4870 = vmax.xlane.f32.xlu0 %v4869_v14  ;;  %v13320_v57 = vpop.f32.mrb[117].mxu1  ;;  %v3367_v60 = vmul.f32 0.2, %v13112_v53 }
 0x3c7   : > { %16281 = vst [vmem:[#allocation119_spill] sm:$0xff] %v13320_v57  ;;  %v3675_v41 = vadd.f32 %v3674_v21, %v3560_v49  ;;  %v13328_v6 = vpop.xlane.xlu0 %3239  ;;  %v3802_v12 = vmul.f32 %v13304_v10, %v3738_v3  ;;  %v16283_v21 = vld [vmem:[#allocation22_spill] sm:$0xff]  ;;  %v3896_v37 = vmul.f32 %v3832_v32, %v3768_v44  ;;  %v3804_v27 = vmul.f32 %v13304_v10, %v3740_v39 }
 0x3c8   : > { %v3770_v49 = vsub.f32 %v16283_v21, %v3367_v60  ;;  %v13360_v60 = vmul.f32 %v12507_v56, %v12919_v13  ;;  %v16288_v21 = vld [vmem:[#allocation40_spill] sm:$0xff] }
 0x3c9   : > { %3595 = vadd.xlane.f32.xlu1 %v3502_v62  ;;  %v3676_v14 = vadd.f32 %v3675_v41, %v3562_v45  ;;  %v3369_v62 = vmul.f32 0.2, %v13152_v19  ;;  %v3866_v41 = vmul.f32 %v3802_v12, %v3738_v3  ;;  %v3339_v3 = vmul.f32 0.2, %v13190_v16 }
 0x3ca   : > { %v13333_v11 = vpop.xlane.xlu1 %3623  ;;  %3928 = vadd.xlane.f32.xlu0 %v3864_v52  ;;  %v3834_v25 = vmul.f32 %v13304_v10, %v3770_v49 }
 0x3cb   : > { %v13337_v2 = vpop.xlane.xlu0 %3303  ;;  %v3772_v19 = vsub.f32 %v16288_v21, %v3369_v62  ;;  %v3868_v21 = vmul.f32 %v3804_v27, %v3740_v39 }
 0x3cd   : > { %3659 = vadd.xlane.f32.xlu1 %v3534_v23  ;;  %v13342_v53 = vpop.f32.mrb[118].mxu1  ;;  %v3836_v16 = vmul.f32 %v13304_v10, %v3772_v19 }
 0x3ce   : > { %16284 = vst [vmem:[#allocation11_spill] sm:$0xff] %v13342_v53  ;;  %v13344_v30 = vpop.xlane.xlu1 %3229  ;;  %3992 = vadd.xlane.f32.xlu0 %v3896_v37  ;;  %v13346_v45 = vpop.f32.mrb[119].mxu1 }
 0x3cf   : > { %v3566_v52 = vpop.xlane.xlu0 %3565  ;;  %v3900_v39 = vmul.f32 %v3836_v16, %v3772_v19 }
 0x3d1   : > { %3265 = vadd.xlane.f32.xlu1 %v12921_v33  ;;  %v13352_v15 = vpop.f32.mrb[120].mxu1  ;;  %v3898_v33 = vmul.f32 %v3834_v25, %v3770_v49  ;;  %v16291_v49 = vld [vmem:[#allocation42_spill] sm:$0xff]  ;;  %v3371_v25 = vmul.f32 0.2, %v13200_v24  ;;  %v3341_v24 = vmul.f32 0.2, %v13236_v18 }
 0x3d2   : > { %16286 = vst [vmem:[#allocation22_spill] sm:$0xff] %v13352_v15  ;;  %v13354_v23 = vpop.xlane.xlu1 %3293  ;;  %3932 = vadd.xlane.f32.xlu0 %v3866_v41  ;;  %v13356_v44 = vpop.f32.mrb[121].mxu1  ;;  %v13374_v41 = vmul.f32 %v12507_v56, %v12915_v0  ;;  %v3504_v15 = vmul.f32 %v12919_v13, %v13360_v60 }
 0x3d3   : > { %v13362_v32 = vpop.xlane.xlu0 %3629 }
 0x3d4   : > { %16287 = vst [vmem:[#allocation38_spill] sm:$0xff] %v13362_v32  ;;  %v3536_v13 = vmul.f32 %v12915_v0, %v13374_v41 }
 0x3d5   : > { %3329 = vadd.xlane.f32.xlu1 %v12917_v4  ;;  %v13368_v12 = vpop.f32.mrb[122].mxu1  ;;  %v3742_v4 = vsub.f32 %v16291_v49, %v3339_v3  ;;  %v16294_v3 = vld [vmem:[#allocation44_spill] sm:$0xff] }
 0x3d6   : > { %16289 = vst [vmem:[#allocation40_spill] sm:$0xff] %v13368_v12  ;;  %v3564_v37 = vpop.xlane.xlu1 %3563  ;;  %3996 = vadd.xlane.f32.xlu0 %v3898_v33  ;;  %v13370_v22 = vpop.f32.mrb[123].mxu1  ;;  %v3774_v49 = vsub.f32 %v16294_v3, %v3371_v25  ;;  %v16299_v3 = vld [vmem:[#allocation48_spill] sm:$0xff] }
 0x3d7   : > { %16290 = vst [vmem:[#allocation120_spill] sm:$0xff] %v13370_v22  ;;  %v3677_v53 = vadd.f32 %v3676_v14, %v3564_v37  ;;  %v13378_v62 = vpop.xlane.xlu0 %3243  ;;  %v3806_v37 = vmul.f32 %v13304_v10, %v3742_v4 }
 0x3d8   : > { %v3838_v0 = vmul.f32 %v13304_v10, %v3774_v49 }
 0x3d9   : > { %3599 = vadd.xlane.f32.xlu1 %v3504_v15  ;;  %v13383_v33 = vpop.f32.mrb[124].mxu1  ;;  %v3678_v12 = vadd.f32 %v3677_v53, %v3566_v52  ;;  %v3870_v32 = vmul.f32 %v3806_v37, %v3742_v4 }
 0x3da   : > { %16292 = vst [vmem:[#allocation42_spill] sm:$0xff] %v13383_v33  ;;  %v13385_v22 = vpop.xlane.xlu1 %3627  ;;  %3936 = vadd.xlane.f32.xlu0 %v3868_v21  ;;  %v13387_v56 = vpop.f32.mrb[125].mxu1  ;;  %v16296_v21 = vld [vmem:[#allocation46_spill] sm:$0xff] }
 0x3db   : > { %16293 = vst [vmem:[#allocation121_spill] sm:$0xff] %v13387_v56  ;;  %v13391_v14 = vpop.xlane.xlu0 %3307  ;;  %v3744_v33 = vsub.f32 %v16296_v21, %v3341_v24  ;;  %v3373_v56 = vmul.f32 0.2, %v13252_v20  ;;  %v3343_v24 = vmul.f32 0.2, %v13290_v58  ;;  %v3902_v21 = vmul.f32 %v3838_v0, %v3774_v49 }
 0x3dc   : > { %v3375_v58 = vmul.f32 0.2, %v13301_v36 }
 0x3dd   : > { %3663 = vadd.xlane.f32.xlu1 %v3536_v13  ;;  %v13396_v15 = vpop.f32.mrb[126].mxu1  ;;  %v3808_v13 = vmul.f32 %v13304_v10, %v3744_v33 }
 0x3de   : > { %16295 = vst [vmem:[#allocation44_spill] sm:$0xff] %v13396_v15  ;;  %v13398_v53 = vpop.xlane.xlu1 %3233  ;;  %4000 = vadd.xlane.f32.xlu0 %v3900_v39  ;;  %v13400_v52 = vpop.f32.mrb[127].mxu1  ;;  %v3776_v39 = vsub.f32 %v16299_v3, %v3373_v56  ;;  %v3778_v36 = vsub.f32 %v12778_v34, %v3375_v58 }
 0x3df   : > { %v3570_v27 = vpop.xlane.xlu0 %3569  ;;  %v3872_v49 = vmul.f32 %v3808_v13, %v3744_v33  ;;  %v3345_v33 = vmul.f32 0.2, %v13344_v30  ;;  %v3377_v30 = vmul.f32 0.2, %v13354_v23  ;;  %v3347_v23 = vmul.f32 0.2, %v13398_v53 }
 0x3e0   : > { %v3840_v15 = vmul.f32 %v13304_v10, %v3776_v39 }
 0x3e1   : > { %5715 = vadd.xlane.f32.xlu1 %v13161_v5  ;;  %v13406_v18 = vpop.f32.mrb[128].mxu1  ;;  %v3748_v34 = vsub.f32 %v12816_v38, %v3345_v33 }
 0x3e2   : > { %16297 = vst [vmem:[#allocation46_spill] sm:$0xff] %v13406_v18  ;;  %v13408_v19 = vpop.xlane.xlu1 %3297  ;;  %3940 = vadd.xlane.f32.xlu0 %v3870_v32  ;;  %v13410_v16 = vpop.f32.mrb[129].mxu1  ;;  %v3334_v32 = vmul.f32 0.2, %v13063_v31  ;;  %v3366_v31 = vmul.f32 0.2, %v12979_v61  ;;  %v3904_v13 = vmul.f32 %v3840_v15, %v3776_v39 }
 0x3e3   : > { %16298 = vst [vmem:[#allocation122_spill] sm:$0xff] %v13410_v16  ;;  %v13412_v25 = vpop.xlane.xlu0 %3633  ;;  %v16301_v16 = vld [vmem:[#allocation50_spill] sm:$0xff]  ;;  %v16306_v61 = vld [vmem:[#allocation41_spill] sm:$0xff]  ;;  %v3379_v53 = vmul.f32 0.2, %v13408_v19 }
 0x3e4   : > { %v3746_v56 = vsub.f32 %v16301_v16, %v3343_v24 }
 0x3e5   : > { %5717 = vadd.xlane.f32.xlu1 %v13193_v40  ;;  %v13418_v20 = vpop.f32.mrb[130].mxu1  ;;  %v3782_v19 = vsub.f32 %v12925_v42, %v3379_v53 }
 0x3e6   : > { %16300 = vst [vmem:[#allocation48_spill] sm:$0xff] %v13418_v20  ;;  %v3568_v4 = vpop.xlane.xlu1 %3567  ;;  %4004 = vadd.xlane.f32.xlu0 %v3902_v21  ;;  %v13420_v37 = vpop.f32.mrb[131].mxu1  ;;  %v3810_v16 = vmul.f32 %v13304_v10, %v3746_v56 }
 0x3e7   : > { %v3679_v5 = vadd.f32 %v3678_v12, %v3568_v4  ;;  %v13423_v18 = vpop.xlane.xlu0 %3247  ;;  %v16303_v12 = vld [vmem:[#allocation39_spill] sm:$0xff]  ;;  %v3846_v42 = vmul.f32 %v13304_v10, %v3782_v19 }
 0x3e8   : > { %v3737_v4 = vsub.f32 %v16303_v12, %v3334_v32  ;;  %v3874_v15 = vmul.f32 %v3810_v16, %v3746_v56 }
 0x3e9   : > { %5721 = vadd.xlane.f32.xlu1 %v13211_v28  ;;  %v13429_v0 = vpop.f32.mrb[132].mxu1  ;;  %v3680_v3 = vadd.f32 %v3679_v5, %v3570_v27  ;;  %v3842_v28 = vmul.f32 %v13304_v10, %v3778_v36 }
 0x3ea   : > { %16302 = vst [vmem:[#allocation50_spill] sm:$0xff] %v13429_v0  ;;  %v13431_v21 = vpop.xlane.xlu1 %3631  ;;  %3944 = vadd.xlane.f32.xlu0 %v3872_v49  ;;  %v13433_v40 = vpop.f32.mrb[133].mxu1  ;;  %v3769_v49 = vsub.f32 %v16306_v61, %v3366_v31  ;;  %v3801_v32 = vmul.f32 %v13304_v10, %v3737_v4  ;;  %v16309_v0 = vld [vmem:[#allocation54_spill] sm:$0xff] }
 0x3eb   : > { %v13437_v20 = vpop.xlane.xlu0 %3311  ;;  %v3780_v38 = vsub.f32 %v16309_v0, %v3377_v30  ;;  %v3906_v56 = vmul.f32 %v3842_v28, %v3778_v36  ;;  %v3368_v30 = vmul.f32 0.2, %v13035_v54  ;;  %v16315_v54 = vld [vmem:[#allocation45_spill] sm:$0xff] }
 0x3ec   : > { %v3833_v31 = vmul.f32 %v13304_v10, %v3769_v49 }
 0x3ed   : > { %5725 = vadd.xlane.f32.xlu1 %v13239_v50  ;;  %v13443_v5 = vpop.f32.mrb[134].mxu1  ;;  %v3865_v50 = vmul.f32 %v3801_v32, %v3737_v4  ;;  %v3844_v32 = vmul.f32 %v13304_v10, %v3780_v38 }
 0x3ee   : > { %16304 = vst [vmem:[#allocation39_spill] sm:$0xff] %v13443_v5  ;;  %v3238_v27 = vpop.xlane.xlu1 %3237  ;;  %4008 = vadd.xlane.f32.xlu0 %v3904_v13  ;;  %v13445_v24 = vpop.f32.mrb[135].mxu1  ;;  %v3812_v5 = vmul.f32 %v13304_v10, %v3748_v34  ;;  %v3897_v4 = vmul.f32 %v3833_v31, %v3769_v49 }
 0x3ef   : > { %16305 = vst [vmem:[#allocation123_spill] sm:$0xff] %v13445_v24  ;;  %v3574_v12 = vpop.xlane.xlu0 %3573  ;;  %v16311_v24 = vld [vmem:[#allocation58_spill] sm:$0xff] }
 0x3f0   : > { %v3750_v0 = vsub.f32 %v16311_v24, %v3347_v23  ;;  %v3876_v28 = vmul.f32 %v3812_v5, %v3748_v34  ;;  %v3349_v5 = vmul.f32 0.2, %v3238_v27  ;;  %v3908_v34 = vmul.f32 %v3844_v32, %v3780_v38 }
 0x3f1   : > { %v13452_v39 = vpop.f32.mrb[136].mxu1  ;;  %5729 = vadd.xlane.f32.xlu1 %v13267_v35 }
 0x3f2   : > { %16307 = vst [vmem:[#allocation41_spill] sm:$0xff] %v13452_v39  ;;  %v13455_v58 = vpop.f32.mrb[137].mxu1  ;;  %v3302_v13 = vpop.xlane.xlu1 %3301  ;;  %3948 = vadd.xlane.f32.xlu0 %v3874_v15  ;;  %v3336_v15 = vmul.f32 0.2, %v13023_v43  ;;  %v3814_v24 = vmul.f32 %v13304_v10, %v3750_v0  ;;  %v3752_v27 = vsub.f32 %v12960_v59, %v3349_v5 }
 0x3f3   : > { %16308 = vst [vmem:[#allocation124_spill] sm:$0xff] %v13455_v58  ;;  %v13458_v61 = vpop.xlane.xlu0 %3637  ;;  %v3381_v38 = vmul.f32 0.2, %v3302_v13 }
 0x3f4   : > { %v3878_v32 = vmul.f32 %v3814_v24, %v3750_v0  ;;  %v3816_v59 = vmul.f32 %v13304_v10, %v3752_v27  ;;  %v3910_v24 = vmul.f32 %v3846_v42, %v3782_v19 }
 0x3f5   : > { %v13463_v16 = vpop.f32.mrb[138].mxu1  ;;  %3930 = vadd.xlane.f32.xlu1 %v3865_v50  ;;  %v3784_v13 = vsub.f32 %v12973_v1, %v3381_v38 }
 0x3f6   : > { %16310 = vst [vmem:[#allocation54_spill] sm:$0xff] %v13463_v16  ;;  %v13465_v33 = vpop.f32.mrb[139].mxu1  ;;  %v3572_v35 = vpop.xlane.xlu1 %3571  ;;  %4012 = vadd.xlane.f32.xlu0 %v3906_v56 }
 0x3f7   : > { %v3681_v39 = vadd.f32 %v3680_v3, %v3572_v35  ;;  %v13468_v58 = vpop.xlane.xlu0 %3251  ;;  %v16313_v35 = vld [vmem:[#allocation43_spill] sm:$0xff]  ;;  %v3848_v1 = vmul.f32 %v13304_v10, %v3784_v13 }
 0x3f8   : > { %v3739_v3 = vsub.f32 %v16313_v35, %v3336_v15 }
 0x3f9   : > { %v13473_v36 = vpop.f32.mrb[140].mxu1  ;;  %3994 = vadd.xlane.f32.xlu1 %v3897_v4  ;;  %v3682_v50 = vadd.f32 %v3681_v39, %v3574_v12  ;;  %v3771_v39 = vsub.f32 %v16315_v54, %v3368_v30  ;;  %v3338_v4 = vmul.f32 0.2, %v13066_v29  ;;  %v16317_v54 = vld [vmem:[#allocation47_spill] sm:$0xff] }
 0x3fa   : > { %16312 = vst [vmem:[#allocation58_spill] sm:$0xff] %v13473_v36  ;;  %v13476_v56 = vpop.f32.mrb[141].mxu1  ;;  %v13478_v43 = vpop.xlane.xlu1 %3635  ;;  %3952 = vadd.xlane.f32.xlu0 %v3876_v28  ;;  %v3803_v15 = vmul.f32 %v13304_v10, %v3739_v3 }
 0x3fb   : > { %v13481_v49 = vpop.xlane.xlu0 %3315  ;;  %v3835_v30 = vmul.f32 %v13304_v10, %v3771_v39  ;;  %v3741_v29 = vsub.f32 %v16317_v54, %v3338_v4 }
 0x3fc   : > { %v3867_v36 = vmul.f32 %v3803_v15, %v3739_v3  ;;  %v3340_v3 = vmul.f32 0.2, %v13107_v55 }
 0x3fd   : > { %5733 = vadd.xlane.f32.xlu1 %v13292_v26  ;;  %v13486_v12 = vpop.f32.mrb[142].mxu1  ;;  %v3370_v26 = vmul.f32 0.2, %v13077_v9  ;;  %v3805_v4 = vmul.f32 %v13304_v10, %v3741_v29  ;;  %v16319_v9 = vld [vmem:[#allocation49_spill] sm:$0xff] }
 0x3fe   : > { %16314 = vst [vmem:[#allocation43_spill] sm:$0xff] %v13486_v12  ;;  %v3242_v31 = vpop.xlane.xlu1 %3241  ;;  %v13489_v23 = vpop.f32.mrb[143].mxu1  ;;  %4016 = vadd.xlane.f32.xlu0 %v3908_v34 }
 0x3ff   : > { %v13493_v28 = vpop.xlane.xlu0 %3577  ;;  %v3351_v0 = vmul.f32 0.2, %v3242_v31  ;;  %v3773_v54 = vsub.f32 %v16319_v9, %v3370_v26  ;;  %v3880_v31 = vmul.f32 %v3816_v59, %v3752_v27 }
 0x401   : > { %5737 = vadd.xlane.f32.xlu1 %v13320_v57  ;;  %v13498_v53 = vpop.f32.mrb[144].mxu1  ;;  %v3837_v55 = vmul.f32 %v13304_v10, %v3773_v54 }
 0x402   : > { %16316 = vst [vmem:[#allocation45_spill] sm:$0xff] %v13498_v53  ;;  %v3306_v35 = vpop.xlane.xlu1 %3305  ;;  %3956 = vadd.xlane.f32.xlu0 %v3878_v32  ;;  %v13501_v34 = vpop.f32.mrb[145].mxu1  ;;  %v3899_v32 = vmul.f32 %v3835_v30, %v3771_v39  ;;  %v3372_v39 = vmul.f32 0.2, %v13118_v48  ;;  %v16324_v48 = vld [vmem:[#allocation52_spill] sm:$0xff] }
 0x403   : > { %v13505_v12 = vpop.xlane.xlu0 %3641  ;;  %v3383_v19 = vmul.f32 0.2, %v3306_v35  ;;  %v3912_v35 = vmul.f32 %v3848_v1, %v3784_v13 }
 0x405   : > { %3934 = vadd.xlane.f32.xlu1 %v3867_v36  ;;  %v13509_v5 = vpop.f32.mrb[146].mxu1  ;;  %v3754_v36 = vsub.f32 %v13006_v17, %v3351_v0  ;;  %v3786_v27 = vsub.f32 %v13016_v63, %v3383_v19  ;;  %v3775_v0 = vsub.f32 %v16324_v48, %v3372_v39  ;;  %v16328_v48 = vld [vmem:[#allocation53_spill] sm:$0xff] }
 0x406   : > { %16318 = vst [vmem:[#allocation47_spill] sm:$0xff] %v13509_v5  ;;  %v3576_v57 = vpop.xlane.xlu1 %3575  ;;  %4020 = vadd.xlane.f32.xlu0 %v3910_v24  ;;  %v13511_v53 = vpop.f32.mrb[147].mxu1  ;;  %v3869_v24 = vmul.f32 %v3805_v4, %v3741_v29  ;;  %v3901_v4 = vmul.f32 %v3837_v55, %v3773_v54 }
 0x407   : > { %v3683_v15 = vadd.f32 %v3682_v50, %v3576_v57  ;;  %v13516_v16 = vpop.xlane.xlu0 %3255  ;;  %v16322_v57 = vld [vmem:[#allocation51_spill] sm:$0xff]  ;;  %v3818_v17 = vmul.f32 %v13304_v10, %v3754_v36  ;;  %v3850_v63 = vmul.f32 %v13304_v10, %v3786_v27  ;;  %v3839_v39 = vmul.f32 %v13304_v10, %v3775_v0 }
 0x408   : > { %v3743_v50 = vsub.f32 %v16322_v57, %v3340_v3  ;;  %v3342_v3 = vmul.f32 0.2, %v13147_v8 }
 0x409   : > { %3998 = vadd.xlane.f32.xlu1 %v3899_v32  ;;  %v13520_v42 = vpop.f32.mrb[148].mxu1  ;;  %v3882_v13 = vmul.f32 %v3818_v17, %v3754_v36 }
 0x40a   : > { %16320 = vst [vmem:[#allocation49_spill] sm:$0xff] %v13520_v42  ;;  %v13523_v38 = vpop.xlane.xlu1 %3639  ;;  %3960 = vadd.xlane.f32.xlu0 %v3880_v31  ;;  %v13525_v26 = vpop.f32.mrb[149].mxu1  ;;  %v3807_v31 = vmul.f32 %v13304_v10, %v3743_v50  ;;  %v3745_v8 = vsub.f32 %v16328_v48, %v3342_v3  ;;  %v3903_v3 = vmul.f32 %v3839_v39, %v3775_v0 }
 0x40b   : > { %16321 = vst [vmem:[#allocation125_spill] sm:$0xff] %v13525_v26  ;;  %v13529_v30 = vpop.xlane.xlu0 %3319 }
 0x40c   : > { %v3871_v55 = vmul.f32 %v3807_v31, %v3743_v50  ;;  %v16332_v50 = vld [vmem:[#allocation93_spill] sm:$0xff] }
 0x40d   : > { %3938 = vadd.xlane.f32.xlu1 %v3869_v24  ;;  %v13533_v59 = vpop.f32.mrb[150].mxu1  ;;  %v3344_v31 = vmul.f32 0.2, %v16332_v50 }
 0x40e   : > { %16323 = vst [vmem:[#allocation51_spill] sm:$0xff] %v13533_v59  ;;  %v3246_v32 = vpop.xlane.xlu1 %3245  ;;  %4024 = vadd.xlane.f32.xlu0 %v3912_v35  ;;  %v13536_v9 = vpop.f32.mrb[151].mxu1 }
 0x40f   : > { %16325 = vst [vmem:[#allocation52_spill] sm:$0xff] %v13536_v9  ;;  %v3353_v57 = vmul.f32 0.2, %v3246_v32  ;;  %v13540_v29 = vpop.xlane.xlu0 %3581  ;;  %v3374_v32 = vmul.f32 0.2, %v13158_v46  ;;  %v3809_v46 = vmul.f32 %v13304_v10, %v3745_v8 }
 0x411   : > { %v3756_v1 = vsub.f32 %v13048_v47, %v3353_v57  ;;  %v13544_v19 = vpop.f32.mrb[152].mxu1  ;;  %4002 = vadd.xlane.f32.xlu1 %v3901_v4  ;;  %v3914_v47 = vmul.f32 %v3850_v63, %v3786_v27  ;;  %v3684_v4 = vadd.f32 %v3683_v15, %v13493_v28  ;;  %v16334_v28 = vld [vmem:[#allocation95_spill] sm:$0xff] }
 0x412   : > { %16326 = vst [vmem:[#allocation126_spill] sm:$0xff] %v13544_v19  ;;  %v13547_v24 = vpop.f32.mrb[153].mxu1  ;;  %v3310_v35 = vpop.xlane.xlu1 %3309  ;;  %3964 = vadd.xlane.f32.xlu0 %v3882_v13  ;;  %v3376_v15 = vmul.f32 0.2, %v16334_v28 }
 0x413   : > { %16327 = vst [vmem:[#allocation127_spill] sm:$0xff] %v13547_v24  ;;  %v3385_v59 = vmul.f32 0.2, %v3310_v35  ;;  %v13551_v54 = vpop.xlane.xlu0 %3645  ;;  %v3820_v36 = vmul.f32 %v13304_v10, %v3756_v1  ;;  %v16331_v35 = vld [vmem:[#allocation55_spill] sm:$0xff] }
 0x414   : > { %v3777_v48 = vsub.f32 %v16331_v35, %v3374_v32  ;;  %v16336_v32 = vld [vmem:[#allocation56_spill] sm:$0xff] }
 0x415   : > { %v3788_v17 = vsub.f32 %v13059_v7, %v3385_v59  ;;  %v13555_v57 = vpop.f32.mrb[154].mxu1  ;;  %3942 = vadd.xlane.f32.xlu1 %v3871_v55  ;;  %v3884_v59 = vmul.f32 %v3820_v36, %v3756_v1  ;;  %v16338_v1 = vld [vmem:[#allocation57_spill] sm:$0xff] }
 0x416   : > { %16329 = vst [vmem:[#allocation53_spill] sm:$0xff] %v13555_v57  ;;  %v13558_v19 = vpop.f32.mrb[155].mxu1  ;;  %v3580_v13 = vpop.xlane.xlu1 %3579  ;;  %4028 = vadd.xlane.f32.xlu0 %v3914_v47  ;;  %v3841_v39 = vmul.f32 %v13304_v10, %v3777_v48  ;;  %v3747_v47 = vsub.f32 %v16336_v32, %v3344_v31  ;;  %v3779_v36 = vsub.f32 %v16338_v1, %v3376_v15  ;;  %v16341_v32 = vld [vmem:[#allocation73_spill] sm:$0xff]  ;;  %v16345_v1 = vld [vmem:[#allocation108_spill] sm:$0xff] }
 0x417   : > { %16330 = vst [vmem:[#allocation128_spill] sm:$0xff] %v13558_v19  ;;  %v3685_v42 = vadd.f32 %v3684_v4, %v3580_v13  ;;  %v13563_v27 = vpop.xlane.xlu0 %3259  ;;  %v3852_v7 = vmul.f32 %v13304_v10, %v3788_v17  ;;  %v3873_v13 = vmul.f32 %v3809_v46, %v3745_v8  ;;  %v16343_v46 = vld [vmem:[#allocation59_spill] sm:$0xff] }
 0x418   : > { %v3905_v31 = vmul.f32 %v3841_v39, %v3777_v48  ;;  %v16346_v39 = vld [vmem:[#allocation76_spill] sm:$0xff] }
 0x419   : > { %v13566_v63 = vpop.f32.mrb[156].mxu1  ;;  %4006 = vadd.xlane.f32.xlu1 %v3903_v3  ;;  %v3916_v35 = vmul.f32 %v3852_v7, %v3788_v17  ;;  %v16339_v3 = vld [vmem:[#allocation104_spill] sm:$0xff]  ;;  %v3843_v17 = vmul.f32 %v13304_v10, %v3779_v36 }
 0x41a   : > { %16333 = vst [vmem:[#allocation55_spill] sm:$0xff] %v13566_v63  ;;  %v13569_v55 = vpop.f32.mrb[157].mxu1  ;;  %v13571_v0 = vpop.xlane.xlu1 %3643  ;;  %3968 = vadd.xlane.f32.xlu0 %v3884_v59  ;;  %v3346_v28 = vmul.f32 0.2, %v16339_v3  ;;  %v3811_v59 = vmul.f32 %v13304_v10, %v3747_v47  ;;  %v3378_v3 = vmul.f32 0.2, %v16345_v1 }
 0x41b   : > { %16335 = vst [vmem:[#allocation93_spill] sm:$0xff] %v13569_v55  ;;  %v13575_v4 = vpop.xlane.xlu0 %3323  ;;  %v3907_v1 = vmul.f32 %v3843_v17, %v3779_v36  ;;  %v16354_v17 = vld [vmem:[#allocation62_spill] sm:$0xff] }
 0x41c   : > { %v3749_v7 = vsub.f32 %v16343_v46, %v3346_v28  ;;  %v3875_v48 = vmul.f32 %v3811_v59, %v3747_v47 }
 0x41d   : > { %v13577_v50 = vpop.f32.mrb[158].mxu1  ;;  %3946 = vadd.xlane.f32.xlu1 %v3873_v13 }
 0x41e   : > { %16337 = vst [vmem:[#allocation95_spill] sm:$0xff] %v13577_v50  ;;  %v13581_v63 = vpop.f32.mrb[159].mxu1  ;;  %v3250_v57 = vpop.xlane.xlu1 %3249  ;;  %4032 = vadd.xlane.f32.xlu0 %v3916_v35  ;;  %v3813_v28 = vmul.f32 %v13304_v10, %v3749_v7 }
 0x41f   : > { %16340 = vst [vmem:[#allocation56_spill] sm:$0xff] %v13581_v63  ;;  %v3355_v5 = vmul.f32 0.2, %v3250_v57  ;;  %v3586_v55 = vpop.xlane.xlu0 %3585  ;;  %v16349_v63 = vld [vmem:[#allocation60_spill] sm:$0xff] }
 0x420   : > { %v3781_v24 = vsub.f32 %v16349_v63, %v3378_v3 }
 0x421   : > { %v3758_v19 = vsub.f32 %v16341_v32, %v3355_v5  ;;  %v13585_v8 = vpop.f32.mrb[160].mxu1  ;;  %4010 = vadd.xlane.f32.xlu1 %v3905_v31  ;;  %v3686_v31 = vadd.f32 %v3685_v42, %v13540_v29 }
 0x422   : > { %16342 = vst [vmem:[#allocation57_spill] sm:$0xff] %v13585_v8  ;;  %v13589_v15 = vpop.f32.mrb[161].mxu1  ;;  %v3314_v13 = vpop.xlane.xlu1 %3313  ;;  %v3845_v63 = vmul.f32 %v13304_v10, %v3781_v24 }
 0x423   : > { %16344 = vst [vmem:[#allocation104_spill] sm:$0xff] %v13589_v15  ;;  %v3822_v35 = vmul.f32 %v13304_v10, %v3758_v19  ;;  %v3387_v50 = vmul.f32 0.2, %v3314_v13  ;;  %v13593_v57 = vpop.xlane.xlu0 %3649  ;;  %v16350_v13 = vld [vmem:[#allocation117_spill] sm:$0xff] }
 0x424   : > { %v3348_v9 = vmul.f32 0.2, %v16350_v13 }
 0x425   : > { %v3790_v5 = vsub.f32 %v16346_v39, %v3387_v50  ;;  %3950 = vadd.xlane.f32.xlu1 %v3875_v48  ;;  %v13597_v32 = vpop.f32.mrb[162].mxu1  ;;  %v3886_v8 = vmul.f32 %v3822_v35, %v3758_v19  ;;  %v16352_v35 = vld [vmem:[#allocation118_spill] sm:$0xff] }
 0x426   : > { %16347 = vst [vmem:[#allocation73_spill] sm:$0xff] %v13597_v32  ;;  %v3584_v46 = vpop.xlane.xlu1 %3583  ;;  %v13600_v15 = vpop.f32.mrb[163].mxu1  ;;  %v3380_v48 = vmul.f32 0.2, %v16352_v35  ;;  %v3751_v3 = vsub.f32 %v16354_v17, %v3348_v9  ;;  %v3909_v32 = vmul.f32 %v3845_v63, %v3781_v24  ;;  %v16358_v9 = vld [vmem:[#allocation79_spill] sm:$0xff] }
 0x427   : > { %16348 = vst [vmem:[#allocation59_spill] sm:$0xff] %v13600_v15  ;;  %v3854_v47 = vmul.f32 %v13304_v10, %v3790_v5  ;;  %v3687_v59 = vadd.f32 %v3686_v31, %v3584_v46  ;;  %3972 = vadd.xlane.f32.xlu0 %v3886_v8  ;;  %v13605_v50 = vpop.xlane.xlu0 %3263  ;;  %v3877_v8 = vmul.f32 %v3813_v28, %v3749_v7  ;;  %v16359_v28 = vld [vmem:[#allocation65_spill] sm:$0xff] }
 0x429   : > { %4014 = vadd.xlane.f32.xlu1 %v3907_v1  ;;  %v3918_v42 = vmul.f32 %v3854_v47, %v3790_v5  ;;  %v13607_v29 = vpop.f32.mrb[164].mxu1  ;;  %v3688_v19 = vadd.f32 %v3687_v59, %v3586_v55  ;;  %v16356_v5 = vld [vmem:[#allocation63_spill] sm:$0xff]  ;;  %v3350_v55 = vmul.f32 0.2, %v13328_v6  ;;  %v3815_v59 = vmul.f32 %v13304_v10, %v3751_v3 }
 0x42a   : > { %16351 = vst [vmem:[#allocation108_spill] sm:$0xff] %v13607_v29  ;;  %v13610_v39 = vpop.xlane.xlu1 %3647  ;;  %v13612_v36 = vpop.f32.mrb[165].mxu1  ;;  %v3783_v1 = vsub.f32 %v16356_v5, %v3380_v48  ;;  %v3382_v48 = vmul.f32 0.2, %v13337_v2 }
 0x42b   : > { %16353 = vst [vmem:[#allocation76_spill] sm:$0xff] %v13612_v36  ;;  %4036 = vadd.xlane.f32.xlu0 %v3918_v42  ;;  %v13616_v31 = vpop.xlane.xlu0 %3327  ;;  %v3753_v17 = vsub.f32 %v16359_v28, %v3350_v55  ;;  %v16360_v36 = vld [vmem:[#allocation82_spill] sm:$0xff]  ;;  %v3352_v55 = vmul.f32 0.2, %v13378_v62 }
 0x42c   : > { %v3847_v7 = vmul.f32 %v13304_v10, %v3783_v1 }
 0x42d   : > { %3954 = vadd.xlane.f32.xlu1 %v3877_v8  ;;  %v13618_v46 = vpop.f32.mrb[166].mxu1  ;;  %v3817_v63 = vmul.f32 %v13304_v10, %v3753_v17 }
 0x42e   : > { %16355 = vst [vmem:[#allocation60_spill] sm:$0xff] %v13618_v46  ;;  %v3254_v13 = vpop.xlane.xlu1 %3253  ;;  %v13622_v47 = vpop.f32.mrb[167].mxu1 }
 0x42f   : > { %16357 = vst [vmem:[#allocation117_spill] sm:$0xff] %v13622_v47  ;;  %v3357_v35 = vmul.f32 0.2, %v3254_v13  ;;  %v3590_v29 = vpop.xlane.xlu0 %3589  ;;  %v3879_v47 = vmul.f32 %v3815_v59, %v3751_v3  ;;  %v3881_v62 = vmul.f32 %v3817_v63, %v3753_v17  ;;  %v3386_v17 = vmul.f32 0.2, %v13437_v20 }
 0x431   : > { %v3760_v42 = vsub.f32 %v16358_v9, %v3357_v35  ;;  %4018 = vadd.xlane.f32.xlu1 %v3909_v32  ;;  %v3911_v35 = vmul.f32 %v3847_v7, %v3783_v1  ;;  %v16361_v9 = vld [vmem:[#allocation68_spill] sm:$0xff]  ;;  %v16362_v1 = vld [vmem:[#allocation71_spill] sm:$0xff] }
 0x432   : > { %v3318_v8 = vpop.xlane.xlu1 %3317  ;;  %v3785_v15 = vsub.f32 %v16361_v9, %v3382_v48  ;;  %v3755_v7 = vsub.f32 %v16362_v1, %v3352_v55 }
 0x433   : > { %v3824_v6 = vmul.f32 %v13304_v10, %v3760_v42  ;;  %v3389_v5 = vmul.f32 0.2, %v3318_v8  ;;  %v13630_v46 = vpop.xlane.xlu0 %3653 }
 0x435   : > { %v3792_v13 = vsub.f32 %v16360_v36, %v3389_v5  ;;  %3958 = vadd.xlane.f32.xlu1 %v3879_v47  ;;  %v3888_v24 = vmul.f32 %v3824_v6, %v3760_v42  ;;  %v3384_v36 = vmul.f32 0.2, %v13391_v14  ;;  %v3849_v42 = vmul.f32 %v13304_v10, %v3785_v15 }
 0x436   : > { %v3588_v32 = vpop.xlane.xlu1 %3587  ;;  %v3354_v5 = vmul.f32 0.2, %v13423_v18 }
 0x437   : > { %v3856_v2 = vmul.f32 %v13304_v10, %v3792_v13  ;;  %v3689_v28 = vadd.f32 %v3688_v19, %v3588_v32  ;;  %3976 = vadd.xlane.f32.xlu0 %v3888_v24  ;;  %v13637_v8 = vpop.xlane.xlu0 %3267  ;;  %v16363_v19 = vld [vmem:[#allocation72_spill] sm:$0xff]  ;;  %v3913_v32 = vmul.f32 %v3849_v42, %v3785_v15 }
 0x438   : > { %v3787_v6 = vsub.f32 %v16363_v19, %v3384_v36 }
 0x439   : > { %4022 = vadd.xlane.f32.xlu1 %v3911_v35  ;;  %v3920_v3 = vmul.f32 %v3856_v2, %v3792_v13  ;;  %v3690_v59 = vadd.f32 %v3689_v28, %v3590_v29  ;;  %v3819_v29 = vmul.f32 %v13304_v10, %v3755_v7  ;;  %v16364_v35 = vld [vmem:[#allocation87_spill] sm:$0xff]  ;;  %v16365_v2 = vld [vmem:[#allocation77_spill] sm:$0xff] }
 0x43a   : > { %v13640_v47 = vpop.xlane.xlu1 %3651  ;;  %v3851_v55 = vmul.f32 %v13304_v10, %v3787_v6  ;;  %v3757_v28 = vsub.f32 %v16365_v2, %v3354_v5  ;;  %v3356_v5 = vmul.f32 0.2, %v13468_v58 }
 0x43b   : > { %4040 = vadd.xlane.f32.xlu0 %v3920_v3  ;;  %v13644_v48 = vpop.xlane.xlu0 %3331  ;;  %v3883_v1 = vmul.f32 %v3819_v29, %v3755_v7  ;;  %v3388_v29 = vmul.f32 0.2, %v13481_v49 }
 0x43c   : > { %v3821_v42 = vmul.f32 %v13304_v10, %v3757_v28 }
 0x43d   : > { %3962 = vadd.xlane.f32.xlu1 %v3881_v62  ;;  %v16366_v62 = vld [vmem:[#allocation91_spill] sm:$0xff] }
 0x43e   : > { %v3258_v24 = vpop.xlane.xlu1 %3257  ;;  %v3885_v58 = vmul.f32 %v3821_v42, %v3757_v28  ;;  %v3390_v42 = vmul.f32 0.2, %v13529_v30 }
 0x43f   : > { %v3359_v13 = vmul.f32 0.2, %v3258_v24  ;;  %v3594_v14 = vpop.xlane.xlu0 %3593 }
 0x441   : > { %v3762_v9 = vsub.f32 %v16364_v35, %v3359_v13  ;;  %4026 = vadd.xlane.f32.xlu1 %v3913_v32  ;;  %v3915_v13 = vmul.f32 %v3851_v55, %v3787_v6  ;;  %v16367_v32 = vld [vmem:[#allocation78_spill] sm:$0xff] }
 0x442   : > { %v3322_v3 = vpop.xlane.xlu1 %3321  ;;  %v3789_v35 = vsub.f32 %v16367_v32, %v3386_v17  ;;  %v16369_v17 = vld [vmem:[#allocation86_spill] sm:$0xff] }
 0x443   : > { %v3826_v63 = vmul.f32 %v13304_v10, %v3762_v9  ;;  %v3391_v36 = vmul.f32 0.2, %v3322_v3  ;;  %v13654_v18 = vpop.xlane.xlu0 %3657  ;;  %v16372_v32 = vld [vmem:[#allocation94_spill] sm:$0xff] }
 0x445   : > { %v3794_v19 = vsub.f32 %v16366_v62, %v3391_v36  ;;  %3966 = vadd.xlane.f32.xlu1 %v3883_v1  ;;  %v3890_v15 = vmul.f32 %v3826_v63, %v3762_v9  ;;  %v3853_v9 = vmul.f32 %v13304_v10, %v3789_v35  ;;  %v16368_v63 = vld [vmem:[#allocation83_spill] sm:$0xff]  ;;  %v3358_v1 = vmul.f32 0.2, %v13516_v16 }
 0x446   : > { %v3592_v24 = vpop.xlane.xlu1 %3591  ;;  %v3759_v6 = vsub.f32 %v16368_v63, %v3356_v5  ;;  %v16374_v63 = vld [vmem:[#allocation105_spill] sm:$0xff] }
 0x447   : > { %v3858_v20 = vmul.f32 %v13304_v10, %v3794_v19  ;;  %v3691_v2 = vadd.f32 %v3690_v59, %v3592_v24  ;;  %3980 = vadd.xlane.f32.xlu0 %v3890_v15  ;;  %v3598_v3 = vpop.xlane.xlu0 %3597  ;;  %v3791_v59 = vsub.f32 %v16369_v17, %v3388_v29  ;;  %v3917_v15 = vmul.f32 %v3853_v9, %v3789_v35  ;;  %v16371_v24 = vld [vmem:[#allocation99_spill] sm:$0xff] }
 0x448   : > { %v3761_v5 = vsub.f32 %v16372_v32, %v3358_v1  ;;  %v3360_v1 = vmul.f32 0.2, %v13563_v27 }
 0x449   : > { %4030 = vadd.xlane.f32.xlu1 %v3915_v13  ;;  %v3922_v26 = vmul.f32 %v3858_v20, %v3794_v19  ;;  %v3692_v7 = vadd.f32 %v3691_v2, %v3594_v14  ;;  %v3823_v14 = vmul.f32 %v13304_v10, %v3759_v6 }
 0x44a   : > { %v13662_v36 = vpop.xlane.xlu1 %3655  ;;  %v3825_v9 = vmul.f32 %v13304_v10, %v3761_v5 }
 0x44b   : > { %4044 = vadd.xlane.f32.xlu0 %v3922_v26  ;;  %v13666_v55 = vpop.xlane.xlu0 %3661  ;;  %v3855_v26 = vmul.f32 %v13304_v10, %v3791_v59  ;;  %v3887_v29 = vmul.f32 %v3823_v14, %v3759_v6 }
 0x44d   : > { %3970 = vadd.xlane.f32.xlu1 %v3885_v58 }
 0x44e   : > { %v3262_v62 = vpop.xlane.xlu1 %3261 }
 0x44f   : > { %v3361_v19 = vmul.f32 0.2, %v3262_v62  ;;  %v13671_v49 = vpop.xlane.xlu0 %2351  ;;  %v3919_v62 = vmul.f32 %v3855_v26, %v3791_v59  ;;  %v16376_v59 = vld [vmem:[#allocation107_spill] sm:$0xff] }
 0x450   : > { %16370 = vst [vmem:[#allocation118_spill] sm:$0xff] %v13671_v49  ;;  %v3763_v26 = vsub.f32 %v16376_v59, %v3360_v1 }
 0x451   : > { %v3764_v13 = vsub.f32 %v16371_v24, %v3361_v19  ;;  %4034 = vadd.xlane.f32.xlu1 %v3917_v15  ;;  %v16375_v19 = vld [vmem:[#allocation98_spill] sm:$0xff] }
 0x452   : > { %v3326_v28 = vpop.xlane.xlu1 %3325  ;;  %v3793_v15 = vsub.f32 %v16375_v19, %v3390_v42  ;;  %v3889_v42 = vmul.f32 %v3825_v9, %v3761_v5  ;;  %v16379_v19 = vld [vmem:[#allocation21_spill] sm:$0xff] }
 0x453   : > { %v3828_v20 = vmul.f32 %v13304_v10, %v3764_v13  ;;  %v3393_v16 = vmul.f32 0.2, %v3326_v28  ;;  %v13678_v2 = vpop.xlane.xlu0 %4870  ;;  %v3392_v28 = vmul.f32 0.2, %v13575_v4 }
 0x454   : > { %16373 = vst [vmem:[#allocation62_spill] sm:$0xff] %v13678_v2 }
 0x455   : > { %v3796_v58 = vsub.f32 %v16374_v63, %v3393_v16  ;;  %3974 = vadd.xlane.f32.xlu1 %v3887_v29  ;;  %v3892_v35 = vmul.f32 %v3828_v20, %v3764_v13  ;;  %v3857_v20 = vmul.f32 %v13304_v10, %v3793_v15  ;;  %v3362_v29 = vmul.f32 0.2, %v13605_v50 }
 0x456   : > { %v3596_v17 = vpop.xlane.xlu1 %3595 }
 0x457   : > { %v3860_v30 = vmul.f32 %v13304_v10, %v3796_v58  ;;  %v3693_v24 = vadd.f32 %v3692_v7, %v3596_v17  ;;  %3984 = vadd.xlane.f32.xlu0 %v3892_v35  ;;  %v13685_v32 = vpop.xlane.xlu0 %3928  ;;  %v16377_v7 = vld [vmem:[#allocation111_spill] sm:$0xff]  ;;  %v3921_v4 = vmul.f32 %v3857_v20, %v3793_v15  ;;  %v16378_v35 = vld [vmem:[#allocation106_spill] sm:$0xff]  ;;  %v3765_v1 = vsub.f32 %v16379_v19, %v3362_v29 }
 0x458   : > { %v3795_v16 = vsub.f32 %v16377_v7, %v3392_v28  ;;  %v16380_v28 = vld [vmem:[#allocation112_spill] sm:$0xff]  ;;  %v3364_v29 = vmul.f32 0.2, %v13637_v8  ;;  %v16382_v8 = vld [vmem:[#allocation74_spill] sm:$0xff] }
 0x459   : > { %4038 = vadd.xlane.f32.xlu1 %v3919_v62  ;;  %v3924_v6 = vmul.f32 %v3860_v30, %v3796_v58  ;;  %v3694_v14 = vadd.f32 %v3693_v24, %v3598_v3  ;;  %v3827_v3 = vmul.f32 %v13304_v10, %v3763_v26  ;;  %v3394_v30 = vmul.f32 0.2, %v13616_v31 }
 0x45a   : > { %v13688_v13 = vpop.xlane.xlu1 %3659  ;;  %v3859_v62 = vmul.f32 %v13304_v10, %v3795_v16  ;;  %v3829_v20 = vmul.f32 %v13304_v10, %v3765_v1 }
 0x45b   : > { %4048 = vadd.xlane.f32.xlu0 %v3924_v6  ;;  %v13692_v27 = vpop.xlane.xlu0 %3992  ;;  %v3891_v6 = vmul.f32 %v3827_v3, %v3763_v26 }
 0x45c   : > { %v3923_v7 = vmul.f32 %v3859_v62, %v3795_v16  ;;  %v3767_v16 = vsub.f32 %v13360_v60, %v3364_v29 }
 0x45d   : > { %3978 = vadd.xlane.f32.xlu1 %v3889_v42 }
 0x45e   : > { %v3266_v63 = vpop.xlane.xlu1 %3265 }
 0x45f   : > { %v3363_v58 = vmul.f32 0.2, %v3266_v63  ;;  %v13700_v5 = vpop.xlane.xlu0 %3932  ;;  %v3797_v63 = vsub.f32 %v13324_v51, %v3394_v30  ;;  %v3396_v51 = vmul.f32 0.2, %v13644_v48 }
 0x461   : > { %v3766_v17 = vsub.f32 %v16378_v35, %v3363_v58  ;;  %4042 = vadd.xlane.f32.xlu1 %v3921_v4  ;;  %v16381_v35 = vld [vmem:[#allocation64_spill] sm:$0xff] }
 0x462   : > { %v3330_v9 = vpop.xlane.xlu1 %3329 }
 0x463   : > { %v3830_v24 = vmul.f32 %v13304_v10, %v3766_v17  ;;  %v3395_v50 = vmul.f32 0.2, %v3330_v9  ;;  %v13709_v31 = vpop.xlane.xlu0 %3996  ;;  %v3861_v9 = vmul.f32 %v13304_v10, %v3797_v63 }
 0x465   : > { %v3798_v59 = vsub.f32 %v16380_v28, %v3395_v50  ;;  %3982 = vadd.xlane.f32.xlu1 %v3891_v6  ;;  %v3894_v15 = vmul.f32 %v3830_v24, %v3766_v17  ;;  %v3893_v17 = vmul.f32 %v3829_v20, %v3765_v1  ;;  %v3831_v6 = vmul.f32 %v13304_v10, %v3767_v16  ;;  %v16385_v1 = vld [vmem:[#allocation80_spill] sm:$0xff]  ;;  %v16386_v20 = vld [vmem:[#allocation75_spill] sm:$0xff] }
 0x466   : > { %v3600_v42 = vpop.xlane.xlu1 %3599  ;;  %v3799_v28 = vsub.f32 %v13374_v41, %v3396_v51  ;;  %v16391_v41 = vld [vmem:[#allocation100_spill] sm:$0xff] }
 0x467   : > { %v3862_v58 = vmul.f32 %v13304_v10, %v3798_v59  ;;  %v3695_v4 = vadd.f32 %v3694_v14, %v3600_v42  ;;  %3988 = vadd.xlane.f32.xlu0 %v3894_v15  ;;  %v16383_v14 = vld [vmem:[#allocation70_spill] sm:$0xff]  ;;  %v3937_v24 = vpop.xlane.xlu0 %3936  ;;  %v3925_v15 = vmul.f32 %v3861_v9, %v3797_v63  ;;  %v16392_v9 = vld [vmem:[#allocation89_spill] sm:$0xff] }
 0x468   : > { %v3863_v42 = vmul.f32 %v13304_v10, %v3799_v28 }
 0x469   : > { %v3696_v26 = vadd.f32 %v3695_v4, %v16381_v35  ;;  %4046 = vadd.xlane.f32.xlu1 %v3923_v7  ;;  %v3926_v3 = vmul.f32 %v3862_v58, %v3798_v59  ;;  %v16388_v7 = vld [vmem:[#allocation88_spill] sm:$0xff]  ;;  %v3895_v58 = vmul.f32 %v3831_v6, %v3767_v16  ;;  %v16389_v35 = vld [vmem:[#allocation81_spill] sm:$0xff] }
 0x46a   : > { %v13712_v19 = vpop.xlane.xlu1 %3663  ;;  %v3927_v63 = vmul.f32 %v3863_v42, %v3799_v28 }
 0x46b   : > { %v3697_v62 = vadd.f32 %v3696_v26, %v16382_v8  ;;  %4052 = vadd.xlane.f32.xlu0 %v3926_v3  ;;  %v13729_v4 = vpop.xlane.xlu0 %4000 }
 0x46d   : > { %v3698_v30 = vadd.f32 %v3697_v62, %v16383_v14  ;;  %3986 = vadd.xlane.f32.xlu1 %v3893_v17  ;;  %v16394_v14 = vld [vmem:[#allocation113_spill] sm:$0xff] }
 0x46e   : > { %v13719_v50 = vpop.xlane.xlu1 %5715 }
 0x46f   : > { %16384 = vst [vmem:[#allocation63_spill] sm:$0xff] %v13719_v50  ;;  %v3699_v59 = vadd.f32 %v3698_v30, %v16385_v1  ;;  %v3941_v8 = vpop.xlane.xlu0 %3940  ;;  %v16395_v1 = vld [vmem:[#allocation101_spill] sm:$0xff] }
 0x471   : > { %v3700_v60 = vadd.f32 %v3699_v59, %v16386_v20  ;;  %4050 = vadd.xlane.f32.xlu1 %v3925_v15  ;;  %v16397_v20 = vld [vmem:[#allocation114_spill] sm:$0xff] }
 0x472   : > { %v13725_v48 = vpop.xlane.xlu1 %5717 }
 0x473   : > { %16387 = vst [vmem:[#allocation79_spill] sm:$0xff] %v13725_v48  ;;  %v3701_v29 = vadd.f32 %v3700_v60, %v16388_v7  ;;  %v13744_v15 = vpop.xlane.xlu0 %4004 }
 0x475   : > { %v3702_v26 = vadd.f32 %v3701_v29, %v16389_v35  ;;  %3990 = vadd.xlane.f32.xlu1 %v3895_v58  ;;  %v16398_v29 = vld [vmem:[#allocation38_spill] sm:$0xff]  ;;  %v16399_v35 = vld [vmem:[#allocation120_spill] sm:$0xff] }
 0x476   : > { %v13732_v3 = vpop.xlane.xlu1 %5721 }
 0x477   : > { %16390 = vst [vmem:[#allocation65_spill] sm:$0xff] %v13732_v3  ;;  %v3703_v17 = vadd.f32 %v3702_v26, %v16391_v41  ;;  %v3945_v41 = vpop.xlane.xlu0 %3944 }
 0x479   : > { %v3704_v51 = vadd.f32 %v3703_v17, %v16392_v9  ;;  %4054 = vadd.xlane.f32.xlu1 %v3927_v63  ;;  %v16400_v9 = vld [vmem:[#allocation121_spill] sm:$0xff] }
 0x47a   : > { %v13736_v62 = vpop.xlane.xlu1 %5725 }
 0x47b   : > { %16393 = vst [vmem:[#allocation82_spill] sm:$0xff] %v13736_v62  ;;  %v3705_v30 = vadd.f32 %v3704_v51, %v16394_v14  ;;  %v1602_v62 = vstv %s1601_s21 }
 0x47d   : > { %v3706_v16 = vadd.f32 %v3705_v30, %v16395_v1  ;;  %5741 = vadd.xlane.f32.xlu1 %v13346_v45  ;;  %v16403_v30 = vld [vmem:[#allocation12_spill] sm:$0xff] }
 0x47e   : > { %v13741_v6 = vpop.xlane.xlu1 %5729  ;;  %v16404_v1 = vld [vmem:[#allocation24_spill] sm:$0xff] }
 0x47f   : > { %16396 = vst [vmem:[#allocation68_spill] sm:$0xff] %v13741_v6  ;;  %v3707_v59 = vadd.f32 %v3706_v16, %v13333_v11  ;;  %v1597_v6 = vstv %s1596_s20 }
 0x481   : > { %v3708_v28 = vadd.f32 %v3707_v59, %v16397_v20  ;;  %5745 = vadd.xlane.f32.xlu1 %v13356_v44  ;;  %v16405_v59 = vld [vmem:[#allocation122_spill] sm:$0xff]  ;;  %v16406_v20 = vld [vmem:[#allocation25_spill] sm:$0xff] }
 0x482   : > { %v3931_v60 = vpop.xlane.xlu1 %3930 }
 0x483   : > { %v3709_v42 = vadd.f32 %v3708_v28, %v13385_v22  ;;  %v4056_v7 = vadd.f32 %v3931_v60, %v13685_v32  ;;  %v13761_v32 = vpop.xlane.xlu0 %4008 }
 0x485   : > { %v3710_v58 = vadd.f32 %v3709_v42, %v16398_v29  ;;  %5749 = vadd.xlane.f32.xlu1 %v16399_v35  ;;  %v4057_v26 = vadd.f32 %v4056_v7, %v13700_v5 }
 0x486   : > { %v13753_v17 = vpop.xlane.xlu1 %3994 }
 0x487   : > { %v3711_v11 = vadd.f32 %v3710_v58, %v13431_v21  ;;  %v7426_v21 = vsel %vm2043_vm0, %v16404_v1, %v16403_v30  ;;  %v3949_v28 = vpop.xlane.xlu0 %3948  ;;  %v16408_v58 = vld [vmem:[#allocation15_spill] sm:$0xff]  ;;  %v16418_v1 = vld [vmem:[#allocation93_spill] sm:$0xff]  ;;  %v16420_v30 = vld [vmem:[#allocation56_spill] sm:$0xff] }
 0x489   : > { %v3712_v63 = vadd.f32 %v3711_v11, %v13412_v25  ;;  %5753 = vadd.xlane.f32.xlu1 %v16400_v9 }
 0x48a   : > { %v13758_v51 = vpop.xlane.xlu1 %5733 }
 0x48b   : > { %16401 = vst [vmem:[#allocation71_spill] sm:$0xff] %v13758_v51  ;;  %v3713_v22 = vadd.f32 %v3712_v63, %v13478_v43  ;;  %v7427_v43 = vsel %vm2045_vm1, %v16406_v20, %v7426_v21  ;;  %v16409_v21 = vld [vmem:[#allocation31_spill] sm:$0xff]  ;;  %v13787_v20 = vpop.xlane.xlu0 %4012 }
 0x48c   : > { %v7428_v11 = vsel %vm15941_vm2, %v16408_v58, %v7427_v43  ;;  %v16410_v43 = vld [vmem:[#allocation123_spill] sm:$0xff] }
 0x48d   : > { %v3714_v14 = vadd.f32 %v3713_v22, %v13458_v61  ;;  %5757 = vadd.xlane.f32.xlu1 %v13400_v52  ;;  %v16407_v61 = vld [vmem:[#allocation66_spill] sm:$0xff] }
 0x48e   : > { %v13765_v5 = vpop.xlane.xlu1 %5737  ;;  %v4872_v42 = vsub.f32 %v16407_v61, %v13678_v2 }
 0x48f   : > { %16402 = vst [vmem:[#allocation72_spill] sm:$0xff] %v13765_v5  ;;  %v3715_v25 = vadd.f32 %v3714_v14, %v13523_v38  ;;  %v16423_v5 = vld [vmem:[#allocation104_spill] sm:$0xff] }
 0x490   : > { %v4873_v22 = vmul.f32 1.442695, %v4872_v42 }
 0x491   : > { %v3716_v16 = vadd.f32 %v3715_v25, %v13505_v12  ;;  %5761 = vadd.xlane.f32.xlu1 %v16405_v59  ;;  %v7429_v25 = vsel %vm15940_vm3, %v16409_v21, %v7428_v11  ;;  %v16417_v21 = vld [vmem:[#allocation13_spill] sm:$0xff] }
 0x492   : > { %v3935_v60 = vpop.xlane.xlu1 %3934  ;;  %10699 = vpow2.f32 %v4873_v22 }
 0x493   : > { %v3717_v7 = vadd.f32 %v3716_v16, %v13571_v0  ;;  %v4058_v29 = vadd.f32 %v4057_v26, %v3935_v60  ;;  %v3953_v60 = vpop.xlane.xlu0 %3952 }
 0x495   : > { %v3718_v38 = vadd.f32 %v3717_v7, %v13551_v54  ;;  %5765 = vadd.xlane.f32.xlu1 %v13420_v37  ;;  %v4059_v12 = vadd.f32 %v4058_v29, %v3937_v24 }
 0x496   : > { %v13782_v63 = vpop.xlane.xlu1 %3998 }
 0x497   : > { %v3719_v14 = vadd.f32 %v3718_v38, %v13610_v39 }
 0x498   : > { %7446 = vxpose.xlu0.b32.start.end [1/1] (short) %v7429_v25, 128 }
 0x499   : > { %v3720_v0 = vadd.f32 %v3719_v14, %v13593_v57  ;;  %5769 = vadd.xlane.f32.xlu1 %v13433_v40  ;;  %v16411_v57 = vld [vmem:[#allocation124_spill] sm:$0xff] }
 0x49a   : > { %v3939_v26 = vpop.xlane.xlu1 %3938 }
 0x49b   : > { %v3721_v54 = vadd.f32 %v3720_v0, %v13640_v47  ;;  %v4060_v24 = vadd.f32 %v4059_v12, %v3939_v26  ;;  %v13800_v47 = vpop.xlane.xlu0 %4016 }
 0x49c   : > { %v10700_v12 = vpop.eup %10699 }
 0x49d   : > { %v3722_v16 = vadd.f32 %v3721_v54, %v13630_v46  ;;  %5773 = vadd.xlane.f32.xlu1 %v16410_v43  ;;  %v4061_v39 = vadd.f32 %v4060_v24, %v3941_v8 }
 0x49e   : > { %v13794_v42 = vpop.xlane.xlu1 %4002 }
 0x49f   : > { %v3723_v7 = vadd.f32 %v3722_v16, %v13662_v36  ;;  %v3957_v25 = vpop.xlane.xlu0 %3956 }
 0x4a1   : > { %v3724_v29 = vadd.f32 %v3723_v7, %v13654_v18  ;;  %5777 = vadd.xlane.f32.xlu1 %v16411_v57  ;;  %v4875_v18 = vsel %vm2343_vm10, %v10700_v12, 0.0 }
 0x4a2   : > { %v3943_v11 = vpop.xlane.xlu1 %3942 }
 0x4a3   : > { %v3725_v38 = vadd.f32 %v3724_v29, %v13688_v13  ;;  %v4062_v22 = vadd.f32 %v4061_v39, %v3943_v11 }
 0x4a5   : > { %v3726_v46 = vadd.f32 %v3725_v38, %v13666_v55  ;;  %5781 = vadd.xlane.f32.xlu1 %v13465_v33  ;;  %v4063_v8 = vadd.f32 %v4062_v22, %v3945_v41  ;;  %v13813_v55 = vpop.xlane.xlu0 %4020  ;;  %v16413_v22 = vld [vmem:[#allocation52_spill] sm:$0xff] }
 0x4a6   : > { %v13804_v14 = vpop.xlane.xlu1 %4006 }
 0x4a7   : > { %v13807_v36 = vadd.f32 %v3726_v46, %v13712_v19 }
 0x4a9   : > { %4876 = vadd.xlane.f32.xlu1 %v4875_v18  ;;  %v3961_v16 = vpop.xlane.xlu0 %3960 }
 0x4aa   : > { %v3947_v0 = vpop.xlane.xlu1 %3946 }
 0x4ab   : > { %v4064_v13 = vadd.f32 %v4063_v8, %v3947_v0 }
 0x4ad   : > { %5785 = vadd.xlane.f32.xlu1 %v13476_v56  ;;  %v4065_v26 = vadd.f32 %v4064_v13, %v3949_v28  ;;  %v13820_v11 = vpop.xlane.xlu0 %4024  ;;  %v16412_v28 = vld [vmem:[#allocation125_spill] sm:$0xff] }
 0x4ae   : > { %v13811_v54 = vpop.xlane.xlu1 %4010 }
 0x4b1   : > { %5789 = vadd.xlane.f32.xlu1 %v13489_v23  ;;  %v3965_v46 = vpop.xlane.xlu0 %3964 }
 0x4b2   : > { %v3951_v41 = vpop.xlane.xlu1 %3950 }
 0x4b3   : > { %v4066_v24 = vadd.f32 %v4065_v26, %v3951_v41  ;;  %v16415_v26 = vld [vmem:[#allocation128_spill] sm:$0xff] }
 0x4b5   : > { %5793 = vadd.xlane.f32.xlu1 %v13501_v34  ;;  %v4067_v19 = vadd.f32 %v4066_v24, %v3953_v60  ;;  %v16414_v60 = vld [vmem:[#allocation127_spill] sm:$0xff]  ;;  %v13829_v13 = vpop.xlane.xlu0 %4028 }
 0x4b6   : > { %v13817_v39 = vpop.xlane.xlu1 %4014 }
 0x4b9   : > { %5797 = vadd.xlane.f32.xlu1 %v13511_v53 }
 0x4ba   : > { %v3955_v7 = vpop.xlane.xlu1 %3954 }
 0x4bb   : > { %v4068_v29 = vadd.f32 %v4067_v19, %v3955_v7  ;;  %v16416_v7 = vld [vmem:[#allocation26_spill] sm:$0xff] }
 0x4bc   : > { %v7434_v58 = vsel %vm2043_vm0, %v16417_v21, %v16416_v7  ;;  %v16422_v7 = vld [vmem:[#allocation8_spill] sm:$0xff] }
 0x4bd   : > { %5801 = vadd.xlane.f32.xlu1 %v16412_v28  ;;  %v4069_v12 = vadd.f32 %v4068_v29, %v3957_v25  ;;  %v3969_v25 = vpop.xlane.xlu0 %3968 }
 0x4be   : > { %v13823_v38 = vpop.xlane.xlu1 %4018 }
 0x4c1   : > { %5805 = vadd.xlane.f32.xlu1 %v16413_v22  ;;  %v13843_v21 = vpop.xlane.xlu0 %4032 }
 0x4c2   : > { %v3959_v8 = vpop.xlane.xlu1 %3958 }
 0x4c3   : > { %v4070_v18 = vadd.f32 %v4069_v12, %v3959_v8  ;;  %v16419_v12 = vld [vmem:[#allocation27_spill] sm:$0xff] }
 0x4c4   : > { %v7435_v8 = vsel %vm2045_vm1, %v16419_v12, %v7434_v58 }
 0x4c5   : > { %5809 = vadd.xlane.f32.xlu1 %v16414_v60  ;;  %v4071_v41 = vadd.f32 %v4070_v18, %v3961_v16  ;;  %v16421_v16 = vld [vmem:[#allocation28_spill] sm:$0xff]  ;;  %v3973_v12 = vpop.xlane.xlu0 %3972  ;;  %v16528_v60 = vld [vmem:[#allocation57_spill] sm:$0xff] }
 0x4c6   : > { %v13827_v0 = vpop.xlane.xlu1 %4022  ;;  %v7436_v18 = vsel %vm15941_vm2, %v16421_v16, %v7435_v8  ;;  %v16427_v16 = vld [vmem:[#allocation29_spill] sm:$0xff] }
 0x4c7   : > { %v7437_v49 = vsel %vm15940_vm3, %v16422_v7, %v7436_v18  ;;  %vm1598_vm9 = vcmp.eq.s32.totalorder %v16427_v16, %v1597_v6  ;;  %vm1603_vm14 = vcmp.eq.s32.totalorder %v16427_v16, %v1602_v62 }
 0x4c8   : > { %vm1599_vm2 = vmand %vm1565_vm8, %vm1598_vm9 }
 0x4c9   : > { %5813 = vadd.xlane.f32.xlu1 %v16415_v26 }
 0x4ca   : > { %v3963_v24 = vpop.xlane.xlu1 %3962 }
 0x4cb   : > { %v4072_v19 = vadd.f32 %v4071_v41, %v3963_v24 }
 0x4cd   : > { %5817 = vadd.xlane.f32.xlu1 %v16418_v1  ;;  %v4073_v2 = vadd.f32 %v4072_v19, %v3965_v46  ;;  %v16424_v46 = vld [vmem:[#allocation59_spill] sm:$0xff] }
 0x4ce   : > { %v13836_v29 = vpop.xlane.xlu1 %4026 }
 0x4d1   : > { %5821 = vadd.xlane.f32.xlu1 %v16420_v30 }
 0x4d2   : > { %v3967_v41 = vpop.xlane.xlu1 %3966 }
 0x4d3   : > { %v4074_v24 = vadd.f32 %v4073_v2, %v3967_v41  ;;  %v16425_v2 = vld [vmem:[#allocation76_spill] sm:$0xff]  ;;  %v16426_v41 = vld [vmem:[#allocation117_spill] sm:$0xff] }
 0x4d5   : > { %5825 = vadd.xlane.f32.xlu1 %v16423_v5  ;;  %7510 = vxpose.xlu0.b32.start.end [1/1] (short) %v7437_v49, 128  ;;  %v4075_v19 = vadd.f32 %v4074_v24, %v3969_v25  ;;  %v13861_v49 = vpop.xlane.xlu0 %4036  ;;  %v1587_v24 = vstv %s1586_s18 }
 0x4d6   : > { %v13848_v58 = vpop.xlane.xlu1 %4030  ;;  %vm1588_vm15 = vcmp.eq.s32.totalorder %v16427_v16, %v1587_v24 }
 0x4d7   : > { %vm1589_vm6 = vmand %vm1551_vm4, %vm1588_vm15 }
 0x4d8   : > { %vm1604_vm4 = vmand %vm1572_vm12, %vm1603_vm14 }
 0x4d9   : > { %5829 = vadd.xlane.f32.xlu1 %v16424_v46 }
 0x4da   : > { %v3971_v51 = vpop.xlane.xlu1 %3970 }
 0x4db   : > { %v4076_v8 = vadd.f32 %v4075_v19, %v3971_v51  ;;  %v1592_v51 = vstv %s1591_s19  ;;  %v3977_v19 = vpop.xlane.xlu0 %3976 }
 0x4dc   : > { %vm1593_vm5 = vcmp.eq.s32.totalorder %v16427_v16, %v1592_v51 }
 0x4dd   : > { %5833 = vadd.xlane.f32.xlu1 %v16425_v2  ;;  %v4077_v25 = vadd.f32 %v4076_v8, %v3973_v12  ;;  %v16429_v12 = vmov 0.0   ;;  %vm1594_vm11 = vmand %vm1558_vm7, %vm1593_vm5  ;;  %vm16442_vm7 = vcmask 39936  }
 0x4de   : > { %v13863_v18 = vpop.xlane.xlu1 %4034  ;;  %v1590_v8 = vsel %vm1589_vm6, 1.0, %v16429_v12  ;;  %vm16444_vm8 = vmmov %vm16442_vm7 }
 0x4df   : > { %v1595_v24 = vsel %vm1594_vm11, 1.0, %v1590_v8  ;;  %v13884_v62 = vpop.xlane.xlu0 %4040  ;;  %vm16446_vm12 = vmmov %vm16442_vm7 }
 0x4e0   : > { %vm16451_vm11 = vmmov %vm16442_vm7 }
 0x4e1   : > { %5837 = vadd.xlane.f32.xlu1 %v16426_v41  ;;  %v1607_v41 = vstv %s1606_s22  ;;  %vm16453_vm5 = vmmov %vm16442_vm7 }
 0x4e2   : > { %v3975_v7 = vpop.xlane.xlu1 %3974  ;;  %vm1608_vm3 = vcmp.eq.s32.totalorder %v16427_v16, %v1607_v41  ;;  %vm16455_vm6 = vmmov %vm16453_vm5 }
 0x4e3   : > { %v4078_v3 = vadd.f32 %v4077_v25, %v3975_v7  ;;  %v1600_v25 = vsel %vm1599_vm2, 1.0, %v1595_v24  ;;  %vm1609_vm15 = vmand %vm1579_vm13, %vm1608_vm3  ;;  %v3981_v24 = vpop.xlane.xlu0 %3980  ;;  %vm16437_vm2 = vcmask 1043459   ;;  %vm16440_vm3 = vcmask 1044484  }
 0x4e4   : > { %v1605_v6 = vsel %vm1604_vm4, 1.0, %v1600_v25  ;;  %vm16449_vm13 = vmmov %vm16442_vm7 }
 0x4e5   : > { %v13886_v51 = vsel %vm1609_vm15, 1.0, %v1605_v6  ;;  %v4079_v12 = vadd.f32 %v4078_v3, %v3977_v19  ;;  %vm16456_vm9 = vmmov %vm16453_vm5 }
 0x4e6   : > { %v13878_v7 = vpop.xlane.xlu1 %4038  ;;  %16430 = vst [vmem:[#allocation87_spill] sm:$0xff] %v13886_v51  ;;  %10336 = vmatprep.subr.msk.mxu0 %vm2343_vm10, %v13886_v51  ;;  %vm16459_vm14 = vmmov %vm16453_vm5 }
 0x4e7   : > { %10337 = vmatpush3.msk.msra.mxu0 %vm2343_vm10, %v13886_v51  ;;  %v13894_v2 = vpop.xlane.xlu0 %4044  ;;  %vm16461_vm4 = vmmov %vm16453_vm5 }
 0x4e8   : > { %vm16462_vm15 = vmmov %vm16461_vm4 }
 0x4ea   : > { %v3979_v41 = vpop.xlane.xlu1 %3978 }
 0x4eb   : > { %v4080_v8 = vadd.f32 %v4079_v12, %v3979_v41  ;;  %v3985_v46 = vpop.xlane.xlu0 %3984 }
 0x4ed   : > { %v4081_v25 = vadd.f32 %v4080_v8, %v3981_v24 }
 0x4ee   : > { %v13892_v16 = vpop.xlane.xlu1 %4042 }
 0x4ef   : > { %v13898_v50 = vpop.xlane.xlu0 %4048 }
 0x4f2   : > { %v3983_v48 = vpop.xlane.xlu1 %3982 }
 0x4f3   : > { %v4082_v10 = vadd.f32 %v4081_v25, %v3983_v48 }
 0x4f4   : > { %v3989_v51 = vpop.xlane.xlu0 %3988 }
 0x4f5   : > { %v4083_v3 = vadd.f32 %v4082_v10, %v3985_v46  ;;  %v16432_v10 = vld [vmem:[#allocation35_spill] sm:$0xff]  ;;  %v16433_v46 = vld [vmem:[#allocation34_spill] sm:$0xff] }
 0x4f6   : > { %v13896_v6 = vpop.xlane.xlu1 %4046 }
 0x4fa   : > { %v3987_v19 = vpop.xlane.xlu1 %3986 }
 0x4fb   : > { %v4084_v5 = vadd.f32 %v4083_v3, %v3987_v19  ;;  %v7430_v3 = vsel %vm2043_vm0, %v16433_v46, %v16432_v10  ;;  %v16439_v46 = vld [vmem:[#allocation19_spill] sm:$0xff]  ;;  %v16503_v10 = vld [vmem:[#allocation41_spill] sm:$0xff] }
 0x4fd   : > { %v4085_v12 = vadd.f32 %v4084_v5, %v3989_v51  ;;  %v16434_v51 = vld [vmem:[#allocation23_spill] sm:$0xff] }
 0x4fe   : > { %v13900_v30 = vpop.xlane.xlu1 %4050 }
 0x502   : > { %v3991_v41 = vpop.xlane.xlu1 %3990 }
 0x503   : > { %v4086_v1 = vadd.f32 %v4085_v12, %v3991_v41  ;;  %v7431_v12 = vsel %vm2045_vm1, %v16434_v51, %v7430_v3  ;;  %v16502_v51 = vld [vmem:[#allocation39_spill] sm:$0xff] }
 0x505   : > { %v4087_v8 = vadd.f32 %v4086_v1, %v13692_v27 }
 0x506   : > { %v13903_v24 = vpop.xlane.xlu1 %4054 }
 0x507   : > { %v4088_v25 = vadd.f32 %v4087_v8, %v13753_v17  ;;  %v16436_v17 = vld [vmem:[#allocation18_spill] sm:$0xff] }
 0x509   : > { %v4089_v48 = vadd.f32 %v4088_v25, %v13709_v31  ;;  %v7432_v31 = vsel %vm16437_vm2, %v16436_v17, %v7431_v12  ;;  %vm16465_vm2 = vmmov %vm16461_vm4  ;;  %v16500_v17 = vld [vmem:[#allocation50_spill] sm:$0xff] }
 0x50a   : > { %v13907_v26 = vpop.xlane.xlu1 %5741 }
 0x50b   : > { %16431 = vst [vmem:[#allocation77_spill] sm:$0xff] %v13907_v26  ;;  %v4090_v19 = vadd.f32 %v4089_v48, %v13782_v63  ;;  %v7433_v63 = vsel %vm16440_vm3, %v16439_v46, %v7432_v31  ;;  %vm16470_vm3 = vmmov %vm16465_vm2 }
 0x50d   : > { %v4091_v5 = vadd.f32 %v4090_v19, %v13729_v4  ;;  %v13927_v4 = vpop.xlane.xlu0 %4052 }
 0x50e   : > { %v13916_v27 = vpop.xlane.xlu1 %5745 }
 0x50f   : > { %16435 = vst [vmem:[#allocation91_spill] sm:$0xff] %v13916_v27  ;;  %v4092_v1 = vadd.f32 %v4091_v5, %v13794_v42  ;;  %v16526_v27 = vld [vmem:[#allocation20_spill] sm:$0xff] }
 0x511   : > { %v4093_v41 = vadd.f32 %v4092_v1, %v13744_v15 }
 0x512   : > { %v13922_v8 = vpop.xlane.xlu1 %5749 }
 0x513   : > { %16438 = vst [vmem:[#allocation78_spill] sm:$0xff] %v13922_v8  ;;  %v4094_v25 = vadd.f32 %v4093_v41, %v13804_v14 }
 0x514   : > { %7478 = vxpose.xlu1.b32.start.end [1/1] (short) %v7433_v63, 128 }
 0x515   : > { %v4095_v48 = vadd.f32 %v4094_v25, %v13761_v32  ;;  %v16448_v25 = vld [vmem:[#allocation14_spill] sm:$0xff] }
 0x516   : > { %v13930_v3 = vpop.xlane.xlu1 %5753  ;;  %v3466_v63 = vsel %vm2343_vm10, %v16448_v25, 0.0 }
 0x517   : > { %16441 = vst [vmem:[#allocation83_spill] sm:$0xff] %v13930_v3  ;;  %v4096_v42 = vadd.f32 %v4095_v48, %v13811_v54 }
 0x518   : > { %v7462_v19 = vpop.trf.xlu0 }
 0x519   : > { %v4097_v5 = vadd.f32 %v4096_v42, %v13787_v20  ;;  %10338 = vmatprep.mubr.msk.f32.mxu0 %vm16442_vm7, %v7462_v19  ;;  %vm16474_vm7 = vcmask 1043459  }
 0x51a   : > { %v13935_v15 = vpop.xlane.xlu1 %5757 }
 0x51b   : > { %16443 = vst [vmem:[#allocation86_spill] sm:$0xff] %v13935_v15  ;;  %v4098_v14 = vadd.f32 %v4097_v5, %v13817_v39 }
 0x51c   : > { %v7463_v12 = vpop.trf.xlu0 }
 0x51d   : > { %v4099_v1 = vadd.f32 %v4098_v14, %v13800_v47  ;;  %10339 = vmatmul.mubr.msk.f32.vlgmr.msra.gmra.mrb[104].mxu0 %vm16444_vm8, %v7463_v12  ;;  %v3728_v47 = vrot.slane %v13807_v36, 4  ;;  %vm16475_vm8 = vmmov %vm16465_vm2 }
 0x51e   : > { %v13940_v31 = vpop.xlane.xlu1 %5761 }
 0x51f   : > { %16445 = vst [vmem:[#allocation99_spill] sm:$0xff] %v13940_v31  ;;  %v4100_v32 = vadd.f32 %v4099_v1, %v13823_v38  ;;  %v3467_v38 = vrot.slane %v3466_v63, 4  ;;  %v3729_v5 = vadd.f32 %v3728_v47, %v13807_v36 }
 0x520   : > { %v7464_v41 = vpop.trf.xlu0 }
 0x521   : > { %v4101_v54 = vadd.f32 %v4100_v32, %v13813_v55  ;;  %10341 = vmatprep.mubr.msk.f32.mxu0 %vm16446_vm12, %v7464_v41  ;;  %vm16479_vm12 = vcmask 1044484  }
 0x522   : > { %v13945_v20 = vpop.xlane.xlu1 %5765 }
 0x523   : > { %16447 = vst [vmem:[#allocation94_spill] sm:$0xff] %v13945_v20  ;;  %v4102_v39 = vadd.f32 %v4101_v54, %v13827_v0  ;;  %v3468_v0 = vadd.f32 %v3467_v38, %v3466_v63 }
 0x524   : > { %v7465_v48 = vpop.trf.xlu0 }
 0x525   : > { %v4103_v42 = vadd.f32 %v4102_v39, %v13820_v11  ;;  %10342 = vmatmul.mubr.msk.f32.gmra.mrb[106].mxu0 %vm16449_vm13, %v7465_v48  ;;  %v3730_v11 = vrot.slane %v3729_v5, 2  ;;  %v3469_v25 = vrot.slane %v3468_v0, 2  ;;  %vm16480_vm13 = vmmov %vm16465_vm2 }
 0x526   : > { %v13953_v19 = vpop.xlane.xlu1 %5769 }
 0x527   : > { %16450 = vst [vmem:[#allocation105_spill] sm:$0xff] %v13953_v19  ;;  %v4104_v55 = vadd.f32 %v4103_v42, %v13836_v29  ;;  %v3731_v36 = vadd.f32 %v3730_v11, %v3729_v5  ;;  %v3470_v63 = vadd.f32 %v3469_v25, %v3468_v0 }
 0x528   : > { %v7466_v14 = vpop.trf.xlu0 }
 0x529   : > { %v4105_v12 = vadd.f32 %v4104_v55, %v13829_v13  ;;  %10344 = vmatprep.mubr.msk.f32.mxu0 %vm16451_vm11, %v7466_v14  ;;  %v3732_v48 = vrot.slane %v3731_v36, 1  ;;  %v3471_v38 = vrot.slane %v3470_v63, 1  ;;  %vm16484_vm11 = vmmov %vm16465_vm2 }
 0x52a   : > { %v13959_v1 = vpop.xlane.xlu1 %5773 }
 0x52b   : > { %16452 = vst [vmem:[#allocation98_spill] sm:$0xff] %v13959_v1  ;;  %v4106_v32 = vadd.f32 %v4105_v12, %v13848_v58  ;;  %v3733_v5 = vadd.f32 %v3732_v48, %v3731_v36  ;;  %v16458_v12 = vld [vmem:[#allocation10_spill] sm:$0xff]  ;;  %v16464_v36 = vld [vmem:[#allocation85_spill] sm:$0xff]  ;;  %v16467_v48 = vld [vmem:[#allocation36_spill] sm:$0xff] }
 0x52c   : > { %v7467_v41 = vpop.trf.xlu0  ;;  %v4881_v0 = vmul.f32 %v16407_v61, %v16458_v12 }
 0x52d   : > { %v4107_v54 = vadd.f32 %v4106_v32, %v13843_v21  ;;  %10345 = vmatmul.mubr.msk.f32.gmra.mrb[108].mxu0 %vm16453_vm5, %v7467_v41  ;;  %vm16511_vm5 = vmmov %vm16465_vm2 }
 0x52e   : > { %v13965_v39 = vpop.xlane.xlu1 %5777 }
 0x52f   : > { %v4108_v29 = vadd.f32 %v4107_v54, %v13863_v18  ;;  %16454 = vst [vmem:[#allocation107_spill] sm:$0xff] %v13965_v39 }
 0x530   : > { %v7468_v13 = vpop.trf.xlu0 }
 0x531   : > { %v4109_v47 = vadd.f32 %v4108_v29, %v13861_v49  ;;  %10347 = vmatprep.mubr.msk.f32.mxu0 %vm16455_vm6, %v7468_v13  ;;  %vm16513_vm6 = vmmov %vm16465_vm2 }
 0x532   : > { %v13972_v55 = vpop.xlane.xlu1 %5781 }
 0x533   : > { %v4110_v58 = vadd.f32 %v4109_v47, %v13878_v7  ;;  %16457 = vst [vmem:[#allocation111_spill] sm:$0xff] %v13972_v55  ;;  %v3472_v7 = vadd.f32 %v3471_v38, %v3470_v63 }
 0x534   : > { %v7469_v42 = vpop.trf.xlu0 }
 0x535   : > { %v4111_v21 = vadd.f32 %v4110_v58, %v13884_v62  ;;  %10348 = vmatmul.mubr.msk.f32.gmra.mrb[110].mxu0 %vm16456_vm9, %v7469_v42  ;;  %v3734_v62 = vsub.f32 %v3472_v7, %v3733_v5  ;;  %v16466_v58 = vld [vmem:[#allocation90_spill] sm:$0xff]  ;;  %v16468_v42 = vld [vmem:[#allocation17_spill] sm:$0xff]  ;;  %vm16515_vm9 = vmmov %vm16465_vm2 }
 0x536   : > { %v13980_v11 = vpop.xlane.xlu1 %4876  ;;  %v16472_v5 = vld [vmem:[#allocation37_spill] sm:$0xff] }
 0x537   : > { %v4112_v18 = vadd.f32 %v4111_v21, %v13892_v16  ;;  %16460 = vst [vmem:[#allocation106_spill] sm:$0xff] %v13980_v11  ;;  %v4882_v16 = vsel %vm2343_vm10, %v4881_v0, 0.0  ;;  %v3735_v25 = vadd.f32 0.0512, %v3734_v62  ;;  %v16505_v11 = vld [vmem:[#allocation54_spill] sm:$0xff] }
 0x538   : > { %v7470_v14 = vpop.trf.xlu0 }
 0x539   : > { %v4113_v49 = vadd.f32 %v4112_v18, %v13894_v2  ;;  %10350 = vmatprep.mubr.msk.f32.mxu0 %vm16459_vm14, %v7470_v14  ;;  %vm16517_vm14 = vmmov %vm16465_vm2 }
 0x53b   : > { %v4114_v32 = vadd.f32 %v4113_v49, %v13896_v6  ;;  %v13988_v6 = vpop.xlane.xlu1 %5785 }
 0x53c   : > { %v7471_v41 = vpop.trf.xlu0  ;;  %16463 = vst [vmem:[#allocation21_spill] sm:$0xff] %v13988_v6 }
 0x53d   : > { %v4115_v54 = vadd.f32 %v4114_v32, %v13898_v50  ;;  %10351 = vmatmul.mubr.msk.f32.gmra.mrb[112].mxu0 %vm16461_vm4, %v7471_v41  ;;  %v4126_v50 = vadd.f32 1e-06, %v3735_v25  ;;  %v16473_v32 = vld [vmem:[#allocation16_spill] sm:$0xff]  ;;  %vm16519_vm4 = vmmov %vm16465_vm2 }
 0x53e   : > { %4883 = vadd.xlane.f32.xlu0 %v4882_v16 }
 0x53f   : > { %v4116_v2 = vadd.f32 %v4115_v54, %v13900_v30  ;;  %10701 = vrcp.f32 %v4126_v50  ;;  %v13997_v21 = vpop.xlane.xlu1 %5789  ;;  %v16477_v54 = vld [vmem:[#allocation102_spill] sm:$0xff]  ;;  %v16481_v50 = vld [vmem:[#allocation109_spill] sm:$0xff] }
 0x540   : > { %v7472_v61 = vpop.trf.xlu0  ;;  %16469 = vst [vmem:[#allocation112_spill] sm:$0xff] %v13997_v21 }
 0x541   : > { %v4117_v29 = vadd.f32 %v4116_v2, %v13927_v4  ;;  %10353 = vmatprep.mubr.msk.f32.mxu0 %vm16462_vm15, %v7472_v61  ;;  %v7438_v4 = vsel %vm2043_vm0, %v16468_v42, %v16467_v48  ;;  %v16478_v2 = vld [vmem:[#allocation32_spill] sm:$0xff]  ;;  %vm16521_vm15 = vmmov %vm16465_vm2 }
 0x542   : > { %5713 = vadd.xlane.f32.xlu0 %v16464_v36  ;;  %v7439_v14 = vsel %vm2045_vm1, %v16472_v5, %v7438_v4  ;;  %v16485_v4 = vld [vmem:[#allocation115_spill] sm:$0xff] }
 0x543   : > { %v4118_v13 = vadd.f32 %v4117_v29, %v13903_v24  ;;  %v16471_v24 = vld [vmem:[#allocation96_spill] sm:$0xff]  ;;  %v7440_v62 = vsel %vm16474_vm7, %v16473_v32, %v7439_v14  ;;  %v14006_v41 = vpop.xlane.xlu1 %5793  ;;  %v16488_v14 = vld [vmem:[#allocation11_spill] sm:$0xff]  ;;  %vm16530_vm7 = vmmov %vm16465_vm2 }
 0x544   : > { %v7473_v47 = vpop.trf.xlu0  ;;  %16476 = vst [vmem:[#allocation64_spill] sm:$0xff] %v14006_v41  ;;  %v7441_v25 = vsel %vm16479_vm12, %v16478_v2, %v7440_v62  ;;  %v16492_v62 = vld [vmem:[#allocation40_spill] sm:$0xff]  ;;  %v16497_v2 = vld [vmem:[#allocation46_spill] sm:$0xff]  ;;  %vm16537_vm12 = vmmov %vm16465_vm2 }
 0x545   : > { %v4119_v63 = vrot.slane %v4118_v13, 4  ;;  %10354 = vmatmul.mubr.msk.f32.gmra.mrb[114].mxu0 %vm16465_vm2, %v7473_v47  ;;  %v16498_v32 = vld [vmem:[#allocation48_spill] sm:$0xff] }
 0x546   : > { %5719 = vadd.xlane.f32.xlu0 %v16466_v58 }
 0x547   : > { %v4120_v30 = vadd.f32 %v4119_v63, %v4118_v13  ;;  %v14015_v63 = vpop.xlane.xlu1 %5797 }
 0x548   : > { %v7474_v38 = vpop.trf.xlu0  ;;  %16483 = vst [vmem:[#allocation70_spill] sm:$0xff] %v14015_v63 }
 0x549   : > { %v4121_v18 = vrot.slane %v4120_v30, 2  ;;  %10356 = vmatprep.mubr.msk.f32.mxu0 %vm16470_vm3, %v7474_v38  ;;  %v10702_v13 = vpop.eup %10701  ;;  %vm16524_vm3 = vmmov %vm16465_vm2 }
 0x54a   : > { %5723 = vadd.xlane.f32.xlu0 %v16471_v24 }
 0x54b   : > { %v4122_v49 = vadd.f32 %v4121_v18, %v4120_v30  ;;  %v14019_v38 = vpop.xlane.xlu1 %5801  ;;  %v16487_v18 = vld [vmem:[#allocation9_spill] sm:$0xff] }
 0x54c   : > { %v7475_v0 = vpop.trf.xlu0  ;;  %16486 = vst [vmem:[#allocation80_spill] sm:$0xff] %v14019_v38  ;;  %v16510_v38 = vld [vmem:[#allocation45_spill] sm:$0xff] }
 0x54d   : > { %v4123_v7 = vrot.slane %v4122_v49, 1  ;;  %10357 = vmatmul.mubr.msk.f32.gmra.mrb[116].mxu0 %vm16475_vm8, %v7475_v0  ;;  %v16490_v0 = vld [vmem:[#allocation22_spill] sm:$0xff]  ;;  %vm16533_vm8 = vmmov %vm16465_vm2 }
 0x54e   : > { %5727 = vadd.xlane.f32.xlu0 %v16477_v54 }
 0x54f   : > { %v4124_v16 = vadd.f32 %v4123_v7, %v4122_v49  ;;  %v14023_v49 = vpop.xlane.xlu1 %5805 }
 0x550   : > { %v7476_v61 = vpop.trf.xlu0  ;;  %16489 = vst [vmem:[#allocation75_spill] sm:$0xff] %v14023_v49 }
 0x551   : > { %v4125_v29 = vsub.f32 0.0, %v4124_v16  ;;  %7542 = vxpose.xlu1.b32.start.end [1/1] (short) %v7441_v25, 128  ;;  %10359 = vmatprep.mubr.msk.f32.mxu0 %vm16480_vm13, %v7476_v61  ;;  %v16493_v16 = vld [vmem:[#allocation42_spill] sm:$0xff]  ;;  %vm16541_vm13 = vmmov %vm16465_vm2 }
 0x552   : > { %5731 = vadd.xlane.f32.xlu0 %v16481_v50 }
 0x553   : > { %v14013_v47 = vmul.f32 %v10702_v13, %v4125_v29  ;;  %v14026_v7 = vpop.xlane.xlu1 %5809  ;;  %v16495_v29 = vld [vmem:[#allocation44_spill] sm:$0xff] }
 0x554   : > { %v7477_v30 = vpop.trf.xlu0  ;;  %16491 = vst [vmem:[#allocation88_spill] sm:$0xff] %v14026_v7  ;;  %v16508_v7 = vld [vmem:[#allocation43_spill] sm:$0xff] }
 0x555   : > { %16482 = vst [vmem:[#allocation74_spill] sm:$0xff] %v14013_v47  ;;  %10360 = vmatmul.mubr.msk.f32.gmra.mrb[118].mxu0 %vm16484_vm11, %v7477_v30  ;;  %vm16545_vm11 = vmmov %vm16465_vm2 }
 0x556   : > { %5735 = vadd.xlane.f32.xlu0 %v16485_v4 }
 0x557   : > { %v14032_v61 = vpop.xlane.xlu1 %5813 }
 0x558   : > { %v14030_v25 = vpop.trf.xlu0  ;;  %16494 = vst [vmem:[#allocation81_spill] sm:$0xff] %v14032_v61 }
 0x55a   : > { %5739 = vadd.xlane.f32.xlu0 %v16487_v18 }
 0x55b   : > { %v14037_v30 = vpop.xlane.xlu1 %5817 }
 0x55c   : > { %v14035_v13 = vpop.trf.xlu0  ;;  %16496 = vst [vmem:[#allocation100_spill] sm:$0xff] %v14037_v30 }
 0x55e   : > { %5743 = vadd.xlane.f32.xlu0 %v16488_v14 }
 0x55f   : > { %v14043_v5 = vpop.xlane.xlu1 %5821 }
 0x560   : > { %v14041_v46 = vpop.trf.xlu0  ;;  %16499 = vst [vmem:[#allocation89_spill] sm:$0xff] %v14043_v5  ;;  %v16507_v5 = vld [vmem:[#allocation58_spill] sm:$0xff] }
 0x562   : > { %5747 = vadd.xlane.f32.xlu0 %v16490_v0 }
 0x563   : > { %v14048_v48 = vpop.xlane.xlu1 %5825 }
 0x564   : > { %v14046_v42 = vpop.trf.xlu0  ;;  %16501 = vst [vmem:[#allocation113_spill] sm:$0xff] %v14048_v48 }
 0x566   : > { %5751 = vadd.xlane.f32.xlu0 %v16492_v62 }
 0x567   : > { %v14054_v47 = vpop.xlane.xlu1 %5829 }
 0x568   : > { %v14052_v12 = vpop.trf.xlu0  ;;  %16504 = vst [vmem:[#allocation101_spill] sm:$0xff] %v14054_v47  ;;  %v16512_v47 = vld [vmem:[#allocation47_spill] sm:$0xff] }
 0x56a   : > { %5755 = vadd.xlane.f32.xlu0 %v16493_v16 }
 0x56b   : > { %v14059_v61 = vpop.xlane.xlu1 %5833 }
 0x56c   : > { %v14057_v30 = vpop.trf.xlu0  ;;  %16506 = vst [vmem:[#allocation114_spill] sm:$0xff] %v14059_v61  ;;  %v16514_v61 = vld [vmem:[#allocation49_spill] sm:$0xff] }
 0x56e   : > { %5759 = vadd.xlane.f32.xlu0 %v16495_v29 }
 0x56f   : > { %v14065_v48 = vpop.xlane.xlu1 %5837 }
 0x570   : > { %v14063_v49 = vpop.trf.xlu0  ;;  %16509 = vst [vmem:[#allocation38_spill] sm:$0xff] %v14065_v48  ;;  %v16516_v48 = vld [vmem:[#allocation51_spill] sm:$0xff] }
 0x572   : > { %5763 = vadd.xlane.f32.xlu0 %v16497_v2 }
 0x574   : > { %v14068_v41 = vpop.trf.xlu0 }
 0x576   : > { %5767 = vadd.xlane.f32.xlu0 %v16498_v32 }
 0x578   : > { %v14074_v6 = vpop.trf.xlu0 }
 0x57a   : > { %5771 = vadd.xlane.f32.xlu0 %v16500_v17 }
 0x57c   : > { %v14078_v1 = vpop.trf.xlu0 }
 0x57e   : > { %5775 = vadd.xlane.f32.xlu0 %v16502_v51 }
 0x580   : > { %v14084_v20 = vpop.trf.xlu0 }
 0x582   : > { %5779 = vadd.xlane.f32.xlu0 %v16503_v10 }
 0x584   : > { %v14088_v3 = vpop.trf.xlu0 }
 0x586   : > { %5783 = vadd.xlane.f32.xlu0 %v16505_v11 }
 0x588   : > { %v14098_v22 = vpop.trf.xlu0 }
 0x58a   : > { %5787 = vadd.xlane.f32.xlu0 %v16507_v5 }
 0x58c   : > { %v14109_v28 = vpop.trf.xlu0 }
 0x58e   : > { %5791 = vadd.xlane.f32.xlu0 %v16508_v7 }
 0x592   : > { %5795 = vadd.xlane.f32.xlu0 %v16510_v38 }
 0x594   : > { %v7494_v63 = vpop.trf.xlu1 }
 0x595   : > { %10362 = vmatprep.mubr.msk.f32.mxu0 %vm16511_vm5, %v7494_v63  ;;  %v16518_v63 = vld [vmem:[#allocation126_spill] sm:$0xff]  ;;  %vm16548_vm5 = vmmov %vm16465_vm2 }
 0x596   : > { %5799 = vadd.xlane.f32.xlu0 %v16512_v47 }
 0x598   : > { %v7495_v21 = vpop.trf.xlu1 }
 0x599   : > { %10363 = vmatmul.mubr.msk.f32.gmra.mrb[120].mxu0 %vm16513_vm6, %v7495_v21  ;;  %v16520_v21 = vld [vmem:[#allocation53_spill] sm:$0xff]  ;;  %vm16552_vm6 = vmmov %vm16465_vm2 }
 0x59a   : > { %5803 = vadd.xlane.f32.xlu0 %v16514_v61 }
 0x59c   : > { %v7496_v55 = vpop.trf.xlu1 }
 0x59d   : > { %10365 = vmatprep.mubr.msk.f32.mxu0 %vm16515_vm9, %v7496_v55  ;;  %v16522_v55 = vld [vmem:[#allocation55_spill] sm:$0xff]  ;;  %vm16554_vm9 = vmmov %vm16465_vm2 }
 0x59e   : > { %5807 = vadd.xlane.f32.xlu0 %v16516_v48 }
 0x5a0   : > { %v7497_v39 = vpop.trf.xlu1 }
 0x5a1   : > { %10366 = vmatmul.mubr.msk.f32.gmra.mrb[122].mxu0 %vm16517_vm14, %v7497_v39  ;;  %v16523_v39 = vld [vmem:[#allocation95_spill] sm:$0xff]  ;;  %vm16555_vm14 = vmmov %vm16465_vm2 }
 0x5a2   : > { %5811 = vadd.xlane.f32.xlu0 %v16518_v63 }
 0x5a4   : > { %v7498_v19 = vpop.trf.xlu1 }
 0x5a5   : > { %10368 = vmatprep.mubr.msk.f32.mxu0 %vm16519_vm4, %v7498_v19  ;;  %v16525_v19 = vld [vmem:[#allocation84_spill] sm:$0xff]  ;;  %vm16557_vm4 = vmmov %vm16465_vm2 }
 0x5a6   : > { %5815 = vadd.xlane.f32.xlu0 %v16520_v21  ;;  %v14095_v26 = vmul.f32 %v16526_v27, %v16525_v19 }
 0x5a8   : > { %v7499_v31 = vpop.trf.xlu1  ;;  %16527 = vst [vmem:[#allocation120_spill] sm:$0xff] %v14095_v26 }
 0x5a9   : > { %10369 = vmatmul.mubr.msk.f32.gmra.mrb[124].mxu0 %vm16521_vm15, %v7499_v31  ;;  %v16529_v31 = vld [vmem:[#allocation33_spill] sm:$0xff]  ;;  %vm16558_vm15 = vmmov %vm16465_vm2 }
 0x5aa   : > { %5819 = vadd.xlane.f32.xlu0 %v16522_v55 }
 0x5ac   : > { %v7500_v15 = vpop.trf.xlu1 }
 0x5ad   : > { %10371 = vmatprep.mubr.msk.f32.mxu0 %vm16465_vm2, %v7500_v15  ;;  %v5982_v15 = vmul.f32 %v16525_v19, %v14095_v26  ;;  %v16535_v19 = vld [vmem:[#allocation108_spill] sm:$0xff]  ;;  %v14121_v26 = vmul.f32 %v16526_v27, %v16464_v36 }
 0x5ae   : > { %5823 = vadd.xlane.f32.xlu0 %v16523_v39  ;;  %v14106_v39 = vmul.f32 %v16526_v27, %v16466_v58 }
 0x5af   : > { %16536 = vst [vmem:[#allocation66_spill] sm:$0xff] %v14121_v26 }
 0x5b0   : > { %v7501_v8 = vpop.trf.xlu1  ;;  %16531 = vst [vmem:[#allocation121_spill] sm:$0xff] %v14106_v39 }
 0x5b1   : > { %10372 = vmatmul.mubr.msk.f32.gmra.mrb[126].mxu0 %vm16524_vm3, %v7501_v8  ;;  %v16532_v8 = vld [vmem:[#allocation73_spill] sm:$0xff]  ;;  %vm16559_vm3 = vmmov %vm16465_vm2 }
 0x5b2   : > { %5827 = vadd.xlane.f32.xlu0 %v16528_v60  ;;  %v16539_v60 = vld [vmem:[#allocation92_spill] sm:$0xff] }
 0x5b4   : > { %5972 = vadd.xlane.f32.xlu1 %v16529_v31  ;;  %v7502_v55 = vpop.trf.xlu1  ;;  %v5984_v31 = vmul.f32 %v16466_v58, %v14106_v39  ;;  %v14128_v58 = vmul.f32 %v16526_v27, %v16477_v54  ;;  %v16538_v39 = vld [vmem:[#allocation60_spill] sm:$0xff] }
 0x5b5   : > { %10374 = vmatprep.mubr.msk.f32.mxu0 %vm16530_vm7, %v7502_v55  ;;  %v14116_v55 = vmul.f32 %v16526_v27, %v16471_v24  ;;  %vm16560_vm7 = vmmov %vm16465_vm2 }
 0x5b6   : > { %5831 = vadd.xlane.f32.xlu0 %v16532_v8  ;;  %v14131_v8 = vpop.trf.xlu0 }
 0x5b7   : > { %16534 = vst [vmem:[#allocation122_spill] sm:$0xff] %v14116_v55 }
 0x5b8   : > { %6047 = vadd.xlane.f32.xlu1 %v5982_v15  ;;  %v7503_v21 = vpop.trf.xlu1 }
 0x5b9   : > { %10375 = vmatmul.mubr.msk.f32.gmra.mrb[128].mxu0 %vm16533_vm8, %v7503_v21  ;;  %v5986_v21 = vmul.f32 %v16471_v24, %v14116_v55  ;;  %v5988_v24 = vmul.f32 %v16477_v54, %v14128_v58  ;;  %v14144_v55 = vmul.f32 %v16526_v27, %v16481_v50  ;;  %vm16561_vm8 = vmmov %vm16465_vm2 }
 0x5ba   : > { %5835 = vadd.xlane.f32.xlu0 %v16535_v19  ;;  %v5981_v19 = vmul.f32 %v14121_v26, %v16464_v36  ;;  %v16543_v36 = vld [vmem:[#allocation97_spill] sm:$0xff]  ;;  %v14152_v63 = vpop.trf.xlu0 }
 0x5bb   : > { %16542 = vst [vmem:[#allocation124_spill] sm:$0xff] %v14144_v55  ;;  %v14150_v26 = vmul.f32 %v16526_v27, %v16543_v36  ;;  %v5990_v54 = vmul.f32 %v16481_v50, %v14144_v55  ;;  %v14172_v50 = vmul.f32 %v16526_v27, %v16487_v18 }
 0x5bc   : > { %6051 = vadd.xlane.f32.xlu1 %v5984_v31  ;;  %v7504_v15 = vpop.trf.xlu1  ;;  %v14137_v31 = vmul.f32 %v16526_v27, %v16539_v60 }
 0x5bd   : > { %10377 = vmatprep.mubr.msk.f32.mxu0 %vm16537_vm12, %v7504_v15  ;;  %16544 = vst [vmem:[#allocation7_spill] sm:$0xff] %v14150_v26  ;;  %vm16562_vm12 = vmmov %vm16465_vm2 }
 0x5be   : > { %5839 = vadd.xlane.f32.xlu0 %v16538_v39  ;;  %16540 = vst [vmem:[#allocation123_spill] sm:$0xff] %v14137_v31  ;;  %v5983_v39 = vmul.f32 %v14137_v31, %v16539_v60  ;;  %v5985_v60 = vmul.f32 %v14150_v26, %v16543_v36  ;;  %v16550_v26 = vld [vmem:[#allocation110_spill] sm:$0xff] }
 0x5bf   : > { %v14180_v55 = vmul.f32 %v16526_v27, %v16550_v26 }
 0x5c0   : > { %6055 = vadd.xlane.f32.xlu1 %v5986_v21  ;;  %v7505_v15 = vpop.trf.xlu1 }
 0x5c1   : > { %10378 = vmatmul.mubr.msk.f32.gmra.mrb[130].mxu0 %vm16541_vm13, %v7505_v15  ;;  %v14159_v15 = vmul.f32 %v16526_v27, %v16485_v4  ;;  %16551 = vst [vmem:[#allocation90_spill] sm:$0xff] %v14180_v55  ;;  %vm16563_vm13 = vmmov %vm16465_vm2 }
 0x5c2   : > { %6045 = vadd.xlane.f32.xlu0 %v5981_v19  ;;  %v16546_v19 = vld [vmem:[#allocation103_spill] sm:$0xff] }
 0x5c3   : > { %v14165_v31 = vmul.f32 %v16526_v27, %v16546_v19 }
 0x5c4   : > { %6059 = vadd.xlane.f32.xlu1 %v5988_v24  ;;  %v7506_v21 = vpop.trf.xlu1 }
 0x5c5   : > { %10380 = vmatprep.mubr.msk.f32.mxu0 %vm16545_vm11, %v7506_v21  ;;  %16547 = vst [vmem:[#allocation14_spill] sm:$0xff] %v14165_v31  ;;  %v5992_v21 = vmul.f32 %v16485_v4, %v14159_v15  ;;  %v5987_v36 = vmul.f32 %v14165_v31, %v16546_v19  ;;  %v5994_v4 = vmul.f32 %v16487_v18, %v14172_v50  ;;  %vm16564_vm11 = vmmov %vm16465_vm2 }
 0x5c6   : > { %6049 = vadd.xlane.f32.xlu0 %v5983_v39  ;;  %v5989_v19 = vmul.f32 %v14180_v55, %v16550_v26 }
 0x5c8   : > { %6063 = vadd.xlane.f32.xlu1 %v5990_v54  ;;  %v7507_v24 = vpop.trf.xlu1 }
 0x5c9   : > { %10381 = vmatmul.mubr.msk.f32.gmra.mrb[132].mxu0 %vm16548_vm5, %v7507_v24  ;;  %v14187_v24 = vmul.f32 %v16526_v27, %v16488_v14  ;;  %vm16565_vm5 = vmmov %vm16465_vm2 }
 0x5ca   : > { %6053 = vadd.xlane.f32.xlu0 %v5985_v60 }
 0x5cb   : > { %v14174_v39 = vpop.xlane.xlu0 %4883  ;;  %v5996_v18 = vmul.f32 %v16488_v14, %v14187_v24 }
 0x5cc   : > { %16549 = vst [vmem:[#allocation85_spill] sm:$0xff] %v14174_v39  ;;  %6067 = vadd.xlane.f32.xlu1 %v5992_v21  ;;  %v7508_v54 = vpop.trf.xlu1  ;;  %v16553_v39 = vld [vmem:[#allocation116_spill] sm:$0xff] }
 0x5cd   : > { %10383 = vmatprep.mubr.msk.f32.mxu0 %vm16552_vm6, %v7508_v54  ;;  %v14195_v31 = vmul.f32 %v16526_v27, %v16553_v39  ;;  %v14202_v54 = vmul.f32 %v16526_v27, %v16490_v0  ;;  %vm16566_vm6 = vmmov %vm16465_vm2 }
 0x5ce   : > { %6057 = vadd.xlane.f32.xlu0 %v5987_v36 }
 0x5cf   : > { %v14189_v60 = vpop.xlane.xlu0 %5713  ;;  %v5991_v36 = vmul.f32 %v14195_v31, %v16553_v39  ;;  %v5998_v14 = vmul.f32 %v16490_v0, %v14202_v54 }
 0x5d0   : > { %6071 = vadd.xlane.f32.xlu1 %v5994_v4  ;;  %v7509_v21 = vpop.trf.xlu1  ;;  %v16556_v4 = vld [vmem:[#allocation119_spill] sm:$0xff] }
 0x5d1   : > { %10384 = vmatmul.mubr.msk.f32.gmra.mrb[134].mxu0 %vm16554_vm9, %v7509_v21  ;;  %v14212_v55 = vmul.f32 %v16526_v27, %v16556_v4  ;;  %vm16568_vm9 = vmmov %vm16465_vm2 }
 0x5d2   : > { %10386 = vmatprep.mubr.msk.f32.mxu0 %vm16555_vm14, %v14030_v25  ;;  %6061 = vadd.xlane.f32.xlu0 %v5989_v19  ;;  %v14222_v25 = vmul.f32 %v16526_v27, %v16492_v62  ;;  %vm16569_vm14 = vmmov %vm16465_vm2 }
 0x5d3   : > { %v14206_v26 = vpop.xlane.xlu0 %5719  ;;  %v5993_v19 = vmul.f32 %v14212_v55, %v16556_v4 }
 0x5d4   : > { %6075 = vadd.xlane.f32.xlu1 %v5996_v18  ;;  %v14214_v21 = vpop.trf.xlu1  ;;  %v14232_v18 = vmul.f32 %v16526_v27, %v13346_v45  ;;  %v6000_v0 = vmul.f32 %v16492_v62, %v14222_v25 }
 0x5d5   : > { %10387 = vmatmul.mubr.msk.f32.gmra.mrb[136].mxu0 %vm16557_vm4, %v14035_v13  ;;  %vm16570_vm4 = vmmov %vm16465_vm2 }
 0x5d6   : > { %10389 = vmatprep.mubr.msk.f32.mxu0 %vm16558_vm15, %v14041_v46  ;;  %6065 = vadd.xlane.f32.xlu0 %v5991_v36  ;;  %v14242_v46 = vmul.f32 %v16526_v27, %v16493_v16  ;;  %v5995_v4 = vmul.f32 %v14232_v18, %v13346_v45  ;;  %vm16572_vm15 = vmmov %vm16465_vm2 }
 0x5d7   : > { %v14226_v39 = vpop.xlane.xlu0 %5723 }
 0x5d8   : > { %6079 = vadd.xlane.f32.xlu1 %v5998_v14  ;;  %v14234_v13 = vpop.trf.xlu1  ;;  %v14252_v14 = vmul.f32 %v16526_v27, %v13356_v44  ;;  %v6002_v62 = vmul.f32 %v16493_v16, %v14242_v46 }
 0x5d9   : > { %10390 = vmatmul.mubr.msk.f32.gmra.mrb[138].mxu0 %vm16465_vm2, %v14046_v42 }
 0x5da   : > { %10392 = vmatprep.mubr.msk.f32.mxu0 %vm16559_vm3, %v14052_v12  ;;  %6069 = vadd.xlane.f32.xlu0 %v5993_v19  ;;  %v14262_v12 = vmul.f32 %v16526_v27, %v16495_v29  ;;  %v5997_v19 = vmul.f32 %v14252_v14, %v13356_v44  ;;  %vm16574_vm3 = vmmov %vm16465_vm2 }
 0x5db   : > { %v14246_v36 = vpop.xlane.xlu0 %5727 }
 0x5dc   : > { %6083 = vadd.xlane.f32.xlu1 %v6000_v0  ;;  %v14254_v42 = vpop.trf.xlu1  ;;  %v14272_v0 = vmul.f32 %v16526_v27, %v16399_v35  ;;  %v6004_v16 = vmul.f32 %v16495_v29, %v14262_v12 }
 0x5dd   : > { %10393 = vmatmul.mubr.msk.f32.gmra.mrb[140].mxu0 %vm16560_vm7, %v14057_v30  ;;  %vm16575_vm7 = vmmov %vm16465_vm2 }
 0x5de   : > { %10395 = vmatprep.mubr.msk.f32.mxu0 %vm16561_vm8, %v14063_v49  ;;  %6073 = vadd.xlane.f32.xlu0 %v5995_v4  ;;  %v14282_v49 = vmul.f32 %v16526_v27, %v16497_v2  ;;  %v5999_v4 = vmul.f32 %v14272_v0, %v16399_v35  ;;  %vm16578_vm8 = vmmov %vm16465_vm2 }
 0x5df   : > { %v14266_v45 = vpop.xlane.xlu0 %5731 }
 0x5e0   : > { %6087 = vadd.xlane.f32.xlu1 %v6002_v62  ;;  %v14274_v30 = vpop.trf.xlu1  ;;  %v14292_v62 = vmul.f32 %v16526_v27, %v16400_v9  ;;  %v6006_v29 = vmul.f32 %v16497_v2, %v14282_v49 }
 0x5e1   : > { %10396 = vmatmul.mubr.msk.f32.gmra.mrb[142].mxu0 %vm16562_vm12, %v14068_v41  ;;  %vm16579_vm12 = vmmov %vm16465_vm2 }
 0x5e2   : > { %10398 = vmatprep.mubr.msk.f32.mxu0 %vm16563_vm13, %v14074_v6  ;;  %6077 = vadd.xlane.f32.xlu0 %v5997_v19  ;;  %v14300_v6 = vmul.f32 %v16526_v27, %v16498_v32  ;;  %v6001_v19 = vmul.f32 %v14292_v62, %v16400_v9  ;;  %vm16581_vm13 = vmmov %vm16465_vm2 }
 0x5e3   : > { %v14286_v44 = vpop.xlane.xlu0 %5735 }
 0x5e4   : > { %6091 = vadd.xlane.f32.xlu1 %v6004_v16  ;;  %v7562_v41 = vpop.trf.xlu1  ;;  %v14310_v16 = vmul.f32 %v16526_v27, %v13400_v52  ;;  %v6008_v2 = vmul.f32 %v16498_v32, %v14300_v6 }
 0x5e5   : > { %10399 = vmatmul.mubr.msk.f32.gmra.mrb[144].mxu0 %vm16564_vm11, %v14078_v1  ;;  %vm16583_vm11 = vmmov %vm16465_vm2 }
 0x5e6   : > { %6081 = vadd.xlane.f32.xlu0 %v5999_v4  ;;  %10401 = vmatprep.mubr.msk.f32.mxu0 %vm16565_vm5, %v14084_v20  ;;  %v14318_v20 = vmul.f32 %v16526_v27, %v16500_v17  ;;  %v6003_v4 = vmul.f32 %v14310_v16, %v13400_v52  ;;  %vm16587_vm5 = vmmov %vm16465_vm2 }
 0x5e7   : > { %v14304_v35 = vpop.xlane.xlu0 %5739 }
 0x5e8   : > { %6095 = vadd.xlane.f32.xlu1 %v6006_v29  ;;  %v7563_v1 = vpop.trf.xlu1  ;;  %16567 = vst [vmem:[#allocation96_spill] sm:$0xff] %v14318_v20  ;;  %v14328_v29 = vmul.f32 %v16526_v27, %v16405_v59  ;;  %v6010_v32 = vmul.f32 %v16500_v17, %v14318_v20  ;;  %v14358_v20 = vmul.f32 %v16526_v27, %v16503_v10 }
 0x5e9   : > { %10402 = vmatmul.mubr.msk.f32.gmra.mrb[146].mxu0 %vm16566_vm6, %v14088_v3  ;;  %vm16589_vm6 = vmmov %vm16465_vm2 }
 0x5ea   : > { %6085 = vadd.xlane.f32.xlu0 %v6001_v19  ;;  %10404 = vmatprep.mubr.msk.f32.mxu0 %vm16568_vm9, %v14098_v22  ;;  %v14336_v22 = vmul.f32 %v16526_v27, %v16502_v51  ;;  %v6005_v19 = vmul.f32 %v14328_v29, %v16405_v59  ;;  %vm16591_vm9 = vmmov %vm16465_vm2 }
 0x5eb   : > { %v14322_v9 = vpop.xlane.xlu0 %5743 }
 0x5ec   : > { %6099 = vadd.xlane.f32.xlu1 %v6008_v2  ;;  %v7564_v3 = vpop.trf.xlu1  ;;  %v14346_v2 = vmul.f32 %v16526_v27, %v13420_v37 }
 0x5ed   : > { %10405 = vmatmul.mubr.msk.f32.gmra.mrb[148].mxu0 %vm16569_vm14, %v14109_v28  ;;  %vm16593_vm14 = vmmov %vm16465_vm2 }
 0x5ee   : > { %6089 = vadd.xlane.f32.xlu0 %v6003_v4  ;;  %10407 = vmatprep.mubr.msk.f32.mxu0 %vm16570_vm4, %v14131_v8  ;;  %v6012_v8 = vmul.f32 %v16502_v51, %v14336_v22  ;;  %v6014_v51 = vmul.f32 %v16503_v10, %v14358_v20  ;;  %vm16597_vm4 = vmmov %vm16465_vm2 }
 0x5ef   : > { %v14340_v52 = vpop.xlane.xlu0 %5747 }
 0x5f0   : > { %6103 = vadd.xlane.f32.xlu1 %v6010_v32  ;;  %v7565_v28 = vpop.trf.xlu1  ;;  %v14348_v17 = vpop.f32.mrb[104].mxu0  ;;  %v6007_v32 = vmul.f32 %v14346_v2, %v13420_v37 }
 0x5f1   : > { %16571 = vst [vmem:[#allocation102_spill] sm:$0xff] %v14348_v17  ;;  %10408 = vmatmul.mubr.msk.f32.gmra.mrb[150].mxu0 %vm16572_vm15, %v14152_v63  ;;  %v14352_v4 = vpop.f32.mrb[105].mxu0  ;;  %v14368_v63 = vmul.f32 %v16526_v27, %v13433_v40  ;;  %vm16599_vm15 = vmmov %vm16465_vm2 }
 0x5f2   : > { %16573 = vst [vmem:[#allocation109_spill] sm:$0xff] %v14352_v4  ;;  %6093 = vadd.xlane.f32.xlu0 %v6005_v19  ;;  %10410 = vmatprep.mubr.msk.f32.mxu0 %vm16465_vm2, %v14214_v21  ;;  %v14376_v21 = vmul.f32 %v16526_v27, %v16505_v11 }
 0x5f3   : > { %v14362_v59 = vpop.xlane.xlu0 %5751  ;;  %v6009_v19 = vmul.f32 %v14368_v63, %v13433_v40 }
 0x5f4   : > { %6107 = vadd.xlane.f32.xlu1 %v6012_v8  ;;  %v7566_v17 = vpop.trf.xlu1  ;;  %v14386_v8 = vmul.f32 %v16526_v27, %v16410_v43 }
 0x5f5   : > { %10411 = vmatmul.mubr.msk.f32.gmra.mrb[152].mxu0 %vm16574_vm3, %v14234_v13  ;;  %vm16602_vm3 = vmmov %vm16465_vm2 }
 0x5f6   : > { %6097 = vadd.xlane.f32.xlu0 %v6007_v32  ;;  %10413 = vmatprep.mubr.msk.f32.mxu0 %vm16575_vm7, %v14254_v42  ;;  %v6016_v42 = vmul.f32 %v16505_v11, %v14376_v21  ;;  %v14398_v32 = vmul.f32 %v16526_v27, %v16507_v5  ;;  %vm16606_vm7 = vmmov %vm16465_vm2 }
 0x5f7   : > { %v14380_v37 = vpop.xlane.xlu0 %5755 }
 0x5f8   : > { %6111 = vadd.xlane.f32.xlu1 %v6014_v51  ;;  %v7567_v13 = vpop.trf.xlu1  ;;  %v14388_v10 = vpop.f32.mrb[106].mxu0  ;;  %v6011_v51 = vmul.f32 %v14386_v8, %v16410_v43  ;;  %v6018_v11 = vmul.f32 %v16507_v5, %v14398_v32 }
 0x5f9   : > { %16576 = vst [vmem:[#allocation115_spill] sm:$0xff] %v14388_v10  ;;  %v14390_v4 = vpop.f32.mrb[107].mxu0  ;;  %10414 = vmatmul.mubr.msk.f32.gmra.mrb[154].mxu0 %vm16578_vm8, %v14274_v30  ;;  %v14407_v10 = vmul.f32 %v16526_v27, %v16411_v57 }
 0x5fa   : > { %16577 = vst [vmem:[#allocation9_spill] sm:$0xff] %v14390_v4  ;;  %6101 = vadd.xlane.f32.xlu0 %v6009_v19  ;;  %10416 = vmatprep.mubr.msk.f32.mxu0 %vm16579_vm12, %v7562_v41  ;;  %v14414_v19 = vmul.f32 %v16526_v27, %v16508_v7 }
 0x5fb   : > { %v14401_v40 = vpop.xlane.xlu0 %5759  ;;  %16580 = vst [vmem:[#allocation11_spill] sm:$0xff] %v14407_v10  ;;  %v6013_v43 = vmul.f32 %v14407_v10, %v16411_v57  ;;  %v16654_v10 = vld [vmem:[#allocation121_spill] sm:$0xff] }
 0x5fc   : > { %6115 = vadd.xlane.f32.xlu1 %v6016_v42  ;;  %v7568_v30 = vpop.trf.xlu1  ;;  %16582 = vst [vmem:[#allocation22_spill] sm:$0xff] %v14414_v19  ;;  %v14423_v42 = vmul.f32 %v16526_v27, %v13465_v33 }
 0x5fd   : > { %10417 = vmatmul.mubr.msk.f32.gmra.mrb[156].mxu0 %vm16581_vm13, %v7563_v1 }
 0x5fe   : > { %6105 = vadd.xlane.f32.xlu0 %v6011_v51  ;;  %10419 = vmatprep.mubr.msk.f32.mxu0 %vm16583_vm11, %v7564_v3  ;;  %16584 = vst [vmem:[#allocation40_spill] sm:$0xff] %v14423_v42  ;;  %v6020_v3 = vmul.f32 %v16508_v7, %v14414_v19  ;;  %v14434_v51 = vmul.f32 %v16526_v27, %v16510_v38  ;;  %v16649_v19 = vld [vmem:[#allocation120_spill] sm:$0xff] }
 0x5ff   : > { %v14417_v41 = vpop.xlane.xlu0 %5763 }
 0x600   : > { %6119 = vadd.xlane.f32.xlu1 %v6018_v11  ;;  %v7569_v1 = vpop.trf.xlu1  ;;  %v14425_v4 = vpop.f32.mrb[108].mxu0  ;;  %16588 = vst [vmem:[#allocation46_spill] sm:$0xff] %v14434_v51  ;;  %v6015_v11 = vmul.f32 %v14423_v42, %v13465_v33  ;;  %v6022_v7 = vmul.f32 %v16510_v38, %v14434_v51 }
 0x601   : > { %16585 = vst [vmem:[#allocation42_spill] sm:$0xff] %v14425_v4  ;;  %v14427_v5 = vpop.f32.mrb[109].mxu0  ;;  %10420 = vmatmul.mubr.msk.f32.gmra.mrb[158].mxu0 %vm16587_vm5, %v7565_v28  ;;  %vm9159_vm5 = vcmask 1040384  }
 0x602   : > { %16586 = vst [vmem:[#allocation44_spill] sm:$0xff] %v14427_v5  ;;  %6109 = vadd.xlane.f32.xlu0 %v6013_v43  ;;  %10422 = vmatprep.mubr.msk.f32.mxu0 %vm16589_vm6, %v7566_v17  ;;  %v14443_v5 = vmul.f32 %v16526_v27, %v13476_v56  ;;  %v14450_v43 = vmul.f32 %v16526_v27, %v16512_v47 }
 0x603   : > { %v14437_v57 = vpop.xlane.xlu0 %5767 }
 0x604   : > { %16590 = vst [vmem:[#allocation48_spill] sm:$0xff] %v14443_v5  ;;  %6123 = vadd.xlane.f32.xlu1 %v6020_v3  ;;  %v7570_v28 = vpop.trf.xlu1  ;;  %16592 = vst [vmem:[#allocation50_spill] sm:$0xff] %v14450_v43  ;;  %v6017_v33 = vmul.f32 %v14443_v5, %v13476_v56  ;;  %v14459_v3 = vmul.f32 %v16526_v27, %v13489_v23  ;;  %v16625_v5 = vld [vmem:[#allocation128_spill] sm:$0xff] }
 0x605   : > { %10423 = vmatmul.mubr.msk.f32.gmra.mrb[160].mxu0 %vm16591_vm9, %v7567_v13  ;;  %vm16875_vm9 = vcmask 1043459  }
 0x606   : > { %6113 = vadd.xlane.f32.xlu0 %v6015_v11  ;;  %10425 = vmatprep.mubr.msk.f32.mxu0 %vm16593_vm14, %v7568_v30  ;;  %16594 = vst [vmem:[#allocation39_spill] sm:$0xff] %v14459_v3  ;;  %v6024_v30 = vmul.f32 %v16512_v47, %v14450_v43  ;;  %v14470_v11 = vmul.f32 %v16526_v27, %v16514_v61  ;;  %vm16877_vm14 = vmmov %vm16875_vm9 }
 0x607   : > { %v14453_v17 = vpop.xlane.xlu0 %5771 }
 0x608   : > { %6127 = vadd.xlane.f32.xlu1 %v6022_v7  ;;  %v7571_v13 = vpop.trf.xlu1  ;;  %v14461_v4 = vpop.f32.mrb[110].mxu0  ;;  %16598 = vst [vmem:[#allocation58_spill] sm:$0xff] %v14470_v11  ;;  %v6019_v7 = vmul.f32 %v14459_v3, %v13489_v23  ;;  %v6026_v47 = vmul.f32 %v16514_v61, %v14470_v11  ;;  %v16613_v3 = vld [vmem:[#allocation52_spill] sm:$0xff] }
 0x609   : > { %16595 = vst [vmem:[#allocation41_spill] sm:$0xff] %v14461_v4  ;;  %v14463_v38 = vpop.f32.mrb[111].mxu0  ;;  %10426 = vmatmul.mubr.msk.f32.gmra.mrb[162].mxu0 %vm16597_vm4, %v7569_v1  ;;  %vm16880_vm4 = vcmask 1044484  }
 0x60a   : > { %16596 = vst [vmem:[#allocation54_spill] sm:$0xff] %v14463_v38  ;;  %6117 = vadd.xlane.f32.xlu0 %v6017_v33  ;;  %10428 = vmatprep.mubr.msk.f32.mxu0 %vm16599_vm15, %v7570_v28  ;;  %v14479_v38 = vmul.f32 %v16526_v27, %v13501_v34  ;;  %v14486_v33 = vmul.f32 %v16526_v27, %v16516_v48  ;;  %vm16882_vm15 = vmmov %vm16875_vm9 }
 0x60b   : > { %v14473_v56 = vpop.xlane.xlu0 %5775 }
 0x60c   : > { %16600 = vst [vmem:[#allocation43_spill] sm:$0xff] %v14479_v38  ;;  %6131 = vadd.xlane.f32.xlu1 %v6024_v30  ;;  %v7572_v1 = vpop.trf.xlu1  ;;  %16601 = vst [vmem:[#allocation45_spill] sm:$0xff] %v14486_v33  ;;  %v6021_v23 = vmul.f32 %v14479_v38, %v13501_v34  ;;  %v14495_v30 = vmul.f32 %v16526_v27, %v13511_v53  ;;  %v16609_v38 = vld [vmem:[#allocation125_spill] sm:$0xff] }
 0x60d   : > { %10429 = vmatmul.mubr.msk.f32.gmra.mrb[164].mxu0 %vm16465_vm2, %v7571_v13  ;;  %vm16884_vm2 = vmmov %vm16875_vm9 }
 0x60e   : > { %6121 = vadd.xlane.f32.xlu0 %v6019_v7  ;;  %10431 = vmatprep.mubr.msk.f32.mxu0 %vm16602_vm3, %v7572_v1  ;;  %16603 = vst [vmem:[#allocation47_spill] sm:$0xff] %v14495_v30  ;;  %v6028_v7 = vmul.f32 %v16516_v48, %v14486_v33  ;;  %v16607_v1 = vld [vmem:[#allocation126_spill] sm:$0xff] }
 0x60f   : > { %v14489_v28 = vpop.xlane.xlu0 %5779  ;;  %v14506_v11 = vmul.f32 %v16526_v27, %v16607_v1 }
 0x610   : > { %6135 = vadd.xlane.f32.xlu1 %v6026_v47  ;;  %v7573_v13 = vpop.trf.xlu1  ;;  %v14497_v4 = vpop.f32.mrb[112].mxu0  ;;  %v6023_v47 = vmul.f32 %v14495_v30, %v13511_v53  ;;  %v14528_v53 = vmul.f32 %v16526_v27, %v16613_v3 }
 0x611   : > { %16604 = vst [vmem:[#allocation49_spill] sm:$0xff] %v14497_v4  ;;  %v14499_v61 = vpop.f32.mrb[113].mxu0  ;;  %10432 = vmatmul.mubr.msk.f32.gmra.mrb[166].mxu0 %vm16606_vm7, %v7573_v13  ;;  %16608 = vst [vmem:[#allocation84_spill] sm:$0xff] %v14506_v11  ;;  %v14514_v4 = vmul.f32 %v16526_v27, %v16609_v38  ;;  %v6030_v13 = vmul.f32 %v16607_v1, %v14506_v11  ;;  %v16617_v11 = vld [vmem:[#allocation55_spill] sm:$0xff] }
 0x612   : > { %16605 = vst [vmem:[#allocation51_spill] sm:$0xff] %v14499_v61  ;;  %6125 = vadd.xlane.f32.xlu0 %v6021_v23  ;;  %v16611_v61 = vld [vmem:[#allocation53_spill] sm:$0xff]  ;;  %16614 = vst [vmem:[#allocation92_spill] sm:$0xff] %v14528_v53 }
 0x613   : > { %v14508_v34 = vpop.xlane.xlu0 %5783  ;;  %16610 = vst [vmem:[#allocation20_spill] sm:$0xff] %v14514_v4  ;;  %v14520_v48 = vmul.f32 %v16526_v27, %v16611_v61  ;;  %v6025_v23 = vmul.f32 %v14514_v4, %v16609_v38  ;;  %v6027_v38 = vmul.f32 %v14528_v53, %v16613_v3  ;;  %v16620_v4 = vld [vmem:[#allocation127_spill] sm:$0xff]  ;;  %v14560_v3 = vmul.f32 %v16526_v27, %v16625_v5 }
 0x614   : > { %6139 = vadd.xlane.f32.xlu1 %v6028_v7 }
 0x615   : > { %16612 = vst [vmem:[#allocation33_spill] sm:$0xff] %v14520_v48  ;;  %v6032_v1 = vmul.f32 %v16611_v61, %v14520_v48  ;;  %16626 = vst [vmem:[#allocation53_spill] sm:$0xff] %v14560_v3 }
 0x616   : > { %6129 = vadd.xlane.f32.xlu0 %v6023_v47  ;;  %v14538_v47 = vmul.f32 %v16526_v27, %v16617_v11 }
 0x617   : > { %v14522_v33 = vpop.xlane.xlu0 %5787 }
 0x618   : > { %6143 = vadd.xlane.f32.xlu1 %v6030_v13  ;;  %v14530_v30 = vpop.f32.mrb[114].mxu0  ;;  %16618 = vst [vmem:[#allocation110_spill] sm:$0xff] %v14538_v47  ;;  %v14546_v13 = vmul.f32 %v16526_v27, %v16620_v4 }
 0x619   : > { %16615 = vst [vmem:[#allocation97_spill] sm:$0xff] %v14530_v30  ;;  %v14532_v7 = vpop.f32.mrb[115].mxu0  ;;  %v16622_v30 = vld [vmem:[#allocation95_spill] sm:$0xff] }
 0x61a   : > { %16616 = vst [vmem:[#allocation103_spill] sm:$0xff] %v14532_v7  ;;  %6133 = vadd.xlane.f32.xlu0 %v6025_v23  ;;  %16621 = vst [vmem:[#allocation119_spill] sm:$0xff] %v14546_v13  ;;  %v6034_v7 = vmul.f32 %v16617_v11, %v14538_v47  ;;  %v14552_v61 = vmul.f32 %v16526_v27, %v16622_v30  ;;  %v6029_v23 = vmul.f32 %v14546_v13, %v16620_v4  ;;  %v16629_v47 = vld [vmem:[#allocation57_spill] sm:$0xff] }
 0x61b   : > { %v14540_v43 = vpop.xlane.xlu0 %5791  ;;  %v6031_v4 = vmul.f32 %v14560_v3, %v16625_v5  ;;  %v16632_v13 = vld [vmem:[#allocation93_spill] sm:$0xff] }
 0x61c   : > { %16619 = vst [vmem:[#allocation116_spill] sm:$0xff] %v14540_v43  ;;  %6147 = vadd.xlane.f32.xlu1 %v6032_v1  ;;  %16623 = vst [vmem:[#allocation126_spill] sm:$0xff] %v14552_v61  ;;  %v6036_v11 = vmul.f32 %v16622_v30, %v14552_v61 }
 0x61e   : > { %6137 = vadd.xlane.f32.xlu0 %v6027_v38  ;;  %v14570_v38 = vmul.f32 %v16526_v27, %v16629_v47 }
 0x61f   : > { %v14554_v48 = vpop.xlane.xlu0 %5795 }
 0x620   : > { %16624 = vst [vmem:[#allocation125_spill] sm:$0xff] %v14554_v48  ;;  %6151 = vadd.xlane.f32.xlu1 %v6034_v7  ;;  %v14562_v53 = vpop.f32.mrb[116].mxu0  ;;  %16630 = vst [vmem:[#allocation127_spill] sm:$0xff] %v14570_v38  ;;  %v14578_v7 = vmul.f32 %v16526_v27, %v16632_v13 }
 0x621   : > { %16627 = vst [vmem:[#allocation52_spill] sm:$0xff] %v14562_v53  ;;  %v14564_v1 = vpop.f32.mrb[117].mxu0  ;;  %v16634_v53 = vld [vmem:[#allocation73_spill] sm:$0xff] }
 0x622   : > { %16628 = vst [vmem:[#allocation55_spill] sm:$0xff] %v14564_v1  ;;  %6141 = vadd.xlane.f32.xlu0 %v6029_v23  ;;  %16633 = vst [vmem:[#allocation128_spill] sm:$0xff] %v14578_v7  ;;  %v6038_v1 = vmul.f32 %v16629_v47, %v14570_v38  ;;  %v14584_v30 = vmul.f32 %v16526_v27, %v16634_v53  ;;  %v6033_v23 = vmul.f32 %v14578_v7, %v16632_v13  ;;  %v16641_v38 = vld [vmem:[#allocation108_spill] sm:$0xff] }
 0x623   : > { %v14572_v51 = vpop.xlane.xlu0 %5799 }
 0x624   : > { %16631 = vst [vmem:[#allocation95_spill] sm:$0xff] %v14572_v51  ;;  %6155 = vadd.xlane.f32.xlu1 %v6036_v11  ;;  %16635 = vst [vmem:[#allocation57_spill] sm:$0xff] %v14584_v30  ;;  %v16637_v51 = vld [vmem:[#allocation56_spill] sm:$0xff]  ;;  %v6040_v47 = vmul.f32 %v16634_v53, %v14584_v30 }
 0x625   : > { %v14592_v5 = vmul.f32 %v16526_v27, %v16637_v51 }
 0x626   : > { %6145 = vadd.xlane.f32.xlu0 %v6031_v4  ;;  %v14602_v4 = vmul.f32 %v16526_v27, %v16641_v38 }
 0x627   : > { %v14586_v61 = vpop.xlane.xlu0 %5803  ;;  %16638 = vst [vmem:[#allocation73_spill] sm:$0xff] %v14592_v5  ;;  %v6035_v7 = vmul.f32 %v14592_v5, %v16637_v51  ;;  %v16651_v5 = vld [vmem:[#allocation59_spill] sm:$0xff] }
 0x628   : > { %16636 = vst [vmem:[#allocation93_spill] sm:$0xff] %v14586_v61  ;;  %6159 = vadd.xlane.f32.xlu1 %v6038_v1  ;;  %v14594_v3 = vpop.f32.mrb[118].mxu0  ;;  %16642 = vst [vmem:[#allocation108_spill] sm:$0xff] %v14602_v4  ;;  %v16643_v61 = vld [vmem:[#allocation63_spill] sm:$0xff]  ;;  %v16645_v1 = vld [vmem:[#allocation104_spill] sm:$0xff]  ;;  %v6042_v53 = vmul.f32 %v16641_v38, %v14602_v4 }
 0x629   : > { %16639 = vst [vmem:[#allocation56_spill] sm:$0xff] %v14594_v3  ;;  %v14596_v11 = vpop.f32.mrb[119].mxu0  ;;  %v5842_v42 = vmul.f32 0.2, %v16643_v61  ;;  %v14611_v3 = vmul.f32 %v16526_v27, %v16645_v1  ;;  %v16653_v4 = vld [vmem:[#allocation30_spill] sm:$0xff] }
 0x62a   : > { %16640 = vst [vmem:[#allocation129_spill] sm:$0xff] %v14596_v11  ;;  %6149 = vadd.xlane.f32.xlu0 %v6033_v23  ;;  %v16647_v11 = vld [vmem:[#allocation60_spill] sm:$0xff]  ;;  %v5844_v23 = vmul.f32 0.2, %v14206_v26  ;;  %v5846_v26 = vmul.f32 0.2, %v14226_v39 }
 0x62b   : > { %v14605_v13 = vpop.xlane.xlu0 %5807  ;;  %16646 = vst [vmem:[#allocation104_spill] sm:$0xff] %v14611_v3  ;;  %v14617_v30 = vmul.f32 %v16526_v27, %v16647_v11  ;;  %v6245_v61 = vsub.f32 %v16649_v19, %v5842_v42  ;;  %v6037_v51 = vmul.f32 %v14611_v3, %v16645_v1  ;;  %v16656_v1 = vld [vmem:[#allocation76_spill] sm:$0xff] }
 0x62c   : > { %16644 = vst [vmem:[#allocation63_spill] sm:$0xff] %v14605_v13  ;;  %6163 = vadd.xlane.f32.xlu1 %v6040_v47  ;;  %v14627_v47 = vmul.f32 %v16526_v27, %v16651_v5  ;;  %v6247_v19 = vsub.f32 %v16654_v10, %v5844_v23  ;;  %v14640_v3 = vmul.f32 %v16526_v27, %v16656_v1  ;;  %v5848_v10 = vmul.f32 0.2, %v14246_v36 }
 0x62d   : > { %16648 = vst [vmem:[#allocation60_spill] sm:$0xff] %v14617_v30  ;;  %v6044_v38 = vmul.f32 %v16647_v11, %v14617_v30  ;;  %v6309_v48 = vmul.f32 %v16653_v4, %v6245_v61  ;;  %v16658_v30 = vld [vmem:[#allocation122_spill] sm:$0xff] }
 0x62e   : > { %6153 = vadd.xlane.f32.xlu0 %v6035_v7  ;;  %16652 = vst [vmem:[#allocation59_spill] sm:$0xff] %v14627_v47  ;;  %v6039_v7 = vmul.f32 %v14627_v47, %v16651_v5  ;;  %16657 = vst [vmem:[#allocation121_spill] sm:$0xff] %v14640_v3  ;;  %v6311_v11 = vmul.f32 %v16653_v4, %v6247_v19  ;;  %v6041_v5 = vmul.f32 %v14640_v3, %v16656_v1  ;;  %v16664_v3 = vld [vmem:[#allocation65_spill] sm:$0xff] }
 0x62f   : > { %v14621_v13 = vpop.xlane.xlu0 %5811  ;;  %v6373_v39 = vmul.f32 %v6309_v48, %v6245_v61  ;;  %v6251_v36 = vsub.f32 %v14128_v58, %v5848_v10  ;;  %v5850_v48 = vmul.f32 0.2, %v14266_v45  ;;  %v5852_v45 = vmul.f32 0.2, %v14286_v44 }
 0x630   : > { %16650 = vst [vmem:[#allocation120_spill] sm:$0xff] %v14621_v13  ;;  %6167 = vadd.xlane.f32.xlu1 %v6042_v53  ;;  %v5841_v53 = vmul.f32 0.2, %v14189_v60  ;;  %v6249_v13 = vsub.f32 %v16658_v30, %v5846_v26  ;;  %v6375_v61 = vmul.f32 %v6311_v11, %v6247_v19  ;;  %v5854_v44 = vmul.f32 0.2, %v14304_v35 }
 0x632   : > { %6157 = vadd.xlane.f32.xlu0 %v6037_v51  ;;  %v16659_v51 = vld [vmem:[#allocation117_spill] sm:$0xff]  ;;  %v6313_v30 = vmul.f32 %v16653_v4, %v6249_v13 }
 0x633   : > { %v14634_v42 = vpop.xlane.xlu0 %5815  ;;  %v14652_v47 = vmul.f32 %v16526_v27, %v16659_v51  ;;  %v16663_v27 = vld [vmem:[#allocation123_spill] sm:$0xff] }
 0x634   : > { %16655 = vst [vmem:[#allocation30_spill] sm:$0xff] %v14634_v42  ;;  %6171 = vadd.xlane.f32.xlu1 %v6044_v38  ;;  %v16661_v42 = vld [vmem:[#allocation79_spill] sm:$0xff]  ;;  %v16662_v38 = vld [vmem:[#allocation66_spill] sm:$0xff]  ;;  %v6377_v19 = vmul.f32 %v6313_v30, %v6249_v13  ;;  %v16669_v30 = vld [vmem:[#allocation68_spill] sm:$0xff] }
 0x635   : > { %16660 = vst [vmem:[#allocation76_spill] sm:$0xff] %v14652_v47  ;;  %v5843_v60 = vmul.f32 0.2, %v16661_v42  ;;  %v6244_v43 = vsub.f32 %v16662_v38, %v5841_v53  ;;  %v5845_v42 = vmul.f32 0.2, %v16664_v3  ;;  %v16665_v38 = vld [vmem:[#allocation124_spill] sm:$0xff] }
 0x636   : > { %6161 = vadd.xlane.f32.xlu0 %v6039_v7  ;;  %v6043_v7 = vmul.f32 %v14652_v47, %v16659_v51  ;;  %v6253_v58 = vsub.f32 %v16665_v38, %v5850_v48  ;;  %v6255_v48 = vsub.f32 %v14159_v15, %v5852_v45  ;;  %v5856_v15 = vmul.f32 0.2, %v14322_v9 }
 0x637   : > { %v14646_v23 = vpop.xlane.xlu0 %5819  ;;  %v6246_v1 = vsub.f32 %v16663_v27, %v5843_v60  ;;  %v6308_v53 = vmul.f32 %v16653_v4, %v6244_v43  ;;  %v16667_v60 = vld [vmem:[#allocation82_spill] sm:$0xff] }
 0x638   : > { %6438 = vadd.xlane.f32.xlu1 %v6373_v39  ;;  %v6315_v39 = vmul.f32 %v16653_v4, %v6251_v36  ;;  %v5847_v27 = vmul.f32 0.2, %v16667_v60 }
 0x639   : > { %v6310_v10 = vmul.f32 %v16653_v4, %v6246_v1  ;;  %v6372_v3 = vmul.f32 %v6308_v53, %v6244_v43 }
 0x63a   : > { %6165 = vadd.xlane.f32.xlu0 %v6041_v5  ;;  %v16666_v5 = vld [vmem:[#allocation7_spill] sm:$0xff]  ;;  %v6379_v13 = vmul.f32 %v6315_v39, %v6251_v36  ;;  %v16672_v36 = vld [vmem:[#allocation90_spill] sm:$0xff] }
 0x63b   : > { %v14659_v26 = vpop.xlane.xlu0 %5823  ;;  %v6248_v51 = vsub.f32 %v16666_v5, %v5845_v42  ;;  %v16671_v5 = vld [vmem:[#allocation14_spill] sm:$0xff]  ;;  %v6374_v43 = vmul.f32 %v6310_v10, %v6246_v1  ;;  %v5858_v1 = vmul.f32 0.2, %v14340_v52 }
 0x63c   : > { %6442 = vadd.xlane.f32.xlu1 %v6375_v61  ;;  %v6317_v61 = vmul.f32 %v16653_v4, %v6253_v58  ;;  %v6250_v60 = vsub.f32 %v16671_v5, %v5847_v27 }
 0x63d   : > { %v6312_v42 = vmul.f32 %v16653_v4, %v6248_v51 }
 0x63e   : > { %6169 = vadd.xlane.f32.xlu0 %v6043_v7  ;;  %v5849_v7 = vmul.f32 0.2, %v16669_v30  ;;  %v6381_v35 = vmul.f32 %v6317_v61, %v6253_v58  ;;  %v16673_v30 = vld [vmem:[#allocation71_spill] sm:$0xff] }
 0x63f   : > { %v14669_v11 = vpop.xlane.xlu0 %5827  ;;  %v6376_v27 = vmul.f32 %v6312_v42, %v6248_v51  ;;  %v6261_v51 = vsub.f32 %v14202_v54, %v5858_v1 }
 0x640   : > { %6446 = vadd.xlane.f32.xlu1 %v6377_v19  ;;  %v6319_v19 = vmul.f32 %v16653_v4, %v6255_v48  ;;  %v6252_v39 = vsub.f32 %v16672_v36, %v5849_v7  ;;  %v16674_v7 = vld [vmem:[#allocation72_spill] sm:$0xff] }
 0x641   : > { %v14674_v47 = vpop.xlane.xlu1 %5972  ;;  %v5853_v5 = vmul.f32 0.2, %v16674_v7 }
 0x642   : > { %16668 = vst [vmem:[#allocation122_spill] sm:$0xff] %v14674_v47  ;;  %6436 = vadd.xlane.f32.xlu0 %v6372_v3  ;;  %v6257_v47 = vsub.f32 %v14172_v50, %v5854_v44  ;;  %v6314_v3 = vmul.f32 %v16653_v4, %v6250_v60  ;;  %v6259_v50 = vsub.f32 %v14187_v24, %v5856_v15 }
 0x643   : > { %v14680_v38 = vpop.xlane.xlu0 %5831  ;;  %v6383_v9 = vmul.f32 %v6319_v19, %v6255_v48  ;;  %v6316_v58 = vmul.f32 %v16653_v4, %v6252_v39  ;;  %v6256_v36 = vsub.f32 %v14212_v55, %v5853_v5 }
 0x644   : > { %16670 = vst [vmem:[#allocation117_spill] sm:$0xff] %v14680_v38  ;;  %6450 = vadd.xlane.f32.xlu1 %v6379_v13  ;;  %v5851_v38 = vmul.f32 0.2, %v16673_v30  ;;  %v6321_v13 = vmul.f32 %v16653_v4, %v6257_v47  ;;  %v6323_v42 = vmul.f32 %v16653_v4, %v6259_v50 }
 0x645   : > { %v6048_v53 = vpop.xlane.xlu1 %6047  ;;  %v6380_v19 = vmul.f32 %v6316_v58, %v6252_v39 }
 0x646   : > { %6440 = vadd.xlane.f32.xlu0 %v6374_v43  ;;  %v6254_v44 = vsub.f32 %v14195_v31, %v5851_v38  ;;  %v6378_v43 = vmul.f32 %v6314_v3, %v6250_v60  ;;  %v6385_v24 = vmul.f32 %v6321_v13, %v6257_v47  ;;  %v16675_v31 = vld [vmem:[#allocation77_spill] sm:$0xff]  ;;  %v6325_v60 = vmul.f32 %v16653_v4, %v6261_v51  ;;  %v16676_v47 = vld [vmem:[#allocation91_spill] sm:$0xff] }
 0x647   : > { %v14688_v45 = vpop.xlane.xlu0 %5835  ;;  %v5855_v38 = vmul.f32 0.2, %v16675_v31  ;;  %v5857_v1 = vmul.f32 0.2, %v16676_v47  ;;  %v6320_v13 = vmul.f32 %v16653_v4, %v6256_v36 }
 0x648   : > { %6454 = vadd.xlane.f32.xlu1 %v6381_v35  ;;  %v5860_v35 = vmul.f32 0.2, %v14362_v59  ;;  %v6318_v15 = vmul.f32 %v16653_v4, %v6254_v44  ;;  %v6387_v59 = vmul.f32 %v6323_v42, %v6259_v50  ;;  %v6389_v7 = vmul.f32 %v6325_v60, %v6261_v51 }
 0x649   : > { %v6052_v10 = vpop.xlane.xlu1 %6051  ;;  %v6258_v55 = vsub.f32 %v14232_v18, %v5855_v38  ;;  %v5866_v51 = vmul.f32 0.2, %v14417_v41 }
 0x64a   : > { %6444 = vadd.xlane.f32.xlu0 %v6376_v27  ;;  %v6263_v3 = vsub.f32 %v14222_v25, %v5860_v35  ;;  %v5862_v27 = vmul.f32 0.2, %v14380_v37  ;;  %v5864_v37 = vmul.f32 0.2, %v14401_v40 }
 0x64b   : > { %v14696_v61 = vpop.xlane.xlu0 %5839  ;;  %v6322_v35 = vmul.f32 %v16653_v4, %v6258_v55  ;;  %v6269_v41 = vsub.f32 %v14282_v49, %v5866_v51 }
 0x64c   : > { %6458 = vadd.xlane.f32.xlu1 %v6383_v9  ;;  %v6327_v5 = vmul.f32 %v16653_v4, %v6263_v3  ;;  %v6265_v25 = vsub.f32 %v14242_v46, %v5862_v27  ;;  %v6267_v46 = vsub.f32 %v14262_v12, %v5864_v37  ;;  %v5868_v12 = vmul.f32 0.2, %v14437_v57  ;;  %v16680_v37 = vld [vmem:[#allocation99_spill] sm:$0xff] }
 0x64d   : > { %v6056_v52 = vpop.xlane.xlu1 %6055  ;;  %v6333_v49 = vmul.f32 %v16653_v4, %v6269_v41  ;;  %v5870_v57 = vmul.f32 0.2, %v14453_v17  ;;  %v5872_v17 = vmul.f32 0.2, %v14473_v56 }
 0x64e   : > { %6448 = vadd.xlane.f32.xlu0 %v6378_v43  ;;  %v6260_v43 = vsub.f32 %v14252_v14, %v5857_v1  ;;  %v6331_v47 = vmul.f32 %v16653_v4, %v6267_v46 }
 0x64f   : > { %v6046_v48 = vpop.xlane.xlu0 %6045 }
 0x650   : > { %v6173_v30 = vadd.f32 %v6048_v53, %v6046_v48  ;;  %6462 = vadd.xlane.f32.xlu1 %v6385_v24  ;;  %v6382_v53 = vmul.f32 %v6318_v15, %v6254_v44  ;;  %v16677_v24 = vld [vmem:[#allocation78_spill] sm:$0xff]  ;;  %v6384_v44 = vmul.f32 %v6320_v13, %v6256_v36  ;;  %v6329_v15 = vmul.f32 %v16653_v4, %v6265_v25 }
 0x651   : > { %v6060_v54 = vpop.xlane.xlu1 %6059  ;;  %v5859_v18 = vmul.f32 0.2, %v16677_v24  ;;  %v6324_v14 = vmul.f32 %v16653_v4, %v6260_v43  ;;  %v6386_v36 = vmul.f32 %v6322_v35, %v6258_v55 }
 0x652   : > { %6452 = vadd.xlane.f32.xlu0 %v6380_v19 }
 0x653   : > { %v6050_v39 = vpop.xlane.xlu0 %6049  ;;  %v6262_v38 = vsub.f32 %v14272_v0, %v5859_v18 }
 0x654   : > { %v6174_v9 = vadd.f32 %v6173_v30, %v6050_v39  ;;  %6466 = vadd.xlane.f32.xlu1 %v6387_v59  ;;  %v16678_v30 = vld [vmem:[#allocation83_spill] sm:$0xff]  ;;  %v6388_v39 = vmul.f32 %v6324_v14, %v6260_v43 }
 0x655   : > { %v6064_v58 = vpop.xlane.xlu1 %6063  ;;  %v5861_v60 = vmul.f32 0.2, %v16678_v30  ;;  %v6326_v13 = vmul.f32 %v16653_v4, %v6262_v38 }
 0x656   : > { %6456 = vadd.xlane.f32.xlu0 %v6382_v53  ;;  %v6175_v50 = vadd.f32 %v6174_v9, %v6052_v10  ;;  %v6391_v10 = vmul.f32 %v6327_v5, %v6263_v3  ;;  %v6393_v3 = vmul.f32 %v6329_v15, %v6265_v25  ;;  %v16679_v9 = vld [vmem:[#allocation86_spill] sm:$0xff]  ;;  %v6271_v5 = vsub.f32 %v14300_v6, %v5868_v12  ;;  %v16681_v6 = vld [vmem:[#allocation96_spill] sm:$0xff] }
 0x657   : > { %v6054_v42 = vpop.xlane.xlu0 %6053  ;;  %v6264_v0 = vsub.f32 %v14292_v62, %v5861_v60  ;;  %v5863_v53 = vmul.f32 0.2, %v16679_v9  ;;  %v6395_v25 = vmul.f32 %v6331_v47, %v6267_v46  ;;  %v6390_v24 = vmul.f32 %v6326_v13, %v6262_v38  ;;  %v16683_v47 = vld [vmem:[#allocation105_spill] sm:$0xff] }
 0x658   : > { %v6176_v48 = vadd.f32 %v6175_v50, %v6054_v42  ;;  %6470 = vadd.xlane.f32.xlu1 %v6389_v7  ;;  %v5865_v50 = vmul.f32 0.2, %v16680_v37  ;;  %v6273_v51 = vsub.f32 %v16681_v6, %v5870_v57  ;;  %v5874_v38 = vmul.f32 0.2, %v14489_v28 }
 0x659   : > { %v6068_v19 = vpop.xlane.xlu1 %6067  ;;  %v6328_v42 = vmul.f32 %v16653_v4, %v6264_v0  ;;  %v6266_v62 = vsub.f32 %v14310_v16, %v5863_v53  ;;  %v5869_v12 = vmul.f32 0.2, %v16683_v47 }
 0x65a   : > { %6460 = vadd.xlane.f32.xlu0 %v6384_v44  ;;  %v6177_v40 = vadd.f32 %v6176_v48, %v6056_v52  ;;  %v6397_v48 = vmul.f32 %v6333_v49, %v6269_v41  ;;  %v6335_v44 = vmul.f32 %v16653_v4, %v6271_v5  ;;  %v6268_v15 = vsub.f32 %v14328_v29, %v5865_v50 }
 0x65b   : > { %v6058_v31 = vpop.xlane.xlu0 %6057  ;;  %v6337_v60 = vmul.f32 %v16653_v4, %v6273_v51  ;;  %v6277_v28 = vsub.f32 %v14358_v20, %v5874_v38  ;;  %v6272_v49 = vsub.f32 %v14368_v63, %v5869_v12  ;;  %v16692_v12 = vld [vmem:[#allocation40_spill] sm:$0xff] }
 0x65c   : > { %v6178_v27 = vadd.f32 %v6177_v40, %v6058_v31  ;;  %6474 = vadd.xlane.f32.xlu1 %v6391_v10  ;;  %v6330_v40 = vmul.f32 %v16653_v4, %v6266_v62  ;;  %v16682_v10 = vld [vmem:[#allocation94_spill] sm:$0xff]  ;;  %v6392_v31 = vmul.f32 %v6328_v42, %v6264_v0  ;;  %v6332_v29 = vmul.f32 %v16653_v4, %v6268_v15 }
 0x65d   : > { %v6072_v59 = vpop.xlane.xlu1 %6071  ;;  %v5867_v16 = vmul.f32 0.2, %v16682_v10  ;;  %v6401_v9 = vmul.f32 %v6337_v60, %v6273_v51  ;;  %v6341_v20 = vmul.f32 %v16653_v4, %v6277_v28  ;;  %v16690_v60 = vld [vmem:[#allocation125_spill] sm:$0xff] }
 0x65e   : > { %6464 = vadd.xlane.f32.xlu0 %v6386_v36  ;;  %v6179_v52 = vadd.f32 %v6178_v27, %v6060_v54  ;;  %v6275_v27 = vsub.f32 %v14336_v22, %v5872_v17  ;;  %v6396_v53 = vmul.f32 %v6332_v29, %v6268_v15  ;;  %v16687_v17 = vld [vmem:[#allocation116_spill] sm:$0xff] }
 0x65f   : > { %v6062_v1 = vpop.xlane.xlu0 %6061  ;;  %v6270_v41 = vsub.f32 %v14346_v2, %v5867_v16  ;;  %v6405_v51 = vmul.f32 %v6341_v20, %v6277_v28  ;;  %v16689_v16 = vld [vmem:[#allocation111_spill] sm:$0xff] }
 0x660   : > { %v6180_v7 = vadd.f32 %v6179_v52, %v6062_v1  ;;  %6478 = vadd.xlane.f32.xlu1 %v6393_v3  ;;  %v6394_v3 = vmul.f32 %v6330_v40, %v6266_v62  ;;  %v6339_v22 = vmul.f32 %v16653_v4, %v6275_v27 }
 0x661   : > { %v6076_v55 = vpop.xlane.xlu1 %6075 }
 0x662   : > { %6468 = vadd.xlane.f32.xlu0 %v6388_v39  ;;  %v6181_v54 = vadd.f32 %v6180_v7, %v6064_v58  ;;  %v6334_v7 = vmul.f32 %v16653_v4, %v6270_v41  ;;  %v6403_v50 = vmul.f32 %v6339_v22, %v6275_v27  ;;  %v5882_v27 = vmul.f32 0.2, %v16690_v60 }
 0x663   : > { %v6066_v43 = vpop.xlane.xlu0 %6065 }
 0x664   : > { %v6182_v35 = vadd.f32 %v6181_v54, %v6066_v43  ;;  %6482 = vadd.xlane.f32.xlu1 %v6395_v25  ;;  %v16685_v43 = vld [vmem:[#allocation107_spill] sm:$0xff] }
 0x665   : > { %v6080_v18 = vpop.xlane.xlu1 %6079  ;;  %v5873_v42 = vmul.f32 0.2, %v16685_v43  ;;  %v16698_v43 = vld [vmem:[#allocation112_spill] sm:$0xff] }
 0x666   : > { %6472 = vadd.xlane.f32.xlu0 %v6390_v24  ;;  %v6183_v58 = vadd.f32 %v6182_v35, %v6068_v19  ;;  %v6399_v19 = vmul.f32 %v6335_v44, %v6271_v5  ;;  %v16684_v5 = vld [vmem:[#allocation98_spill] sm:$0xff]  ;;  %v6336_v35 = vmul.f32 %v16653_v4, %v6272_v49 }
 0x667   : > { %v6070_v46 = vpop.xlane.xlu0 %6069  ;;  %v5871_v57 = vmul.f32 0.2, %v16684_v5 }
 0x668   : > { %v6184_v14 = vadd.f32 %v6183_v58, %v6070_v46  ;;  %6486 = vadd.xlane.f32.xlu1 %v6397_v48  ;;  %v6398_v48 = vmul.f32 %v6334_v7, %v6270_v41  ;;  %v5880_v58 = vmul.f32 0.2, %v16687_v17  ;;  %v16688_v46 = vld [vmem:[#allocation11_spill] sm:$0xff]  ;;  %v6400_v38 = vmul.f32 %v6336_v35, %v6272_v49  ;;  %v16701_v17 = vld [vmem:[#allocation64_spill] sm:$0xff] }
 0x669   : > { %v6084_v30 = vpop.xlane.xlu1 %6083  ;;  %v6274_v63 = vsub.f32 %v14386_v8, %v5871_v57  ;;  %v6276_v40 = vsub.f32 %v16688_v46, %v5873_v42  ;;  %v16696_v49 = vld [vmem:[#allocation95_spill] sm:$0xff]  ;;  %v5879_v42 = vmul.f32 0.2, %v16698_v43 }
 0x66a   : > { %6476 = vadd.xlane.f32.xlu0 %v6392_v31  ;;  %v6185_v56 = vadd.f32 %v6184_v14, %v6072_v59  ;;  %v5876_v59 = vmul.f32 0.2, %v14508_v34  ;;  %v5878_v34 = vmul.f32 0.2, %v14522_v33  ;;  %v5875_v14 = vmul.f32 0.2, %v16689_v16 }
 0x66b   : > { %v6074_v36 = vpop.xlane.xlu0 %6073  ;;  %v6338_v10 = vmul.f32 %v16653_v4, %v6274_v63  ;;  %v6340_v41 = vmul.f32 %v16653_v4, %v6276_v40  ;;  %v5884_v5 = vmul.f32 0.2, %v16696_v49  ;;  %v16709_v49 = vld [vmem:[#allocation45_spill] sm:$0xff] }
 0x66c   : > { %v6186_v52 = vadd.f32 %v6185_v56, %v6074_v36  ;;  %6490 = vadd.xlane.f32.xlu1 %v6399_v19  ;;  %v14748_v1 = vpop.f32.mrb[120].mxu0  ;;  %v6279_v37 = vsub.f32 %v14376_v21, %v5876_v59 }
 0x66d   : > { %v6088_v39 = vpop.xlane.xlu1 %6087  ;;  %v14751_v13 = vpop.f32.mrb[121].mxu0  ;;  %v6402_v59 = vmul.f32 %v6338_v10, %v6274_v63 }
 0x66e   : > { %6480 = vadd.xlane.f32.xlu0 %v6394_v3  ;;  %v6187_v0 = vadd.f32 %v6186_v52, %v6076_v55  ;;  %v6343_v33 = vmul.f32 %v16653_v4, %v6279_v37  ;;  %v6278_v52 = vsub.f32 %v16692_v12, %v5875_v14  ;;  %v16693_v3 = vld [vmem:[#allocation21_spill] sm:$0xff] }
 0x66f   : > { %v6078_v2 = vpop.xlane.xlu0 %6077  ;;  %v5877_v28 = vmul.f32 0.2, %v16693_v3 }
 0x670   : > { %v6188_v54 = vadd.f32 %v6187_v0, %v6078_v2  ;;  %6494 = vadd.xlane.f32.xlu1 %v6401_v9  ;;  %v16695_v9 = vld [vmem:[#allocation46_spill] sm:$0xff] }
 0x671   : > { %v6092_v25 = vpop.xlane.xlu1 %6091  ;;  %v6285_v2 = vsub.f32 %v16695_v9, %v5882_v27 }
 0x672   : > { %6484 = vadd.xlane.f32.xlu0 %v6396_v53  ;;  %v6189_v55 = vadd.f32 %v6188_v54, %v6080_v18  ;;  %v6281_v18 = vsub.f32 %v14398_v32, %v5878_v34  ;;  %v16691_v32 = vld [vmem:[#allocation22_spill] sm:$0xff]  ;;  %v6342_v34 = vmul.f32 %v16653_v4, %v6278_v52 }
 0x673   : > { %v6082_v62 = vpop.xlane.xlu0 %6081  ;;  %v6283_v29 = vsub.f32 %v16691_v32, %v5880_v58  ;;  %v6349_v35 = vmul.f32 %v16653_v4, %v6285_v2  ;;  %v5881_v58 = vmul.f32 0.2, %v16701_v17  ;;  %v16705_v32 = vld [vmem:[#allocation63_spill] sm:$0xff] }
 0x674   : > { %v6190_v24 = vadd.f32 %v6189_v55, %v6082_v62  ;;  %6498 = vadd.xlane.f32.xlu1 %v6403_v50  ;;  %v14764_v44 = vpop.f32.mrb[122].mxu0  ;;  %v6345_v19 = vmul.f32 %v16653_v4, %v6281_v18  ;;  %v16697_v55 = vld [vmem:[#allocation48_spill] sm:$0xff]  ;;  %v6406_v16 = vmul.f32 %v6342_v34, %v6278_v52  ;;  %v16707_v52 = vld [vmem:[#allocation70_spill] sm:$0xff] }
 0x675   : > { %16686 = vst [vmem:[#allocation79_spill] sm:$0xff] %v14764_v44  ;;  %v6096_v6 = vpop.xlane.xlu1 %6095  ;;  %v14766_v21 = vpop.f32.mrb[123].mxu0  ;;  %v6280_v50 = vsub.f32 %v16697_v55, %v5877_v28  ;;  %v5883_v3 = vmul.f32 0.2, %v16707_v52  ;;  %v16711_v55 = vld [vmem:[#allocation80_spill] sm:$0xff] }
 0x676   : > { %6488 = vadd.xlane.f32.xlu0 %v6398_v48  ;;  %v6191_v15 = vadd.f32 %v6190_v24, %v6084_v30  ;;  %v6407_v30 = vmul.f32 %v6343_v33, %v6279_v37  ;;  %v6409_v54 = vmul.f32 %v6345_v19, %v6281_v18  ;;  %v6404_v37 = vmul.f32 %v6340_v41, %v6276_v40  ;;  %v16699_v24 = vld [vmem:[#allocation50_spill] sm:$0xff]  ;;  %v16702_v40 = vld [vmem:[#allocation39_spill] sm:$0xff]  ;;  %v16719_v52 = vld [vmem:[#allocation92_spill] sm:$0xff] }
 0x677   : > { %v6086_v8 = vpop.xlane.xlu0 %6085  ;;  %v6287_v48 = vsub.f32 %v16699_v24, %v5884_v5  ;;  %v6344_v46 = vmul.f32 %v16653_v4, %v6280_v50  ;;  %v5885_v43 = vmul.f32 0.2, %v16711_v55 }
 0x678   : > { %v6192_v31 = vadd.f32 %v6191_v15, %v6086_v8  ;;  %6502 = vadd.xlane.f32.xlu1 %v6405_v51  ;;  %v16700_v51 = vld [vmem:[#allocation93_spill] sm:$0xff]  ;;  %v6282_v8 = vsub.f32 %v16702_v40, %v5879_v42  ;;  %v16715_v40 = vld [vmem:[#allocation20_spill] sm:$0xff] }
 0x679   : > { %v6100_v56 = vpop.xlane.xlu1 %6099  ;;  %v5886_v33 = vmul.f32 0.2, %v16700_v51  ;;  %v6351_v27 = vmul.f32 %v16653_v4, %v6287_v48 }
 0x67a   : > { %6492 = vadd.xlane.f32.xlu0 %v6400_v38  ;;  %v6193_v36 = vadd.f32 %v6192_v31, %v6088_v39  ;;  %v6347_v39 = vmul.f32 %v16653_v4, %v6283_v29  ;;  %v6413_v38 = vmul.f32 %v6349_v35, %v6285_v2  ;;  %v6346_v12 = vmul.f32 %v16653_v4, %v6282_v8  ;;  %v16713_v35 = vld [vmem:[#allocation84_spill] sm:$0xff] }
 0x67b   : > { %v6090_v47 = vpop.xlane.xlu0 %6089 }
 0x67c   : > { %v6194_v22 = vadd.f32 %v6193_v36, %v6090_v47  ;;  %6506 = vadd.xlane.f32.xlu1 %v6407_v30  ;;  %v14780_v0 = vpop.f32.mrb[124].mxu0  ;;  %v6411_v18 = vmul.f32 %v6347_v39, %v6283_v29  ;;  %v5888_v29 = vmul.f32 0.2, %v16705_v32  ;;  %v16706_v30 = vld [vmem:[#allocation43_spill] sm:$0xff]  ;;  %v16717_v32 = vld [vmem:[#allocation33_spill] sm:$0xff] }
 0x67d   : > { %16694 = vst [vmem:[#allocation66_spill] sm:$0xff] %v14780_v0  ;;  %v6104_v53 = vpop.xlane.xlu1 %6103  ;;  %v14783_v7 = vpop.f32.mrb[125].mxu0  ;;  %v6284_v41 = vsub.f32 %v16706_v30, %v5881_v58  ;;  %v16718_v30 = vld [vmem:[#allocation88_spill] sm:$0xff] }
 0x67e   : > { %6496 = vadd.xlane.f32.xlu0 %v6402_v59  ;;  %v6195_v57 = vadd.f32 %v6194_v22, %v6092_v25  ;;  %v6408_v22 = vmul.f32 %v6344_v46, %v6280_v50  ;;  %v16708_v59 = vld [vmem:[#allocation120_spill] sm:$0xff]  ;;  %v6291_v5 = vsub.f32 %v16709_v49, %v5888_v29  ;;  %v6410_v50 = vmul.f32 %v6346_v12, %v6282_v8 }
 0x67f   : > { %v6094_v20 = vpop.xlane.xlu0 %6093  ;;  %v5890_v9 = vmul.f32 0.2, %v16708_v59  ;;  %v6288_v8 = vsub.f32 %v16715_v40, %v5885_v43 }
 0x680   : > { %v6196_v62 = vadd.f32 %v6195_v57, %v6094_v20  ;;  %6510 = vadd.xlane.f32.xlu1 %v6409_v54  ;;  %v6348_v54 = vmul.f32 %v16653_v4, %v6284_v41 }
 0x681   : > { %v6108_v63 = vpop.xlane.xlu1 %6107  ;;  %v6293_v24 = vsub.f32 %v16713_v35, %v5890_v9  ;;  %v6352_v12 = vmul.f32 %v16653_v4, %v6288_v8  ;;  %v5898_v35 = vmul.f32 0.2, %v14669_v11  ;;  %v16728_v11 = vld [vmem:[#allocation127_spill] sm:$0xff] }
 0x682   : > { %6500 = vadd.xlane.f32.xlu0 %v6404_v37  ;;  %v6197_v25 = vadd.f32 %v6196_v62, %v6096_v6  ;;  %v16704_v6 = vld [vmem:[#allocation58_spill] sm:$0xff]  ;;  %v16710_v37 = vld [vmem:[#allocation47_spill] sm:$0xff] }
 0x683   : > { %v6098_v15 = vpop.xlane.xlu0 %6097  ;;  %v6289_v19 = vsub.f32 %v16704_v6, %v5886_v33  ;;  %v6286_v34 = vsub.f32 %v16710_v37, %v5883_v3 }
 0x684   : > { %v6198_v10 = vadd.f32 %v6197_v25, %v6098_v15  ;;  %6514 = vadd.xlane.f32.xlu1 %v6411_v18  ;;  %v14796_v14 = vpop.f32.mrb[126].mxu0  ;;  %v6412_v15 = vmul.f32 %v6348_v54, %v6284_v41  ;;  %v5889_v41 = vmul.f32 0.2, %v16718_v30  ;;  %v16722_v54 = vld [vmem:[#allocation119_spill] sm:$0xff] }
 0x685   : > { %16703 = vst [vmem:[#allocation123_spill] sm:$0xff] %v14796_v14  ;;  %v6112_v31 = vpop.xlane.xlu1 %6111  ;;  %v14798_v60 = vpop.f32.mrb[127].mxu0  ;;  %v6353_v39 = vmul.f32 %v16653_v4, %v6289_v19  ;;  %v6350_v46 = vmul.f32 %v16653_v4, %v6286_v34 }
 0x686   : > { %6504 = vadd.xlane.f32.xlu0 %v6406_v16  ;;  %v6199_v36 = vadd.f32 %v6198_v10, %v6100_v56  ;;  %v6415_v56 = vmul.f32 %v6351_v27, %v6287_v48  ;;  %v16714_v48 = vld [vmem:[#allocation30_spill] sm:$0xff]  ;;  %v16716_v10 = vld [vmem:[#allocation75_spill] sm:$0xff]  ;;  %v6357_v27 = vmul.f32 %v16653_v4, %v6293_v24 }
 0x687   : > { %v6102_v47 = vpop.xlane.xlu0 %6101  ;;  %v5892_v25 = vmul.f32 0.2, %v16714_v48  ;;  %v6417_v17 = vmul.f32 %v6353_v39, %v6289_v19  ;;  %v5887_v16 = vmul.f32 0.2, %v16716_v10  ;;  %v16724_v48 = vld [vmem:[#allocation126_spill] sm:$0xff] }
 0x688   : > { %v6200_v28 = vadd.f32 %v6199_v36, %v6102_v47  ;;  %6518 = vadd.xlane.f32.xlu1 %v6413_v38  ;;  %v5894_v36 = vmul.f32 0.2, %v14646_v23  ;;  %v6421_v39 = vmul.f32 %v6357_v27, %v6293_v24 }
 0x689   : > { %v6116_v2 = vpop.xlane.xlu1 %6115  ;;  %v6295_v29 = vsub.f32 %v16717_v32, %v5892_v25  ;;  %v6290_v3 = vsub.f32 %v16719_v52, %v5887_v16 }
 0x68a   : > { %6508 = vadd.xlane.f32.xlu0 %v6408_v22  ;;  %v6201_v57 = vadd.f32 %v6200_v28, %v6104_v53  ;;  %v6355_v53 = vmul.f32 %v16653_v4, %v6291_v5  ;;  %v6414_v22 = vmul.f32 %v6350_v46, %v6286_v34  ;;  %v16723_v34 = vld [vmem:[#allocation81_spill] sm:$0xff]  ;;  %v16726_v46 = vld [vmem:[#allocation100_spill] sm:$0xff] }
 0x68b   : > { %v6106_v20 = vpop.xlane.xlu0 %6105  ;;  %v6359_v23 = vmul.f32 %v16653_v4, %v6295_v29  ;;  %v6354_v55 = vmul.f32 %v16653_v4, %v6290_v3  ;;  %v5891_v43 = vmul.f32 0.2, %v16723_v34  ;;  %v5893_v40 = vmul.f32 0.2, %v16726_v46  ;;  %v16734_v34 = vld [vmem:[#allocation73_spill] sm:$0xff] }
 0x68c   : > { %v6202_v42 = vadd.f32 %v6201_v57, %v6106_v20  ;;  %6522 = vadd.xlane.f32.xlu1 %v6415_v56  ;;  %v14812_v62 = vpop.f32.mrb[128].mxu0  ;;  %v6419_v19 = vmul.f32 %v6355_v53, %v6291_v5  ;;  %v5896_v57 = vmul.f32 0.2, %v14659_v26  ;;  %v6292_v20 = vsub.f32 %v16722_v54, %v5889_v41  ;;  %v16733_v54 = vld [vmem:[#allocation113_spill] sm:$0xff] }
 0x68d   : > { %16712 = vst [vmem:[#allocation65_spill] sm:$0xff] %v14812_v62  ;;  %v6120_v51 = vpop.xlane.xlu1 %6119  ;;  %v14815_v33 = vpop.f32.mrb[129].mxu0 }
 0x68e   : > { %6512 = vadd.xlane.f32.xlu0 %v6410_v50  ;;  %v6203_v18 = vadd.f32 %v6202_v42, %v6108_v63  ;;  %v6416_v50 = vmul.f32 %v6352_v12, %v6288_v8  ;;  %v6299_v25 = vsub.f32 %v16724_v48, %v5896_v57  ;;  %v6418_v8 = vmul.f32 %v6354_v55, %v6290_v3  ;;  %v16730_v12 = vld [vmem:[#allocation128_spill] sm:$0xff]  ;;  %v16731_v3 = vld [vmem:[#allocation89_spill] sm:$0xff] }
 0x68f   : > { %v6110_v58 = vpop.xlane.xlu0 %6109  ;;  %v6296_v52 = vsub.f32 %v16730_v12, %v5893_v40 }
 0x690   : > { %v6204_v38 = vadd.f32 %v6203_v18, %v6110_v58  ;;  %6526 = vadd.xlane.f32.xlu1 %v6417_v17  ;;  %v6356_v18 = vmul.f32 %v16653_v4, %v6292_v20  ;;  %v16725_v58 = vld [vmem:[#allocation53_spill] sm:$0xff] }
 0x691   : > { %v6124_v6 = vpop.xlane.xlu1 %6123  ;;  %v6360_v55 = vmul.f32 %v16653_v4, %v6296_v52 }
 0x692   : > { %6516 = vadd.xlane.f32.xlu0 %v6412_v15  ;;  %v6205_v63 = vadd.f32 %v6204_v38, %v6112_v31  ;;  %v16721_v31 = vld [vmem:[#allocation110_spill] sm:$0xff]  ;;  %v6294_v15 = vsub.f32 %v16725_v58, %v5891_v43  ;;  %v6301_v38 = vsub.f32 %v16728_v11, %v5898_v35  ;;  %v6420_v41 = vmul.f32 %v6356_v18, %v6292_v20 }
 0x693   : > { %v6114_v47 = vpop.xlane.xlu0 %6113  ;;  %v6297_v5 = vsub.f32 %v16721_v31, %v5894_v36  ;;  %v16732_v31 = vld [vmem:[#allocation57_spill] sm:$0xff]  ;;  %v5897_v20 = vmul.f32 0.2, %v16733_v54 }
 0x694   : > { %v6206_v28 = vadd.f32 %v6205_v63, %v6114_v47  ;;  %6530 = vadd.xlane.f32.xlu1 %v6419_v19  ;;  %v14828_v59 = vpop.f32.mrb[130].mxu0  ;;  %v6358_v47 = vmul.f32 %v16653_v4, %v6294_v15 }
 0x695   : > { %16720 = vst [vmem:[#allocation124_spill] sm:$0xff] %v14828_v59  ;;  %v6128_v9 = vpop.xlane.xlu1 %6127  ;;  %v14830_v49 = vpop.f32.mrb[131].mxu0  ;;  %v6361_v53 = vmul.f32 %v16653_v4, %v6297_v5 }
 0x696   : > { %6520 = vadd.xlane.f32.xlu0 %v6414_v22  ;;  %v6207_v56 = vadd.f32 %v6206_v28, %v6116_v2  ;;  %v6423_v2 = vmul.f32 %v6359_v23, %v6295_v29  ;;  %v16729_v29 = vld [vmem:[#allocation117_spill] sm:$0xff]  ;;  %v5895_v28 = vmul.f32 0.2, %v16731_v3  ;;  %v6422_v35 = vmul.f32 %v6358_v47, %v6294_v15  ;;  %v16741_v47 = vld [vmem:[#allocation59_spill] sm:$0xff]  ;;  %v16742_v3 = vld [vmem:[#allocation114_spill] sm:$0xff] }
 0x697   : > { %v6118_v37 = vpop.xlane.xlu0 %6117  ;;  %v5900_v36 = vmul.f32 0.2, %v16729_v29  ;;  %v6425_v19 = vmul.f32 %v6361_v53, %v6297_v5 }
 0x698   : > { %v6208_v42 = vadd.f32 %v6207_v56, %v6118_v37  ;;  %6534 = vadd.xlane.f32.xlu1 %v6421_v39  ;;  %v6365_v39 = vmul.f32 %v16653_v4, %v6301_v38  ;;  %v5902_v56 = vmul.f32 0.2, %v14688_v45  ;;  %v6298_v43 = vsub.f32 %v16734_v34, %v5895_v28  ;;  %v16745_v34 = vld [vmem:[#allocation38_spill] sm:$0xff] }
 0x699   : > { %v6132_v24 = vpop.xlane.xlu1 %6131  ;;  %v6303_v57 = vsub.f32 %v16732_v31, %v5900_v36  ;;  %v5901_v28 = vmul.f32 0.2, %v16742_v3 }
 0x69a   : > { %6524 = vadd.xlane.f32.xlu0 %v6416_v50  ;;  %v6209_v26 = vadd.f32 %v6208_v42, %v6120_v51  ;;  %v6363_v51 = vmul.f32 %v16653_v4, %v6299_v25  ;;  %v6362_v40 = vmul.f32 %v16653_v4, %v6298_v43 }
 0x69b   : > { %v6122_v17 = vpop.xlane.xlu0 %6121  ;;  %v6367_v45 = vmul.f32 %v16653_v4, %v6303_v57 }
 0x69c   : > { %v6210_v10 = vadd.f32 %v6209_v26, %v6122_v17  ;;  %6538 = vadd.xlane.f32.xlu1 %v6423_v2  ;;  %v14844_v16 = vpop.f32.mrb[132].mxu0  ;;  %v6427_v5 = vmul.f32 %v6363_v51, %v6299_v25  ;;  %v6429_v26 = vmul.f32 %v6365_v39, %v6301_v38  ;;  %v5904_v2 = vmul.f32 0.2, %v14696_v61  ;;  %v16737_v17 = vld [vmem:[#allocation104_spill] sm:$0xff] }
 0x69d   : > { %16727 = vst [vmem:[#allocation7_spill] sm:$0xff] %v14844_v16  ;;  %v6136_v27 = vpop.xlane.xlu1 %6135  ;;  %v14847_v32 = vpop.f32.mrb[133].mxu0  ;;  %v6300_v58 = vsub.f32 %v16737_v17, %v5897_v20  ;;  %v6424_v38 = vmul.f32 %v6360_v55, %v6296_v52  ;;  %v16740_v61 = vld [vmem:[#allocation60_spill] sm:$0xff]  ;;  %v6426_v52 = vmul.f32 %v6362_v40, %v6298_v43 }
 0x69e   : > { %6528 = vadd.xlane.f32.xlu0 %v6418_v8  ;;  %v6211_v63 = vadd.f32 %v6210_v10, %v6124_v6  ;;  %v16738_v10 = vld [vmem:[#allocation101_spill] sm:$0xff] }
 0x69f   : > { %v6126_v30 = vpop.xlane.xlu0 %6125  ;;  %v5899_v8 = vmul.f32 0.2, %v16738_v10 }
 0x6a0   : > { %v6212_v22 = vadd.f32 %v6211_v63, %v6126_v30  ;;  %6542 = vadd.xlane.f32.xlu1 %v6425_v19  ;;  %v6307_v63 = vsub.f32 %v16740_v61, %v5904_v2  ;;  %v6431_v19 = vmul.f32 %v6367_v45, %v6303_v57  ;;  %v6364_v30 = vmul.f32 %v16653_v4, %v6300_v58 }
 0x6a1   : > { %v6140_v23 = vpop.xlane.xlu1 %6139  ;;  %v6302_v12 = vsub.f32 %v16741_v47, %v5899_v8 }
 0x6a2   : > { %6532 = vadd.xlane.f32.xlu0 %v6420_v41  ;;  %v6213_v6 = vadd.f32 %v6212_v22, %v6128_v9  ;;  %v16736_v9 = vld [vmem:[#allocation108_spill] sm:$0xff]  ;;  %v6428_v54 = vmul.f32 %v6364_v30, %v6300_v58 }
 0x6a3   : > { %v6130_v37 = vpop.xlane.xlu0 %6129  ;;  %v6305_v25 = vsub.f32 %v16736_v9, %v5902_v56  ;;  %v6366_v20 = vmul.f32 %v16653_v4, %v6302_v12 }
 0x6a4   : > { %v6214_v42 = vadd.f32 %v6213_v6, %v6130_v37  ;;  %6546 = vadd.xlane.f32.xlu1 %v6427_v5  ;;  %v14860_v50 = vpop.f32.mrb[134].mxu0  ;;  %v6371_v6 = vmul.f32 %v16653_v4, %v6307_v63  ;;  %v16744_v37 = vld [vmem:[#allocation121_spill] sm:$0xff] }
 0x6a5   : > { %16735 = vst [vmem:[#allocation82_spill] sm:$0xff] %v14860_v50  ;;  %v6144_v53 = vpop.xlane.xlu1 %6143  ;;  %v14862_v48 = vpop.f32.mrb[135].mxu0  ;;  %v6369_v36 = vmul.f32 %v16653_v4, %v6305_v25  ;;  %v6304_v55 = vsub.f32 %v16744_v37, %v5901_v28  ;;  %v6430_v40 = vmul.f32 %v6366_v20, %v6302_v12  ;;  %v16757_v20 = vld [vmem:[#allocation122_spill] sm:$0xff] }
 0x6a6   : > { %6536 = vadd.xlane.f32.xlu0 %v6422_v35  ;;  %v6215_v18 = vadd.f32 %v6214_v42, %v6132_v24  ;;  %v5903_v42 = vmul.f32 0.2, %v16745_v34  ;;  %v6435_v2 = vmul.f32 %v6371_v6, %v6307_v63  ;;  %v5974_v37 = vsel %vm2343_vm10, %v16757_v20, 0.0  ;;  %v16766_v20 = vld [vmem:[#allocation42_spill] sm:$0xff] }
 0x6a7   : > { %v6134_v46 = vpop.xlane.xlu0 %6133  ;;  %v6433_v57 = vmul.f32 %v6369_v36, %v6305_v25  ;;  %v6368_v25 = vmul.f32 %v16653_v4, %v6304_v55 }
 0x6a8   : > { %v6216_v15 = vadd.f32 %v6215_v18, %v6134_v46  ;;  %v14870_v11 = vpop.f32.mrb[136].mxu0  ;;  %6550 = vadd.xlane.f32.xlu1 %v6429_v26  ;;  %v16747_v18 = vld [vmem:[#allocation76_spill] sm:$0xff] }
 0x6a9   : > { %16739 = vst [vmem:[#allocation68_spill] sm:$0xff] %v14870_v11  ;;  %v6148_v51 = vpop.xlane.xlu1 %6147  ;;  %v14872_v29 = vpop.f32.mrb[137].mxu0  ;;  %v6306_v17 = vsub.f32 %v16747_v18, %v5903_v42  ;;  %v6432_v63 = vmul.f32 %v6368_v25, %v6304_v55 }
 0x6aa   : > { %6540 = vadd.xlane.f32.xlu0 %v6424_v38  ;;  %v6217_v24 = vadd.f32 %v6216_v15, %v6136_v27 }
 0x6ab   : > { %v6138_v41 = vpop.xlane.xlu0 %6137  ;;  %v6370_v36 = vmul.f32 %v16653_v4, %v6306_v17 }
 0x6ac   : > { %v6218_v22 = vadd.f32 %v6217_v24, %v6138_v41  ;;  %v14879_v39 = vpop.f32.mrb[138].mxu0  ;;  %6554 = vadd.xlane.f32.xlu1 %v6431_v19 }
 0x6ad   : > { %16743 = vst [vmem:[#allocation14_spill] sm:$0xff] %v14879_v39  ;;  %v6152_v31 = vpop.xlane.xlu1 %6151  ;;  %v14881_v56 = vpop.f32.mrb[139].mxu0  ;;  %v6434_v3 = vmul.f32 %v6370_v36, %v6306_v17 }
 0x6ae   : > { %6544 = vadd.xlane.f32.xlu0 %v6426_v52  ;;  %v6219_v27 = vadd.f32 %v6218_v22, %v6140_v23 }
 0x6af   : > { %v6142_v5 = vpop.xlane.xlu0 %6141 }
 0x6b0   : > { %v6220_v35 = vadd.f32 %v6219_v27, %v6142_v5  ;;  %v14887_v26 = vpop.f32.mrb[140].mxu0  ;;  %6558 = vadd.xlane.f32.xlu1 %v6433_v57  ;;  %v16756_v5 = vld [vmem:[#allocation67_spill] sm:$0xff] }
 0x6b1   : > { %16746 = vst [vmem:[#allocation90_spill] sm:$0xff] %v14887_v26  ;;  %v6156_v43 = vpop.xlane.xlu1 %6155  ;;  %v14889_v45 = vpop.f32.mrb[141].mxu0 }
 0x6b2   : > { %6548 = vadd.xlane.f32.xlu0 %v6428_v54  ;;  %v6221_v9 = vadd.f32 %v6220_v35, %v6144_v53 }
 0x6b3   : > { %v6146_v23 = vpop.xlane.xlu0 %6145 }
 0x6b4   : > { %v6222_v58 = vadd.f32 %v6221_v9, %v6146_v23  ;;  %v14893_v46 = vpop.f32.mrb[142].mxu0  ;;  %6562 = vadd.xlane.f32.xlu1 %v6435_v2  ;;  %v5975_v9 = vrot.slane %v5974_v37, 4  ;;  %v16760_v2 = vld [vmem:[#allocation109_spill] sm:$0xff] }
 0x6b5   : > { %16748 = vst [vmem:[#allocation71_spill] sm:$0xff] %v14893_v46  ;;  %v6160_v10 = vpop.xlane.xlu1 %6159  ;;  %v14895_v8 = vpop.f32.mrb[143].mxu0 }
 0x6b6   : > { %16749 = vst [vmem:[#allocation72_spill] sm:$0xff] %v14895_v8  ;;  %6552 = vadd.xlane.f32.xlu0 %v6430_v40  ;;  %v6223_v15 = vadd.f32 %v6222_v58, %v6148_v51 }
 0x6b7   : > { %v6150_v38 = vpop.xlane.xlu0 %6149 }
 0x6b8   : > { %v6224_v53 = vadd.f32 %v6223_v15, %v6150_v38  ;;  %v14898_v61 = vpop.f32.mrb[144].mxu0  ;;  %v16763_v15 = vld [vmem:[#allocation9_spill] sm:$0xff] }
 0x6b9   : > { %16750 = vst [vmem:[#allocation77_spill] sm:$0xff] %v14898_v61  ;;  %v6164_v24 = vpop.xlane.xlu1 %6163  ;;  %v14900_v19 = vpop.f32.mrb[145].mxu0 }
 0x6ba   : > { %16751 = vst [vmem:[#allocation91_spill] sm:$0xff] %v14900_v19  ;;  %6556 = vadd.xlane.f32.xlu0 %v6432_v63  ;;  %v6225_v30 = vadd.f32 %v6224_v53, %v6152_v31  ;;  %v7371_v31 = vsel %vm2343_vm10, %v16756_v5, -inf }
 0x6bb   : > { %v6154_v41 = vpop.xlane.xlu0 %6153 }
 0x6bc   : > { %v6226_v47 = vadd.f32 %v6225_v30, %v6154_v41  ;;  %v14902_v12 = vpop.f32.mrb[146].mxu0 }
 0x6bd   : > { %16752 = vst [vmem:[#allocation78_spill] sm:$0xff] %v14902_v12  ;;  %v6168_v28 = vpop.xlane.xlu1 %6167  ;;  %v14904_v22 = vpop.f32.mrb[147].mxu0 }
 0x6be   : > { %16753 = vst [vmem:[#allocation83_spill] sm:$0xff] %v14904_v22  ;;  %6560 = vadd.xlane.f32.xlu0 %v6434_v3  ;;  %v6227_v51 = vadd.f32 %v6226_v47, %v6156_v43  ;;  %v16765_v3 = vld [vmem:[#allocation115_spill] sm:$0xff] }
 0x6bf   : > { %v6158_v4 = vpop.xlane.xlu0 %6157 }
 0x6c0   : > { %v6228_v52 = vadd.f32 %v6227_v51, %v6158_v4  ;;  %v14906_v6 = vpop.f32.mrb[148].mxu0 }
 0x6c1   : > { %16754 = vst [vmem:[#allocation86_spill] sm:$0xff] %v14906_v6  ;;  %v6172_v27 = vpop.xlane.xlu1 %6171  ;;  %v14908_v57 = vpop.f32.mrb[149].mxu0 }
 0x6c2   : > { %16755 = vst [vmem:[#allocation99_spill] sm:$0xff] %v14908_v57  ;;  %7372 = vmax.xlane.f32.xlu0 %v7371_v31  ;;  %v6229_v54 = vadd.f32 %v6228_v52, %v6160_v10  ;;  %v5976_v10 = vadd.f32 %v5975_v9, %v5974_v37 }
 0x6c3   : > { %v6162_v55 = vpop.xlane.xlu0 %6161 }
 0x6c4   : > { %v6230_v34 = vadd.f32 %v6229_v54, %v6162_v55  ;;  %v14914_v42 = vpop.f32.mrb[150].mxu0  ;;  %v5977_v41 = vrot.slane %v5976_v10, 2 }
 0x6c5   : > { %16758 = vst [vmem:[#allocation96_spill] sm:$0xff] %v14914_v42  ;;  %v6439_v35 = vpop.xlane.xlu1 %6438  ;;  %v14916_v43 = vpop.f32.mrb[151].mxu0 }
 0x6c6   : > { %16759 = vst [vmem:[#allocation94_spill] sm:$0xff] %v14916_v43  ;;  %8230 = vadd.xlane.f32.xlu0 %v16760_v2  ;;  %v6231_v23 = vadd.f32 %v6230_v34, %v6164_v24  ;;  %v5978_v52 = vadd.f32 %v5977_v41, %v5976_v10 }
 0x6c7   : > { %v6166_v25 = vpop.xlane.xlu0 %6165 }
 0x6c8   : > { %v6232_v18 = vadd.f32 %v6231_v23, %v6166_v25  ;;  %v14919_v17 = vpop.f32.mrb[152].mxu0  ;;  %v5979_v9 = vrot.slane %v5978_v52, 1  ;;  %v16767_v25 = vld [vmem:[#allocation41_spill] sm:$0xff] }
 0x6c9   : > { %16761 = vst [vmem:[#allocation105_spill] sm:$0xff] %v14919_v17  ;;  %v6443_v58 = vpop.xlane.xlu1 %6442  ;;  %v14921_v40 = vpop.f32.mrb[153].mxu0 }
 0x6ca   : > { %16762 = vst [vmem:[#allocation98_spill] sm:$0xff] %v14921_v40  ;;  %8234 = vadd.xlane.f32.xlu0 %v16763_v15  ;;  %v6233_v38 = vadd.f32 %v6232_v18, %v6168_v28 }
 0x6cb   : > { %v6170_v36 = vpop.xlane.xlu0 %6169 }
 0x6cc   : > { %v6234_v53 = vadd.f32 %v6233_v38, %v6170_v36  ;;  %v14924_v63 = vpop.f32.mrb[154].mxu0 }
 0x6cd   : > { %16764 = vst [vmem:[#allocation107_spill] sm:$0xff] %v14924_v63  ;;  %v6447_v30 = vpop.xlane.xlu1 %6446 }
 0x6ce   : > { %v6235_v47 = vadd.f32 %v6234_v53, %v6172_v27  ;;  %8236 = vadd.xlane.f32.xlu0 %v16765_v3  ;;  %v14929_v3 = vadd.f32 %v5979_v9, %v5978_v52 }
 0x6cf   : > { %v6437_v24 = vpop.xlane.xlu0 %6436 }
 0x6d0   : > { %v6236_v51 = vrot.slane %v6235_v47, 4  ;;  %v6564_v54 = vadd.f32 %v6439_v35, %v6437_v24  ;;  %v16768_v35 = vld [vmem:[#allocation49_spill] sm:$0xff] }
 0x6d1   : > { %v6451_v4 = vpop.xlane.xlu1 %6450 }
 0x6d2   : > { %v6237_v31 = vadd.f32 %v6236_v51, %v6235_v47  ;;  %8240 = vadd.xlane.f32.xlu0 %v16766_v20 }
 0x6d3   : > { %v6441_v37 = vpop.xlane.xlu0 %6440 }
 0x6d4   : > { %v6238_v55 = vrot.slane %v6237_v31, 2  ;;  %v6565_v28 = vadd.f32 %v6564_v54, %v6441_v37  ;;  %v16769_v54 = vld [vmem:[#allocation97_spill] sm:$0xff] }
 0x6d5   : > { %v6455_v34 = vpop.xlane.xlu1 %6454 }
 0x6d6   : > { %v6239_v23 = vadd.f32 %v6238_v55, %v6237_v31  ;;  %8244 = vadd.xlane.f32.xlu0 %v16767_v25  ;;  %v6566_v18 = vadd.f32 %v6565_v28, %v6443_v58 }
 0x6d7   : > { %v6445_v27 = vpop.xlane.xlu0 %6444 }
 0x6d8   : > { %v6240_v38 = vrot.slane %v6239_v23, 1  ;;  %v6567_v36 = vadd.f32 %v6566_v18, %v6445_v27  ;;  %v16770_v18 = vld [vmem:[#allocation52_spill] sm:$0xff] }
 0x6d9   : > { %v6459_v53 = vpop.xlane.xlu1 %6458 }
 0x6da   : > { %v14931_v10 = vadd.f32 %v6240_v38, %v6239_v23  ;;  %8248 = vadd.xlane.f32.xlu0 %v16768_v35  ;;  %v6568_v41 = vadd.f32 %v6567_v36, %v6447_v30  ;;  %v16771_v38 = vld [vmem:[#allocation56_spill] sm:$0xff] }
 0x6db   : > { %v6449_v47 = vpop.xlane.xlu0 %6448 }
 0x6dc   : > { %v6569_v51 = vadd.f32 %v6568_v41, %v6449_v47 }
 0x6dd   : > { %v6463_v31 = vpop.xlane.xlu1 %6462 }
 0x6de   : > { %8252 = vadd.xlane.f32.xlu0 %v16769_v54  ;;  %v6570_v58 = vadd.f32 %v6569_v51, %v6451_v4 }
 0x6df   : > { %v6453_v37 = vpop.xlane.xlu0 %6452 }
 0x6e0   : > { %v6571_v55 = vadd.f32 %v6570_v58, %v6453_v37 }
 0x6e1   : > { %v6467_v28 = vpop.xlane.xlu1 %6466 }
 0x6e2   : > { %8256 = vadd.xlane.f32.xlu0 %v16770_v18  ;;  %v6572_v52 = vadd.f32 %v6571_v55, %v6455_v34 }
 0x6e3   : > { %v6457_v9 = vpop.xlane.xlu0 %6456 }
 0x6e4   : > { %v6573_v23 = vadd.f32 %v6572_v52, %v6457_v9 }
 0x6e5   : > { %v6471_v27 = vpop.xlane.xlu1 %6470 }
 0x6e6   : > { %8260 = vadd.xlane.f32.xlu0 %v16771_v38  ;;  %v6574_v30 = vadd.f32 %v6573_v23, %v6459_v53 }
 0x6e7   : > { %v6461_v36 = vpop.xlane.xlu0 %6460 }
 0x6e8   : > { %v6575_v35 = vadd.f32 %v6574_v30, %v6461_v36 }
 0x6e9   : > { %v6475_v24 = vpop.xlane.xlu1 %6474 }
 0x6ea   : > { %8264 = vadd.xlane.f32.xlu0 %v14748_v1  ;;  %v6576_v41 = vadd.f32 %v6575_v35, %v6463_v31 }
 0x6eb   : > { %v6465_v47 = vpop.xlane.xlu0 %6464 }
 0x6ec   : > { %v6577_v4 = vadd.f32 %v6576_v41, %v6465_v47 }
 0x6ed   : > { %v6479_v51 = vpop.xlane.xlu1 %6478 }
 0x6ee   : > { %8268 = vadd.xlane.f32.xlu0 %v14764_v44  ;;  %v6578_v58 = vadd.f32 %v6577_v4, %v6467_v28  ;;  %v16798_v44 = vld [vmem:[#allocation29_spill] sm:$0xff] }
 0x6ef   : > { %v6469_v37 = vpop.xlane.xlu0 %6468  ;;  %vm4131_vm13 = vcmp.eq.s32.totalorder %v16798_v44, 0  ;;  %vm4135_vm11 = vcmp.eq.s32.totalorder %v16798_v44, 1 }
 0x6f0   : > { %v6579_v34 = vadd.f32 %v6578_v58, %v6469_v37 }
 0x6f1   : > { %v6483_v55 = vpop.xlane.xlu1 %6482 }
 0x6f2   : > { %8272 = vadd.xlane.f32.xlu0 %v14780_v0  ;;  %v6580_v52 = vadd.f32 %v6579_v34, %v6471_v27  ;;  %v16772_v27 = vld [vmem:[#allocation87_spill] sm:$0xff] }
 0x6f3   : > { %v6473_v9 = vpop.xlane.xlu0 %6472  ;;  %v8154_v34 = vsel %vm2343_vm10, %v16772_v27, 0.0 }
 0x6f4   : > { %v6581_v53 = vadd.f32 %v6580_v52, %v6473_v9 }
 0x6f5   : > { %v6487_v23 = vpop.xlane.xlu1 %6486 }
 0x6f6   : > { %8276 = vadd.xlane.f32.xlu0 %v14796_v14  ;;  %v6582_v30 = vadd.f32 %v6581_v53, %v6475_v24  ;;  %v8155_v53 = vrot.slane %v8154_v34, 4 }
 0x6f7   : > { %v6477_v36 = vpop.xlane.xlu0 %6476 }
 0x6f8   : > { %v6583_v35 = vadd.f32 %v6582_v30, %v6477_v36 }
 0x6f9   : > { %v6491_v31 = vpop.xlane.xlu1 %6490 }
 0x6fa   : > { %8280 = vadd.xlane.f32.xlu0 %v14812_v62  ;;  %v6584_v41 = vadd.f32 %v6583_v35, %v6479_v51  ;;  %v8156_v35 = vadd.f32 %v8155_v53, %v8154_v34 }
 0x6fb   : > { %v6481_v47 = vpop.xlane.xlu0 %6480 }
 0x6fc   : > { %v6585_v28 = vadd.f32 %v6584_v41, %v6481_v47 }
 0x6fd   : > { %v6495_v4 = vpop.xlane.xlu1 %6494 }
 0x6fe   : > { %8284 = vadd.xlane.f32.xlu0 %v14828_v59  ;;  %v6586_v58 = vadd.f32 %v6585_v28, %v6483_v55  ;;  %v14949_v55 = vpop.f32.mrb[155].mxu0 }
 0x6ff   : > { %v6485_v37 = vpop.xlane.xlu0 %6484 }
 0x700   : > { %v6587_v52 = vadd.f32 %v6586_v58, %v6485_v37  ;;  %v8157_v37 = vrot.slane %v8156_v35, 2 }
 0x701   : > { %v6499_v9 = vpop.xlane.xlu1 %6498 }
 0x702   : > { %8288 = vadd.xlane.f32.xlu0 %v14844_v16  ;;  %v6588_v24 = vadd.f32 %v6587_v52, %v6487_v23 }
 0x703   : > { %v6489_v30 = vpop.xlane.xlu0 %6488 }
 0x704   : > { %v6589_v36 = vadd.f32 %v6588_v24, %v6489_v30  ;;  %v8158_v24 = vadd.f32 %v8157_v37, %v8156_v35 }
 0x705   : > { %v6503_v62 = vpop.xlane.xlu1 %6502 }
 0x706   : > { %8292 = vadd.xlane.f32.xlu0 %v14860_v50  ;;  %v6590_v51 = vadd.f32 %v6589_v36, %v6491_v31  ;;  %v14953_v31 = vpop.f32.mrb[156].mxu0 }
 0x707   : > { %v6493_v41 = vpop.xlane.xlu0 %6492  ;;  %16773 = vst [vmem:[#allocation116_spill] sm:$0xff] %v14953_v31  ;;  %v14955_v53 = vpop.f32.mrb[157].mxu0 }
 0x708   : > { %v6591_v47 = vadd.f32 %v6590_v51, %v6493_v41  ;;  %v8159_v51 = vrot.slane %v8158_v24, 1  ;;  %v14961_v35 = vpop.f32.mrb[158].mxu0 }
 0x709   : > { %v6507_v28 = vpop.xlane.xlu1 %6506  ;;  %16774 = vst [vmem:[#allocation11_spill] sm:$0xff] %v14961_v35 }
 0x70a   : > { %8296 = vadd.xlane.f32.xlu0 %v14870_v11  ;;  %v6592_v58 = vadd.f32 %v6591_v47, %v6495_v4 }
 0x70b   : > { %v6497_v27 = vpop.xlane.xlu0 %6496 }
 0x70c   : > { %v6593_v16 = vadd.f32 %v6592_v58, %v6497_v27  ;;  %v14959_v27 = vadd.f32 %v8159_v51, %v8158_v24 }
 0x70d   : > { %v6511_v23 = vpop.xlane.xlu1 %6510 }
 0x70e   : > { %8300 = vadd.xlane.f32.xlu0 %v14879_v39  ;;  %v6594_v52 = vadd.f32 %v6593_v16, %v6499_v9  ;;  %vm8227_vm6 = vcmp.gt.f32.partialorder %v14959_v27, 0.5 }
 0x70f   : > { %v6501_v30 = vpop.xlane.xlu0 %6500 }
 0x710   : > { %v6595_v50 = vadd.f32 %v6594_v52, %v6501_v30  ;;  %v14963_v52 = vpop.f32.mrb[159].mxu0 }
 0x711   : > { %v6515_v34 = vpop.xlane.xlu1 %6514  ;;  %16775 = vst [vmem:[#allocation111_spill] sm:$0xff] %v14963_v52 }
 0x712   : > { %8304 = vadd.xlane.f32.xlu0 %v14887_v26  ;;  %v6596_v36 = vadd.f32 %v6595_v50, %v6503_v62  ;;  %v8161_v62 = vmax.f32 %v14959_v27, 1.0  ;;  %v16815_v27 = vld [vmem:[#allocation49_spill] sm:$0xff] }
 0x713   : > { %v6505_v4 = vpop.xlane.xlu0 %6504 }
 0x714   : > { %v6597_v41 = vadd.f32 %v6596_v36, %v6505_v4  ;;  %10703 = vrcp.f32 %v8161_v62 }
 0x715   : > { %v6519_v47 = vpop.xlane.xlu1 %6518 }
 0x716   : > { %8308 = vadd.xlane.f32.xlu0 %v14893_v46  ;;  %v6598_v58 = vadd.f32 %v6597_v41, %v6507_v28  ;;  %v14968_v41 = vpop.f32.mrb[160].mxu0 }
 0x717   : > { %v6509_v16 = vpop.xlane.xlu0 %6508  ;;  %16776 = vst [vmem:[#allocation125_spill] sm:$0xff] %v14968_v41 }
 0x718   : > { %v6599_v9 = vadd.f32 %v6598_v58, %v6509_v16  ;;  %v14970_v16 = vpop.f32.mrb[161].mxu0 }
 0x719   : > { %v6523_v37 = vpop.xlane.xlu1 %6522  ;;  %16777 = vst [vmem:[#allocation22_spill] sm:$0xff] %v14970_v16 }
 0x71a   : > { %8312 = vadd.xlane.f32.xlu0 %v14898_v61  ;;  %v6600_v30 = vadd.f32 %v6599_v9, %v6511_v23 }
 0x71b   : > { %v6513_v50 = vpop.xlane.xlu0 %6512 }
 0x71c   : > { %v6601_v36 = vadd.f32 %v6600_v30, %v6513_v50  ;;  %v16778_v50 = vld [vmem:[#allocation118_spill] sm:$0xff] }
 0x71d   : > { %v6527_v4 = vpop.xlane.xlu1 %6526  ;;  %10705 = vlog2.f32 %v16778_v50 }
 0x71e   : > { %8316 = vadd.xlane.f32.xlu0 %v14902_v12  ;;  %v6602_v28 = vadd.f32 %v6601_v36, %v6515_v34  ;;  %v14975_v36 = vpop.f32.mrb[162].mxu0 }
 0x71f   : > { %v6517_v24 = vpop.xlane.xlu0 %6516  ;;  %16779 = vst [vmem:[#allocation40_spill] sm:$0xff] %v14975_v36  ;;  %v14979_v12 = vpop.f32.mrb[163].mxu0 }
 0x720   : > { %v6603_v51 = vadd.f32 %v6602_v28, %v6517_v24  ;;  %v14977_v28 = vpop.eup %10703  ;;  %16780 = vst [vmem:[#allocation21_spill] sm:$0xff] %v14979_v12 }
 0x721   : > { %v6531_v58 = vpop.xlane.xlu1 %6530 }
 0x722   : > { %8320 = vadd.xlane.f32.xlu0 %v14906_v6  ;;  %v6604_v61 = vadd.f32 %v6603_v51, %v6519_v47 }
 0x723   : > { %v6521_v23 = vpop.xlane.xlu0 %6520 }
 0x724   : > { %v6605_v9 = vadd.f32 %v6604_v61, %v6521_v23  ;;  %v14984_v61 = vmul.f32 %v14977_v28, %v16760_v2  ;;  %v16781_v23 = vld [vmem:[#allocation106_spill] sm:$0xff] }
 0x725   : > { %v6535_v46 = vpop.xlane.xlu1 %6534  ;;  %10707 = vlog2.f32 %v16781_v23 }
 0x726   : > { %8324 = vadd.xlane.f32.xlu0 %v14914_v42  ;;  %v6606_v30 = vadd.f32 %v6605_v9, %v6523_v37  ;;  %v14992_v42 = vmul.f32 %v14977_v28, %v16763_v15 }
 0x727   : > { %v6525_v34 = vpop.xlane.xlu0 %6524  ;;  %v10706_v6 = vpop.eup %10705 }
 0x728   : > { %v6607_v62 = vadd.f32 %v6606_v30, %v6525_v34  ;;  %v8498_v34 = vmul.f32 %v14984_v61, %v16760_v2  ;;  %v2354_v23 = vmul.f32 0.6931472, %v10706_v6 }
 0x729   : > { %v6539_v24 = vpop.xlane.xlu1 %6538 }
 0x72a   : > { %8328 = vadd.xlane.f32.xlu0 %v14919_v17  ;;  %v6608_v47 = vadd.f32 %v6607_v62, %v6527_v4  ;;  %v14994_v62 = vpop.f32.mrb[164].mxu0 }
 0x72b   : > { %v6529_v51 = vpop.xlane.xlu0 %6528  ;;  %16782 = vst [vmem:[#allocation46_spill] sm:$0xff] %v14994_v62  ;;  %v14996_v26 = vpop.f32.mrb[165].mxu0  ;;  %v16785_v62 = vld [vmem:[#allocation61_spill] sm:$0xff] }
 0x72c   : > { %v6609_v37 = vadd.f32 %v6608_v47, %v6529_v51  ;;  %16783 = vst [vmem:[#allocation95_spill] sm:$0xff] %v14996_v26  ;;  %v2355_v36 = vadd.f32 %v2354_v23, %v16785_v62  ;;  %v16791_v26 = vld [vmem:[#allocation51_spill] sm:$0xff] }
 0x72d   : > { %v6543_v30 = vpop.xlane.xlu1 %6542  ;;  %v15020_v35 = vmul.f32 %v14977_v28, %v16791_v26 }
 0x72e   : > { %8332 = vadd.xlane.f32.xlu0 %v14924_v63  ;;  %v6610_v9 = vadd.f32 %v6609_v37, %v6531_v58  ;;  %v8500_v58 = vmul.f32 %v14992_v42, %v16763_v15  ;;  %v16784_v37 = vld [vmem:[#allocation44_spill] sm:$0xff] }
 0x72f   : > { %v6533_v50 = vpop.xlane.xlu0 %6532  ;;  %v15002_v2 = vmul.f32 %v14977_v28, %v16784_v37  ;;  %v10708_v11 = vpop.eup %10707  ;;  %16792 = vst [vmem:[#allocation93_spill] sm:$0xff] %v15020_v35 }
 0x730   : > { %v6611_v4 = vadd.f32 %v6610_v9, %v6533_v50 }
 0x731   : > { %v6547_v39 = vpop.xlane.xlu1 %6546 }
 0x732   : > { %8562 = vadd.xlane.f32.xlu0 %v8498_v34  ;;  %v6612_v47 = vadd.f32 %v6611_v4, %v6535_v46  ;;  %v8502_v46 = vmul.f32 %v15002_v2, %v16784_v37  ;;  %v16786_v34 = vld [vmem:[#allocation54_spill] sm:$0xff]  ;;  %v15011_v4 = vpop.f32.mrb[166].mxu0 }
 0x733   : > { %v6537_v51 = vpop.xlane.xlu0 %6536  ;;  %v15009_v6 = vmul.f32 %v14977_v28, %v16786_v34  ;;  %16788 = vst [vmem:[#allocation112_spill] sm:$0xff] %v15011_v4  ;;  %v15013_v59 = vpop.f32.mrb[167].mxu0 }
 0x734   : > { %v6613_v63 = vadd.f32 %v6612_v47, %v6537_v51  ;;  %16789 = vst [vmem:[#allocation50_spill] sm:$0xff] %v15013_v59  ;;  %v4879_v51 = vmul.f32 0.6931472, %v10708_v11  ;;  %v8506_v11 = vmul.f32 %v15020_v35, %v16791_v26 }
 0x735   : > { %16787 = vst [vmem:[#allocation48_spill] sm:$0xff] %v15009_v6  ;;  %v8504_v23 = vmul.f32 %v15009_v6, %v16786_v34 }
 0x736   : > { %8566 = vadd.xlane.f32.xlu0 %v8500_v58  ;;  %v6614_v9 = vadd.f32 %v6613_v63, %v6539_v24  ;;  %v6551_v63 = vpop.xlane.xlu1 %6550  ;;  %v16790_v58 = vld [vmem:[#allocation69_spill] sm:$0xff] }
 0x737   : > { %v6541_v50 = vpop.xlane.xlu0 %6540  ;;  %v2360_v41 = vsub.f32 %v2355_v36, %v16790_v58  ;;  %v16794_v36 = vld [vmem:[#allocation85_spill] sm:$0xff]  ;;  %vm2370_vm8 = vcmp.ge.f32.partialorder %v16790_v58, %v16785_v62 }
 0x738   : > { %v6615_v15 = vadd.f32 %v6614_v9, %v6541_v50  ;;  %v16793_v50 = vld [vmem:[#allocation62_spill] sm:$0xff] }
 0x739   : > { %v4880_v4 = vadd.f32 %v4879_v51, %v16793_v50  ;;  %vm4894_vm12 = vcmp.ge.f32.partialorder %v16794_v36, %v16793_v50  ;;  %v16795_v51 = vmov 0.0  }
 0x73a   : > { %8570 = vadd.xlane.f32.xlu0 %v8502_v46  ;;  %v6616_v47 = vadd.f32 %v6615_v15, %v6543_v30  ;;  %v2361_v30 = vsel %vm2343_vm10, %v2360_v41, 0.0  ;;  %v6555_v12 = vpop.xlane.xlu1 %6554  ;;  %v9412_v41 = vsel %vm2370_vm8, 1.0, %v16795_v51 }
 0x73b   : > { %v6545_v24 = vpop.xlane.xlu0 %6544  ;;  %v4885_v15 = vsub.f32 %v4880_v4, %v16794_v36  ;;  %v2373_v62 = vsel %vm2343_vm10, %v9412_v41, 0.0 }
 0x73c   : > { %v6617_v14 = vadd.f32 %v6616_v47, %v6545_v24  ;;  %v2362_v47 = vrot.slane %v2361_v30, 4  ;;  %v2374_v50 = vrot.slane %v2373_v62, 4 }
 0x73d   : > { %v4886_v24 = vsel %vm2343_vm10, %v4885_v15, 0.0 }
 0x73e   : > { %8574 = vadd.xlane.f32.xlu0 %v8504_v23  ;;  %v6618_v9 = vadd.f32 %v6617_v14, %v6547_v39  ;;  %v2363_v4 = vadd.f32 %v2362_v47, %v2361_v30  ;;  %v4887_v58 = vrot.slane %v4886_v24, 4 }
 0x73f   : > { %v6549_v59 = vpop.xlane.xlu0 %6548 }
 0x740   : > { %v6619_v46 = vadd.f32 %v6618_v9, %v6549_v59  ;;  %v9579_v59 = vsel %vm4894_vm12, 1.0, %v16795_v51  ;;  %v6559_v9 = vpop.xlane.xlu1 %6558  ;;  %v2364_v36 = vrot.slane %v2363_v4, 2  ;;  %v4888_v16 = vadd.f32 %v4887_v58, %v4886_v24 }
 0x742   : > { %8578 = vadd.xlane.f32.xlu0 %v8506_v11  ;;  %v6620_v31 = vadd.f32 %v6619_v46, %v6551_v63  ;;  %v4897_v11 = vsel %vm2343_vm10, %v9579_v59, 0.0  ;;  %v2365_v35 = vadd.f32 %v2364_v36, %v2363_v4 }
 0x743   : > { %v6553_v14 = vpop.xlane.xlu0 %6552  ;;  %v4898_v52 = vrot.slane %v4897_v11, 4 }
 0x744   : > { %v6621_v39 = vadd.f32 %v6620_v31, %v6553_v14  ;;  %v16796_v31 = vsub.f32 %v14929_v3, %v14931_v10  ;;  %v6563_v30 = vpop.xlane.xlu1 %6562 }
 0x745   : > { %v4899_v59 = vadd.f32 %v4898_v52, %v4897_v11 }
 0x746   : > { %v6622_v23 = vadd.f32 %v6621_v39, %v6555_v12  ;;  %v6243_v14 = vadd.f32 0.0512, %v16796_v31  ;;  %v2375_v39 = vadd.f32 %v2374_v50, %v2373_v62  ;;  %v2366_v31 = vrot.slane %v2365_v35, 1 }
 0x747   : > { %v6557_v0 = vpop.xlane.xlu0 %6556 }
 0x748   : > { %v6623_v63 = vadd.f32 %v6622_v23, %v6557_v0  ;;  %v6634_v41 = vadd.f32 1e-06, %v6243_v14  ;;  %v4889_v0 = vrot.slane %v4888_v16, 2  ;;  %v2376_v10 = vrot.slane %v2375_v39, 2 }
 0x749   : > { %v2367_v36 = vadd.f32 %v2366_v31, %v2365_v35 }
 0x74a   : > { %v6624_v46 = vadd.f32 %v6623_v63, %v6559_v9  ;;  %10709 = vrcp.f32 %v6634_v41  ;;  %v4890_v58 = vadd.f32 %v4889_v0, %v4888_v16  ;;  %v2377_v50 = vadd.f32 %v2376_v10, %v2375_v39 }
 0x74b   : > { %v6561_v15 = vpop.xlane.xlu0 %6560 }
 0x74c   : > { %v6625_v12 = vadd.f32 %v6624_v46, %v6561_v15  ;;  %v4900_v46 = vrot.slane %v4899_v59, 2  ;;  %v4891_v52 = vrot.slane %v4890_v58, 1 }
 0x74e   : > { %v6626_v47 = vadd.f32 %v6625_v12, %v6563_v30  ;;  %v4901_v11 = vadd.f32 %v4900_v46, %v4899_v59  ;;  %v16797_v12 = vld [vmem:[#allocation74_spill] sm:$0xff]  ;;  %v4892_v16 = vadd.f32 %v4891_v52, %v4890_v58  ;;  %v15053_v59 = vsel %vm4131_vm13, 1.0, %v16795_v51 }
 0x74f   : > { %v15039_v6 = vpop.xlane.xlu0 %7372  ;;  %v4129_v30 = vmul.f32 0.1, %v16797_v12  ;;  %16799 = vst [vmem:[#allocation64_spill] sm:$0xff] %v15053_v59  ;;  %v15061_v12 = vsel %vm4135_vm11, 1.0, %v16795_v51 }
 0x750   : > { %v6627_v23 = vrot.slane %v6626_v47, 4  ;;  %v7374_v9 = vsub.f32 %v16756_v5, %v15039_v6  ;;  %v4902_v0 = vrot.slane %v4901_v11, 1  ;;  %v4893_v58 = vmul.f32 0.2, %v4892_v16  ;;  %16801 = vst [vmem:[#allocation39_spill] sm:$0xff] %v15061_v12  ;;  %v16802_v16 = vld [vmem:[#allocation102_spill] sm:$0xff] }
 0x752   : > { %v6628_v63 = vadd.f32 %v6627_v23, %v6626_v47  ;;  %v7375_v3 = vmul.f32 1.442695, %v7374_v9  ;;  %v2378_v23 = vrot.slane %v2377_v50, 1  ;;  %v2369_v9 = vmul.f32 0.2, %v2367_v36 }
 0x753   : > { %v15043_v24 = vpop.xlane.xlu0 %8230  ;;  %v4903_v52 = vadd.f32 %v4902_v0, %v4901_v11 }
 0x754   : > { %v6629_v62 = vrot.slane %v6628_v63, 2  ;;  %10711 = vpow2.f32 %v7375_v3  ;;  %v4130_v35 = vadd.f32 %v4129_v30, %v2369_v9  ;;  %v2379_v36 = vadd.f32 %v2378_v23, %v2377_v50 }
 0x756   : > { %v6630_v4 = vadd.f32 %v6629_v62, %v6628_v63  ;;  %v10710_v63 = vpop.eup %10709  ;;  %v16800_v62 = vld [vmem:[#allocation10_spill] sm:$0xff]  ;;  %v4134_v44 = vmul.f32 %v15053_v59, %v4130_v35 }
 0x757   : > { %v15045_v14 = vpop.xlane.xlu0 %8234 }
 0x758   : > { %v6631_v15 = vrot.slane %v6630_v4, 1 }
 0x75a   : > { %v6632_v47 = vadd.f32 %v6631_v15, %v6630_v4  ;;  %v7383_v4 = vmul.f32 %v16756_v5, %v16800_v62  ;;  %v16804_v62 = vld [vmem:[#allocation103_spill] sm:$0xff] }
 0x75b   : > { %v15048_v41 = vpop.xlane.xlu0 %8236 }
 0x75c   : > { %v6633_v3 = vsub.f32 0.0, %v6632_v47  ;;  %v7384_v9 = vsel %vm2343_vm10, %v7383_v4, 0.0 }
 0x75e   : > { %v10712_v39 = vpop.eup %10711  ;;  %v6636_v10 = vmul.f32 %v10710_v63, %v6633_v3  ;;  %v4138_v3 = vmul.f32 %v15061_v12, %v2379_v36  ;;  %v6640_v63 = vmul.f32 %v15061_v12, %v4903_v52  ;;  %v16805_v36 = vld [vmem:[#allocation55_spill] sm:$0xff]  ;;  %v16806_v52 = vld [vmem:[#allocation129_spill] sm:$0xff]  ;;  %v15134_v12 = vmul.f32 %v14977_v28, %v14919_v17 }
 0x75f   : > { %v15055_v31 = vpop.xlane.xlu0 %8240  ;;  %v7377_v46 = vsel %vm2343_vm10, %v10712_v39, 0.0  ;;  %v16814_v17 = vld [vmem:[#allocation115_spill] sm:$0xff] }
 0x760   : > { %v6637_v15 = vmul.f32 0.1, %v6636_v10  ;;  %7378 = vadd.xlane.f32.xlu1 %v7377_v46  ;;  %v4139_v50 = vadd.f32 %v4138_v3, %v4134_v44  ;;  %16812 = vst [vmem:[#allocation47_spill] sm:$0xff] %v15134_v12 }
 0x762   : > { %v6638_v30 = vadd.f32 %v6637_v15, %v4893_v58 }
 0x763   : > { %v15064_v47 = vpop.xlane.xlu0 %8244 }
 0x764   : > { %v6639_v5 = vmul.f32 %v15053_v59, %v6638_v30  ;;  %7385 = vadd.xlane.f32.xlu1 %v7384_v9 }
 0x766   : > { %v6641_v11 = vadd.f32 %v6640_v63, %v6639_v5 }
 0x767   : > { %v15070_v23 = vpop.xlane.xlu0 %8248 }
 0x768   : > { %8232 = vadd.xlane.f32.xlu1 %v16802_v16  ;;  %v15073_v0 = vsel %vm9159_vm5, %v4139_v50, %v6641_v11 }
 0x769   : > { %16803 = vst [vmem:[#allocation58_spill] sm:$0xff] %v15073_v0 }
 0x76b   : > { %v15075_v39 = vpop.xlane.xlu0 %8252 }
 0x76c   : > { %8238 = vadd.xlane.f32.xlu1 %v16784_v37 }
 0x76f   : > { %v15078_v35 = vpop.xlane.xlu0 %8256 }
 0x770   : > { %8242 = vadd.xlane.f32.xlu1 %v16786_v34 }
 0x773   : > { %v15081_v10 = vpop.xlane.xlu0 %8260 }
 0x774   : > { %8246 = vadd.xlane.f32.xlu1 %v16791_v26 }
 0x777   : > { %v15084_v46 = vpop.xlane.xlu0 %8264 }
 0x778   : > { %8250 = vadd.xlane.f32.xlu1 %v16804_v62 }
 0x77b   : > { %v15087_v4 = vpop.xlane.xlu0 %8268 }
 0x77c   : > { %8254 = vadd.xlane.f32.xlu1 %v16805_v36 }
 0x77f   : > { %v15090_v58 = vpop.xlane.xlu0 %8272 }
 0x780   : > { %8258 = vadd.xlane.f32.xlu1 %v16806_v52 }
 0x783   : > { %v15093_v37 = vpop.xlane.xlu0 %8276 }
 0x784   : > { %8262 = vadd.xlane.f32.xlu1 %v14751_v13 }
 0x787   : > { %v15096_v34 = vpop.xlane.xlu0 %8280 }
 0x788   : > { %8266 = vadd.xlane.f32.xlu1 %v14766_v21 }
 0x78b   : > { %v15099_v26 = vpop.xlane.xlu0 %8284 }
 0x78c   : > { %8270 = vadd.xlane.f32.xlu1 %v14783_v7 }
 0x78f   : > { %v15102_v15 = vpop.xlane.xlu0 %8288 }
 0x790   : > { %8274 = vadd.xlane.f32.xlu1 %v14798_v60 }
 0x793   : > { %v15105_v44 = vpop.xlane.xlu0 %8292 }
 0x794   : > { %8278 = vadd.xlane.f32.xlu1 %v14815_v33 }
 0x797   : > { %v15108_v30 = vpop.xlane.xlu0 %8296 }
 0x798   : > { %8282 = vadd.xlane.f32.xlu1 %v14830_v49 }
 0x79b   : > { %v15111_v9 = vpop.xlane.xlu0 %8300 }
 0x79c   : > { %8286 = vadd.xlane.f32.xlu1 %v14847_v32 }
 0x79f   : > { %v15114_v3 = vpop.xlane.xlu0 %8304 }
 0x7a0   : > { %8290 = vadd.xlane.f32.xlu1 %v14862_v48 }
 0x7a3   : > { %v15117_v63 = vpop.xlane.xlu0 %8308 }
 0x7a4   : > { %16807 = vst [vmem:[#allocation63_spill] sm:$0xff] %v15117_v63  ;;  %8294 = vadd.xlane.f32.xlu1 %v14872_v29 }
 0x7a7   : > { %v15120_v5 = vpop.xlane.xlu0 %8312 }
 0x7a8   : > { %16808 = vst [vmem:[#allocation43_spill] sm:$0xff] %v15120_v5  ;;  %8298 = vadd.xlane.f32.xlu1 %v14881_v56 }
 0x7ab   : > { %v15123_v50 = vpop.xlane.xlu0 %8316 }
 0x7ac   : > { %16809 = vst [vmem:[#allocation70_spill] sm:$0xff] %v15123_v50  ;;  %8302 = vadd.xlane.f32.xlu1 %v14889_v45 }
 0x7af   : > { %v15126_v11 = vpop.xlane.xlu0 %8320 }
 0x7b0   : > { %16810 = vst [vmem:[#allocation120_spill] sm:$0xff] %v15126_v11  ;;  %8306 = vadd.xlane.f32.xlu1 %v14895_v8  ;;  %v8166_v11 = vmul.f32 %v14977_v28, %v16814_v17 }
 0x7b3   : > { %v15129_v0 = vpop.xlane.xlu0 %8324 }
 0x7b4   : > { %16811 = vst [vmem:[#allocation45_spill] sm:$0xff] %v15129_v0  ;;  %8310 = vadd.xlane.f32.xlu1 %v14900_v19  ;;  %v8164_v0 = vmul.f32 %v14977_v28, %v16802_v16 }
 0x7b7   : > { %v8329_v59 = vpop.xlane.xlu0 %8328 }
 0x7b8   : > { %v8407_v5 = vmul.f32 0.2, %v8329_v59  ;;  %8314 = vadd.xlane.f32.xlu1 %v14904_v22  ;;  %v8499_v59 = vmul.f32 %v16802_v16, %v8164_v0  ;;  %v15161_v16 = vmul.f32 %v14977_v28, %v16767_v25 }
 0x7ba   : > { %v15138_v50 = vsub.f32 %v15134_v12, %v8407_v5  ;;  %v8501_v5 = vmul.f32 %v16814_v17, %v8166_v11  ;;  %v15153_v12 = vmul.f32 %v14977_v28, %v16766_v20  ;;  %v15165_v17 = vsel %vm8227_vm6, 1.0, %v16795_v51 }
 0x7bc   : > { %16813 = vst [vmem:[#allocation80_spill] sm:$0xff] %v15138_v50  ;;  %8318 = vadd.xlane.f32.xlu1 %v14908_v57  ;;  %v8358_v50 = vmul.f32 0.2, %v15043_v24 }
 0x7c0   : > { %8322 = vadd.xlane.f32.xlu1 %v14916_v43  ;;  %v8505_v43 = vmul.f32 %v16767_v25, %v15161_v16 }
 0x7c4   : > { %8326 = vadd.xlane.f32.xlu1 %v14921_v40  ;;  %v8503_v40 = vmul.f32 %v16766_v20, %v15153_v12 }
 0x7c8   : > { %8330 = vadd.xlane.f32.xlu1 %v14949_v55 }
 0x7cc   : > { %8334 = vadd.xlane.f32.xlu1 %v14955_v53 }
 0x7d0   : > { %8564 = vadd.xlane.f32.xlu1 %v8499_v59  ;;  %v8761_v59 = vsub.f32 %v14984_v61, %v8358_v50  ;;  %v15178_v61 = vmul.f32 %v14977_v28, %v16804_v62  ;;  %v15190_v50 = vmul.f32 %v14977_v28, %v16805_v36 }
 0x7d2   : > { %v8825_v24 = vmul.f32 %v15165_v17, %v8761_v59 }
 0x7d4   : > { %8568 = vadd.xlane.f32.xlu1 %v8501_v5  ;;  %v15172_v5 = vmul.f32 %v14977_v28, %v16815_v27  ;;  %v8889_v20 = vmul.f32 %v8825_v24, %v8761_v59  ;;  %v8510_v24 = vmul.f32 %v15190_v50, %v16805_v36 }
 0x7d6   : > { %v8507_v57 = vmul.f32 %v16815_v27, %v15172_v5 }
 0x7d8   : > { %8572 = vadd.xlane.f32.xlu1 %v8503_v40  ;;  %v15182_v40 = vmul.f32 %v14977_v28, %v16769_v54 }
 0x7da   : > { %v8509_v25 = vmul.f32 %v16769_v54, %v15182_v40  ;;  %v15201_v54 = vmul.f32 %v14977_v28, %v16806_v52 }
 0x7dc   : > { %8576 = vadd.xlane.f32.xlu1 %v8505_v43  ;;  %v8508_v43 = vmul.f32 %v15178_v61, %v16804_v62  ;;  %v8512_v36 = vmul.f32 %v15201_v54, %v16806_v52 }
 0x7e0   : > { %8953 = vadd.xlane.f32.xlu1 %v8889_v20  ;;  %v8360_v20 = vmul.f32 0.2, %v15045_v14 }
 0x7e2   : > { %v8763_v51 = vsub.f32 %v14992_v42, %v8360_v20 }
 0x7e4   : > { %8580 = vadd.xlane.f32.xlu1 %v8507_v57  ;;  %v8176_v57 = vmul.f32 %v14977_v28, %v16770_v18  ;;  %v8827_v42 = vmul.f32 %v15165_v17, %v8763_v51 }
 0x7e6   : > { %v8511_v62 = vmul.f32 %v16770_v18, %v8176_v57  ;;  %v8361_v18 = vmul.f32 0.2, %v15048_v41 }
 0x7e8   : > { %8582 = vadd.xlane.f32.xlu1 %v8508_v43  ;;  %v8764_v20 = vsub.f32 %v8166_v11, %v8361_v18  ;;  %v15238_v18 = vmul.f32 %v14977_v28, %v14766_v21 }
 0x7ec   : > { %8584 = vadd.xlane.f32.xlu1 %v8509_v25  ;;  %v15206_v25 = vmul.f32 %v14977_v28, %v16771_v38 }
 0x7ed   : > { %v7379_v59 = vpop.xlane.xlu1 %7378 }
 0x7ee   : > { %10713 = vlog2.f32 %v7379_v59  ;;  %v8513_v14 = vmul.f32 %v16771_v38, %v15206_v25  ;;  %v15227_v38 = vmul.f32 %v14977_v28, %v14748_v1 }
 0x7f0   : > { %8586 = vadd.xlane.f32.xlu1 %v8510_v24  ;;  %v8515_v11 = vmul.f32 %v14748_v1, %v15227_v38  ;;  %v8516_v1 = vmul.f32 %v15238_v18, %v14766_v21 }
 0x7f1   : > { %v15196_v27 = vpop.xlane.xlu1 %7385 }
 0x7f2   : > { %vm7396_vm7 = vcmp.ge.f32.partialorder %v15196_v27, %v15039_v6 }
 0x7f4   : > { %8588 = vadd.xlane.f32.xlu1 %v8511_v62  ;;  %v15216_v62 = vmul.f32 %v14977_v28, %v14751_v13 }
 0x7f5   : > { %v8233_v43 = vpop.xlane.xlu1 %8232 }
 0x7f6   : > { %v8359_v59 = vmul.f32 0.2, %v8233_v43 }
 0x7f8   : > { %v10714_v24 = vpop.eup %10713  ;;  %v8762_v22 = vsub.f32 %v8164_v0, %v8359_v59  ;;  %8590 = vadd.xlane.f32.xlu1 %v8512_v36  ;;  %v8514_v59 = vmul.f32 %v15216_v62, %v14751_v13 }
 0x7f9   : > { %v7381_v19 = vmul.f32 0.6931472, %v10714_v24  ;;  %v8239_v63 = vpop.xlane.xlu1 %8238  ;;  %v8363_v24 = vmul.f32 0.2, %v15055_v31 }
 0x7fa   : > { %v8826_v8 = vmul.f32 %v15165_v17, %v8762_v22  ;;  %v8362_v41 = vmul.f32 0.2, %v8239_v63 }
 0x7fb   : > { %v15220_v52 = vadd.f32 %v7381_v19, %v15039_v6  ;;  %v8828_v19 = vmul.f32 %v15165_v17, %v8764_v20  ;;  %v8766_v13 = vsub.f32 %v15153_v12, %v8363_v24  ;;  %v8365_v12 = vmul.f32 0.2, %v15064_v47 }
 0x7fc   : > { %8592 = vadd.xlane.f32.xlu1 %v8513_v14  ;;  %v8890_v0 = vmul.f32 %v8826_v8, %v8762_v22  ;;  %v8765_v63 = vsub.f32 %v15002_v2, %v8362_v41  ;;  %v8891_v8 = vmul.f32 %v8827_v42, %v8763_v51  ;;  %v16816_v2 = vld [vmem:[#allocation79_spill] sm:$0xff]  ;;  %v8371_v42 = vmul.f32 0.2, %v15078_v35 }
 0x7fd   : > { %v8243_v36 = vpop.xlane.xlu1 %8242  ;;  %v8892_v31 = vmul.f32 %v8828_v19, %v8764_v20  ;;  %v15244_v51 = vmul.f32 %v14977_v28, %v16816_v2  ;;  %v8830_v41 = vmul.f32 %v15165_v17, %v8766_v13  ;;  %v8768_v35 = vsub.f32 %v15161_v16, %v8365_v12 }
 0x7fe   : > { %8955 = vadd.xlane.f32.xlu0 %v8890_v0  ;;  %v8829_v14 = vmul.f32 %v15165_v17, %v8765_v63  ;;  %v8364_v0 = vmul.f32 0.2, %v8243_v36  ;;  %v8774_v21 = vsub.f32 %v8176_v57, %v8371_v42  ;;  %v16818_v57 = vld [vmem:[#allocation93_spill] sm:$0xff] }
 0x7ff   : > { %v8517_v19 = vmul.f32 %v16816_v2, %v15244_v51  ;;  %v8894_v47 = vmul.f32 %v8830_v41, %v8766_v13  ;;  %v8832_v2 = vmul.f32 %v15165_v17, %v8768_v35 }
 0x800   : > { %8594 = vadd.xlane.f32.xlu1 %v8514_v59  ;;  %v16817_v59 = vld [vmem:[#allocation48_spill] sm:$0xff]  ;;  %v8893_v36 = vmul.f32 %v8829_v14, %v8765_v63  ;;  %v8838_v14 = vmul.f32 %v15165_v17, %v8774_v21 }
 0x801   : > { %v8247_v22 = vpop.xlane.xlu1 %8246  ;;  %v8767_v24 = vsub.f32 %v16817_v59, %v8364_v0 }
 0x802   : > { %8957 = vadd.xlane.f32.xlu0 %v8891_v8  ;;  %v15256_v8 = vmul.f32 %v14977_v28, %v14783_v7  ;;  %v8902_v13 = vmul.f32 %v8838_v14, %v8774_v21  ;;  %v8369_v21 = vmul.f32 0.2, %v15075_v39 }
 0x804   : > { %8596 = vadd.xlane.f32.xlu1 %v8515_v11  ;;  %v8831_v11 = vmul.f32 %v15165_v17, %v8767_v24  ;;  %v8518_v63 = vmul.f32 %v15256_v8, %v14783_v7 }
 0x805   : > { %v8251_v43 = vpop.xlane.xlu1 %8250 }
 0x806   : > { %8959 = vadd.xlane.f32.xlu0 %v8892_v31  ;;  %v8366_v31 = vmul.f32 0.2, %v8247_v22  ;;  %v8895_v16 = vmul.f32 %v8831_v11, %v8767_v24  ;;  %v8373_v22 = vmul.f32 0.2, %v15081_v10  ;;  %v8368_v59 = vmul.f32 0.2, %v8251_v43 }
 0x807   : > { %v16819_v11 = vld [vmem:[#allocation111_spill] sm:$0xff] }
 0x808   : > { %8598 = vadd.xlane.f32.xlu1 %v8516_v1  ;;  %v8367_v1 = vmul.f32 0.2, %v15070_v23  ;;  %v8769_v42 = vsub.f32 %v16818_v57, %v8366_v31  ;;  %v15275_v23 = vmul.f32 %v14977_v28, %v14798_v60  ;;  %v8776_v24 = vsub.f32 %v15206_v25, %v8373_v22 }
 0x809   : > { %v8255_v20 = vpop.xlane.xlu1 %8254  ;;  %v8772_v25 = vsub.f32 %v15182_v40, %v8369_v21  ;;  %v15298_v40 = vmul.f32 %v14977_v28, %v14815_v33  ;;  %v16821_v21 = vld [vmem:[#allocation66_spill] sm:$0xff] }
 0x80a   : > { %8961 = vadd.xlane.f32.xlu0 %v8893_v36  ;;  %v8770_v41 = vsub.f32 %v15172_v5, %v8367_v1  ;;  %v8833_v7 = vmul.f32 %v15165_v17, %v8769_v42  ;;  %v8896_v36 = vmul.f32 %v8832_v2, %v8768_v35  ;;  %v8771_v5 = vsub.f32 %v15178_v61, %v8368_v59 }
 0x80b   : > { %v8520_v35 = vmul.f32 %v15275_v23, %v14798_v60  ;;  %v8370_v14 = vmul.f32 0.2, %v8255_v20  ;;  %v8375_v61 = vmul.f32 0.2, %v15084_v46  ;;  %v8836_v57 = vmul.f32 %v15165_v17, %v8772_v25  ;;  %v16820_v46 = vld [vmem:[#allocation22_spill] sm:$0xff] }
 0x80c   : > { %8600 = vadd.xlane.f32.xlu1 %v8517_v19  ;;  %v8834_v10 = vmul.f32 %v15165_v17, %v8770_v41  ;;  %v8897_v43 = vmul.f32 %v8833_v7, %v8769_v42 }
 0x80d   : > { %v8259_v0 = vpop.xlane.xlu1 %8258  ;;  %v8773_v60 = vsub.f32 %v15190_v50, %v8370_v14  ;;  %v8778_v20 = vsub.f32 %v15227_v38, %v8375_v61  ;;  %v8522_v50 = vmul.f32 %v15298_v40, %v14815_v33  ;;  %v8377_v38 = vmul.f32 0.2, %v15087_v4 }
 0x80e   : > { %8963 = vadd.xlane.f32.xlu0 %v8894_v47  ;;  %v8840_v47 = vmul.f32 %v15165_v17, %v8776_v24  ;;  %v8898_v39 = vmul.f32 %v8834_v10, %v8770_v41  ;;  %v8372_v59 = vmul.f32 0.2, %v8259_v0  ;;  %v15318_v33 = vmul.f32 %v14977_v28, %v14830_v49 }
 0x80f   : > { %v8837_v22 = vmul.f32 %v15165_v17, %v8773_v60  ;;  %v8842_v7 = vmul.f32 %v15165_v17, %v8778_v20  ;;  %v8780_v0 = vsub.f32 %v15244_v51, %v8377_v38 }
 0x810   : > { %8602 = vadd.xlane.f32.xlu1 %v8518_v63  ;;  %v8835_v63 = vmul.f32 %v15165_v17, %v8771_v5  ;;  %v8904_v1 = vmul.f32 %v8840_v47, %v8776_v24  ;;  %v16822_v47 = vld [vmem:[#allocation116_spill] sm:$0xff] }
 0x811   : > { %v15266_v12 = vpop.xlane.xlu1 %8262  ;;  %v8906_v10 = vmul.f32 %v8842_v7, %v8778_v20 }
 0x812   : > { %8965 = vadd.xlane.f32.xlu0 %v8895_v16  ;;  %v8899_v42 = vmul.f32 %v8835_v63, %v8771_v5  ;;  %v8184_v5 = vmul.f32 %v14977_v28, %v16821_v21  ;;  %v16823_v63 = vld [vmem:[#allocation21_spill] sm:$0xff]  ;;  %v8374_v61 = vmul.f32 0.2, %v15266_v12 }
 0x814   : > { %8979 = vadd.xlane.f32.xlu1 %v8902_v13  ;;  %v8900_v13 = vmul.f32 %v8836_v57, %v8772_v25  ;;  %v8519_v4 = vmul.f32 %v16821_v21, %v8184_v5  ;;  %v8379_v57 = vmul.f32 0.2, %v15090_v58 }
 0x815   : > { %v15271_v19 = vpop.xlane.xlu1 %8266 }
 0x816   : > { %8967 = vadd.xlane.f32.xlu0 %v8896_v36  ;;  %v8901_v36 = vmul.f32 %v8837_v22, %v8773_v60  ;;  %v8777_v22 = vsub.f32 %v15216_v62, %v8374_v61  ;;  %v8782_v12 = vsub.f32 %v8184_v5, %v8379_v57 }
 0x818   : > { %8338 = vadd.xlane.f32.xlu1 %v16819_v11  ;;  %v8841_v58 = vmul.f32 %v15165_v17, %v8777_v22  ;;  %v8846_v38 = vmul.f32 %v15165_v17, %v8782_v12 }
 0x819   : > { %v15282_v31 = vpop.xlane.xlu1 %8270 }
 0x81a   : > { %8969 = vadd.xlane.f32.xlu0 %v8897_v43  ;;  %v8775_v43 = vsub.f32 %v15201_v54, %v8372_v59  ;;  %v8524_v54 = vmul.f32 %v15318_v33, %v14830_v49  ;;  %v16826_v59 = vld [vmem:[#allocation95_spill] sm:$0xff]  ;;  %v8905_v21 = vmul.f32 %v8841_v58, %v8777_v22 }
 0x81c   : > { %8606 = vadd.xlane.f32.xlu1 %v8520_v35  ;;  %v8839_v25 = vmul.f32 %v15165_v17, %v8775_v43 }
 0x81d   : > { %v15289_v2 = vpop.xlane.xlu1 %8274 }
 0x81e   : > { %8971 = vadd.xlane.f32.xlu0 %v8898_v39  ;;  %v8844_v39 = vmul.f32 %v15165_v17, %v8780_v0  ;;  %v8903_v51 = vmul.f32 %v8839_v25, %v8775_v43  ;;  %v8381_v43 = vmul.f32 0.2, %v15093_v37 }
 0x820   : > { %8983 = vadd.xlane.f32.xlu1 %v8904_v1  ;;  %v8908_v60 = vmul.f32 %v8844_v39, %v8780_v0  ;;  %v8910_v0 = vmul.f32 %v8846_v38, %v8782_v12  ;;  %v15363_v39 = vmul.f32 %v14977_v28, %v14862_v48  ;;  %v8383_v12 = vmul.f32 0.2, %v15096_v34 }
 0x821   : > { %v15294_v16 = vpop.xlane.xlu1 %8278 }
 0x822   : > { %8973 = vadd.xlane.f32.xlu0 %v8899_v42  ;;  %v16824_v42 = vld [vmem:[#allocation123_spill] sm:$0xff]  ;;  %v8382_v61 = vmul.f32 0.2, %v15294_v16  ;;  %v8378_v16 = vmul.f32 0.2, %v15282_v31 }
 0x823   : > { %v8186_v20 = vmul.f32 %v14977_v28, %v16824_v42  ;;  %v8385_v31 = vmul.f32 0.2, %v15099_v26 }
 0x824   : > { %8342 = vadd.xlane.f32.xlu1 %v16820_v46 }
 0x825   : > { %v15303_v41 = vpop.xlane.xlu1 %8282  ;;  %v8521_v7 = vmul.f32 %v16824_v42, %v8186_v20 }
 0x826   : > { %8975 = vadd.xlane.f32.xlu0 %v8900_v13  ;;  %v15341_v13 = vmul.f32 %v14977_v28, %v14847_v32 }
 0x828   : > { %8610 = vadd.xlane.f32.xlu1 %v8522_v50  ;;  %v16825_v50 = vld [vmem:[#allocation11_spill] sm:$0xff]  ;;  %v8526_v62 = vmul.f32 %v15341_v13, %v14847_v32 }
 0x829   : > { %v15308_v24 = vpop.xlane.xlu1 %8286 }
 0x82a   : > { %8977 = vadd.xlane.f32.xlu0 %v8901_v36 }
 0x82c   : > { %8987 = vadd.xlane.f32.xlu1 %v8906_v10  ;;  %v8376_v10 = vmul.f32 0.2, %v15271_v19  ;;  %v8784_v19 = vsub.f32 %v8186_v20, %v8381_v43  ;;  %v8785_v20 = vsub.f32 %v15298_v40, %v8382_v61  ;;  %v16830_v43 = vld [vmem:[#allocation124_spill] sm:$0xff]  ;;  %v8781_v40 = vsub.f32 %v15256_v8, %v8378_v16 }
 0x82d   : > { %v15314_v35 = vpop.xlane.xlu1 %8290  ;;  %v8190_v34 = vmul.f32 %v14977_v28, %v16830_v43  ;;  %v15397_v8 = vmul.f32 %v14977_v28, %v14949_v55 }
 0x82e   : > { %8336 = vadd.xlane.f32.xlu0 %v16822_v47  ;;  %v8848_v22 = vmul.f32 %v15165_v17, %v8784_v19  ;;  %v8849_v38 = vmul.f32 %v15165_v17, %v8785_v20  ;;  %v8845_v61 = vmul.f32 %v15165_v17, %v8781_v40 }
 0x830   : > { %8346 = vadd.xlane.f32.xlu1 %v16823_v63 }
 0x831   : > { %v15325_v14 = vpop.xlane.xlu1 %8294 }
 0x832   : > { %8604 = vadd.xlane.f32.xlu0 %v8519_v4  ;;  %v16827_v4 = vld [vmem:[#allocation65_spill] sm:$0xff] }
 0x833   : > { %v8188_v25 = vmul.f32 %v14977_v28, %v16827_v4 }
 0x834   : > { %8614 = vadd.xlane.f32.xlu1 %v8524_v54  ;;  %v8779_v54 = vsub.f32 %v15238_v18, %v8376_v10  ;;  %v8528_v18 = vmul.f32 %v15363_v39, %v14862_v48  ;;  %v8384_v10 = vmul.f32 0.2, %v15303_v41  ;;  %v8912_v48 = vmul.f32 %v8848_v22, %v8784_v19 }
 0x835   : > { %v15331_v1 = vpop.xlane.xlu1 %8298  ;;  %v8523_v37 = vmul.f32 %v16827_v4, %v8188_v25  ;;  %v8913_v41 = vmul.f32 %v8849_v38, %v8785_v20  ;;  %v8525_v19 = vmul.f32 %v16830_v43, %v8190_v34  ;;  %v8386_v22 = vmul.f32 0.2, %v15308_v24 }
 0x836   : > { %8981 = vadd.xlane.f32.xlu0 %v8903_v51  ;;  %v16828_v51 = vld [vmem:[#allocation125_spill] sm:$0xff]  ;;  %v8843_v57 = vmul.f32 %v15165_v17, %v8779_v54  ;;  %v8380_v20 = vmul.f32 0.2, %v15289_v2  ;;  %v15407_v38 = vmul.f32 %v14977_v28, %v14955_v53  ;;  %v16832_v2 = vld [vmem:[#allocation7_spill] sm:$0xff] }
 0x837   : > { %v8789_v24 = vsub.f32 %v15341_v13, %v8386_v22  ;;  %v16833_v22 = vld [vmem:[#allocation46_spill] sm:$0xff] }
 0x838   : > { %8991 = vadd.xlane.f32.xlu1 %v8908_v60  ;;  %v16829_v60 = vld [vmem:[#allocation50_spill] sm:$0xff] }
 0x839   : > { %v15337_v49 = vpop.xlane.xlu1 %8302 }
 0x83a   : > { %8340 = vadd.xlane.f32.xlu0 %v16825_v50 }
 0x83c   : > { %8350 = vadd.xlane.f32.xlu1 %v16826_v59 }
 0x83d   : > { %v15347_v36 = vpop.xlane.xlu1 %8306 }
 0x83e   : > { %8608 = vadd.xlane.f32.xlu0 %v8521_v7  ;;  %v8907_v7 = vmul.f32 %v8843_v57, %v8779_v54  ;;  %v16831_v54 = vld [vmem:[#allocation40_spill] sm:$0xff] }
 0x840   : > { %8618 = vadd.xlane.f32.xlu1 %v8526_v62  ;;  %v8786_v62 = vsub.f32 %v8188_v25, %v8383_v12  ;;  %v8787_v25 = vsub.f32 %v15318_v33, %v8384_v10  ;;  %v8387_v10 = vmul.f32 0.2, %v15102_v15 }
 0x841   : > { %v15353_v5 = vpop.xlane.xlu1 %8310 }
 0x842   : > { %8985 = vadd.xlane.f32.xlu0 %v8905_v21  ;;  %v15382_v21 = vpop.xlane.xlu0 %8332  ;;  %v8850_v4 = vmul.f32 %v15165_v17, %v8786_v62 }
 0x844   : > { %8995 = vadd.xlane.f32.xlu1 %v8910_v0  ;;  %v8914_v12 = vmul.f32 %v8850_v4, %v8786_v62 }
 0x845   : > { %v15359_v32 = vpop.xlane.xlu1 %8314 }
 0x846   : > { %8344 = vadd.xlane.f32.xlu0 %v16828_v51  ;;  %v8563_v26 = vpop.xlane.xlu0 %8562 }
 0x848   : > { %8354 = vadd.xlane.f32.xlu1 %v16829_v60 }
 0x849   : > { %v15370_v42 = vpop.xlane.xlu1 %8318 }
 0x84a   : > { %8612 = vadd.xlane.f32.xlu0 %v8523_v37  ;;  %v8788_v37 = vsub.f32 %v8190_v34, %v8385_v31  ;;  %v8192_v31 = vmul.f32 %v14977_v28, %v16832_v2  ;;  %v8567_v4 = vpop.xlane.xlu0 %8566 }
 0x84c   : > { %8622 = vadd.xlane.f32.xlu1 %v8528_v18  ;;  %v8851_v18 = vmul.f32 %v15165_v17, %v8787_v25  ;;  %v8852_v43 = vmul.f32 %v15165_v17, %v8788_v37 }
 0x84d   : > { %v15378_v58 = vpop.xlane.xlu1 %8322 }
 0x84e   : > { %8989 = vadd.xlane.f32.xlu0 %v8907_v7  ;;  %v8909_v7 = vmul.f32 %v8845_v61, %v8781_v40  ;;  %v8915_v62 = vmul.f32 %v8851_v18, %v8787_v25  ;;  %v8783_v40 = vsub.f32 %v15275_v23, %v8380_v20  ;;  %v8853_v61 = vmul.f32 %v15165_v17, %v8789_v24  ;;  %v8571_v20 = vpop.xlane.xlu0 %8570 }
 0x84f   : > { %v8916_v25 = vmul.f32 %v8852_v43, %v8788_v37  ;;  %v8527_v18 = vmul.f32 %v16832_v2, %v8192_v31  ;;  %v8389_v23 = vmul.f32 0.2, %v15105_v44  ;;  %v8390_v44 = vmul.f32 0.2, %v15325_v14 }
 0x850   : > { %8999 = vadd.xlane.f32.xlu1 %v8912_v48 }
 0x851   : > { %v15388_v0 = vpop.xlane.xlu1 %8326 }
 0x852   : > { %8348 = vadd.xlane.f32.xlu0 %v16831_v54 }
 0x854   : > { %9001 = vadd.xlane.f32.xlu1 %v8913_v41 }
 0x855   : > { %v8331_v57 = vpop.xlane.xlu1 %8330 }
 0x856   : > { %v8408_v33 = vmul.f32 0.2, %v8331_v57  ;;  %8616 = vadd.xlane.f32.xlu0 %v8525_v19  ;;  %v8790_v19 = vsub.f32 %v8192_v31, %v8387_v10  ;;  %v8388_v57 = vmul.f32 0.2, %v15314_v35  ;;  %v8917_v35 = vmul.f32 %v8853_v61, %v8789_v24 }
 0x858   : > { %v15403_v16 = vsub.f32 %v15397_v8, %v8408_v33  ;;  %9003 = vadd.xlane.f32.xlu1 %v8914_v12  ;;  %v8847_v33 = vmul.f32 %v15165_v17, %v8783_v40  ;;  %v8854_v10 = vmul.f32 %v15165_v17, %v8790_v19 }
 0x859   : > { %v8335_v48 = vpop.xlane.xlu1 %8334 }
 0x85a   : > { %v8410_v34 = vmul.f32 0.2, %v8335_v48  ;;  %8993 = vadd.xlane.f32.xlu0 %v8909_v7  ;;  %v8791_v48 = vsub.f32 %v15363_v39, %v8388_v57  ;;  %v8195_v39 = vmul.f32 %v14977_v28, %v14872_v29 }
 0x85c   : > { %v15416_v41 = vsub.f32 %v15407_v38, %v8410_v34  ;;  %9005 = vadd.xlane.f32.xlu1 %v8915_v62  ;;  %v8911_v62 = vmul.f32 %v8847_v33, %v8783_v40  ;;  %v8391_v40 = vmul.f32 0.2, %v15108_v30 }
 0x85d   : > { %v8565_v15 = vpop.xlane.xlu1 %8564 }
 0x85e   : > { %v8690_v13 = vadd.f32 %v8565_v15, %v8563_v26  ;;  %8352 = vadd.xlane.f32.xlu0 %v16833_v22  ;;  %v16834_v26 = vld [vmem:[#allocation82_spill] sm:$0xff] }
 0x85f   : > { %v8194_v37 = vmul.f32 %v14977_v28, %v16834_v26 }
 0x860   : > { %v8691_v12 = vadd.f32 %v8690_v13, %v8567_v4  ;;  %9007 = vadd.xlane.f32.xlu1 %v8916_v25  ;;  %v8855_v4 = vmul.f32 %v15165_v17, %v8791_v48  ;;  %v8918_v13 = vmul.f32 %v8854_v10, %v8790_v19  ;;  %v8575_v25 = vpop.xlane.xlu0 %8574 }
 0x861   : > { %v8569_v7 = vpop.xlane.xlu1 %8568  ;;  %v8792_v2 = vsub.f32 %v8194_v37, %v8389_v23  ;;  %v8529_v14 = vmul.f32 %v16834_v26, %v8194_v37  ;;  %v8393_v37 = vmul.f32 0.2, %v15111_v9 }
 0x862   : > { %v8692_v34 = vadd.f32 %v8691_v12, %v8569_v7  ;;  %8620 = vadd.xlane.f32.xlu0 %v8527_v18  ;;  %v8793_v18 = vsub.f32 %v8195_v39, %v8390_v44  ;;  %v16835_v12 = vld [vmem:[#allocation112_spill] sm:$0xff]  ;;  %v8919_v23 = vmul.f32 %v8855_v4, %v8791_v48  ;;  %v8197_v48 = vmul.f32 %v14977_v28, %v14881_v56 }
 0x863   : > { %v8856_v61 = vmul.f32 %v15165_v17, %v8792_v2 }
 0x864   : > { %v8693_v43 = vadd.f32 %v8692_v34, %v8571_v20  ;;  %9009 = vadd.xlane.f32.xlu1 %v8917_v35  ;;  %v16836_v20 = vld [vmem:[#allocation68_spill] sm:$0xff]  ;;  %v8857_v34 = vmul.f32 %v15165_v17, %v8793_v18  ;;  %v8392_v35 = vmul.f32 0.2, %v15331_v1  ;;  %v16837_v1 = vld [vmem:[#allocation14_spill] sm:$0xff] }
 0x865   : > { %v8573_v31 = vpop.xlane.xlu1 %8572  ;;  %v8196_v19 = vmul.f32 %v14977_v28, %v16836_v20  ;;  %v8920_v30 = vmul.f32 %v8856_v61, %v8792_v2  ;;  %v8198_v2 = vmul.f32 %v14977_v28, %v16837_v1  ;;  %v8394_v61 = vmul.f32 0.2, %v15337_v49 }
 0x866   : > { %v8694_v15 = vadd.f32 %v8693_v43, %v8573_v31  ;;  %8997 = vadd.xlane.f32.xlu0 %v8911_v62  ;;  %v8579_v43 = vpop.xlane.xlu0 %8578  ;;  %v8530_v62 = vmul.f32 %v8195_v39, %v14872_v29  ;;  %v8795_v44 = vsub.f32 %v8197_v48, %v8392_v35  ;;  %v16838_v35 = vld [vmem:[#allocation90_spill] sm:$0xff] }
 0x867   : > { %v8794_v10 = vsub.f32 %v8196_v19, %v8391_v40  ;;  %v8796_v29 = vsub.f32 %v8198_v2, %v8393_v37  ;;  %v8532_v40 = vmul.f32 %v8197_v48, %v14881_v56  ;;  %v8200_v49 = vmul.f32 %v14977_v28, %v16838_v35  ;;  %v16839_v37 = vld [vmem:[#allocation72_spill] sm:$0xff] }
 0x868   : > { %v8695_v24 = vadd.f32 %v8694_v15, %v8575_v25  ;;  %9011 = vadd.xlane.f32.xlu1 %v8918_v13  ;;  %v8921_v13 = vmul.f32 %v8857_v34, %v8793_v18  ;;  %v8531_v25 = vmul.f32 %v16836_v20, %v8196_v19  ;;  %v8199_v18 = vmul.f32 %v14977_v28, %v14889_v45 }
 0x869   : > { %v8577_v57 = vpop.xlane.xlu1 %8576  ;;  %v8858_v4 = vmul.f32 %v15165_v17, %v8794_v10 }
 0x86a   : > { %v8696_v33 = vadd.f32 %v8695_v24, %v8577_v57  ;;  %8356 = vadd.xlane.f32.xlu0 %v16835_v12  ;;  %v8859_v24 = vmul.f32 %v15165_v17, %v8795_v44  ;;  %v8797_v20 = vsub.f32 %v8199_v18, %v8394_v61 }
 0x86b   : > { %v8922_v57 = vmul.f32 %v8858_v4, %v8794_v10  ;;  %v8533_v10 = vmul.f32 %v16837_v1, %v8198_v2  ;;  %v16840_v4 = vld [vmem:[#allocation63_spill] sm:$0xff] }
 0x86c   : > { %9013 = vadd.xlane.f32.xlu1 %v8919_v23  ;;  %v8697_v26 = vadd.f32 %v8696_v33, %v8579_v43  ;;  %v8395_v33 = vmul.f32 0.2, %v15114_v3  ;;  %v8923_v34 = vmul.f32 %v8859_v24, %v8795_v44  ;;  %v8861_v43 = vmul.f32 %v15165_v17, %v8797_v20 }
 0x86d   : > { %v15438_v7 = vpop.xlane.xlu1 %8953  ;;  %v8397_v44 = vmul.f32 0.2, %v16840_v4 }
 0x86e   : > { %8624 = vadd.xlane.f32.xlu0 %v8529_v14  ;;  %v8860_v14 = vmul.f32 %v15165_v17, %v8796_v29  ;;  %v8798_v56 = vsub.f32 %v8200_v49, %v8395_v33  ;;  %v16842_v33 = vld [vmem:[#allocation91_spill] sm:$0xff] }
 0x870   : > { %9015 = vadd.xlane.f32.xlu1 %v8920_v30  ;;  %v8924_v48 = vmul.f32 %v8860_v14, %v8796_v29  ;;  %v8535_v29 = vmul.f32 %v16838_v35, %v8200_v49  ;;  %v16843_v14 = vld [vmem:[#allocation43_spill] sm:$0xff] }
 0x871   : > { %v8581_v31 = vpop.xlane.xlu1 %8580 }
 0x872   : > { %v8698_v15 = vadd.f32 %v8697_v26, %v8581_v31  ;;  %8626 = vadd.xlane.f32.xlu0 %v8530_v62  ;;  %v8396_v62 = vmul.f32 0.2, %v15347_v36  ;;  %v8534_v26 = vmul.f32 %v8199_v18, %v14889_v45  ;;  %v8201_v31 = vmul.f32 %v14977_v28, %v16839_v37 }
 0x874   : > { %9017 = vadd.xlane.f32.xlu1 %v8921_v13  ;;  %v8862_v13 = vmul.f32 %v15165_v17, %v8798_v56  ;;  %v8799_v1 = vsub.f32 %v8201_v31, %v8396_v62  ;;  %v8536_v18 = vmul.f32 %v8201_v31, %v16839_v37  ;;  %v8400_v37 = vmul.f32 0.2, %v15359_v32 }
 0x875   : > { %v8583_v39 = vpop.xlane.xlu1 %8582 }
 0x876   : > { %v8699_v9 = vadd.f32 %v8698_v15, %v8583_v39  ;;  %8628 = vadd.xlane.f32.xlu0 %v8531_v25  ;;  %v8925_v25 = vmul.f32 %v8861_v43, %v8797_v20  ;;  %v16841_v39 = vld [vmem:[#allocation71_spill] sm:$0xff]  ;;  %v8863_v61 = vmul.f32 %v15165_v17, %v8799_v1  ;;  %v8399_v20 = vmul.f32 0.2, %v16843_v14 }
 0x877   : > { %v8202_v36 = vmul.f32 %v14977_v28, %v16841_v39  ;;  %v8402_v14 = vmul.f32 0.2, %v15370_v42 }
 0x878   : > { %9019 = vadd.xlane.f32.xlu1 %v8922_v57 }
 0x879   : > { %v8585_v23 = vpop.xlane.xlu1 %8584  ;;  %v8800_v45 = vsub.f32 %v8202_v36, %v8397_v44 }
 0x87a   : > { %v8700_v19 = vadd.f32 %v8699_v9, %v8585_v23  ;;  %8630 = vadd.xlane.f32.xlu0 %v8532_v40  ;;  %v8398_v9 = vmul.f32 0.2, %v15353_v5  ;;  %v8926_v40 = vmul.f32 %v8862_v13, %v8798_v56  ;;  %v8203_v23 = vmul.f32 %v14977_v28, %v16842_v33  ;;  %v16845_v13 = vld [vmem:[#allocation83_spill] sm:$0xff] }
 0x87b   : > { %v8537_v56 = vmul.f32 %v16841_v39, %v8202_v36 }
 0x87c   : > { %9021 = vadd.xlane.f32.xlu1 %v8923_v34  ;;  %v8864_v34 = vmul.f32 %v15165_v17, %v8800_v45  ;;  %v8801_v35 = vsub.f32 %v8203_v23, %v8398_v9 }
 0x87d   : > { %v8587_v30 = vpop.xlane.xlu1 %8586 }
 0x87e   : > { %v8701_v3 = vadd.f32 %v8700_v19, %v8587_v30  ;;  %8632 = vadd.xlane.f32.xlu0 %v8533_v10  ;;  %v8927_v10 = vmul.f32 %v8863_v61, %v8799_v1  ;;  %v16844_v30 = vld [vmem:[#allocation77_spill] sm:$0xff]  ;;  %v8928_v4 = vmul.f32 %v8864_v34, %v8800_v45  ;;  %v8205_v1 = vmul.f32 %v14977_v28, %v16845_v13  ;;  %v16847_v61 = vld [vmem:[#allocation78_spill] sm:$0xff] }
 0x87f   : > { %v8204_v5 = vmul.f32 %v14977_v28, %v16844_v30  ;;  %v8206_v45 = vmul.f32 %v14977_v28, %v16847_v61 }
 0x880   : > { %9023 = vadd.xlane.f32.xlu1 %v8924_v48 }
 0x881   : > { %v8589_v15 = vpop.xlane.xlu1 %8588 }
 0x882   : > { %v8702_v2 = vadd.f32 %v8701_v3, %v8589_v15  ;;  %8634 = vadd.xlane.f32.xlu0 %v8534_v26  ;;  %v8802_v3 = vsub.f32 %v8204_v5, %v8399_v20  ;;  %v8865_v26 = vmul.f32 %v15165_v17, %v8801_v35  ;;  %v8538_v15 = vmul.f32 %v8203_v23, %v16842_v33 }
 0x884   : > { %9025 = vadd.xlane.f32.xlu1 %v8925_v25  ;;  %v16846_v25 = vld [vmem:[#allocation70_spill] sm:$0xff]  ;;  %v8866_v36 = vmul.f32 %v15165_v17, %v8802_v3  ;;  %v8929_v32 = vmul.f32 %v8865_v26, %v8801_v35  ;;  %v8540_v35 = vmul.f32 %v8205_v1, %v16845_v13 }
 0x885   : > { %v8591_v24 = vpop.xlane.xlu1 %8590 }
 0x886   : > { %v8703_v57 = vadd.f32 %v8702_v2, %v8591_v24  ;;  %8636 = vadd.xlane.f32.xlu0 %v8535_v29  ;;  %v8803_v29 = vsub.f32 %v8205_v1, %v8400_v37  ;;  %v16850_v37 = vld [vmem:[#allocation86_spill] sm:$0xff] }
 0x888   : > { %9027 = vadd.xlane.f32.xlu1 %v8926_v40  ;;  %v8867_v23 = vmul.f32 %v15165_v17, %v8803_v29 }
 0x889   : > { %v8593_v19 = vpop.xlane.xlu1 %8592 }
 0x88a   : > { %v8704_v49 = vadd.f32 %v8703_v57, %v8593_v19  ;;  %8638 = vadd.xlane.f32.xlu0 %v8536_v18  ;;  %v8539_v57 = vmul.f32 %v16844_v30, %v8204_v5  ;;  %v8930_v19 = vmul.f32 %v8866_v36, %v8802_v3  ;;  %v16849_v30 = vld [vmem:[#allocation120_spill] sm:$0xff]  ;;  %v8931_v42 = vmul.f32 %v8867_v23, %v8803_v29  ;;  %v16851_v29 = vld [vmem:[#allocation94_spill] sm:$0xff] }
 0x88b   : > { %v8956_v43 = vpop.xlane.xlu0 %8955  ;;  %v8403_v5 = vmul.f32 0.2, %v16849_v30  ;;  %v8208_v3 = vmul.f32 %v14977_v28, %v16850_v37  ;;  %v16853_v23 = vld [vmem:[#allocation96_spill] sm:$0xff] }
 0x88c   : > { %v9081_v62 = vadd.f32 %v8956_v43, %v15438_v7  ;;  %9029 = vadd.xlane.f32.xlu1 %v8927_v10  ;;  %v8401_v7 = vmul.f32 0.2, %v16846_v25 }
 0x88d   : > { %v8595_v48 = vpop.xlane.xlu1 %8594 }
 0x88e   : > { %v8705_v31 = vadd.f32 %v8704_v49, %v8595_v48  ;;  %8640 = vadd.xlane.f32.xlu0 %v8537_v56  ;;  %v8804_v18 = vsub.f32 %v8206_v45, %v8401_v7  ;;  %v16848_v49 = vld [vmem:[#allocation99_spill] sm:$0xff] }
 0x88f   : > { %v8958_v44 = vpop.xlane.xlu0 %8957  ;;  %v8207_v10 = vmul.f32 %v14977_v28, %v16848_v49 }
 0x890   : > { %v9082_v2 = vadd.f32 %v9081_v62, %v8958_v44  ;;  %9031 = vadd.xlane.f32.xlu1 %v8928_v4  ;;  %v8868_v62 = vmul.f32 %v15165_v17, %v8804_v18  ;;  %v8541_v4 = vmul.f32 %v16847_v61, %v8206_v45 }
 0x891   : > { %v8597_v39 = vpop.xlane.xlu1 %8596  ;;  %v8805_v48 = vsub.f32 %v8207_v10, %v8402_v14  ;;  %v8542_v36 = vmul.f32 %v8207_v10, %v16848_v49  ;;  %v8210_v14 = vmul.f32 %v14977_v28, %v16853_v23  ;;  %v8406_v49 = vmul.f32 0.2, %v15388_v0 }
 0x892   : > { %v8706_v24 = vadd.f32 %v8705_v31, %v8597_v39  ;;  %8642 = vadd.xlane.f32.xlu0 %v8538_v15  ;;  %v8806_v15 = vsub.f32 %v8208_v3, %v8403_v5  ;;  %v8932_v7 = vmul.f32 %v8868_v62, %v8804_v18  ;;  %v8543_v18 = vmul.f32 %v16850_v37, %v8208_v3  ;;  %v16854_v5 = vld [vmem:[#allocation98_spill] sm:$0xff] }
 0x893   : > { %v8960_v9 = vpop.xlane.xlu0 %8959  ;;  %v8869_v1 = vmul.f32 %v15165_v17, %v8805_v48  ;;  %v8545_v0 = vmul.f32 %v16853_v23, %v8210_v14 }
 0x894   : > { %v9083_v40 = vadd.f32 %v9082_v2, %v8960_v9  ;;  %9033 = vadd.xlane.f32.xlu1 %v8929_v32  ;;  %v8404_v2 = vmul.f32 0.2, %v15378_v58  ;;  %v8870_v45 = vmul.f32 %v15165_v17, %v8806_v15  ;;  %v16852_v9 = vld [vmem:[#allocation45_spill] sm:$0xff] }
 0x895   : > { %v8599_v33 = vpop.xlane.xlu1 %8598  ;;  %v8933_v58 = vmul.f32 %v8869_v1, %v8805_v48 }
 0x896   : > { %v8707_v20 = vadd.f32 %v8706_v24, %v8599_v33  ;;  %8644 = vadd.xlane.f32.xlu0 %v8539_v57  ;;  %v8209_v24 = vmul.f32 %v14977_v28, %v16851_v29  ;;  %v8405_v57 = vmul.f32 0.2, %v16852_v9  ;;  %v8934_v10 = vmul.f32 %v8870_v45, %v8806_v15  ;;  %v16856_v45 = vld [vmem:[#allocation47_spill] sm:$0xff]  ;;  %v16857_v9 = vld [vmem:[#allocation105_spill] sm:$0xff] }
 0x897   : > { %v8962_v34 = vpop.xlane.xlu0 %8961 }
 0x898   : > { %v9084_v43 = vadd.f32 %v9083_v40, %v8962_v34  ;;  %9035 = vadd.xlane.f32.xlu1 %v8930_v19  ;;  %v8807_v40 = vsub.f32 %v8209_v24, %v8404_v2  ;;  %v8808_v34 = vsub.f32 %v8210_v14, %v8405_v57  ;;  %v8544_v30 = vmul.f32 %v8209_v24, %v16851_v29  ;;  %v16860_v14 = vld [vmem:[#allocation35_spill] sm:$0xff] }
 0x899   : > { %v8601_v56 = vpop.xlane.xlu1 %8600  ;;  %v8409_v29 = vmul.f32 0.2, %v15382_v21  ;;  %v8547_v57 = vmul.f32 %v16857_v9, %v16856_v45 }
 0x89a   : > { %v8708_v26 = vadd.f32 %v8707_v20, %v8601_v56  ;;  %8646 = vadd.xlane.f32.xlu0 %v8540_v35  ;;  %v8871_v35 = vmul.f32 %v15165_v17, %v8807_v40  ;;  %v8211_v56 = vmul.f32 %v14977_v28, %v16854_v5 }
 0x89b   : > { %v8964_v31 = vpop.xlane.xlu0 %8963 }
 0x89c   : > { %v9085_v44 = vadd.f32 %v9084_v43, %v8964_v31  ;;  %9037 = vadd.xlane.f32.xlu1 %v8931_v42  ;;  %v8809_v42 = vsub.f32 %v8211_v56, %v8406_v49  ;;  %v8935_v37 = vmul.f32 %v8871_v35, %v8807_v40  ;;  %v8546_v1 = vmul.f32 %v8211_v56, %v16854_v5  ;;  %v16858_v40 = vld [vmem:[#allocation107_spill] sm:$0xff]  ;;  %v16862_v49 = vld [vmem:[#allocation34_spill] sm:$0xff] }
 0x89d   : > { %v8603_v13 = vpop.xlane.xlu1 %8602 }
 0x89e   : > { %v15503_v25 = vadd.f32 %v8708_v26, %v8603_v13  ;;  %8648 = vadd.xlane.f32.xlu0 %v8541_v4  ;;  %v8872_v26 = vmul.f32 %v15165_v17, %v8808_v34 }
 0x89f   : > { %v8966_v39 = vpop.xlane.xlu0 %8965 }
 0x8a0   : > { %v9086_v32 = vadd.f32 %v9085_v44, %v8966_v39  ;;  %9039 = vadd.xlane.f32.xlu1 %v8932_v7  ;;  %v8873_v44 = vmul.f32 %v15165_v17, %v8809_v42  ;;  %v8936_v15 = vmul.f32 %v8872_v26, %v8808_v34  ;;  %v16855_v39 = vld [vmem:[#allocation80_spill] sm:$0xff] }
 0x8a1   : > { %v15508_v61 = vpop.xlane.xlu1 %8979  ;;  %v16861_v34 = vld [vmem:[#allocation24_spill] sm:$0xff] }
 0x8a2   : > { %8650 = vadd.xlane.f32.xlu0 %v8542_v36  ;;  %v8874_v36 = vmul.f32 %v15165_v17, %v16855_v39  ;;  %v8937_v24 = vmul.f32 %v8873_v44, %v8809_v42  ;;  %v8426_v21 = vmul.f32 %v16861_v34, %v16861_v34  ;;  %v16863_v42 = vld [vmem:[#allocation25_spill] sm:$0xff] }
 0x8a3   : > { %v8968_v33 = vpop.xlane.xlu0 %8967 }
 0x8a4   : > { %v9087_v20 = vadd.f32 %v9086_v32, %v8968_v33  ;;  %9041 = vadd.xlane.f32.xlu1 %v8933_v58  ;;  %v8214_v58 = vmul.f32 %v14977_v28, %v16858_v40  ;;  %v8938_v5 = vmul.f32 %v8874_v36, %v16855_v39  ;;  %v16866_v39 = vld [vmem:[#allocation36_spill] sm:$0xff] }
 0x8a5   : > { %v15515_v19 = vpop.xlane.xlu1 %8338  ;;  %v8425_v36 = vmul.f32 %v16866_v39, %v16866_v39 }
 0x8a6   : > { %8652 = vadd.xlane.f32.xlu0 %v8543_v18  ;;  %v16859_v18 = vld [vmem:[#allocation12_spill] sm:$0xff] }
 0x8a7   : > { %v8970_v43 = vpop.xlane.xlu0 %8969  ;;  %v8422_v23 = vmul.f32 %v16859_v18, %v16859_v18 }
 0x8a8   : > { %v9088_v62 = vadd.f32 %v9087_v20, %v8970_v43  ;;  %9043 = vadd.xlane.f32.xlu1 %v8934_v10  ;;  %v8423_v20 = vmul.f32 %v16860_v14, %v16860_v14  ;;  %v8427_v10 = vmul.f32 %v16862_v49, %v16862_v49  ;;  %v8812_v43 = vsub.f32 %v8214_v58, %v8409_v29  ;;  %v16867_v29 = vld [vmem:[#allocation13_spill] sm:$0xff] }
 0x8a9   : > { %v15522_v48 = vpop.xlane.xlu1 %8606  ;;  %v8462_v44 = vsel %vm2043_vm0, %v8426_v21, %v8422_v23  ;;  %v16870_v23 = vld [vmem:[#allocation27_spill] sm:$0xff] }
 0x8aa   : > { %8654 = vadd.xlane.f32.xlu0 %v8544_v30  ;;  %v8875_v30 = vmul.f32 %v15165_v17, %v15403_v16  ;;  %v8432_v14 = vmul.f32 %v16870_v23, %v16870_v23 }
 0x8ab   : > { %v8972_v3 = vpop.xlane.xlu0 %8971 }
 0x8ac   : > { %v9089_v31 = vadd.f32 %v9088_v62, %v8972_v3  ;;  %9045 = vadd.xlane.f32.xlu1 %v8935_v37  ;;  %v8548_v62 = vmul.f32 %v15397_v8, %v14949_v55  ;;  %v8430_v37 = vmul.f32 %v16863_v42, %v16863_v42  ;;  %v16864_v3 = vld [vmem:[#allocation23_spill] sm:$0xff]  ;;  %v8466_v55 = vsel %vm2043_vm0, %v8427_v10, %v8423_v20  ;;  %v16865_v8 = vld [vmem:[#allocation26_spill] sm:$0xff] }
 0x8ad   : > { %v15526_v4 = vpop.xlane.xlu1 %8983  ;;  %v16871_v20 = vld [vmem:[#allocation18_spill] sm:$0xff] }
 0x8ae   : > { %8656 = vadd.xlane.f32.xlu0 %v8545_v0  ;;  %v8431_v0 = vmul.f32 %v16864_v3, %v16864_v3  ;;  %v8435_v34 = vmul.f32 %v16871_v20, %v16871_v20  ;;  %v8463_v49 = vsel %vm2045_vm1, %v8430_v37, %v8462_v44  ;;  %v16874_v3 = vld [vmem:[#allocation19_spill] sm:$0xff]  ;;  %v8550_v44 = vmul.f32 %v15407_v38, %v14955_v53 }
 0x8af   : > { %v8974_v13 = vpop.xlane.xlu0 %8973 }
 0x8b0   : > { %v9090_v2 = vadd.f32 %v9089_v31, %v8974_v13  ;;  %9047 = vadd.xlane.f32.xlu1 %v8936_v15  ;;  %v8876_v15 = vmul.f32 %v15165_v17, %v8812_v43  ;;  %v8467_v10 = vsel %vm2045_vm1, %v8431_v0, %v8466_v55  ;;  %v16876_v55 = vld [vmem:[#allocation28_spill] sm:$0xff] }
 0x8b1   : > { %v15530_v7 = vpop.xlane.xlu1 %8342 }
 0x8b2   : > { %8658 = vadd.xlane.f32.xlu0 %v8546_v1  ;;  %v8939_v1 = vmul.f32 %v8875_v30, %v15403_v16  ;;  %v8549_v16 = vmul.f32 %v16858_v40, %v8214_v58  ;;  %v8877_v40 = vmul.f32 %v15165_v17, %v15416_v41  ;;  %v8412_v58 = vmul.f32 0.2, %v15515_v19 }
 0x8b3   : > { %v8976_v32 = vpop.xlane.xlu0 %8975  ;;  %v8217_v19 = vmul.f32 %v14977_v28, %v16819_v11 }
 0x8b4   : > { %v9091_v33 = vadd.f32 %v9090_v2, %v8976_v32  ;;  %9049 = vadd.xlane.f32.xlu1 %v8937_v24  ;;  %v8424_v2 = vmul.f32 %v16865_v8, %v16865_v8  ;;  %v8428_v24 = vmul.f32 %v16867_v29, %v16867_v29  ;;  %v16868_v32 = vld [vmem:[#allocation17_spill] sm:$0xff]  ;;  %v8436_v8 = vmul.f32 %v16876_v55, %v16876_v55 }
 0x8b5   : > { %v15545_v35 = vpop.xlane.xlu1 %8610  ;;  %v8429_v45 = vmul.f32 %v16868_v32, %v16868_v32  ;;  %v8468_v29 = vsel %vm16877_vm14, %v8435_v34, %v8467_v10  ;;  %v8941_v38 = vmul.f32 %v8877_v40, %v15416_v41  ;;  %v16883_v40 = vld [vmem:[#allocation32_spill] sm:$0xff] }
 0x8b6   : > { %8660 = vadd.xlane.f32.xlu0 %v8547_v57  ;;  %v16869_v57 = vld [vmem:[#allocation15_spill] sm:$0xff]  ;;  %v8470_v0 = vsel %vm2043_vm0, %v8428_v24, %v8424_v2  ;;  %v8815_v24 = vsub.f32 %v8217_v19, %v8412_v58  ;;  %v8441_v58 = vmul.f32 %v16883_v40, %v16883_v40 }
 0x8b7   : > { %v8978_v56 = vpop.xlane.xlu0 %8977  ;;  %v8474_v2 = vsel %vm2043_vm0, %v8429_v45, %v8425_v36  ;;  %vm16881_vm0 = vmmov %vm16880_vm4 }
 0x8b8   : > { %v9092_v26 = vadd.f32 %v9091_v33, %v8978_v56  ;;  %9051 = vadd.xlane.f32.xlu1 %v8938_v5  ;;  %v8216_v33 = vmul.f32 %v14977_v28, %v16822_v47  ;;  %v8940_v5 = vmul.f32 %v8876_v15, %v8812_v43  ;;  %v16872_v56 = vld [vmem:[#allocation37_spill] sm:$0xff]  ;;  %v8879_v34 = vmul.f32 %v15165_v17, %v8815_v24  ;;  %vm16886_vm3 = vmmov %vm16881_vm0 }
 0x8b9   : > { %v15558_v31 = vpop.xlane.xlu1 %8987 }
 0x8ba   : > { %v9093_v13 = vadd.f32 %v9092_v26, %v15508_v61  ;;  %8662 = vadd.xlane.f32.xlu0 %v8548_v62  ;;  %v8434_v61 = vmul.f32 %v16869_v57, %v16869_v57  ;;  %v8433_v62 = vmul.f32 %v16872_v56, %v16872_v56  ;;  %v16873_v26 = vld [vmem:[#allocation31_spill] sm:$0xff]  ;;  %v8551_v23 = vmul.f32 %v16822_v47, %v8216_v33 }
 0x8bb   : > { %v8337_v9 = vpop.xlane.xlu0 %8336  ;;  %v8438_v42 = vmul.f32 %v16873_v26, %v16873_v26  ;;  %v8552_v56 = vmul.f32 %v8217_v19, %v16819_v11  ;;  %v8219_v11 = vmul.f32 %v14977_v28, %v16820_v46 }
 0x8bc   : > { %v8411_v18 = vmul.f32 0.2, %v8337_v9  ;;  %9053 = vadd.xlane.f32.xlu1 %v8939_v1  ;;  %v8439_v1 = vmul.f32 %v16874_v3, %v16874_v3  ;;  %v8464_v15 = vsel %vm16875_vm9, %v8434_v61, %v8463_v49  ;;  %v16878_v9 = vld [vmem:[#allocation16_spill] sm:$0xff]  ;;  %v8475_v20 = vsel %vm2045_vm1, %v8433_v62, %v8474_v2 }
 0x8bd   : > { %v15582_v21 = vpop.xlane.xlu1 %8346  ;;  %v8437_v57 = vmul.f32 %v16878_v9, %v16878_v9  ;;  %v16879_v61 = vld [vmem:[#allocation8_spill] sm:$0xff] }
 0x8be   : > { %v8814_v30 = vsub.f32 %v8216_v33, %v8411_v18  ;;  %8664 = vadd.xlane.f32.xlu0 %v8549_v16  ;;  %v8440_v16 = vmul.f32 %v16879_v61, %v16879_v61  ;;  %v8465_v18 = vsel %vm16880_vm4, %v8438_v42, %v8464_v15  ;;  %v8469_v45 = vsel %vm16881_vm0, %v8439_v1, %v8468_v29 }
 0x8bf   : > { %v8605_v37 = vpop.xlane.xlu0 %8604  ;;  %v8476_v47 = vsel %vm16884_vm2, %v8437_v57, %v8475_v20  ;;  %v8483_v33 = vsel %vm2343_vm10, %v8469_v45, 0.0  ;;  %v8943_v1 = vmul.f32 %v8879_v34, %v8815_v24 }
 0x8c0   : > { %v8710_v43 = vadd.f32 %v15503_v25, %v8605_v37  ;;  %9055 = vadd.xlane.f32.xlu1 %v8940_v5  ;;  %v8878_v53 = vmul.f32 %v15165_v17, %v8814_v30  ;;  %v8471_v25 = vsel %vm2045_vm1, %v8432_v14, %v8470_v0  ;;  %v8218_v5 = vmul.f32 %v14977_v28, %v16825_v50  ;;  %vm16885_vm1 = vmmov %vm16881_vm0 }
 0x8c1   : > { %v15604_v39 = vpop.xlane.xlu1 %8614  ;;  %v8472_v14 = vsel %vm16882_vm15, %v8436_v8, %v8471_v25  ;;  %v8554_v25 = vmul.f32 %v8219_v11, %v16820_v46  ;;  %v8222_v46 = vmul.f32 %v14977_v28, %v16831_v54 }
 0x8c2   : > { %8666 = vadd.xlane.f32.xlu0 %v8550_v44  ;;  %v8942_v49 = vmul.f32 %v8878_v53, %v8814_v30  ;;  %v8473_v26 = vsel %vm16885_vm1, %v8440_v16, %v8472_v14  ;;  %v8711_v42 = vadd.f32 %v8710_v43, %v15522_v48  ;;  %v8477_v44 = vsel %vm16886_vm3, %v8441_v58, %v8476_v47 }
 0x8c3   : > { %v8982_v32 = vpop.xlane.xlu0 %8981  ;;  %v8485_v15 = vsel %vm2343_vm10, %v8473_v26, 0.0  ;;  %v8553_v55 = vmul.f32 %v16825_v50, %v8218_v5  ;;  %v8220_v50 = vmul.f32 %v14977_v28, %v16828_v51  ;;  %v8221_v16 = vmul.f32 %v14977_v28, %v16823_v63 }
 0x8c4   : > { %v9094_v36 = vadd.f32 %v9093_v13, %v8982_v32  ;;  %9057 = vadd.xlane.f32.xlu1 %v8941_v38  ;;  %v8482_v13 = vsel %vm2343_vm10, %v8465_v18, 0.0  ;;  %v8487_v38 = vsel %vm2343_vm10, %v8477_v44, 0.0  ;;  %v8557_v40 = vmul.f32 %v16831_v54, %v8222_v46 }
 0x8c5   : > { %v15619_v41 = vpop.xlane.xlu1 %8991  ;;  %v8484_v37 = vadd.f32 %v8483_v33, %v8482_v13  ;;  %v8556_v20 = vmul.f32 %v8221_v16, %v16823_v63  ;;  %v8223_v58 = vmul.f32 %v14977_v28, %v16826_v59  ;;  %v8414_v54 = vmul.f32 0.2, %v15530_v7 }
 0x8c6   : > { %8668 = vadd.xlane.f32.xlu0 %v8551_v23  ;;  %v9095_v48 = vadd.f32 %v9094_v36, %v15526_v4  ;;  %v8226_v7 = vmul.f32 %v14977_v28, %v16835_v12 }
 0x8c7   : > { %v8341_v10 = vpop.xlane.xlu0 %8340  ;;  %v8486_v24 = vadd.f32 %v8485_v15, %v8484_v37 }
 0x8c8   : > { %v8413_v62 = vmul.f32 0.2, %v8341_v10  ;;  %9059 = vadd.xlane.f32.xlu1 %v8942_v49 }
 0x8c9   : > { %v15632_v30 = vpop.xlane.xlu1 %8350  ;;  %v8488_v4 = vadd.f32 %v8487_v38, %v8486_v24 }
 0x8ca   : > { %v8816_v3 = vsub.f32 %v8218_v5, %v8413_v62  ;;  %8670 = vadd.xlane.f32.xlu0 %v8552_v56  ;;  %v8224_v5 = vmul.f32 %v14977_v28, %v16833_v22 }
 0x8cb   : > { %v8609_v0 = vpop.xlane.xlu0 %8608 }
 0x8cc   : > { %v8880_v19 = vmul.f32 %v15165_v17, %v8816_v3  ;;  %v8712_v8 = vadd.f32 %v8711_v42, %v8609_v0  ;;  %9061 = vadd.xlane.f32.xlu1 %v8943_v1  ;;  %v8225_v1 = vmul.f32 %v14977_v28, %v16829_v60 }
 0x8cd   : > { %v8619_v29 = vpop.xlane.xlu1 %8618 }
 0x8ce   : > { %v8713_v43 = vadd.f32 %v8712_v8, %v15545_v35  ;;  %8672 = vadd.xlane.f32.xlu0 %v8553_v55  ;;  %v8944_v2 = vmul.f32 %v8880_v19, %v8816_v3  ;;  %v8555_v35 = vmul.f32 %v16828_v51, %v8220_v50  ;;  %v8559_v3 = vmul.f32 %v16833_v22, %v8224_v5 }
 0x8cf   : > { %v8986_v53 = vpop.xlane.xlu0 %8985  ;;  %v8416_v55 = vmul.f32 0.2, %v15582_v21  ;;  %v8560_v8 = vmul.f32 %v8225_v1, %v16829_v60  ;;  %v8418_v21 = vmul.f32 0.2, %v15632_v30 }
 0x8d0   : > { %v9096_v32 = vadd.f32 %v9095_v48, %v8986_v53  ;;  %9063 = vadd.xlane.f32.xlu1 %v8944_v2 }
 0x8d1   : > { %v8996_v9 = vpop.xlane.xlu1 %8995 }
 0x8d2   : > { %v9097_v57 = vadd.f32 %v9096_v32, %v15558_v31  ;;  %8674 = vadd.xlane.f32.xlu0 %v8554_v25  ;;  %v8821_v32 = vsub.f32 %v8223_v58, %v8418_v21 }
 0x8d3   : > { %v8345_v61 = vpop.xlane.xlu0 %8344 }
 0x8d4   : > { %v8415_v18 = vmul.f32 0.2, %v8345_v61  ;;  %8489 = vadd.xlane.f32.xlu1 %v8488_v4 }
 0x8d5   : > { %v8355_v23 = vpop.xlane.xlu1 %8354 }
 0x8d6   : > { %v8818_v36 = vsub.f32 %v8220_v50, %v8415_v18  ;;  %8676 = vadd.xlane.f32.xlu0 %v8555_v35 }
 0x8d7   : > { %v8613_v45 = vpop.xlane.xlu0 %8612 }
 0x8d8   : > { %v8882_v31 = vmul.f32 %v15165_v17, %v8818_v36  ;;  %v8714_v14 = vadd.f32 %v8713_v43, %v8613_v45 }
 0x8d9   : > { %v8623_v34 = vpop.xlane.xlu1 %8622 }
 0x8da   : > { %v8715_v51 = vadd.f32 %v8714_v14, %v15604_v39  ;;  %8678 = vadd.xlane.f32.xlu0 %v8556_v20  ;;  %v8946_v49 = vmul.f32 %v8882_v31, %v8818_v36  ;;  %v8558_v39 = vmul.f32 %v8223_v58, %v16826_v59  ;;  %v8817_v59 = vsub.f32 %v8219_v11, %v8414_v54 }
 0x8db   : > { %v8990_v10 = vpop.xlane.xlu0 %8989  ;;  %v8561_v11 = vmul.f32 %v16835_v12, %v8226_v7 }
 0x8dc   : > { %v9098_v47 = vadd.f32 %v9097_v57, %v8990_v10  ;;  %9067 = vadd.xlane.f32.xlu1 %v8946_v49  ;;  %v8881_v2 = vmul.f32 %v15165_v17, %v8817_v59 }
 0x8dd   : > { %v9000_v13 = vpop.xlane.xlu1 %8999 }
 0x8de   : > { %v9099_v33 = vadd.f32 %v9098_v47, %v15619_v41  ;;  %8680 = vadd.xlane.f32.xlu0 %v8557_v40  ;;  %v8945_v25 = vmul.f32 %v8881_v2, %v8817_v59 }
 0x8df   : > { %v8349_v63 = vpop.xlane.xlu0 %8348 }
 0x8e0   : > { %v8417_v56 = vmul.f32 0.2, %v8349_v63 }
 0x8e1   : > { %v9002_v62 = vpop.xlane.xlu1 %9001 }
 0x8e2   : > { %v8820_v26 = vsub.f32 %v8222_v46, %v8417_v56  ;;  %8682 = vadd.xlane.f32.xlu0 %v8558_v39 }
 0x8e3   : > { %v8617_v42 = vpop.xlane.xlu0 %8616 }
 0x8e4   : > { %v8884_v41 = vmul.f32 %v15165_v17, %v8820_v26  ;;  %v8716_v37 = vadd.f32 %v8715_v51, %v8617_v42 }
 0x8e5   : > { %v9004_v0 = vpop.xlane.xlu1 %9003 }
 0x8e6   : > { %v8717_v44 = vadd.f32 %v8716_v37, %v8619_v29  ;;  %8684 = vadd.xlane.f32.xlu0 %v8559_v3  ;;  %v8948_v15 = vmul.f32 %v8884_v41, %v8820_v26  ;;  %v8819_v29 = vsub.f32 %v8221_v16, %v8416_v55  ;;  %v8885_v16 = vmul.f32 %v15165_v17, %v8821_v32 }
 0x8e7   : > { %v8994_v19 = vpop.xlane.xlu0 %8993 }
 0x8e8   : > { %v9100_v22 = vadd.f32 %v9099_v33, %v8994_v19  ;;  %9071 = vadd.xlane.f32.xlu1 %v8948_v15  ;;  %v8883_v60 = vmul.f32 %v15165_v17, %v8819_v29  ;;  %v8949_v49 = vmul.f32 %v8885_v16, %v8821_v32 }
 0x8e9   : > { %v15672_v48 = vpop.xlane.xlu1 %9005 }
 0x8ea   : > { %v9101_v43 = vadd.f32 %v9100_v22, %v8996_v9  ;;  %8686 = vadd.xlane.f32.xlu0 %v8560_v8  ;;  %v8420_v9 = vmul.f32 0.2, %v8355_v23  ;;  %v8947_v45 = vmul.f32 %v8883_v60, %v8819_v29 }
 0x8eb   : > { %v8353_v24 = vpop.xlane.xlu0 %8352 }
 0x8ec   : > { %v8419_v53 = vmul.f32 0.2, %v8353_v24  ;;  %v8823_v18 = vsub.f32 %v8225_v1, %v8420_v9 }
 0x8ed   : > { %v15677_v38 = vpop.xlane.xlu1 %9007 }
 0x8ee   : > { %v8822_v28 = vsub.f32 %v8224_v5, %v8419_v53  ;;  %8688 = vadd.xlane.f32.xlu0 %v8561_v11  ;;  %v8887_v23 = vmul.f32 %v15165_v17, %v8823_v18 }
 0x8ef   : > { %v8621_v50 = vpop.xlane.xlu0 %8620 }
 0x8f0   : > { %v8886_v57 = vmul.f32 %v15165_v17, %v8822_v28  ;;  %v8718_v4 = vadd.f32 %v8717_v44, %v8621_v50  ;;  %v8951_v63 = vmul.f32 %v8887_v23, %v8823_v18 }
 0x8f1   : > { %v15681_v61 = vpop.xlane.xlu1 %9009 }
 0x8f2   : > { %v8719_v35 = vadd.f32 %v8718_v4, %v8623_v34  ;;  %9065 = vadd.xlane.f32.xlu0 %v8945_v25  ;;  %v8950_v12 = vmul.f32 %v8886_v57, %v8822_v28 }
 0x8f3   : > { %v8998_v30 = vpop.xlane.xlu0 %8997 }
 0x8f4   : > { %v9102_v36 = vadd.f32 %v9101_v43, %v8998_v30  ;;  %9075 = vadd.xlane.f32.xlu1 %v8950_v12 }
 0x8f5   : > { %v9012_v46 = vpop.xlane.xlu1 %9011 }
 0x8f6   : > { %v9103_v20 = vadd.f32 %v9102_v36, %v9000_v13  ;;  %9069 = vadd.xlane.f32.xlu0 %v8947_v45 }
 0x8f7   : > { %v8357_v31 = vpop.xlane.xlu0 %8356 }
 0x8f8   : > { %v9104_v14 = vadd.f32 %v9103_v20, %v9002_v62  ;;  %v8421_v51 = vmul.f32 0.2, %v8357_v31 }
 0x8f9   : > { %v9014_v10 = vpop.xlane.xlu1 %9013 }
 0x8fa   : > { %v9105_v34 = vadd.f32 %v9104_v14, %v9004_v0  ;;  %v8824_v40 = vsub.f32 %v8226_v7, %v8421_v51  ;;  %9073 = vadd.xlane.f32.xlu0 %v8949_v49 }
 0x8fb   : > { %v8625_v58 = vpop.xlane.xlu0 %8624 }
 0x8fc   : > { %v8888_v47 = vmul.f32 %v15165_v17, %v8824_v40  ;;  %v8720_v33 = vadd.f32 %v8719_v35, %v8625_v58  ;;  %v9106_v28 = vadd.f32 %v9105_v34, %v15672_v48 }
 0x8fd   : > { %v9016_v5 = vpop.xlane.xlu1 %9015 }
 0x8fe   : > { %9077 = vadd.xlane.f32.xlu0 %v8951_v63  ;;  %v8952_v39 = vmul.f32 %v8888_v47, %v8824_v40  ;;  %v9107_v25 = vadd.f32 %v9106_v28, %v15677_v38 }
 0x8ff   : > { %v8627_v13 = vpop.xlane.xlu0 %8626 }
 0x900   : > { %v8721_v56 = vadd.f32 %v8720_v33, %v8627_v13  ;;  %9079 = vadd.xlane.f32.xlu1 %v8952_v39  ;;  %v9108_v57 = vadd.f32 %v9107_v25, %v15681_v61 }
 0x901   : > { %v9018_v26 = vpop.xlane.xlu1 %9017 }
 0x902   : > { %v9109_v12 = vadd.f32 %v9108_v57, %v9012_v46 }
 0x903   : > { %v8629_v54 = vpop.xlane.xlu0 %8628 }
 0x904   : > { %v8722_v16 = vadd.f32 %v8721_v56, %v8629_v54  ;;  %v9110_v36 = vadd.f32 %v9109_v12, %v9014_v10 }
 0x905   : > { %v9020_v62 = vpop.xlane.xlu1 %9019 }
 0x906   : > { %v9111_v23 = vadd.f32 %v9110_v36, %v9016_v5 }
 0x907   : > { %v8631_v42 = vpop.xlane.xlu0 %8630 }
 0x908   : > { %v8723_v45 = vadd.f32 %v8722_v16, %v8631_v42  ;;  %v9112_v49 = vadd.f32 %v9111_v23, %v9018_v26 }
 0x909   : > { %v9022_v3 = vpop.xlane.xlu1 %9021 }
 0x90a   : > { %v9113_v47 = vadd.f32 %v9112_v49, %v9020_v62 }
 0x90b   : > { %v8633_v1 = vpop.xlane.xlu0 %8632 }
 0x90c   : > { %v8724_v48 = vadd.f32 %v8723_v45, %v8633_v1  ;;  %v9114_v13 = vadd.f32 %v9113_v47, %v9022_v3 }
 0x90d   : > { %v9024_v41 = vpop.xlane.xlu1 %9023 }
 0x90e   : > { %v9115_v42 = vadd.f32 %v9114_v13, %v9024_v41 }
 0x90f   : > { %v8635_v37 = vpop.xlane.xlu0 %8634 }
 0x910   : > { %v8725_v14 = vadd.f32 %v8724_v48, %v8635_v37 }
 0x911   : > { %v9026_v0 = vpop.xlane.xlu1 %9025 }
 0x912   : > { %v9116_v28 = vadd.f32 %v9115_v42, %v9026_v0 }
 0x913   : > { %v8637_v44 = vpop.xlane.xlu0 %8636 }
 0x914   : > { %v8726_v38 = vadd.f32 %v8725_v14, %v8637_v44 }
 0x915   : > { %v9028_v15 = vpop.xlane.xlu1 %9027 }
 0x916   : > { %v9117_v26 = vadd.f32 %v9116_v28, %v9028_v15 }
 0x917   : > { %v8639_v17 = vpop.xlane.xlu0 %8638 }
 0x918   : > { %v8727_v34 = vadd.f32 %v8726_v38, %v8639_v17 }
 0x919   : > { %v9030_v59 = vpop.xlane.xlu1 %9029 }
 0x91a   : > { %v9118_v57 = vadd.f32 %v9117_v26, %v9030_v59 }
 0x91b   : > { %v8641_v55 = vpop.xlane.xlu0 %8640 }
 0x91c   : > { %v8728_v61 = vadd.f32 %v8727_v34, %v8641_v55 }
 0x91d   : > { %v9032_v19 = vpop.xlane.xlu1 %9031 }
 0x91f   : > { %v8643_v7 = vpop.xlane.xlu0 %8642 }
 0x920   : > { %v8729_v33 = vadd.f32 %v8728_v61, %v8643_v7  ;;  %v9119_v7 = vadd.f32 %v9118_v57, %v9032_v19 }
 0x921   : > { %v9034_v8 = vpop.xlane.xlu1 %9033 }
 0x922   : > { %v9120_v16 = vadd.f32 %v9119_v7, %v9034_v8 }
 0x923   : > { %v8645_v22 = vpop.xlane.xlu0 %8644 }
 0x924   : > { %v8730_v63 = vadd.f32 %v8729_v33, %v8645_v22 }
 0x925   : > { %v9036_v43 = vpop.xlane.xlu1 %9035 }
 0x927   : > { %v8647_v2 = vpop.xlane.xlu0 %8646 }
 0x928   : > { %v8731_v10 = vadd.f32 %v8730_v63, %v8647_v2  ;;  %v9121_v2 = vadd.f32 %v9120_v16, %v9036_v43 }
 0x929   : > { %v9038_v29 = vpop.xlane.xlu1 %9037 }
 0x92b   : > { %v8649_v24 = vpop.xlane.xlu0 %8648 }
 0x92c   : > { %v8732_v54 = vadd.f32 %v8731_v10, %v8649_v24 }
 0x92d   : > { %v9040_v11 = vpop.xlane.xlu1 %9039 }
 0x92f   : > { %v8651_v21 = vpop.xlane.xlu0 %8650 }
 0x930   : > { %v8733_v1 = vadd.f32 %v8732_v54, %v8651_v21  ;;  %v9122_v21 = vadd.f32 %v9121_v2, %v9038_v29 }
 0x931   : > { %v15686_v53 = vpop.xlane.xlu1 %9041 }
 0x932   : > { %v9123_v48 = vadd.f32 %v9122_v21, %v9040_v11 }
 0x933   : > { %v8653_v60 = vpop.xlane.xlu0 %8652 }
 0x934   : > { %v8734_v44 = vadd.f32 %v8733_v1, %v8653_v60  ;;  %v9124_v15 = vadd.f32 %v9123_v48, %v15686_v53 }
 0x935   : > { %v15689_v50 = vpop.xlane.xlu1 %9043 }
 0x937   : > { %v8655_v32 = vpop.xlane.xlu0 %8654 }
 0x938   : > { %v8735_v17 = vadd.f32 %v8734_v44, %v8655_v32 }
 0x939   : > { %v15692_v9 = vpop.xlane.xlu1 %9045 }
 0x93b   : > { %v8657_v4 = vpop.xlane.xlu0 %8656 }
 0x93c   : > { %v8736_v55 = vadd.f32 %v8735_v17, %v8657_v4  ;;  %v9125_v4 = vadd.f32 %v9124_v15, %v15689_v50 }
 0x93d   : > { %v9048_v35 = vpop.xlane.xlu1 %9047 }
 0x93e   : > { %v9126_v8 = vadd.f32 %v9125_v4, %v15692_v9 }
 0x93f   : > { %v8659_v30 = vpop.xlane.xlu0 %8658 }
 0x940   : > { %v8737_v12 = vadd.f32 %v8736_v55, %v8659_v30  ;;  %v9127_v43 = vadd.f32 %v9126_v8, %v9048_v35 }
 0x941   : > { %v9050_v18 = vpop.xlane.xlu1 %9049 }
 0x942   : > { %v9128_v29 = vadd.f32 %v9127_v43, %v9050_v18 }
 0x943   : > { %v8661_v20 = vpop.xlane.xlu0 %8660 }
 0x944   : > { %v8738_v3 = vadd.f32 %v8737_v12, %v8661_v20 }
 0x945   : > { %v9052_v31 = vpop.xlane.xlu1 %9051 }
 0x946   : > { %v9129_v49 = vadd.f32 %v9128_v29, %v9052_v31 }
 0x947   : > { %v8663_v51 = vpop.xlane.xlu0 %8662 }
 0x948   : > { %v8739_v36 = vadd.f32 %v8738_v3, %v8663_v51 }
 0x949   : > { %v9054_v40 = vpop.xlane.xlu1 %9053 }
 0x94b   : > { %v8665_v58 = vpop.xlane.xlu0 %8664 }
 0x94c   : > { %v8740_v45 = vadd.f32 %v8739_v36, %v8665_v58  ;;  %v9130_v58 = vadd.f32 %v9129_v49, %v9054_v40 }
 0x94d   : > { %v9056_v39 = vpop.xlane.xlu1 %9055 }
 0x94e   : > { %v9131_v50 = vadd.f32 %v9130_v58, %v9056_v39 }
 0x94f   : > { %v8667_v46 = vpop.xlane.xlu0 %8666 }
 0x950   : > { %v8741_v0 = vadd.f32 %v8740_v45, %v8667_v46 }
 0x951   : > { %v9058_v5 = vpop.xlane.xlu1 %9057 }
 0x952   : > { %v9132_v63 = vadd.f32 %v9131_v50, %v9058_v5 }
 0x953   : > { %v8669_v56 = vpop.xlane.xlu0 %8668 }
 0x954   : > { %v8742_v32 = vadd.f32 %v8741_v0, %v8669_v56 }
 0x955   : > { %v9060_v62 = vpop.xlane.xlu1 %9059 }
 0x956   : > { %v9133_v35 = vadd.f32 %v9132_v63, %v9060_v62  ;;  %v16887_v62 = vsub.f32 %v15220_v52, %v15196_v27 }
 0x957   : > { %v8671_v37 = vpop.xlane.xlu0 %8670 }
 0x958   : > { %v8743_v19 = vadd.f32 %v8742_v32, %v8671_v37  ;;  %v7388_v7 = vsel %vm2343_vm10, %v16887_v62, 0.0 }
 0x959   : > { %v9062_v24 = vpop.xlane.xlu1 %9061 }
 0x95a   : > { %v9134_v54 = vadd.f32 %v9133_v35, %v9062_v24  ;;  %v7389_v24 = vrot.slane %v7388_v7, 4  ;;  %v16889_v35 = vld [vmem:[#allocation39_spill] sm:$0xff] }
 0x95b   : > { %v8673_v25 = vpop.xlane.xlu0 %8672 }
 0x95c   : > { %v8744_v20 = vadd.f32 %v8743_v19, %v8673_v25  ;;  %v7390_v32 = vadd.f32 %v7389_v24, %v7388_v7 }
 0x95d   : > { %v9064_v59 = vpop.xlane.xlu1 %9063 }
 0x95e   : > { %v9135_v1 = vadd.f32 %v9134_v54, %v9064_v59  ;;  %v7391_v8 = vrot.slane %v7390_v32, 2 }
 0x95f   : > { %v8675_v22 = vpop.xlane.xlu0 %8674 }
 0x960   : > { %v8745_v23 = vadd.f32 %v8744_v20, %v8675_v22  ;;  %v16888_v22 = vmov 0.0  }
 0x961   : > { %v8490_v14 = vpop.xlane.xlu1 %8489  ;;  %v9743_v16 = vsel %vm7396_vm7, 1.0, %v16888_v22 }
 0x962   : > { %v8491_v11 = vsel %vm2343_vm10, %v8490_v14, 0.0  ;;  %v7399_v6 = vsel %vm2343_vm10, %v9743_v16, 0.0  ;;  %v7392_v14 = vadd.f32 %v7391_v8, %v7390_v32  ;;  %vm9161_vm10 = vcmask 1041408  }
 0x963   : > { %v8677_v41 = vpop.xlane.xlu0 %8676  ;;  %v8492_v61 = vrot.slane %v8491_v11, 4  ;;  %v7400_v27 = vrot.slane %v7399_v6, 4 }
 0x964   : > { %v8746_v38 = vadd.f32 %v8745_v23, %v8677_v41 }
 0x965   : > { %v8493_v9 = vadd.f32 %v8492_v61, %v8491_v11  ;;  %v7401_v20 = vadd.f32 %v7400_v27, %v7399_v6  ;;  %v7393_v11 = vrot.slane %v7392_v14, 1 }
 0x967   : > { %v8679_v60 = vpop.xlane.xlu0 %8678  ;;  %v8494_v18 = vrot.slane %v8493_v9, 2  ;;  %v7394_v58 = vadd.f32 %v7393_v11, %v7392_v14 }
 0x968   : > { %v8747_v34 = vadd.f32 %v8746_v38, %v8679_v60 }
 0x969   : > { %v8495_v28 = vadd.f32 %v8494_v18, %v8493_v9  ;;  %v9068_v26 = vpop.xlane.xlu1 %9067 }
 0x96b   : > { %v8681_v30 = vpop.xlane.xlu0 %8680  ;;  %v8496_v25 = vrot.slane %v8495_v28, 1 }
 0x96c   : > { %v8748_v47 = vadd.f32 %v8747_v34, %v8681_v30 }
 0x96d   : > { %v8497_v41 = vadd.f32 %v8496_v25, %v8495_v28 }
 0x96f   : > { %v8683_v51 = vpop.xlane.xlu0 %8682 }
 0x970   : > { %v8749_v33 = vadd.f32 %v8748_v47, %v8683_v51  ;;  %v7402_v51 = vrot.slane %v7401_v20, 2 }
 0x972   : > { %v7403_v49 = vadd.f32 %v7402_v51, %v7401_v20 }
 0x973   : > { %v8685_v53 = vpop.xlane.xlu0 %8684 }
 0x974   : > { %v8750_v13 = vadd.f32 %v8749_v33, %v8685_v53  ;;  %v7404_v61 = vrot.slane %v7403_v49, 1 }
 0x975   : > { %v9072_v12 = vpop.xlane.xlu1 %9071 }
 0x976   : > { %v7405_v63 = vadd.f32 %v7404_v61, %v7403_v49 }
 0x977   : > { %v8687_v46 = vpop.xlane.xlu0 %8686 }
 0x978   : > { %v8751_v10 = vadd.f32 %v8750_v13, %v8687_v46  ;;  %v7395_v46 = vmul.f32 0.2, %v7394_v58 }
 0x97b   : > { %v8689_v56 = vpop.xlane.xlu0 %8688 }
 0x97c   : > { %v8752_v42 = vadd.f32 %v8751_v10, %v8689_v56  ;;  %v9157_v10 = vmul.f32 %v16889_v35, %v7405_v63  ;;  %v16890_v56 = vld [vmem:[#allocation64_spill] sm:$0xff] }
 0x97e   : > { %v8753_v37 = vrot.slane %v8752_v42, 4 }
 0x97f   : > { %v9066_v31 = vpop.xlane.xlu0 %9065 }
 0x980   : > { %v8754_v44 = vadd.f32 %v8753_v37, %v8752_v42  ;;  %v9136_v40 = vadd.f32 %v9135_v1, %v9066_v31  ;;  %v16891_v42 = vld [vmem:[#allocation58_spill] sm:$0xff] }
 0x981   : > { %v9076_v48 = vpop.xlane.xlu1 %9075 }
 0x982   : > { %v8755_v17 = vrot.slane %v8754_v44, 2  ;;  %v9137_v39 = vadd.f32 %v9136_v40, %v9068_v26 }
 0x983   : > { %v9070_v5 = vpop.xlane.xlu0 %9069 }
 0x984   : > { %v8756_v57 = vadd.f32 %v8755_v17, %v8754_v44  ;;  %v9138_v55 = vadd.f32 %v9137_v39, %v9070_v5 }
 0x986   : > { %v8757_v3 = vrot.slane %v8756_v57, 1  ;;  %v9139_v2 = vadd.f32 %v9138_v55, %v9072_v12 }
 0x987   : > { %v9074_v36 = vpop.xlane.xlu0 %9073 }
 0x988   : > { %v8758_v21 = vadd.f32 %v8757_v3, %v8756_v57  ;;  %v9140_v45 = vadd.f32 %v9139_v2, %v9074_v36 }
 0x98a   : > { %v8759_v0 = vsub.f32 %v8497_v41, %v8758_v21  ;;  %v9141_v60 = vadd.f32 %v9140_v45, %v9076_v48 }
 0x98b   : > { %v9078_v15 = vpop.xlane.xlu0 %9077 }
 0x98c   : > { %v8760_v52 = vadd.f32 0.0512, %v8759_v0  ;;  %v9142_v59 = vadd.f32 %v9141_v60, %v9078_v15 }
 0x98d   : > { %v9080_v4 = vpop.xlane.xlu1 %9079 }
 0x98e   : > { %v9143_v19 = vadd.f32 %v9142_v59, %v9080_v4  ;;  %v9151_v30 = vadd.f32 1e-06, %v8760_v52 }
 0x990   : > { %v9144_v43 = vrot.slane %v9143_v19, 4  ;;  %10715 = vrcp.f32 %v9151_v30 }
 0x992   : > { %v9145_v23 = vadd.f32 %v9144_v43, %v9143_v19 }
 0x994   : > { %v9146_v29 = vrot.slane %v9145_v23, 2 }
 0x996   : > { %v9147_v38 = vadd.f32 %v9146_v29, %v9145_v23 }
 0x998   : > { %v9148_v34 = vrot.slane %v9147_v38, 1 }
 0x99a   : > { %v9149_v53 = vadd.f32 %v9148_v34, %v9147_v38  ;;  %v10716_v50 = vpop.eup %10715 }
 0x99c   : > { %v9150_v47 = vsub.f32 0.0, %v9149_v53 }
 0x99e   : > { %v9153_v33 = vmul.f32 %v10716_v50, %v9150_v47 }
 0x9a0   : > { %v9154_v9 = vmul.f32 0.1, %v9153_v33 }
 0x9a2   : > { %v9155_v13 = vadd.f32 %v9154_v9, %v7395_v46 }
 0x9a4   : > { %v9156_v54 = vmul.f32 %v16890_v56, %v9155_v13 }
 0x9a6   : > { %v9158_v18 = vadd.f32 %v9157_v10, %v9156_v54 }
 0x9a8   : > { %v9162_v1 = vsel %vm9161_vm10, %v16891_v42, %v9158_v18 }
 0x9a9   : > { %9163 = vst [vmem:[%s311_s25] sm:$0x7] %v9162_v1 }
 0x9aa PF: > { %s27_s1 = sadd.s32 1, %s10749_s1  }
 0x9ab   : > { %p24_p0 = scmp.ge.s32.totalorder %s27_s1, 4  }
 0x9ad   :  { %26 = sbr.rel (!%p24_p0) target bundleno = 26 (0x1a), region = 86 }

</bundles_post_ra>
